<compile_context>
chip_gen: v7x
topology: tpu7x:2x2x1
jax: 0.10.0
libtpu: 0.0.40
codegen_flags: <defaults>
</compile_context>

<pallas_src>
import functools

import jax
import jax.numpy as jnp
from jax.experimental import pallas as pl
from jax.experimental.pallas import tpu as pltpu

_MASK_VALUE = -1e30  # finite "minus infinity": avoids exp(-inf - -inf) NaN paths


def _mha_flash_kernel(qi_ref, ki_ref,                       # scalar prefetch (SMEM)
                      q_ref, k_ref, v_ref, wo_ref, bo_ref,  # inputs (VMEM)
                      o_ref,                                # output (VMEM)
                      m_scr, l_scr, acc_scr, ctx_scr,       # scratch (VMEM)
                      *, num_heads, head_dim_p, block_q, block_k):
    """One (batch, lower-triangular step) of causal flash MHA + out-projection.

    q_ref  : (1, H, block_q, hd_p)  bf16  pre-projected, pre-scaled queries
    k_ref  : (1, H, block_k, hd_p)  bf16  pre-projected keys
    v_ref  : (1, H, block_k, hd_p)  bf16  pre-projected values
    wo_ref : (H*hd_p, d_out_p)      bf16  packed out-projection weight
    bo_ref : (1, d_out_p)           f32   out-projection bias
    o_ref  : (1, block_q, d_out_p)
    """
    step = pl.program_id(1)
    qi = qi_ref[step]
    ki = ki_ref[step]

    # ---- init accumulators at the first kv step of every q block ----
    @pl.when(ki == 0)
    def _init():
        m_scr[...] = jnp.full_like(m_scr, _MASK_VALUE)
        l_scr[...] = jnp.zeros_like(l_scr)
        acc_scr[...] = jnp.zeros_like(acc_scr)

    def _accumulate(masked):
        q = q_ref[0]                                          # (H, bq, hd_p) bf16
        k = k_ref[0]                                          # (H, bk, hd_p) bf16
        s = jnp.einsum('hqc,hkc->hqk', q, k,
                       preferred_element_type=jnp.float32)    # (H, bq, bk) f32
        if masked:
            # Diagonal tile (qi == ki, block_q == block_k): local triu mask only.
            row = jax.lax.broadcasted_iota(jnp.int32, (1, block_q, block_k), 1)
            col = jax.lax.broadcasted_iota(jnp.int32, (1, block_q, block_k), 2)
            s = jnp.where(col > row, _MASK_VALUE, s)
        m_prev = m_scr[...]                                   # (H, bq, 1)
        m_new = jnp.maximum(m_prev, jnp.max(s, axis=-1, keepdims=True))
        alpha = jnp.exp(m_prev - m_new)
        p = jnp.exp(s - m_new)                                # (H, bq, bk) f32
        l_scr[...] = alpha * l_scr[...] + jnp.sum(p, axis=-1, keepdims=True)
        acc_scr[...] = alpha * acc_scr[...] + jnp.einsum(
            'hqk,hkc->hqc', p.astype(v_ref.dtype), v_ref[0],
            preferred_element_type=jnp.float32)
        m_scr[...] = m_new

    # ---- strictly-below-diagonal tiles: no mask / iota / select needed ----
    @pl.when(ki < qi)
    def _off_diag():
        _accumulate(masked=False)

    # ---- diagonal tile: masked accumulate, then finalize (it is the last kv step) ----
    @pl.when(ki == qi)
    def _diag_and_finalize():
        _accumulate(masked=True)
        inv_l = 1.0 / l_scr[...]                              # once per q block
        ctx = acc_scr[...] * inv_l                            # (H, bq, hd_p) f32
        for h in range(num_heads):                            # pack heads along lanes
            ctx_scr[:, h * head_dim_p:(h + 1) * head_dim_p] = (
                ctx[h].astype(ctx_scr.dtype))
        out = jnp.dot(ctx_scr[...], wo_ref[...],
                      preferred_element_type=jnp.float32)     # one wide matmul
        o_ref[0] = (out + bo_ref[...]).astype(o_ref.dtype)    # lane-dense store


def _round_up(a, m):
    return (a + m - 1) // m * m


def _pick_block(T):
    """256 tiles on v6e/v7x (2x256 MXU), 128 elsewhere; clamp for short sequences."""
    try:
        kind = jax.devices()[0].device_kind.lower()
    except Exception:
        kind = ""
    blk = 256 if any(t in kind for t in ("v6", "v7", "7x")) else 128
    return min(blk, _round_up(max(T, 1), 128))


def multi_head_attention(x, wq_t, wk_t, wv_t, wo_t, bo, *, num_heads,
                         block=None, compute_dtype=jnp.bfloat16):
    """x: (B, T, d_in); weights pre-transposed to (in, out). Returns (B, T, d_out)."""
    B, T, d_in = x.shape
    d_out = wq_t.shape[1]
    assert d_out % num_heads == 0, "d_out must be divisible by num_heads"
    head_dim = d_out // num_heads
    inv_scale = 1.0 / head_dim ** 0.5

    if block is None:
        block = _pick_block(T)
    T_pad = _round_up(T, block)
    hd_p = _round_up(head_dim, 128)
    d_out_p = _round_up(d_out, 128)

    # ---- hoisted Q/K/V projections: single wide matmuls, done once (f32) ----
    def project_split(w, scale=1.0):
        y = x @ (w * scale)                                       # (B, T, d_out)
        y = y.reshape(B, T, num_heads, head_dim).transpose(0, 2, 1, 3)
        y = jnp.pad(y, ((0, 0), (0, 0), (0, T_pad - T), (0, hd_p - head_dim)))
        return y.astype(compute_dtype)                            # (B, H, T_pad, hd_p)

    q_p = project_split(wq_t, inv_scale)     # softmax scale folded into Wq
    k_p = project_split(wk_t)
    v_p = project_split(wv_t)

    # ---- packed out-projection: head h occupies rows [h*hd_p, h*hd_p + hd) ----
    wo_p = jnp.pad(wo_t.reshape(num_heads, head_dim, d_out),
                   ((0, 0), (0, hd_p - head_dim), (0, d_out_p - d_out)))
    wo_p = wo_p.reshape(num_heads * hd_p, d_out_p).astype(compute_dtype)
    bo_p = jnp.pad(bo, (0, d_out_p - d_out)).reshape(1, d_out_p).astype(jnp.float32)

    # ---- 1-D lower-triangular (qi, ki) schedule (scalar prefetch; no dead tiles) ----
    num_q = T_pad // block
    qi_list, ki_list = [], []
    for qi in range(num_q):
        for ki in range(qi + 1):
            qi_list.append(qi)
            ki_list.append(ki)
    steps = len(qi_list)
    qi_map = jnp.asarray(qi_list, jnp.int32)
    ki_map = jnp.asarray(ki_list, jnp.int32)

    kernel = functools.partial(
        _mha_flash_kernel, num_heads=num_heads, head_dim_p=hd_p,
        block_q=block, block_k=block)

    # ---- advisory cost estimate + explicit VMEM budget ----
    attn_flops = 4 * B * steps * num_heads * block * block * hd_p
    proj_flops = 2 * B * num_q * block * (num_heads * hd_p) * d_out_p
    cost = pl.CostEstimate(
        flops=int(attn_flops + proj_flops),
        transcendentals=int(B * steps * num_heads * block * block),
        bytes_accessed=int((q_p.size + k_p.size + v_p.size) * 2
                           + wo_p.size * 2 + bo_p.size * 4
                           + B * T_pad * d_out_p * 4))
    est_vmem = (3 * 2 * num_heads * block * hd_p * 2            # q/k/v (double-buffered)
                + 2 * num_heads * hd_p * d_out_p * 2            # Wo (worst case x2)
                + 2 * d_out_p * 4                               # bias
                + 2 * block * d_out_p * 4                       # output
                + 2 * num_heads * block * 4                     # m, l
                + num_heads * block * hd_p * 4                  # acc
                + block * num_heads * hd_p * 2)                 # packed ctx
    vmem_limit = int(min(64 << 20, max(32 << 20, int(est_vmem * 1.5))))

    q_spec = pl.BlockSpec((1, num_heads, block, hd_p),
                          lambda b, s, qm, km: (b, 0, qm[s], 0))
    kv_spec = pl.BlockSpec((1, num_heads, block, hd_p),
                           lambda b, s, qm, km: (b, 0, km[s], 0))
    out_spec = pl.BlockSpec((1, block, d_out_p),
                            lambda b, s, qm, km: (b, qm[s], 0))

    def call(weight_pipeline_mode):
        wo_spec = pl.BlockSpec((num_heads * hd_p, d_out_p),
                               lambda b, s, qm, km: (0, 0),
                               pipeline_mode=weight_pipeline_mode)
        bo_spec = pl.BlockSpec((1, d_out_p), lambda b, s, qm, km: (0, 0),
                               pipeline_mode=weight_pipeline_mode)
        return pl.pallas_call(
            kernel,
            out_shape=jax.ShapeDtypeStruct((B, T_pad, d_out_p), x.dtype),
            grid_spec=pltpu.PrefetchScalarGridSpec(
                num_scalar_prefetch=2,
                grid=(B, steps),
                in_specs=[q_spec, kv_spec, kv_spec, wo_spec, bo_spec],
                out_specs=out_spec,
                scratch_shapes=[
                    pltpu.VMEM((num_heads, block, 1), jnp.float32),       # m (running max)
                    pltpu.VMEM((num_heads, block, 1), jnp.float32),       # l (running denom)
                    pltpu.VMEM((num_heads, block, hd_p), jnp.float32),    # acc
                    pltpu.VMEM((block, num_heads * hd_p), compute_dtype), # packed ctx
                ]),
            compiler_params=pltpu.CompilerParams(
                dimension_semantics=("parallel", "arbitrary"),
                vmem_limit_bytes=vmem_limit),
            cost_estimate=cost,
        )(qi_map, ki_map, q_p, k_p, v_p, wo_p, bo_p)

    try:
        # Constant-index weight/bias inputs: single-buffer them (halves residency).
        out_p = call(pl.Buffered(1))
    except Exception:
        # Fallback to default (double) buffering if Buffered(1) is rejected.
        out_p = call(None)

    return out_p[:, :T, :d_out]


def _reference(x, wq_t, wk_t, wv_t, wo_t, bo, *, num_heads):
    """Pure-JAX f32 reference mirroring the PyTorch forward (eval mode)."""
    B, T, d_in = x.shape
    d_out = wq_t.shape[1]
    hd = d_out // num_heads
    q = (x @ wq_t).reshape(B, T, num_heads, hd).transpose(0, 2, 1, 3)
    k = (x @ wk_t).reshape(B, T, num_heads, hd).transpose(0, 2, 1, 3)
    v = (x @ wv_t).reshape(B, T, num_heads, hd).transpose(0, 2, 1, 3)
    scores = q @ k.transpose(0, 1, 3, 2)
    mask = jnp.triu(jnp.ones((T, T), dtype=bool), k=1)
    scores = jnp.where(mask, -jnp.inf, scores)
    w = jax.nn.softmax(scores / hd ** 0.5, axis=-1)
    ctx = (w @ v).transpose(0, 2, 1, 3).reshape(B, T, d_out)
    return ctx @ wo_t + bo


def _run_case(seed, B, T, d_in, d_out, num_heads, tol=2e-2):
    key = jax.random.PRNGKey(seed)
    kx, kq, kk, kv, ko, kb = jax.random.split(key, 6)

    x = jax.random.uniform(kx, (B, T, d_in), dtype=jnp.float32)
    # nn.Linear-like params, stored pre-transposed as (in_features, out_features).
    wq_t = jax.random.uniform(kq, (d_in, d_out), jnp.float32, -0.5, 0.5)
    wk_t = jax.random.uniform(kk, (d_in, d_out), jnp.float32, -0.5, 0.5)
    wv_t = jax.random.uniform(kv, (d_in, d_out), jnp.float32, -0.5, 0.5)
    wo_t = jax.random.uniform(ko, (d_out, d_out), jnp.float32, -0.5, 0.5)
    bo = jax.random.uniform(kb, (d_out,), jnp.float32, -0.5, 0.5)

    out = multi_head_attention(x, wq_t, wk_t, wv_t, wo_t, bo, num_heads=num_heads)
    out = jax.block_until_ready(out)

    ref = _reference(x, wq_t, wk_t, wv_t, wo_t, bo, num_heads=num_heads)
    assert out.shape == (B, T, d_out), f"bad shape {out.shape}"
    err = jnp.max(jnp.abs(out - ref))
    assert jnp.allclose(out, ref, atol=tol, rtol=tol), \
        f"mismatch vs reference (max abs err {err})"


if __name__ == "__main__":
    # Shapes implied by the module: d_in=3, d_out=4, context_length=6,
    # num_heads=2, batch=2.
    _run_case(seed=0, B=2, T=6, d_in=3, d_out=4, num_heads=2)
    # Longer, padded sequence: multi-block lower-triangular flash path
    # (online-softmax carry, unmasked off-diagonal tiles, diagonal finalize).
    _run_case(seed=0, B=2, T=320, d_in=3, d_out=4, num_heads=2)
    # Larger head_dim / d_model slice exercising the wide packed out-projection.
    _run_case(seed=1, B=2, T=256, d_in=32, d_out=128, num_heads=2, tol=3e-2)
    print("KERNEL_OK")
</pallas_src>

<mosaic_0001>
module attributes {stable_mosaic.version = 11 : i64} {
  func.func @_mha_flash_kernel(%arg0: i32, %arg1: i32, %arg2: memref<1xi32, #tpu.memory_space<smem>>, %arg3: memref<1xi32, #tpu.memory_space<smem>>, %arg4: memref<1x2x128x128xbf16, #tpu.memory_space<vmem>>, %arg5: memref<1x2x128x128xbf16, #tpu.memory_space<vmem>>, %arg6: memref<1x2x128x128xbf16, #tpu.memory_space<vmem>>, %arg7: memref<256x128xbf16, #tpu.memory_space<vmem>>, %arg8: memref<1x128xf32, #tpu.memory_space<vmem>>, %arg9: memref<1x128x128xf32, #tpu.memory_space<vmem>>, %arg10: memref<2x128x1xf32, #tpu.memory_space<vmem>>, %arg11: memref<2x128x1xf32, #tpu.memory_space<vmem>>, %arg12: memref<2x128x128xf32, #tpu.memory_space<vmem>>, %arg13: memref<128x256xbf16, #tpu.memory_space<vmem>>) attributes {dimension_semantics = [#tpu.dimension_semantics<parallel>, #tpu.dimension_semantics<arbitrary>], iteration_bounds = array<i64: 2, 1>, scalar_prefetch = 2 : i64, scratch_operands = 4 : i64, tpu.core_type = #tpu.core_type<tc>, window_params = [{transform_indices = @transform_0, window_bounds = array<i64: 1, 2, 128, 128>}, {transform_indices = @transform_1, window_bounds = array<i64: 1, 2, 128, 128>}, {transform_indices = @transform_2, window_bounds = array<i64: 1, 2, 128, 128>}, {pipeline_mode = #tpu.pipeline_mode<synchronous>, transform_indices = @transform_3, window_bounds = array<i64: 256, 128>}, {pipeline_mode = #tpu.pipeline_mode<synchronous>, transform_indices = @transform_4, window_bounds = array<i64: 1, 128>}, {transform_indices = @transform_5, window_bounds = array<i64: 1, 128, 128>}]} {
    %0 = arith.index_cast %arg1 : i32 to index
    %1 = memref.load %arg2[%0] : memref<1xi32, #tpu.memory_space<smem>>
    %2 = arith.index_cast %arg1 : i32 to index
    %3 = memref.load %arg3[%2] : memref<1xi32, #tpu.memory_space<smem>>
    %c0_i32 = arith.constant 0 : i32
    %4 = arith.cmpi eq, %3, %c0_i32 : i32
    %5 = arith.extui %4 : i1 to i32
    %c0_i32_0 = arith.constant 0 : i32
    %6 = arith.cmpi ne, %5, %c0_i32_0 : i32
    scf.if %6 {
      %cst = arith.constant -1.000000e+30 : f32
      %13 = vector.broadcast %cst : f32 to vector<2x128x1xf32>
      %c0 = arith.constant 0 : index
      %c0_3 = arith.constant 0 : index
      %c0_4 = arith.constant 0 : index
      %14 = vector.load %arg10[%c0, %c0_3, %c0_4] : memref<2x128x1xf32, #tpu.memory_space<vmem>>, vector<2x128x1xf32>
      tpu.vector_store %arg10[%c0, %c0_3, %c0_4], %13 {strides = array<i32>} : memref<2x128x1xf32, #tpu.memory_space<vmem>>, vector<2x128x1xf32>,
      %cst_5 = arith.constant 0.000000e+00 : f32
      %15 = vector.broadcast %cst_5 : f32 to vector<2x128x1xf32>
      %c0_6 = arith.constant 0 : index
      %c0_7 = arith.constant 0 : index
      %c0_8 = arith.constant 0 : index
      %16 = vector.load %arg11[%c0_6, %c0_7, %c0_8] : memref<2x128x1xf32, #tpu.memory_space<vmem>>, vector<2x128x1xf32>
      tpu.vector_store %arg11[%c0_6, %c0_7, %c0_8], %15 {strides = array<i32>} : memref<2x128x1xf32, #tpu.memory_space<vmem>>, vector<2x128x1xf32>,
      %cst_9 = arith.constant 0.000000e+00 : f32
      %17 = vector.broadcast %cst_9 : f32 to vector<2x128x128xf32>
      %c0_10 = arith.constant 0 : index
      %c0_11 = arith.constant 0 : index
      %c0_12 = arith.constant 0 : index
      %18 = vector.load %arg12[%c0_10, %c0_11, %c0_12] : memref<2x128x128xf32, #tpu.memory_space<vmem>>, vector<2x128x128xf32>
      tpu.vector_store %arg12[%c0_10, %c0_11, %c0_12], %17 {strides = array<i32>} : memref<2x128x128xf32, #tpu.memory_space<vmem>>, vector<2x128x128xf32>,
    } else {
    }
    %7 = arith.cmpi slt, %3, %1 : i32
    %8 = arith.extui %7 : i1 to i32
    %c0_i32_1 = arith.constant 0 : i32
    %9 = arith.cmpi ne, %8, %c0_i32_1 : i32
    scf.if %9 {
      %c0 = arith.constant 0 : index
      %c0_3 = arith.constant 0 : index
      %c0_4 = arith.constant 0 : index
      %c0_5 = arith.constant 0 : index
      %13 = vector.load %arg4[%c0, %c0_3, %c0_4, %c0_5] : memref<1x2x128x128xbf16, #tpu.memory_space<vmem>>, vector<1x2x128x128xbf16>
      %14 = vector.shape_cast %13 : vector<1x2x128x128xbf16> to vector<2x128x128xbf16>
      %c0_6 = arith.constant 0 : index
      %c0_7 = arith.constant 0 : index
      %c0_8 = arith.constant 0 : index
      %c0_9 = arith.constant 0 : index
      %15 = vector.load %arg5[%c0_6, %c0_7, %c0_8, %c0_9] : memref<1x2x128x128xbf16, #tpu.memory_space<vmem>>, vector<1x2x128x128xbf16>
      %16 = vector.shape_cast %15 : vector<1x2x128x128xbf16> to vector<2x128x128xbf16>
      "tpu.trace_start"() <{level = 10 : i32, message = "hqc,hkc->hqk"}> : () -> ()
      %cst = arith.constant dense<0.000000e+00> : vector<2x128x128xf32>
      %17 = tpu.matmul %14, %16, %cst {dimension_numbers = #tpu.dot_dimension_numbers<[2], [2], [1], [1], [0, 0, 0, 1, 1, 1], [0], [0]>} : vector<2x128x128xbf16>, vector<2x128x128xbf16>, vector<2x128x128xf32> -> vector<2x128x128xf32>
      "tpu.trace_stop"() : () -> ()
      %c0_10 = arith.constant 0 : index
      %c0_11 = arith.constant 0 : index
      %c0_12 = arith.constant 0 : index
      %18 = vector.load %arg10[%c0_10, %c0_11, %c0_12] : memref<2x128x1xf32, #tpu.memory_space<vmem>>, vector<2x128x1xf32>
      %cst_13 = arith.constant dense<0xFF800000> : vector<2x128xf32>
      %19 = vector.multi_reduction <maximumf>, %17, %cst_13 [2] : vector<2x128x128xf32> to vector<2x128xf32>
      %20 = vector.shape_cast %19 : vector<2x128xf32> to vector<2x128x1xf32>
      %21 = arith.maximumf %18, %20 : vector<2x128x1xf32>
      %22 = arith.subf %18, %21 : vector<2x128x1xf32>
      %23 = math.exp %22 : vector<2x128x1xf32>
      %24 = vector.broadcast %21 : vector<2x128x1xf32> to vector<2x128x128xf32>
      %25 = arith.subf %17, %24 : vector<2x128x128xf32>
      %26 = math.exp %25 : vector<2x128x128xf32>
      %c0_14 = arith.constant 0 : index
      %c0_15 = arith.constant 0 : index
      %c0_16 = arith.constant 0 : index
      %27 = vector.load %arg11[%c0_14, %c0_15, %c0_16] : memref<2x128x1xf32, #tpu.memory_space<vmem>>, vector<2x128x1xf32>
      %28 = arith.mulf %23, %27 : vector<2x128x1xf32>
      %cst_17 = arith.constant dense<0.000000e+00> : vector<2x128xf32>
      %29 = vector.multi_reduction <add>, %26, %cst_17 [2] : vector<2x128x128xf32> to vector<2x128xf32>
      %30 = vector.shape_cast %29 : vector<2x128xf32> to vector<2x128x1xf32>
      %31 = arith.addf %28, %30 : vector<2x128x1xf32>
      %c0_18 = arith.constant 0 : index
      %c0_19 = arith.constant 0 : index
      %c0_20 = arith.constant 0 : index
      %32 = vector.load %arg11[%c0_18, %c0_19, %c0_20] : memref<2x128x1xf32, #tpu.memory_space<vmem>>, vector<2x128x1xf32>
      tpu.vector_store %arg11[%c0_18, %c0_19, %c0_20], %31 {strides = array<i32>} : memref<2x128x1xf32, #tpu.memory_space<vmem>>, vector<2x128x1xf32>,
      %c0_21 = arith.constant 0 : index
      %c0_22 = arith.constant 0 : index
      %c0_23 = arith.constant 0 : index
      %33 = vector.load %arg12[%c0_21, %c0_22, %c0_23] : memref<2x128x128xf32, #tpu.memory_space<vmem>>, vector<2x128x128xf32>
      %34 = vector.broadcast %23 : vector<2x128x1xf32> to vector<2x128x128xf32>
      %35 = arith.mulf %34, %33 : vector<2x128x128xf32>
      %36 = arith.truncf %26 : vector<2x128x128xf32> to vector<2x128x128xbf16>
      %c0_24 = arith.constant 0 : index
      %c0_25 = arith.constant 0 : index
      %c0_26 = arith.constant 0 : index
      %c0_27 = arith.constant 0 : index
      %37 = vector.load %arg6[%c0_24, %c0_25, %c0_26, %c0_27] : memref<1x2x128x128xbf16, #tpu.memory_space<vmem>>, vector<1x2x128x128xbf16>
      %38 = vector.shape_cast %37 : vector<1x2x128x128xbf16> to vector<2x128x128xbf16>
      "tpu.trace_start"() <{level = 10 : i32, message = "hqk,hkc->hqc"}> : () -> ()
      %cst_28 = arith.constant dense<0.000000e+00> : vector<2x128x128xf32>
      %39 = tpu.matmul %36, %38, %cst_28 {dimension_numbers = #tpu.dot_dimension_numbers<[2], [1], [1], [2], [0, 0, 0, 1, 1, 2], [0], [0]>} : vector<2x128x128xbf16>, vector<2x128x128xbf16>, vector<2x128x128xf32> -> vector<2x128x128xf32>
      "tpu.trace_stop"() : () -> ()
      %40 = arith.addf %35, %39 : vector<2x128x128xf32>
      %c0_29 = arith.constant 0 : index
      %c0_30 = arith.constant 0 : index
      %c0_31 = arith.constant 0 : index
      %41 = vector.load %arg12[%c0_29, %c0_30, %c0_31] : memref<2x128x128xf32, #tpu.memory_space<vmem>>, vector<2x128x128xf32>
      tpu.vector_store %arg12[%c0_29, %c0_30, %c0_31], %40 {strides = array<i32>} : memref<2x128x128xf32, #tpu.memory_space<vmem>>, vector<2x128x128xf32>,
      %c0_32 = arith.constant 0 : index
      %c0_33 = arith.constant 0 : index
      %c0_34 = arith.constant 0 : index
      %42 = vector.load %arg10[%c0_32, %c0_33, %c0_34] : memref<2x128x1xf32, #tpu.memory_space<vmem>>, vector<2x128x1xf32>
      tpu.vector_store %arg10[%c0_32, %c0_33, %c0_34], %21 {strides = array<i32>} : memref<2x128x1xf32, #tpu.memory_space<vmem>>, vector<2x128x1xf32>,
    } else {
    }
    %10 = arith.cmpi eq, %3, %1 : i32
    %11 = arith.extui %10 : i1 to i32
    %c0_i32_2 = arith.constant 0 : i32
    %12 = arith.cmpi ne, %11, %c0_i32_2 : i32
    scf.if %12 {
      %c0 = arith.constant 0 : index
      %c0_3 = arith.constant 0 : index
      %c0_4 = arith.constant 0 : index
      %c0_5 = arith.constant 0 : index
      %13 = vector.load %arg4[%c0, %c0_3, %c0_4, %c0_5] : memref<1x2x128x128xbf16, #tpu.memory_space<vmem>>, vector<1x2x128x128xbf16>
      %14 = vector.shape_cast %13 : vector<1x2x128x128xbf16> to vector<2x128x128xbf16>
      %c0_6 = arith.constant 0 : index
      %c0_7 = arith.constant 0 : index
      %c0_8 = arith.constant 0 : index
      %c0_9 = arith.constant 0 : index
      %15 = vector.load %arg5[%c0_6, %c0_7, %c0_8, %c0_9] : memref<1x2x128x128xbf16, #tpu.memory_space<vmem>>, vector<1x2x128x128xbf16>
      %16 = vector.shape_cast %15 : vector<1x2x128x128xbf16> to vector<2x128x128xbf16>
      "tpu.trace_start"() <{level = 10 : i32, message = "hqc,hkc->hqk"}> : () -> ()
      %cst = arith.constant dense<0.000000e+00> : vector<2x128x128xf32>
      %17 = tpu.matmul %14, %16, %cst {dimension_numbers = #tpu.dot_dimension_numbers<[2], [2], [1], [1], [0, 0, 0, 1, 1, 1], [0], [0]>} : vector<2x128x128xbf16>, vector<2x128x128xbf16>, vector<2x128x128xf32> -> vector<2x128x128xf32>
      "tpu.trace_stop"() : () -> ()
      %18 = tpu.iota {dimensions = array<i32: 1>} : vector<1x128x128xi32>
      %19 = tpu.iota {dimensions = array<i32: 2>} : vector<1x128x128xi32>
      %20 = arith.cmpi sgt, %19, %18 : vector<1x128x128xi32>
      %cst_10 = arith.constant -1.000000e+30 : f32
      %21 = vector.shape_cast %20 : vector<1x128x128xi1> to vector<1x128x128xi1>
      %22 = vector.broadcast %21 : vector<1x128x128xi1> to vector<2x128x128xi1>
      %23 = vector.broadcast %cst_10 : f32 to vector<2x128x128xf32>
      %24 = arith.select %22, %23, %17 : vector<2x128x128xi1>, vector<2x128x128xf32>
      %c0_11 = arith.constant 0 : index
      %c0_12 = arith.constant 0 : index
      %c0_13 = arith.constant 0 : index
      %25 = vector.load %arg10[%c0_11, %c0_12, %c0_13] : memref<2x128x1xf32, #tpu.memory_space<vmem>>, vector<2x128x1xf32>
      %cst_14 = arith.constant dense<0xFF800000> : vector<2x128xf32>
      %26 = vector.multi_reduction <maximumf>, %24, %cst_14 [2] : vector<2x128x128xf32> to vector<2x128xf32>
      %27 = vector.shape_cast %26 : vector<2x128xf32> to vector<2x128x1xf32>
      %28 = arith.maximumf %25, %27 : vector<2x128x1xf32>
      %29 = arith.subf %25, %28 : vector<2x128x1xf32>
      %30 = math.exp %29 : vector<2x128x1xf32>
      %31 = vector.broadcast %28 : vector<2x128x1xf32> to vector<2x128x128xf32>
      %32 = arith.subf %24, %31 : vector<2x128x128xf32>
      %33 = math.exp %32 : vector<2x128x128xf32>
      %c0_15 = arith.constant 0 : index
      %c0_16 = arith.constant 0 : index
      %c0_17 = arith.constant 0 : index
      %34 = vector.load %arg11[%c0_15, %c0_16, %c0_17] : memref<2x128x1xf32, #tpu.memory_space<vmem>>, vector<2x128x1xf32>
      %35 = arith.mulf %30, %34 : vector<2x128x1xf32>
      %cst_18 = arith.constant dense<0.000000e+00> : vector<2x128xf32>
      %36 = vector.multi_reduction <add>, %33, %cst_18 [2] : vector<2x128x128xf32> to vector<2x128xf32>
      %37 = vector.shape_cast %36 : vector<2x128xf32> to vector<2x128x1xf32>
      %38 = arith.addf %35, %37 : vector<2x128x1xf32>
      %c0_19 = arith.constant 0 : index
      %c0_20 = arith.constant 0 : index
      %c0_21 = arith.constant 0 : index
      %39 = vector.load %arg11[%c0_19, %c0_20, %c0_21] : memref<2x128x1xf32, #tpu.memory_space<vmem>>, vector<2x128x1xf32>
      tpu.vector_store %arg11[%c0_19, %c0_20, %c0_21], %38 {strides = array<i32>} : memref<2x128x1xf32, #tpu.memory_space<vmem>>, vector<2x128x1xf32>,
      %c0_22 = arith.constant 0 : index
      %c0_23 = arith.constant 0 : index
      %c0_24 = arith.constant 0 : index
      %40 = vector.load %arg12[%c0_22, %c0_23, %c0_24] : memref<2x128x128xf32, #tpu.memory_space<vmem>>, vector<2x128x128xf32>
      %41 = vector.broadcast %30 : vector<2x128x1xf32> to vector<2x128x128xf32>
      %42 = arith.mulf %41, %40 : vector<2x128x128xf32>
      %43 = arith.truncf %33 : vector<2x128x128xf32> to vector<2x128x128xbf16>
      %c0_25 = arith.constant 0 : index
      %c0_26 = arith.constant 0 : index
      %c0_27 = arith.constant 0 : index
      %c0_28 = arith.constant 0 : index
      %44 = vector.load %arg6[%c0_25, %c0_26, %c0_27, %c0_28] : memref<1x2x128x128xbf16, #tpu.memory_space<vmem>>, vector<1x2x128x128xbf16>
      %45 = vector.shape_cast %44 : vector<1x2x128x128xbf16> to vector<2x128x128xbf16>
      "tpu.trace_start"() <{level = 10 : i32, message = "hqk,hkc->hqc"}> : () -> ()
      %cst_29 = arith.constant dense<0.000000e+00> : vector<2x128x128xf32>
      %46 = tpu.matmul %43, %45, %cst_29 {dimension_numbers = #tpu.dot_dimension_numbers<[2], [1], [1], [2], [0, 0, 0, 1, 1, 2], [0], [0]>} : vector<2x128x128xbf16>, vector<2x128x128xbf16>, vector<2x128x128xf32> -> vector<2x128x128xf32>
      "tpu.trace_stop"() : () -> ()
      %47 = arith.addf %42, %46 : vector<2x128x128xf32>
      %c0_30 = arith.constant 0 : index
      %c0_31 = arith.constant 0 : index
      %c0_32 = arith.constant 0 : index
      %48 = vector.load %arg12[%c0_30, %c0_31, %c0_32] : memref<2x128x128xf32, #tpu.memory_space<vmem>>, vector<2x128x128xf32>
      tpu.vector_store %arg12[%c0_30, %c0_31, %c0_32], %47 {strides = array<i32>} : memref<2x128x128xf32, #tpu.memory_space<vmem>>, vector<2x128x128xf32>,
      %c0_33 = arith.constant 0 : index
      %c0_34 = arith.constant 0 : index
      %c0_35 = arith.constant 0 : index
      %49 = vector.load %arg10[%c0_33, %c0_34, %c0_35] : memref<2x128x1xf32, #tpu.memory_space<vmem>>, vector<2x128x1xf32>
      tpu.vector_store %arg10[%c0_33, %c0_34, %c0_35], %28 {strides = array<i32>} : memref<2x128x1xf32, #tpu.memory_space<vmem>>, vector<2x128x1xf32>,
      %c0_36 = arith.constant 0 : index
      %c0_37 = arith.constant 0 : index
      %c0_38 = arith.constant 0 : index
      %50 = vector.load %arg11[%c0_36, %c0_37, %c0_38] : memref<2x128x1xf32, #tpu.memory_space<vmem>>, vector<2x128x1xf32>
      %cst_39 = arith.constant 1.000000e+00 : f32
      %51 = vector.broadcast %cst_39 : f32 to vector<2x128x1xf32>
      %52 = arith.divf %51, %50 : vector<2x128x1xf32>
      %c0_40 = arith.constant 0 : index
      %c0_41 = arith.constant 0 : index
      %c0_42 = arith.constant 0 : index
      %53 = vector.load %arg12[%c0_40, %c0_41, %c0_42] : memref<2x128x128xf32, #tpu.memory_space<vmem>>, vector<2x128x128xf32>
      %54 = vector.broadcast %52 : vector<2x128x1xf32> to vector<2x128x128xf32>
      %55 = arith.mulf %53, %54 : vector<2x128x128xf32>
      %56 = vector.extract_strided_slice %55 {offsets = [0, 0, 0], sizes = [1, 128, 128], strides = [1, 1, 1]} : vector<2x128x128xf32> to vector<1x128x128xf32>
      %57 = vector.shape_cast %56 : vector<1x128x128xf32> to vector<128x128xf32>
      %58 = arith.truncf %57 : vector<128x128xf32> to vector<128x128xbf16>
      %c0_43 = arith.constant 0 : index
      %c0_44 = arith.constant 0 : index
      %59 = vector.load %arg13[%c0_43, %c0_44] : memref<128x256xbf16, #tpu.memory_space<vmem>>, vector<128x128xbf16>
      tpu.vector_store %arg13[%c0_43, %c0_44], %58 {strides = array<i32>} : memref<128x256xbf16, #tpu.memory_space<vmem>>, vector<128x128xbf16>,
      %60 = vector.extract_strided_slice %55 {offsets = [1, 0, 0], sizes = [1, 128, 128], strides = [1, 1, 1]} : vector<2x128x128xf32> to vector<1x128x128xf32>
      %61 = vector.shape_cast %60 : vector<1x128x128xf32> to vector<128x128xf32>
      %62 = arith.truncf %61 : vector<128x128xf32> to vector<128x128xbf16>
      %c0_45 = arith.constant 0 : index
      %c128 = arith.constant 128 : index
      %63 = vector.load %arg13[%c0_45, %c128] : memref<128x256xbf16, #tpu.memory_space<vmem>>, vector<128x128xbf16>
      tpu.vector_store %arg13[%c0_45, %c128], %62 {strides = array<i32>} : memref<128x256xbf16, #tpu.memory_space<vmem>>, vector<128x128xbf16>,
      %c0_46 = arith.constant 0 : index
      %c0_47 = arith.constant 0 : index
      %64 = vector.load %arg13[%c0_46, %c0_47] : memref<128x256xbf16, #tpu.memory_space<vmem>>, vector<128x256xbf16>
      %c0_48 = arith.constant 0 : index
      %c0_49 = arith.constant 0 : index
      %65 = vector.load %arg7[%c0_48, %c0_49] : memref<256x128xbf16, #tpu.memory_space<vmem>>, vector<256x128xbf16>
      %cst_50 = arith.constant dense<0.000000e+00> : vector<128x128xf32>
      %66 = tpu.matmul %64, %65, %cst_50 {dimension_numbers = #tpu.dot_dimension_numbers<[1], [0], [0], [1], [0, 0, 1, 1], [], []>} : vector<128x256xbf16>, vector<256x128xbf16>, vector<128x128xf32> -> vector<128x128xf32>
      %c0_51 = arith.constant 0 : index
      %c0_52 = arith.constant 0 : index
      %67 = vector.load %arg8[%c0_51, %c0_52] : memref<1x128xf32, #tpu.memory_space<vmem>>, vector<1x128xf32>
      %68 = vector.broadcast %67 : vector<1x128xf32> to vector<128x128xf32>
      %69 = arith.addf %66, %68 : vector<128x128xf32>
      %c0_53 = arith.constant 0 : index
      %c0_54 = arith.constant 0 : index
      %c0_55 = arith.constant 0 : index
      %70 = vector.load %arg9[%c0_53, %c0_54, %c0_55] : memref<1x128x128xf32, #tpu.memory_space<vmem>>, vector<1x128x128xf32>
      %71 = vector.shape_cast %70 : vector<1x128x128xf32> to vector<128x128xf32>
      %72 = vector.shape_cast %69 : vector<128x128xf32> to vector<1x128x128xf32>
      tpu.vector_store %arg9[%c0_53, %c0_54, %c0_55], %72 {strides = array<i32>} : memref<1x128x128xf32, #tpu.memory_space<vmem>>, vector<1x128x128xf32>,
    } else {
    }
    return
  }
  func.func @transform_0(%arg0: i32, %arg1: i32, %arg2: memref<1xi32, #tpu.memory_space<smem>>, %arg3: memref<1xi32, #tpu.memory_space<smem>>) -> (i32, i32, i32, i32) {
    %0 = arith.index_cast %arg1 : i32 to index
    %1 = memref.load %arg2[%0] : memref<1xi32, #tpu.memory_space<smem>>
    %c0_i32 = arith.constant 0 : i32
    %c0_i32_0 = arith.constant 0 : i32
    %c0_i32_1 = arith.constant 0 : i32
    return %arg0, %c0_i32, %1, %c0_i32_0 : i32, i32, i32, i32
  }
  func.func @transform_1(%arg0: i32, %arg1: i32, %arg2: memref<1xi32, #tpu.memory_space<smem>>, %arg3: memref<1xi32, #tpu.memory_space<smem>>) -> (i32, i32, i32, i32) {
    %0 = arith.index_cast %arg1 : i32 to index
    %1 = memref.load %arg3[%0] : memref<1xi32, #tpu.memory_space<smem>>
    %c0_i32 = arith.constant 0 : i32
    %c0_i32_0 = arith.constant 0 : i32
    %c0_i32_1 = arith.constant 0 : i32
    return %arg0, %c0_i32, %1, %c0_i32_0 : i32, i32, i32, i32
  }
  func.func @transform_2(%arg0: i32, %arg1: i32, %arg2: memref<1xi32, #tpu.memory_space<smem>>, %arg3: memref<1xi32, #tpu.memory_space<smem>>) -> (i32, i32, i32, i32) {
    %0 = arith.index_cast %arg1 : i32 to index
    %1 = memref.load %arg3[%0] : memref<1xi32, #tpu.memory_space<smem>>
    %c0_i32 = arith.constant 0 : i32
    %c0_i32_0 = arith.constant 0 : i32
    %c0_i32_1 = arith.constant 0 : i32
    return %arg0, %c0_i32, %1, %c0_i32_0 : i32, i32, i32, i32
  }
  func.func @transform_3(%arg0: i32, %arg1: i32, %arg2: memref<1xi32, #tpu.memory_space<smem>>, %arg3: memref<1xi32, #tpu.memory_space<smem>>) -> (i32, i32) {
    %c0_i32 = arith.constant 0 : i32
    %c0_i32_0 = arith.constant 0 : i32
    %c0_i32_1 = arith.constant 0 : i32
    return %c0_i32, %c0_i32_0 : i32, i32
  }
  func.func @transform_4(%arg0: i32, %arg1: i32, %arg2: memref<1xi32, #tpu.memory_space<smem>>, %arg3: memref<1xi32, #tpu.memory_space<smem>>) -> (i32, i32) {
    %c0_i32 = arith.constant 0 : i32
    %c0_i32_0 = arith.constant 0 : i32
    %c0_i32_1 = arith.constant 0 : i32
    return %c0_i32, %c0_i32_0 : i32, i32
  }
  func.func @transform_5(%arg0: i32, %arg1: i32, %arg2: memref<1xi32, #tpu.memory_space<smem>>, %arg3: memref<1xi32, #tpu.memory_space<smem>>) -> (i32, i32, i32) {
    %0 = arith.index_cast %arg1 : i32 to index
    %1 = memref.load %arg2[%0] : memref<1xi32, #tpu.memory_space<smem>>
    %c0_i32 = arith.constant 0 : i32
    %c0_i32_0 = arith.constant 0 : i32
    return %arg0, %1, %c0_i32 : i32, i32, i32
  }
}

module attributes {stable_mosaic.version = 11 : i64} {
  func.func @_mha_flash_kernel(%arg0: i32, %arg1: i32, %arg2: memref<1xi32, #tpu.memory_space<smem>>, %arg3: memref<1xi32, #tpu.memory_space<smem>>, %arg4: memref<1x2x128x128xbf16, #tpu.memory_space<vmem>>, %arg5: memref<1x2x128x128xbf16, #tpu.memory_space<vmem>>, %arg6: memref<1x2x128x128xbf16, #tpu.memory_space<vmem>>, %arg7: memref<256x128xbf16, #tpu.memory_space<vmem>>, %arg8: memref<1x128xf32, #tpu.memory_space<vmem>>, %arg9: memref<1x128x128xf32, #tpu.memory_space<vmem>>, %arg10: memref<2x128x1xf32, #tpu.memory_space<vmem>>, %arg11: memref<2x128x1xf32, #tpu.memory_space<vmem>>, %arg12: memref<2x128x128xf32, #tpu.memory_space<vmem>>, %arg13: memref<128x256xbf16, #tpu.memory_space<vmem>>) attributes {dimension_semantics = [#tpu.dimension_semantics<parallel>, #tpu.dimension_semantics<arbitrary>], iteration_bounds = array<i64: 2, 1>, scalar_prefetch = 2 : i64, scratch_operands = 4 : i64, tpu.core_type = #tpu.core_type<tc>, window_params = [{transform_indices = @transform_0, window_bounds = array<i64: 1, 2, 128, 128>}, {transform_indices = @transform_1, window_bounds = array<i64: 1, 2, 128, 128>}, {transform_indices = @transform_2, window_bounds = array<i64: 1, 2, 128, 128>}, {pipeline_mode = #tpu.pipeline_mode<synchronous>, transform_indices = @transform_3, window_bounds = array<i64: 256, 128>}, {pipeline_mode = #tpu.pipeline_mode<synchronous>, transform_indices = @transform_4, window_bounds = array<i64: 1, 128>}, {transform_indices = @transform_5, window_bounds = array<i64: 1, 128, 128>}]} {
    %0 = arith.index_cast %arg1 : i32 to index
    %1 = memref.load %arg2[%0] : memref<1xi32, #tpu.memory_space<smem>>
    %2 = arith.index_cast %arg1 : i32 to index
    %3 = memref.load %arg3[%2] : memref<1xi32, #tpu.memory_space<smem>>
    %c0_i32 = arith.constant 0 : i32
    %4 = arith.cmpi eq, %3, %c0_i32 : i32
    %5 = arith.extui %4 : i1 to i32
    %c0_i32_0 = arith.constant 0 : i32
    %6 = arith.cmpi ne, %5, %c0_i32_0 : i32
    scf.if %6 {
      %cst = arith.constant -1.000000e+30 : f32
      %13 = vector.broadcast %cst : f32 to vector<2x128x1xf32>
      %c0 = arith.constant 0 : index
      %c0_3 = arith.constant 0 : index
      %c0_4 = arith.constant 0 : index
      %14 = vector.load %arg10[%c0, %c0_3, %c0_4] : memref<2x128x1xf32, #tpu.memory_space<vmem>>, vector<2x128x1xf32>
      tpu.vector_store %arg10[%c0, %c0_3, %c0_4], %13 {strides = array<i32>} : memref<2x128x1xf32, #tpu.memory_space<vmem>>, vector<2x128x1xf32>,
      %cst_5 = arith.constant 0.000000e+00 : f32
      %15 = vector.broadcast %cst_5 : f32 to vector<2x128x1xf32>
      %c0_6 = arith.constant 0 : index
      %c0_7 = arith.constant 0 : index
      %c0_8 = arith.constant 0 : index
      %16 = vector.load %arg11[%c0_6, %c0_7, %c0_8] : memref<2x128x1xf32, #tpu.memory_space<vmem>>, vector<2x128x1xf32>
      tpu.vector_store %arg11[%c0_6, %c0_7, %c0_8], %15 {strides = array<i32>} : memref<2x128x1xf32, #tpu.memory_space<vmem>>, vector<2x128x1xf32>,
      %cst_9 = arith.constant 0.000000e+00 : f32
      %17 = vector.broadcast %cst_9 : f32 to vector<2x128x128xf32>
      %c0_10 = arith.constant 0 : index
      %c0_11 = arith.constant 0 : index
      %c0_12 = arith.constant 0 : index
      %18 = vector.load %arg12[%c0_10, %c0_11, %c0_12] : memref<2x128x128xf32, #tpu.memory_space<vmem>>, vector<2x128x128xf32>
      tpu.vector_store %arg12[%c0_10, %c0_11, %c0_12], %17 {strides = array<i32>} : memref<2x128x128xf32, #tpu.memory_space<vmem>>, vector<2x128x128xf32>,
    } else {
    }
    %7 = arith.cmpi slt, %3, %1 : i32
    %8 = arith.extui %7 : i1 to i32
    %c0_i32_1 = arith.constant 0 : i32
    %9 = arith.cmpi ne, %8, %c0_i32_1 : i32
    scf.if %9 {
      %c0 = arith.constant 0 : index
      %c0_3 = arith.constant 0 : index
      %c0_4 = arith.constant 0 : index
      %c0_5 = arith.constant 0 : index
      %13 = vector.load %arg4[%c0, %c0_3, %c0_4, %c0_5] : memref<1x2x128x128xbf16, #tpu.memory_space<vmem>>, vector<1x2x128x128xbf16>
      %14 = vector.shape_cast %13 : vector<1x2x128x128xbf16> to vector<2x128x128xbf16>
      %c0_6 = arith.constant 0 : index
      %c0_7 = arith.constant 0 : index
      %c0_8 = arith.constant 0 : index
      %c0_9 = arith.constant 0 : index
      %15 = vector.load %arg5[%c0_6, %c0_7, %c0_8, %c0_9] : memref<1x2x128x128xbf16, #tpu.memory_space<vmem>>, vector<1x2x128x128xbf16>
      %16 = vector.shape_cast %15 : vector<1x2x128x128xbf16> to vector<2x128x128xbf16>
      "tpu.trace_start"() <{level = 10 : i32, message = "hqc,hkc->hqk"}> : () -> ()
      %cst = arith.constant dense<0.000000e+00> : vector<2x128x128xf32>
      %17 = tpu.matmul %14, %16, %cst {dimension_numbers = #tpu.dot_dimension_numbers<[2], [2], [1], [1], [0, 0, 0, 1, 1, 1], [0], [0]>} : vector<2x128x128xbf16>, vector<2x128x128xbf16>, vector<2x128x128xf32> -> vector<2x128x128xf32>
      "tpu.trace_stop"() : () -> ()
      %c0_10 = arith.constant 0 : index
      %c0_11 = arith.constant 0 : index
      %c0_12 = arith.constant 0 : index
      %18 = vector.load %arg10[%c0_10, %c0_11, %c0_12] : memref<2x128x1xf32, #tpu.memory_space<vmem>>, vector<2x128x1xf32>
      %cst_13 = arith.constant dense<0xFF800000> : vector<2x128xf32>
      %19 = vector.multi_reduction <maximumf>, %17, %cst_13 [2] : vector<2x128x128xf32> to vector<2x128xf32>
      %20 = vector.shape_cast %19 : vector<2x128xf32> to vector<2x128x1xf32>
      %21 = arith.maximumf %18, %20 : vector<2x128x1xf32>
      %22 = arith.subf %18, %21 : vector<2x128x1xf32>
      %23 = math.exp %22 : vector<2x128x1xf32>
      %24 = vector.broadcast %21 : vector<2x128x1xf32> to vector<2x128x128xf32>
      %25 = arith.subf %17, %24 : vector<2x128x128xf32>
      %26 = math.exp %25 : vector<2x128x128xf32>
      %c0_14 = arith.constant 0 : index
      %c0_15 = arith.constant 0 : index
      %c0_16 = arith.constant 0 : index
      %27 = vector.load %arg11[%c0_14, %c0_15, %c0_16] : memref<2x128x1xf32, #tpu.memory_space<vmem>>, vector<2x128x1xf32>
      %28 = arith.mulf %23, %27 : vector<2x128x1xf32>
      %cst_17 = arith.constant dense<0.000000e+00> : vector<2x128xf32>
      %29 = vector.multi_reduction <add>, %26, %cst_17 [2] : vector<2x128x128xf32> to vector<2x128xf32>
      %30 = vector.shape_cast %29 : vector<2x128xf32> to vector<2x128x1xf32>
      %31 = arith.addf %28, %30 : vector<2x128x1xf32>
      %c0_18 = arith.constant 0 : index
      %c0_19 = arith.constant 0 : index
      %c0_20 = arith.constant 0 : index
      %32 = vector.load %arg11[%c0_18, %c0_19, %c0_20] : memref<2x128x1xf32, #tpu.memory_space<vmem>>, vector<2x128x1xf32>
      tpu.vector_store %arg11[%c0_18, %c0_19, %c0_20], %31 {strides = array<i32>} : memref<2x128x1xf32, #tpu.memory_space<vmem>>, vector<2x128x1xf32>,
      %c0_21 = arith.constant 0 : index
      %c0_22 = arith.constant 0 : index
      %c0_23 = arith.constant 0 : index
      %33 = vector.load %arg12[%c0_21, %c0_22, %c0_23] : memref<2x128x128xf32, #tpu.memory_space<vmem>>, vector<2x128x128xf32>
      %34 = vector.broadcast %23 : vector<2x128x1xf32> to vector<2x128x128xf32>
      %35 = arith.mulf %34, %33 : vector<2x128x128xf32>
      %36 = arith.truncf %26 : vector<2x128x128xf32> to vector<2x128x128xbf16>
      %c0_24 = arith.constant 0 : index
      %c0_25 = arith.constant 0 : index
      %c0_26 = arith.constant 0 : index
      %c0_27 = arith.constant 0 : index
      %37 = vector.load %arg6[%c0_24, %c0_25, %c0_26, %c0_27] : memref<1x2x128x128xbf16, #tpu.memory_space<vmem>>, vector<1x2x128x128xbf16>
      %38 = vector.shape_cast %37 : vector<1x2x128x128xbf16> to vector<2x128x128xbf16>
      "tpu.trace_start"() <{level = 10 : i32, message = "hqk,hkc->hqc"}> : () -> ()
      %cst_28 = arith.constant dense<0.000000e+00> : vector<2x128x128xf32>
      %39 = tpu.matmul %36, %38, %cst_28 {dimension_numbers = #tpu.dot_dimension_numbers<[2], [1], [1], [2], [0, 0, 0, 1, 1, 2], [0], [0]>} : vector<2x128x128xbf16>, vector<2x128x128xbf16>, vector<2x128x128xf32> -> vector<2x128x128xf32>
      "tpu.trace_stop"() : () -> ()
      %40 = arith.addf %35, %39 : vector<2x128x128xf32>
      %c0_29 = arith.constant 0 : index
      %c0_30 = arith.constant 0 : index
      %c0_31 = arith.constant 0 : index
      %41 = vector.load %arg12[%c0_29, %c0_30, %c0_31] : memref<2x128x128xf32, #tpu.memory_space<vmem>>, vector<2x128x128xf32>
      tpu.vector_store %arg12[%c0_29, %c0_30, %c0_31], %40 {strides = array<i32>} : memref<2x128x128xf32, #tpu.memory_space<vmem>>, vector<2x128x128xf32>,
      %c0_32 = arith.constant 0 : index
      %c0_33 = arith.constant 0 : index
      %c0_34 = arith.constant 0 : index
      %42 = vector.load %arg10[%c0_32, %c0_33, %c0_34] : memref<2x128x1xf32, #tpu.memory_space<vmem>>, vector<2x128x1xf32>
      tpu.vector_store %arg10[%c0_32, %c0_33, %c0_34], %21 {strides = array<i32>} : memref<2x128x1xf32, #tpu.memory_space<vmem>>, vector<2x128x1xf32>,
    } else {
    }
    %10 = arith.cmpi eq, %3, %1 : i32
    %11 = arith.extui %10 : i1 to i32
    %c0_i32_2 = arith.constant 0 : i32
    %12 = arith.cmpi ne, %11, %c0_i32_2 : i32
    scf.if %12 {
      %c0 = arith.constant 0 : index
      %c0_3 = arith.constant 0 : index
      %c0_4 = arith.constant 0 : index
      %c0_5 = arith.constant 0 : index
      %13 = vector.load %arg4[%c0, %c0_3, %c0_4, %c0_5] : memref<1x2x128x128xbf16, #tpu.memory_space<vmem>>, vector<1x2x128x128xbf16>
      %14 = vector.shape_cast %13 : vector<1x2x128x128xbf16> to vector<2x128x128xbf16>
      %c0_6 = arith.constant 0 : index
      %c0_7 = arith.constant 0 : index
      %c0_8 = arith.constant 0 : index
      %c0_9 = arith.constant 0 : index
      %15 = vector.load %arg5[%c0_6, %c0_7, %c0_8, %c0_9] : memref<1x2x128x128xbf16, #tpu.memory_space<vmem>>, vector<1x2x128x128xbf16>
      %16 = vector.shape_cast %15 : vector<1x2x128x128xbf16> to vector<2x128x128xbf16>
      "tpu.trace_start"() <{level = 10 : i32, message = "hqc,hkc->hqk"}> : () -> ()
      %cst = arith.constant dense<0.000000e+00> : vector<2x128x128xf32>
      %17 = tpu.matmul %14, %16, %cst {dimension_numbers = #tpu.dot_dimension_numbers<[2], [2], [1], [1], [0, 0, 0, 1, 1, 1], [0], [0]>} : vector<2x128x128xbf16>, vector<2x128x128xbf16>, vector<2x128x128xf32> -> vector<2x128x128xf32>
      "tpu.trace_stop"() : () -> ()
      %18 = tpu.iota {dimensions = array<i32: 1>} : vector<1x128x128xi32>
      %19 = tpu.iota {dimensions = array<i32: 2>} : vector<1x128x128xi32>
      %20 = arith.cmpi sgt, %19, %18 : vector<1x128x128xi32>
      %cst_10 = arith.constant -1.000000e+30 : f32
      %21 = vector.shape_cast %20 : vector<1x128x128xi1> to vector<1x128x128xi1>
      %22 = vector.broadcast %21 : vector<1x128x128xi1> to vector<2x128x128xi1>
      %23 = vector.broadcast %cst_10 : f32 to vector<2x128x128xf32>
      %24 = arith.select %22, %23, %17 : vector<2x128x128xi1>, vector<2x128x128xf32>
      %c0_11 = arith.constant 0 : index
      %c0_12 = arith.constant 0 : index
      %c0_13 = arith.constant 0 : index
      %25 = vector.load %arg10[%c0_11, %c0_12, %c0_13] : memref<2x128x1xf32, #tpu.memory_space<vmem>>, vector<2x128x1xf32>
      %cst_14 = arith.constant dense<0xFF800000> : vector<2x128xf32>
      %26 = vector.multi_reduction <maximumf>, %24, %cst_14 [2] : vector<2x128x128xf32> to vector<2x128xf32>
      %27 = vector.shape_cast %26 : vector<2x128xf32> to vector<2x128x1xf32>
      %28 = arith.maximumf %25, %27 : vector<2x128x1xf32>
      %29 = arith.subf %25, %28 : vector<2x128x1xf32>
      %30 = math.exp %29 : vector<2x128x1xf32>
      %31 = vector.broadcast %28 : vector<2x128x1xf32> to vector<2x128x128xf32>
      %32 = arith.subf %24, %31 : vector<2x128x128xf32>
      %33 = math.exp %32 : vector<2x128x128xf32>
      %c0_15 = arith.constant 0 : index
      %c0_16 = arith.constant 0 : index
      %c0_17 = arith.constant 0 : index
      %34 = vector.load %arg11[%c0_15, %c0_16, %c0_17] : memref<2x128x1xf32, #tpu.memory_space<vmem>>, vector<2x128x1xf32>
      %35 = arith.mulf %30, %34 : vector<2x128x1xf32>
      %cst_18 = arith.constant dense<0.000000e+00> : vector<2x128xf32>
      %36 = vector.multi_reduction <add>, %33, %cst_18 [2] : vector<2x128x128xf32> to vector<2x128xf32>
      %37 = vector.shape_cast %36 : vector<2x128xf32> to vector<2x128x1xf32>
      %38 = arith.addf %35, %37 : vector<2x128x1xf32>
      %c0_19 = arith.constant 0 : index
      %c0_20 = arith.constant 0 : index
      %c0_21 = arith.constant 0 : index
      %39 = vector.load %arg11[%c0_19, %c0_20, %c0_21] : memref<2x128x1xf32, #tpu.memory_space<vmem>>, vector<2x128x1xf32>
      tpu.vector_store %arg11[%c0_19, %c0_20, %c0_21], %38 {strides = array<i32>} : memref<2x128x1xf32, #tpu.memory_space<vmem>>, vector<2x128x1xf32>,
      %c0_22 = arith.constant 0 : index
      %c0_23 = arith.constant 0 : index
      %c0_24 = arith.constant 0 : index
      %40 = vector.load %arg12[%c0_22, %c0_23, %c0_24] : memref<2x128x128xf32, #tpu.memory_space<vmem>>, vector<2x128x128xf32>
      %41 = vector.broadcast %30 : vector<2x128x1xf32> to vector<2x128x128xf32>
      %42 = arith.mulf %41, %40 : vector<2x128x128xf32>
      %43 = arith.truncf %33 : vector<2x128x128xf32> to vector<2x128x128xbf16>
      %c0_25 = arith.constant 0 : index
      %c0_26 = arith.constant 0 : index
      %c0_27 = arith.constant 0 : index
      %c0_28 = arith.constant 0 : index
      %44 = vector.load %arg6[%c0_25, %c0_26, %c0_27, %c0_28] : memref<1x2x128x128xbf16, #tpu.memory_space<vmem>>, vector<1x2x128x128xbf16>
      %45 = vector.shape_cast %44 : vector<1x2x128x128xbf16> to vector<2x128x128xbf16>
      "tpu.trace_start"() <{level = 10 : i32, message = "hqk,hkc->hqc"}> : () -> ()
      %cst_29 = arith.constant dense<0.000000e+00> : vector<2x128x128xf32>
      %46 = tpu.matmul %43, %45, %cst_29 {dimension_numbers = #tpu.dot_dimension_numbers<[2], [1], [1], [2], [0, 0, 0, 1, 1, 2], [0], [0]>} : vector<2x128x128xbf16>, vector<2x128x128xbf16>, vector<2x128x128xf32> -> vector<2x128x128xf32>
      "tpu.trace_stop"() : () -> ()
      %47 = arith.addf %42, %46 : vector<2x128x128xf32>
      %c0_30 = arith.constant 0 : index
      %c0_31 = arith.constant 0 : index
      %c0_32 = arith.constant 0 : index
      %48 = vector.load %arg12[%c0_30, %c0_31, %c0_32] : memref<2x128x128xf32, #tpu.memory_space<vmem>>, vector<2x128x128xf32>
      tpu.vector_store %arg12[%c0_30, %c0_31, %c0_32], %47 {strides = array<i32>} : memref<2x128x128xf32, #tpu.memory_space<vmem>>, vector<2x128x128xf32>,
      %c0_33 = arith.constant 0 : index
      %c0_34 = arith.constant 0 : index
      %c0_35 = arith.constant 0 : index
      %49 = vector.load %arg10[%c0_33, %c0_34, %c0_35] : memref<2x128x1xf32, #tpu.memory_space<vmem>>, vector<2x128x1xf32>
      tpu.vector_store %arg10[%c0_33, %c0_34, %c0_35], %28 {strides = array<i32>} : memref<2x128x1xf32, #tpu.memory_space<vmem>>, vector<2x128x1xf32>,
      %c0_36 = arith.constant 0 : index
      %c0_37 = arith.constant 0 : index
      %c0_38 = arith.constant 0 : index
      %50 = vector.load %arg11[%c0_36, %c0_37, %c0_38] : memref<2x128x1xf32, #tpu.memory_space<vmem>>, vector<2x128x1xf32>
      %cst_39 = arith.constant 1.000000e+00 : f32
      %51 = vector.broadcast %cst_39 : f32 to vector<2x128x1xf32>
      %52 = arith.divf %51, %50 : vector<2x128x1xf32>
      %c0_40 = arith.constant 0 : index
      %c0_41 = arith.constant 0 : index
      %c0_42 = arith.constant 0 : index
      %53 = vector.load %arg12[%c0_40, %c0_41, %c0_42] : memref<2x128x128xf32, #tpu.memory_space<vmem>>, vector<2x128x128xf32>
      %54 = vector.broadcast %52 : vector<2x128x1xf32> to vector<2x128x128xf32>
      %55 = arith.mulf %53, %54 : vector<2x128x128xf32>
      %56 = vector.extract_strided_slice %55 {offsets = [0, 0, 0], sizes = [1, 128, 128], strides = [1, 1, 1]} : vector<2x128x128xf32> to vector<1x128x128xf32>
      %57 = vector.shape_cast %56 : vector<1x128x128xf32> to vector<128x128xf32>
      %58 = arith.truncf %57 : vector<128x128xf32> to vector<128x128xbf16>
      %c0_43 = arith.constant 0 : index
      %c0_44 = arith.constant 0 : index
      %59 = vector.load %arg13[%c0_43, %c0_44] : memref<128x256xbf16, #tpu.memory_space<vmem>>, vector<128x128xbf16>
      tpu.vector_store %arg13[%c0_43, %c0_44], %58 {strides = array<i32>} : memref<128x256xbf16, #tpu.memory_space<vmem>>, vector<128x128xbf16>,
      %60 = vector.extract_strided_slice %55 {offsets = [1, 0, 0], sizes = [1, 128, 128], strides = [1, 1, 1]} : vector<2x128x128xf32> to vector<1x128x128xf32>
      %61 = vector.shape_cast %60 : vector<1x128x128xf32> to vector<128x128xf32>
      %62 = arith.truncf %61 : vector<128x128xf32> to vector<128x128xbf16>
      %c0_45 = arith.constant 0 : index
      %c128 = arith.constant 128 : index
      %63 = vector.load %arg13[%c0_45, %c128] : memref<128x256xbf16, #tpu.memory_space<vmem>>, vector<128x128xbf16>
      tpu.vector_store %arg13[%c0_45, %c128], %62 {strides = array<i32>} : memref<128x256xbf16, #tpu.memory_space<vmem>>, vector<128x128xbf16>,
      %c0_46 = arith.constant 0 : index
      %c0_47 = arith.constant 0 : index
      %64 = vector.load %arg13[%c0_46, %c0_47] : memref<128x256xbf16, #tpu.memory_space<vmem>>, vector<128x256xbf16>
      %c0_48 = arith.constant 0 : index
      %c0_49 = arith.constant 0 : index
      %65 = vector.load %arg7[%c0_48, %c0_49] : memref<256x128xbf16, #tpu.memory_space<vmem>>, vector<256x128xbf16>
      %cst_50 = arith.constant dense<0.000000e+00> : vector<128x128xf32>
      %66 = tpu.matmul %64, %65, %cst_50 {dimension_numbers = #tpu.dot_dimension_numbers<[1], [0], [0], [1], [0, 0, 1, 1], [], []>} : vector<128x256xbf16>, vector<256x128xbf16>, vector<128x128xf32> -> vector<128x128xf32>
      %c0_51 = arith.constant 0 : index
      %c0_52 = arith.constant 0 : index
      %67 = vector.load %arg8[%c0_51, %c0_52] : memref<1x128xf32, #tpu.memory_space<vmem>>, vector<1x128xf32>
      %68 = vector.broadcast %67 : vector<1x128xf32> to vector<128x128xf32>
      %69 = arith.addf %66, %68 : vector<128x128xf32>
      %c0_53 = arith.constant 0 : index
      %c0_54 = arith.constant 0 : index
      %c0_55 = arith.constant 0 : index
      %70 = vector.load %arg9[%c0_53, %c0_54, %c0_55] : memref<1x128x128xf32, #tpu.memory_space<vmem>>, vector<1x128x128xf32>
      %71 = vector.shape_cast %70 : vector<1x128x128xf32> to vector<128x128xf32>
      %72 = vector.shape_cast %69 : vector<128x128xf32> to vector<1x128x128xf32>
      tpu.vector_store %arg9[%c0_53, %c0_54, %c0_55], %72 {strides = array<i32>} : memref<1x128x128xf32, #tpu.memory_space<vmem>>, vector<1x128x128xf32>,
    } else {
    }
    return
  }
  func.func @transform_0(%arg0: i32, %arg1: i32, %arg2: memref<1xi32, #tpu.memory_space<smem>>, %arg3: memref<1xi32, #tpu.memory_space<smem>>) -> (i32, i32, i32, i32) {
    %0 = arith.index_cast %arg1 : i32 to index
    %1 = memref.load %arg2[%0] : memref<1xi32, #tpu.memory_space<smem>>
    %c0_i32 = arith.constant 0 : i32
    %c0_i32_0 = arith.constant 0 : i32
    %c0_i32_1 = arith.constant 0 : i32
    return %arg0, %c0_i32, %1, %c0_i32_0 : i32, i32, i32, i32
  }
  func.func @transform_1(%arg0: i32, %arg1: i32, %arg2: memref<1xi32, #tpu.memory_space<smem>>, %arg3: memref<1xi32, #tpu.memory_space<smem>>) -> (i32, i32, i32, i32) {
    %0 = arith.index_cast %arg1 : i32 to index
    %1 = memref.load %arg3[%0] : memref<1xi32, #tpu.memory_space<smem>>
    %c0_i32 = arith.constant 0 : i32
    %c0_i32_0 = arith.constant 0 : i32
    %c0_i32_1 = arith.constant 0 : i32
    return %arg0, %c0_i32, %1, %c0_i32_0 : i32, i32, i32, i32
  }
  func.func @transform_2(%arg0: i32, %arg1: i32, %arg2: memref<1xi32, #tpu.memory_space<smem>>, %arg3: memref<1xi32, #tpu.memory_space<smem>>) -> (i32, i32, i32, i32) {
    %0 = arith.index_cast %arg1 : i32 to index
    %1 = memref.load %arg3[%0] : memref<1xi32, #tpu.memory_space<smem>>
    %c0_i32 = arith.constant 0 : i32
    %c0_i32_0 = arith.constant 0 : i32
    %c0_i32_1 = arith.constant 0 : i32
    return %arg0, %c0_i32, %1, %c0_i32_0 : i32, i32, i32, i32
  }
  func.func @transform_3(%arg0: i32, %arg1: i32, %arg2: memref<1xi32, #tpu.memory_space<smem>>, %arg3: memref<1xi32, #tpu.memory_space<smem>>) -> (i32, i32) {
    %c0_i32 = arith.constant 0 : i32
    %c0_i32_0 = arith.constant 0 : i32
    %c0_i32_1 = arith.constant 0 : i32
    return %c0_i32, %c0_i32_0 : i32, i32
  }
  func.func @transform_4(%arg0: i32, %arg1: i32, %arg2: memref<1xi32, #tpu.memory_space<smem>>, %arg3: memref<1xi32, #tpu.memory_space<smem>>) -> (i32, i32) {
    %c0_i32 = arith.constant 0 : i32
    %c0_i32_0 = arith.constant 0 : i32
    %c0_i32_1 = arith.constant 0 : i32
    return %c0_i32, %c0_i32_0 : i32, i32
  }
  func.func @transform_5(%arg0: i32, %arg1: i32, %arg2: memref<1xi32, #tpu.memory_space<smem>>, %arg3: memref<1xi32, #tpu.memory_space<smem>>) -> (i32, i32, i32) {
    %0 = arith.index_cast %arg1 : i32 to index
    %1 = memref.load %arg2[%0] : memref<1xi32, #tpu.memory_space<smem>>
    %c0_i32 = arith.constant 0 : i32
    %c0_i32_0 = arith.constant 0 : i32
    return %arg0, %1, %c0_i32 : i32, i32, i32
  }
}

</mosaic_0001>

<bundles_post_ra>
// kernel: tpu_custom_call.1
= control target key start
LH: loop header
LB: loop body
LE: loop exit
PB: predicated region body
PF: predicated region fallthrough
CT: control target
= control target key end

     0   :  { %s8987_s0 = inlined_call_operand.<no memory space> [shape: s32[1], index: 0, kind: input, shape index: {}]   ;;  %s8988_s1 = inlined_call_operand.<no memory space> [shape: s32[1], index: 1, kind: input, shape index: {}]   ;;  %s8989_s2 = inlined_call_operand.hbm [shape: bf16[2,2,128,128], index: 2, kind: input, shape index: {}]   ;;  %s8990_s3 = inlined_call_operand.hbm [shape: bf16[2,2,128,128], index: 3, kind: input, shape index: {}]   ;;  %s8991_s4 = inlined_call_operand.hbm [shape: bf16[2,2,128,128], index: 4, kind: input, shape index: {}]   ;;  %s8992_s5 = inlined_call_operand.hbm [shape: bf16[256,128], index: 5, kind: input, shape index: {}]   ;;  %s8993_s6 = inlined_call_operand.vmem [shape: f32[1,128], index: 6, kind: input, shape index: {}]   ;;  %s8994_s7 = inlined_call_operand.hbm [shape: f32[2,128,128], index: 7, kind: output, shape index: {}]  }
   0x1   :  { %9093 = sst [smem:[#allocation107_spill]] %s8989_s2 }
   0x2   :  { %9094 = sst [smem:[#allocation108_spill]] %s8990_s3 }
   0x3   :  { %9095 = sst [smem:[#allocation109_spill]] %s8991_s4 }
   0x4   :  { %9096 = sst [smem:[#allocation110_spill]] %s8992_s5 }
   0x5   :  { %9097 = sst [smem:[#allocation111_spill]] %s8993_s6 }
   0x6   :  { %9098 = sst [smem:[#allocation112_spill]] %s8994_s7 }
   0x7   :  { %12 = sst [smem:[#allocation7]] %s8987_s0 }
   0x8   :  { %13 = sst [smem:[#allocation8]] %s8988_s1 }
   0x9   :  { %14 = vsyncpa [#allocation10], 0 }
   0xa   :  { %16 = vsyncpa [#allocation10 + $0x1], 0 }
   0xb   :  { %17 = vsyncpa [#allocation13], 0 }
   0xc   :  { %19 = vsyncpa [#allocation13 + $0x1], 0 }
   0xd   :  { %20 = vsyncpa [#allocation16], 0 }
   0xe   :  { %21 = vsyncpa [#allocation11], 0 }
   0xf   :  { %23 = vsyncpa [#allocation11 + $0x1], 0  ;;  %s6473_s28 = smov 0   ;;  %s6475_s29 = smov 0  }
  0x10   :  { %s6477_s30 = smov 0   ;;  %s6479_s8 = smov 0  }
  0x11   :  { %s6481_s0 = smov 0   ;;  %s6483_s9 = smov 0  }
  0x12   :  { %s6485_s1 = smov 0   ;;  %s6487_s10 = smov 0  }
  0x13   :  { %s6489_s11 = smov 0   ;;  %s6491_s12 = smov 0  }
  0x14   :  { %s6493_s13 = smov 0   ;;  %s6495_s14 = smov 0  }
  0x15   :  { %s6497_s15 = smov 0   ;;  %s6499_s16 = smov 0  }
  0x16   :  { %s6501_s17 = smov 0  }
  0x17 LB: > { %9099 = sst [smem:[#allocation23_spill]] %s6364_s30  ;;  %s41_s18 = sadd.s32 1, %s6408_s16  ;;  %s6412_s17 = sphi %s6501_s17, %s29_s17   ;;  %s6408_s16 = sphi %s6499_s16, %s9388_s16   ;;  %s6404_s15 = sphi %s6497_s15, %s9387_s15   ;;  %s6400_s14 = sphi %s6495_s14, %s9386_s14   ;;  %s6396_s13 = sphi %s6493_s13, %s9385_s13   ;;  %s6392_s12 = sphi %s6491_s12, %s9384_s12   ;;  %s6388_s11 = sphi %s6489_s11, %s9375_s11   ;;  %s6384_s10 = sphi %s6487_s10, %s9383_s10   ;;  %s6380_s1 = sphi %s6485_s1, %s9382_s1   ;;  %s6376_s9 = sphi %s6483_s9, %s9381_s9   ;;  %s6372_s0 = sphi %s6481_s0, %s9380_s0   ;;  %s6368_s8 = sphi %s6479_s8, %s9372_s8   ;;  %s6364_s30 = sphi %s6477_s30, %s9371_s30   ;;  %s6360_s29 = sphi %s6475_s29, %s9379_s29   ;;  %s6356_s28 = sphi %s6473_s28, %s9378_s28  }
  0x18   : > { %9100 = sst [smem:[#allocation24_spill]] %s6368_s8  ;;  %s6549_s19 = sld [smem:[#allocation7]] }
  0x19   : > { %9101 = sst [smem:[#allocation25_spill]] %s6372_s0  ;;  %p43_p0 = scmp.ge.s32.totalorder %s41_s18, 2 }
  0x1a   : > { %9102 = sst [smem:[#allocation26_spill]] %s6376_s9  ;;  %p9001_p1 = scmp.eq.s32.totalorder %s6412_s17, 0 }
  0x1b   : > { %9103 = sst [smem:[#allocation27_spill]] %s6388_s11  ;;  %s75_s20 = sld [smem:[#allocation8]] }
  0x1c   : > { %9104 = sst [smem:[#allocation28_spill]] %s6404_s15  ;;  %s82_s21 = sadd.s32 1, %s6388_s11 }
  0x1d   : > { %s9390_s18 = smov (%p43_p0, %s41_s18), 0  ;;  %p89_p2 = scmp.ne.s32.totalorder %s6388_s11, %s6384_s10 }
  0x1e   : > { %9105 = sst [smem:[#allocation29_spill]] %s9390_s18  ;;  %s47_s22 = ssub.s32 %s6408_s16, %s9390_s18 }
  0x1f   : > { %s184_s23 = sadd.s32 1, %s6364_s30  ;;  %p6564_p4 = por %p89_p2, %p9001_p1 }
  0x20   : > { %p6568_p5 = scmp.eq.s32.totalorder %s47_s22, 0  ;;  %p9000_p7 = scmp.lt.s32.totalorder %s6412_s17, 2 }
  0x21   : > { %s9003_s18 = sshll.u32 %s6408_s16, 5  ;;  %s261_s7 = sand.u32 1, %s6412_s17  }
  0x22   : > { %s9107_s25 = scalar_select %p6568_p5, 1, 0 }
  0x23   : > { %s6576_s26 = scalar_select %p6568_p5, %s6364_s30, %s184_s23  }
  0x24   : > { %s6581_s27 = scalar_select %p6568_p5, %s6388_s11, %s82_s21  }
  0x25   : > { %9108 = sst [smem:[#allocation30_spill]] %s6576_s26  ;;  %s263_s15 = sand.u32 1, %s6388_s11  }
  0x26   : > { %9109 = sst [smem:[#allocation31_spill]] %s6581_s27  ;;  %s4945_s6 = sshll.u32 %s263_s15, 7 }
  0x27   : > { %s4946_s22 = sshll.u32 %s75_s20, 4  ;;  %s265_s8 = scalar_lea.vmem [#allocation12], %s4945_s6 }
  0x28   : > { %s6589_s4 = sadd.s32 %s4946_s22, %s9003_s18  ;;  %s275_s0 = sshll.u32 %s265_s8, 4  ;;  %s6592_s0 = int_to_ptr.vmem [resolvable:$true] %s275_s0 }
  0x29   : > { %s9002_s9 = sshll.u32 %s6589_s4, 6  ;;  %s9110_s3 = sld [smem:[#allocation108_spill]] }
  0x2a   : > { %p6605_p8 = pnand %p9000_p7, %p6564_p4  ;;  %s6609_s6 = scalar_lea.sflag [#allocation13], %s261_s7 }
  0x2c   : > { %p6130_p10 = pneg %p6605_p8 }
  0x2f   : > { %s6599_s27 = scalar_lea.hbm %s9110_s3, %s9002_s9  ;;  %s6133_s22 = scalar_lea.hbm %s9110_s3, 4096 }
  0x30   : > { %s6128_s8 = scalar_lea.hbm %s6599_s27, 2048  ;;  %p6134_p13 = scmp.lt.u32.totalorder %s6599_s27, %s9110_s3 }
  0x31   : > { %p6129_p9 = scmp.ne.s32.totalorder %s6599_s27, %s6128_s8  ;;  %p6135_p0 = scmp.lt.u32.totalorder %s6133_s22, %s6128_s8 }
  0x32   : > { %p6137_p4 = scmp.lt.u32.totalorder %s6128_s8, %s6599_s27 }
  0x33   : > { %p6131_p11 = pnand %p6130_p10, %p6129_p9  ;;  %p6136_p2 = por %p6135_p0, %p6134_p13 }
  0x35   : > { %p6132_p12 = pneg %p6131_p11  ;;  %p6138_p6 = por %p6137_p4, %p6136_p2 }
  0x37   : > { %p6139_p7 = pnand %p6138_p6, %p6132_p12 }
  0x39   : > { %6142 = shalt.err (!%p6139_p7)
}
  0x3a   : > { %s6143_s7 = scalar_lea.vmem %s6592_s0, 2048  ;;  %s6414_s20 = smov [#allocation12]  }
  0x3b   : > { %p6144_p9 = scmp.ne.s32.totalorder %s6592_s0, %s6143_s7  ;;  %s6148_s24 = sshll.u32 %s6414_s20, 4  ;;  %s6149_s24 = int_to_ptr.vmem [resolvable:$false] %s6148_s24 }
  0x3c   : > { %s6150_s23 = scalar_lea.vmem %s6149_s24, 4096  ;;  %p6151_p3 = scmp.lt.s32.totalorder %s6592_s0, %s6149_s24 }
  0x3d   : > { %p6146_p11 = pnand %p6144_p9, %p6130_p10  ;;  %p6152_p13 = scmp.lt.s32.totalorder %s6150_s23, %s6143_s7 }
  0x3f   : > { %p6147_p1 = pneg %p6146_p11  ;;  %p6153_p0 = por %p6152_p13, %p6151_p3 }
  0x41   : > { %p6154_p2 = pnand %p6153_p0, %p6147_p1 }
  0x43   : > { %6157 = shalt.err (!%p6154_p2)
}
  0x44   : > { %s9004_s8 = smov 64   ;;  %s9006_s22 = smov 4  }
  0x45   : > { %5551 = dma.hbm_to_vmem [thread:$0]  (!%p6605_p8), %s6599_s27, 2048, %s6592_s0, %s6609_s6, %s9004_s8, %s9004_s8, %s9006_s22  }
  0x46   : > { %s6641_s21 = sadd.s32 4294967295, %s6412_s17   ;;  %s4937_s7 = sadd.s32 4294967294, %s6412_s17  }
  0x47   : > { %p9009_p1 = scmp.eq.s32.totalorder %s6641_s21, 0  ;;  %p194_p3 = scmp.ne.s32.totalorder %s6364_s30, %s6360_s29 }
  0x48   : > { %p195_p6 = scmp.eq.s32.totalorder %s6641_s21, 1  ;;  %p9112_p7 = scmp.ne.s32.totalorder %s6384_s10, %s6380_s1 }
  0x49   : > { %p200_p12 = scmp.ne.s32.totalorder %s6360_s29, %s6356_s28  ;;  %p201_p8 = scmp.eq.s32.totalorder %s4937_s7, 1 }
  0x4a   : > { %p6653_p10 = por %p9112_p7, %p9009_p1  ;;  %p6659_p4 = por %p195_p6, %p194_p3 }
  0x4b   : > { %p4938_p9 = scmp.ge.s32.totalorder %s6412_s17, 1  ;;  %p208_p11 = scmp.lt.s32.totalorder %s6412_s17, 3 }
  0x4c   : > { %s9113_s20 = scalar_select %p6653_p10, 1, 0 }
  0x4d   : > { %s9114_s0 = scalar_select %p6659_p4, 1, 0 }
  0x4e   : > { %p6665_p13 = por %p201_p8, %p200_p12  ;;  %p6669_p0 = pnand %p4938_p9, %p208_p11 }
  0x4f   : > { %s6417_s1 = smov [#allocation15]   ;;  %s52_s7 = sadd.s32 1, %s6400_s14 }
  0x50   : > { %s9115_s27 = scalar_select %p6665_p13, 1, 0 }
  0x51   : > { %s9117_s15 = scalar_select %p6669_p0, 1, 0 }
  0x52   : > { %9116 = sst [smem:[#allocation32_spill]] %s9115_s27  ;;  %s220_s24 = sshll.u32 %s6417_s1, 4  ;;  %s221_s24 = int_to_ptr.vmem [resolvable:$true] %s220_s24 }
  0x53   : > { %p5541_p2 = pneg %p6669_p0  ;;  %s9119_s5 = sld [smem:[#allocation110_spill]] }
  0x55   : > { %p6677_p3 = pnand %p5541_p2, %p9009_p1 }
  0x57   : > { %p6160_p7 = pneg %p6677_p3 }
  0x59   : > { %s6158_s8 = scalar_lea.hbm %s9119_s5, 2048 }
  0x5a   : > { %p6159_p6 = scmp.ne.s32.totalorder %s9119_s5, %s6158_s8  ;;  %p6165_p9 = scmp.lt.u32.totalorder %s6158_s8, %s9119_s5 }
  0x5c   : > { %p6161_p12 = pnand %p6160_p7, %p6159_p6 }
  0x5e   : > { %p6162_p8 = pneg %p6161_p12 }
  0x60   : > { %p6167_p11 = pnand %p6165_p9, %p6162_p8 }
  0x62   : > { %6170 = shalt.err (!%p6167_p11)
}
  0x63   : > { %s6171_s26 = scalar_lea.vmem %s221_s24, 2048  ;;  %p6179_p4 = scmp.lt.s32.totalorder %s221_s24, %s221_s24 }
  0x64   : > { %p6172_p2 = scmp.ne.s32.totalorder %s221_s24, %s6171_s26  ;;  %p6180_p10 = scmp.lt.s32.totalorder %s6171_s26, %s6171_s26 }
  0x66   : > { %p6174_p1 = pnand %p6172_p2, %p6160_p7  ;;  %p6181_p0 = por %p6180_p10, %p6179_p4 }
  0x68   : > { %p6175_p13 = pneg %p6174_p1 }
  0x6a   : > { %p6182_p5 = pnand %p6181_p0, %p6175_p13 }
  0x6c   : > { %6185 = shalt.err (!%p6182_p5)
}
  0x6d   : > { %s9120_s3 = smov 4   ;;  %s9121_s9 = smov 64  }
  0x6e   : > { %5544 = dma.hbm_to_vmem [thread:$0]  (!%p6677_p3), %s9119_s5, 2048, %s221_s24, [#allocation16], %s9121_s9, %s9121_s9, %s9120_s3  }
  0x6f   : > { %p9122_p5 = scmp.ne.s32.totalorder %s9107_s25, 0  ;;  %p59_p1 = scmp.ne.s32.totalorder %s6400_s14, %s6396_s13 }
  0x70   : > { %p65_p10 = scmp.ne.s32.totalorder %s6396_s13, %s6392_s12  ;;  %s237_s26 = sand.u32 1, %s6400_s14  }
  0x71   : > { %s6704_s11 = scalar_select %p9122_p5, %s6400_s14, %s52_s7  }
  0x72   : > { %s4942_s8 = sshll.u32 %s6549_s19, 4  ;;  %p9124_p4 = scmp.eq.s32.totalorder %s6412_s17, 0 }
  0x73   : > { %9123 = sst [smem:[#allocation33_spill]] %s6704_s11  ;;  %p9125_p0 = scmp.eq.s32.totalorder %s6641_s21, 0 }
  0x74   : > { %p61_p13 = por %p9124_p4, %p59_p1  ;;  %s4941_s1 = sshll.u32 %s237_s26, 7 }
  0x75   : > { %p6716_p6 = por %p9125_p0, %p65_p10  ;;  %s9127_s18 = sshll.u32 %s6408_s16, 5 }
  0x76   : > { %s248_s22 = sadd.s32 %s9127_s18, %s4942_s8  ;;  %s241_s27 = scalar_lea.vmem [#allocation9], %s4941_s1 }
  0x77   : > { %s9126_s23 = scalar_select %p6716_p6, 1, 0 }
  0x78   : > { %s4944_s30 = sshll.u32 %s248_s22, 6  ;;  %s251_s24 = sshll.u32 %s241_s27, 4  ;;  %s6727_s24 = int_to_ptr.vmem [resolvable:$true] %s251_s24 }
  0x79   : > { %s9128_s2 = sld [smem:[#allocation107_spill]]  ;;  %p9129_p3 = scmp.lt.s32.totalorder %s6412_s17, 2 }
  0x7a   : > { %s6735_s19 = scalar_lea.sflag [#allocation10], %s237_s26 }
  0x7b   : > { %p6731_p7 = pnand %p9129_p3, %p61_p13 }
  0x7d   : > { %p6188_p8 = pneg %p6731_p7 }
  0x7f   : > { %s6725_s11 = scalar_lea.hbm %s9128_s2, %s4944_s30  ;;  %s6191_s8 = scalar_lea.hbm %s9128_s2, 4096 }
  0x80   : > { %s6186_s27 = scalar_lea.hbm %s6725_s11, 2048  ;;  %p6192_p2 = scmp.lt.u32.totalorder %s6725_s11, %s9128_s2 }
  0x81   : > { %p6187_p12 = scmp.ne.s32.totalorder %s6725_s11, %s6186_s27  ;;  %p6193_p1 = scmp.lt.u32.totalorder %s6191_s8, %s6186_s27 }
  0x82   : > { %p6195_p4 = scmp.lt.u32.totalorder %s6186_s27, %s6725_s11 }
  0x83   : > { %p6189_p9 = pnand %p6188_p8, %p6187_p12  ;;  %p6194_p10 = por %p6193_p1, %p6192_p2 }
  0x85   : > { %p6190_p11 = pneg %p6189_p9  ;;  %p6196_p13 = por %p6195_p4, %p6194_p10 }
  0x87   : > { %p6197_p0 = pnand %p6196_p13, %p6190_p11 }
  0x89   : > { %6200 = shalt.err (!%p6197_p0)
}
  0x8a   : > { %s6201_s26 = scalar_lea.vmem %s6727_s24, 2048  ;;  %s6418_s22 = smov [#allocation9]  }
  0x8b   : > { %p6202_p3 = scmp.ne.s32.totalorder %s6727_s24, %s6201_s26  ;;  %s6206_s7 = sshll.u32 %s6418_s22, 4  ;;  %s6207_s7 = int_to_ptr.vmem [resolvable:$false] %s6206_s7 }
  0x8c   : > { %s6208_s5 = scalar_lea.vmem %s6207_s7, 4096  ;;  %p6209_p6 = scmp.lt.s32.totalorder %s6727_s24, %s6207_s7 }
  0x8d   : > { %p6204_p12 = pnand %p6202_p3, %p6188_p8  ;;  %p6210_p2 = scmp.lt.s32.totalorder %s6208_s5, %s6201_s26 }
  0x8f   : > { %p6205_p9 = pneg %p6204_p12  ;;  %p6211_p1 = por %p6210_p2, %p6209_p6 }
  0x91   : > { %p6212_p10 = pnand %p6211_p1, %p6205_p9 }
  0x93   : > { %6215 = shalt.err (!%p6212_p10)
}
  0x94   : > { %s9131_s27 = sld [smem:[#allocation26_spill]]  ;;  %s9132_s30 = sld [smem:[#allocation25_spill]] }
  0x95   : > { %s9133_s8 = sld [smem:[#allocation24_spill]]  ;;  %p9134_p8 = scmp.eq.s32.totalorder %s6412_s17, 0 }
  0x96   : > { %5548 = dma.hbm_to_vmem [thread:$0]  (!%p6731_p7), %s6725_s11, 2048, %s6727_s24, %s6735_s19, %s9121_s9, %s9121_s9, %s9120_s3  }
  0x97   : > { %s9135_s26 = sshll.u32 %s6589_s4, 6  ;;  %s9136_s5 = sld [smem:[#allocation109_spill]] }
  0x98   : > { %p9137_p13 = scmp.eq.s32.totalorder %s6641_s21, 0 }
  0x9a   : > { %s112_s12 = sadd.s32 1, %s9131_s27  ;;  %p119_p6 = scmp.ne.s32.totalorder %s9131_s27, %s9132_s30 }
  0x9b   : > { %s6772_s1 = scalar_select %p9122_p5, %s9131_s27, %s112_s12  }
  0x9c   : > { %p121_p11 = por %p119_p6, %p9134_p8  ;;  %p125_p4 = scmp.ne.s32.totalorder %s9132_s30, %s9133_s8 }
  0x9d   : > { %s287_s18 = sand.u32 1, %s9131_s27   ;;  %s6784_s2 = scalar_lea.hbm %s9136_s5, %s9135_s26 }
  0x9e   : > { %p6788_p7 = por %p125_p4, %p9137_p13  ;;  %s4949_s25 = sshll.u32 %s287_s18, 7 }
  0x9f   : > { %p9139_p5 = scmp.lt.s32.totalorder %s6412_s17, 2  ;;  %s289_s4 = scalar_lea.vmem [#allocation14], %s4949_s25 }
  0xa0   : > { %s299_s19 = sshll.u32 %s289_s4, 4  ;;  %s6216_s27 = scalar_lea.hbm %s6784_s2, 2048  ;;  %s6798_s19 = int_to_ptr.vmem [resolvable:$true] %s299_s19 }
  0xa1   : > { %p6794_p0 = pnand %p9139_p5, %p121_p11  ;;  %p6217_p3 = scmp.ne.s32.totalorder %s6784_s2, %s6216_s27 }
  0xa2   : > { %s6221_s12 = scalar_lea.hbm %s9136_s5, 4096  ;;  %p6222_p1 = scmp.lt.u32.totalorder %s6784_s2, %s9136_s5 }
  0xa3   : > { %p6218_p12 = pneg %p6794_p0  ;;  %p6223_p10 = scmp.lt.u32.totalorder %s6221_s12, %s6216_s27 }
  0xa4   : > { %p6225_p8 = scmp.lt.u32.totalorder %s6216_s27, %s6784_s2 }
  0xa5   : > { %p6219_p9 = pnand %p6218_p12, %p6217_p3  ;;  %p6224_p6 = por %p6223_p10, %p6222_p1 }
  0xa7   : > { %p6220_p2 = pneg %p6219_p9  ;;  %p6226_p11 = por %p6225_p8, %p6224_p6 }
  0xa9   : > { %p6227_p4 = pnand %p6226_p11, %p6220_p2 }
  0xab   : > { %6230 = shalt.err (!%p6227_p4)
}
  0xac   : > { %s6231_s22 = scalar_lea.vmem %s6798_s19, 2048  ;;  %s6419_s7 = smov [#allocation14]  }
  0xad   : > { %p6232_p13 = scmp.ne.s32.totalorder %s6798_s19, %s6231_s22  ;;  %s6236_s25 = sshll.u32 %s6419_s7, 4  ;;  %s6237_s25 = int_to_ptr.vmem [resolvable:$false] %s6236_s25 }
  0xae   : > { %s6238_s4 = scalar_lea.vmem %s6237_s25, 4096  ;;  %p6239_p9 = scmp.lt.s32.totalorder %s6798_s19, %s6237_s25 }
  0xaf   : > { %p6234_p5 = pnand %p6232_p13, %p6218_p12  ;;  %p6240_p1 = scmp.lt.s32.totalorder %s6238_s4, %s6231_s22 }
  0xb1   : > { %p6235_p3 = pneg %p6234_p5  ;;  %p6241_p10 = por %p6240_p1, %p6239_p9 }
  0xb3   : > { %p6242_p6 = pnand %p6241_p10, %p6235_p3 }
  0xb5   : > { %6245 = shalt.err (!%p6242_p6)
}
  0xb6   : > { %5554 = dma.hbm_to_vmem [thread:$0]  (!%p6794_p0), %s6784_s2, 2048, %s6798_s19, %s6609_s6, %s9121_s9, %s9121_s9, %s9120_s3  }
  0xb7   : > { %p9141_p12 = scmp.ne.s32.totalorder %s9117_s15, 0 }
  0xb8   : > { %s313_s27 = sand.u32 (!%p9141_p12), 1, %s6396_s13   ;;  %p9142_p2 = scmp.ne.s32.totalorder (!%p9141_p12), %s9126_s23, 0 }
  0xb9   : > { %311 = sbr.rel (%p9141_p12) target bundleno = 2461 (0x99d), region = 40  ;;  %s4954_s30 = sshll.u32 (!%p9141_p12), %s313_s27, 7 }
  0xba   : > { %s314_s8 = scalar_lea.sflag (!%p9141_p12), [#allocation10], %s313_s27  ;;  %s6832_s12 = scalar_lea.vmem (!%p9141_p12), [#allocation9], %s4954_s30 }
  0xc0   : > { %6335 = dma.done.wait (%p9142_p2), %s314_s8, 2048  }
  0xc1   : > { %6337 = vsyncadd (%p9142_p2), %s314_s8, 4294965248  ;;  %s322_s24 = sand.u32 1, %s6641_s21   ;;  %s324_s2 = sand.u32 1, %s6384_s10  }
  0xc2   : > { %s4955_s6 = sshll.u32 %s324_s2, 7  ;;  %s323_s15 = scalar_lea.sflag [#allocation13], %s322_s24 }
  0xc3   : > { %s6840_s3 = scalar_lea.vmem [#allocation12], %s4955_s6  ;;  %p9143_p0 = scmp.ne.s32.totalorder %s9113_s20, 0 }
  0xc5   : > { %6339 = dma.done.wait (%p9143_p0), %s323_s15, 2048  }
  0xc6   : > { %6341 = vsyncadd (%p9143_p0), %s323_s15, 4294965248  ;;  %s9144_s9 = sld [smem:[#allocation25_spill]] }
  0xcc   : > { %s333_s19 = sand.u32 1, %s9144_s9  }
  0xcd   : > { %s4956_s18 = sshll.u32 %s333_s19, 7 }
  0xce   : > { %s6847_s23 = scalar_lea.vmem [#allocation14], %s4956_s18 }
  0xcf   : > { %6343 = dma.done.wait (%p6788_p7), %s323_s15, 2048  }
  0xd0   : > { %6345 = vsyncadd (%p6788_p7), %s323_s15, 4294965248  ;;  %p9145_p8 = scmp.eq.s32.totalorder %s6641_s21, 0 }
  0xd2   : > { %6347 = dma.done.wait (%p9145_p8), [#allocation16], 2048   ;;  %p9146_p11 = pmov %p9145_p8 }
  0xd3   : > { %s373_s20 = sand.u32 1, %s6360_s29   ;;  %s6858_s26 = sld [smem:[#allocation7]] }
  0xd4   : > { %6349 = vsyncadd (%p9146_p11), [#allocation16], 4294965248  ;;  %s6860_s22 = sld [smem:[#allocation8]]  ;;  %s4958_s7 = sshll.u32 %s373_s20, 7 }
  0xd5   : > { %s6864_s25 = scalar_lea.vmem [#allocation17], %s4958_s7 }
  0xda   : > { %p4959_p4 = scmp.ne.s32.totalorder %s6860_s22, 0 }
  0xdb   : > { %vm391_vm0 = vcmask (!%p4959_p4), 7168   ;;  %v6420_v0 = vmov (!%p4959_p4), -1e+30   ;;  %v6421_v1 = vmov (!%p4959_p4), 0.0  }
  0xdc   : > { %390 = sbr.rel (%p4959_p4) target bundleno = 268 (0x10c), region = 60  ;;  %392 = vst.msk [vmem:[#allocation2] sm:$0xff] (!%p4959_p4), %vm391_vm0, %v6420_v0  ;;  %393 = vst.msk [vmem:[#allocation2 + $0x8] sm:$0xff] (!%p4959_p4), %vm391_vm0, %v6420_v0 }
  0xdd   : > { %394 = vst.msk [vmem:[#allocation2 + $0x10] sm:$0xff] (!%p4959_p4), %vm391_vm0, %v6420_v0  ;;  %395 = vst.msk [vmem:[#allocation2 + $0x18] sm:$0xff] (!%p4959_p4), %vm391_vm0, %v6420_v0 }
  0xde   : > { %396 = vst.msk [vmem:[#allocation2 + $0x20] sm:$0xff] (!%p4959_p4), %vm391_vm0, %v6420_v0  ;;  %397 = vst.msk [vmem:[#allocation2 + $0x28] sm:$0xff] (!%p4959_p4), %vm391_vm0, %v6420_v0 }
  0xdf   : > { %398 = vst.msk [vmem:[#allocation2 + $0x30] sm:$0xff] (!%p4959_p4), %vm391_vm0, %v6420_v0  ;;  %399 = vst.msk [vmem:[#allocation2 + $0x38] sm:$0xff] (!%p4959_p4), %vm391_vm0, %v6420_v0 }
  0xe0   : > { %400 = vst.msk [vmem:[#allocation2 + $0x40] sm:$0xff] (!%p4959_p4), %vm391_vm0, %v6420_v0  ;;  %401 = vst.msk [vmem:[#allocation2 + $0x48] sm:$0xff] (!%p4959_p4), %vm391_vm0, %v6420_v0 }
  0xe1   : > { %402 = vst.msk [vmem:[#allocation2 + $0x50] sm:$0xff] (!%p4959_p4), %vm391_vm0, %v6420_v0  ;;  %403 = vst.msk [vmem:[#allocation2 + $0x58] sm:$0xff] (!%p4959_p4), %vm391_vm0, %v6420_v0 }
  0xe2   : > { %404 = vst.msk [vmem:[#allocation2 + $0x60] sm:$0xff] (!%p4959_p4), %vm391_vm0, %v6420_v0  ;;  %405 = vst.msk [vmem:[#allocation2 + $0x68] sm:$0xff] (!%p4959_p4), %vm391_vm0, %v6420_v0 }
  0xe3   : > { %406 = vst.msk [vmem:[#allocation2 + $0x70] sm:$0xff] %vm391_vm0, %v6420_v0  ;;  %407 = vst.msk [vmem:[#allocation2 + $0x78] sm:$0xff] %vm391_vm0, %v6420_v0 }
  0xe4   : > { %408 = vst.msk [vmem:[#allocation2 + $0x80] sm:$0xff] %vm391_vm0, %v6420_v0  ;;  %409 = vst.msk [vmem:[#allocation2 + $0x88] sm:$0xff] %vm391_vm0, %v6420_v0 }
  0xe5   : > { %410 = vst.msk [vmem:[#allocation2 + $0x90] sm:$0xff] %vm391_vm0, %v6420_v0  ;;  %411 = vst.msk [vmem:[#allocation2 + $0x98] sm:$0xff] %vm391_vm0, %v6420_v0 }
  0xe6   : > { %412 = vst.msk [vmem:[#allocation2 + $0xa0] sm:$0xff] %vm391_vm0, %v6420_v0  ;;  %413 = vst.msk [vmem:[#allocation2 + $0xa8] sm:$0xff] %vm391_vm0, %v6420_v0 }
  0xe7   : > { %414 = vst.msk [vmem:[#allocation2 + $0xb0] sm:$0xff] %vm391_vm0, %v6420_v0  ;;  %415 = vst.msk [vmem:[#allocation2 + $0xb8] sm:$0xff] %vm391_vm0, %v6420_v0 }
  0xe8   : > { %416 = vst.msk [vmem:[#allocation2 + $0xc0] sm:$0xff] %vm391_vm0, %v6420_v0  ;;  %417 = vst.msk [vmem:[#allocation2 + $0xc8] sm:$0xff] %vm391_vm0, %v6420_v0 }
  0xe9   : > { %418 = vst.msk [vmem:[#allocation2 + $0xd0] sm:$0xff] %vm391_vm0, %v6420_v0  ;;  %419 = vst.msk [vmem:[#allocation2 + $0xd8] sm:$0xff] %vm391_vm0, %v6420_v0 }
  0xea   : > { %420 = vst.msk [vmem:[#allocation2 + $0xe0] sm:$0xff] %vm391_vm0, %v6420_v0  ;;  %421 = vst.msk [vmem:[#allocation2 + $0xe8] sm:$0xff] %vm391_vm0, %v6420_v0 }
  0xeb   : > { %422 = vst.msk [vmem:[#allocation2 + $0xf0] sm:$0xff] %vm391_vm0, %v6420_v0  ;;  %423 = vst.msk [vmem:[#allocation2 + $0xf8] sm:$0xff] %vm391_vm0, %v6420_v0 }
  0xec   : > { %424 = vst.msk [vmem:[#allocation3] sm:$0xff] %vm391_vm0, %v6421_v1  ;;  %425 = vst.msk [vmem:[#allocation3 + $0x8] sm:$0xff] %vm391_vm0, %v6421_v1 }
  0xed   : > { %426 = vst.msk [vmem:[#allocation3 + $0x10] sm:$0xff] %vm391_vm0, %v6421_v1  ;;  %427 = vst.msk [vmem:[#allocation3 + $0x18] sm:$0xff] %vm391_vm0, %v6421_v1 }
  0xee   : > { %428 = vst.msk [vmem:[#allocation3 + $0x20] sm:$0xff] %vm391_vm0, %v6421_v1  ;;  %429 = vst.msk [vmem:[#allocation3 + $0x28] sm:$0xff] %vm391_vm0, %v6421_v1 }
  0xef   : > { %430 = vst.msk [vmem:[#allocation3 + $0x30] sm:$0xff] %vm391_vm0, %v6421_v1  ;;  %431 = vst.msk [vmem:[#allocation3 + $0x38] sm:$0xff] %vm391_vm0, %v6421_v1 }
  0xf0   : > { %432 = vst.msk [vmem:[#allocation3 + $0x40] sm:$0xff] %vm391_vm0, %v6421_v1  ;;  %433 = vst.msk [vmem:[#allocation3 + $0x48] sm:$0xff] %vm391_vm0, %v6421_v1 }
  0xf1   : > { %434 = vst.msk [vmem:[#allocation3 + $0x50] sm:$0xff] %vm391_vm0, %v6421_v1  ;;  %435 = vst.msk [vmem:[#allocation3 + $0x58] sm:$0xff] %vm391_vm0, %v6421_v1 }
  0xf2   : > { %436 = vst.msk [vmem:[#allocation3 + $0x60] sm:$0xff] %vm391_vm0, %v6421_v1  ;;  %437 = vst.msk [vmem:[#allocation3 + $0x68] sm:$0xff] %vm391_vm0, %v6421_v1 }
  0xf3   : > { %438 = vst.msk [vmem:[#allocation3 + $0x70] sm:$0xff] %vm391_vm0, %v6421_v1  ;;  %439 = vst.msk [vmem:[#allocation3 + $0x78] sm:$0xff] %vm391_vm0, %v6421_v1 }
  0xf4   : > { %440 = vst.msk [vmem:[#allocation3 + $0x80] sm:$0xff] %vm391_vm0, %v6421_v1  ;;  %441 = vst.msk [vmem:[#allocation3 + $0x88] sm:$0xff] %vm391_vm0, %v6421_v1 }
  0xf5   : > { %442 = vst.msk [vmem:[#allocation3 + $0x90] sm:$0xff] %vm391_vm0, %v6421_v1  ;;  %443 = vst.msk [vmem:[#allocation3 + $0x98] sm:$0xff] %vm391_vm0, %v6421_v1 }
  0xf6   : > { %444 = vst.msk [vmem:[#allocation3 + $0xa0] sm:$0xff] %vm391_vm0, %v6421_v1  ;;  %445 = vst.msk [vmem:[#allocation3 + $0xa8] sm:$0xff] %vm391_vm0, %v6421_v1 }
  0xf7   : > { %446 = vst.msk [vmem:[#allocation3 + $0xb0] sm:$0xff] %vm391_vm0, %v6421_v1  ;;  %447 = vst.msk [vmem:[#allocation3 + $0xb8] sm:$0xff] %vm391_vm0, %v6421_v1 }
  0xf8   : > { %448 = vst.msk [vmem:[#allocation3 + $0xc0] sm:$0xff] %vm391_vm0, %v6421_v1  ;;  %449 = vst.msk [vmem:[#allocation3 + $0xc8] sm:$0xff] %vm391_vm0, %v6421_v1 }
  0xf9   : > { %450 = vst.msk [vmem:[#allocation3 + $0xd0] sm:$0xff] %vm391_vm0, %v6421_v1  ;;  %451 = vst.msk [vmem:[#allocation3 + $0xd8] sm:$0xff] %vm391_vm0, %v6421_v1 }
  0xfa   : > { %452 = vst.msk [vmem:[#allocation3 + $0xe0] sm:$0xff] %vm391_vm0, %v6421_v1  ;;  %453 = vst.msk [vmem:[#allocation3 + $0xe8] sm:$0xff] %vm391_vm0, %v6421_v1 }
  0xfb   : > { %454 = vst.msk [vmem:[#allocation3 + $0xf0] sm:$0xff] %vm391_vm0, %v6421_v1  ;;  %455 = vst.msk [vmem:[#allocation3 + $0xf8] sm:$0xff] %vm391_vm0, %v6421_v1 }
  0xfc   : > { %456 = vst [vmem:[#allocation4] sm:$0xff] %v6421_v1  ;;  %457 = vst [vmem:[#allocation4 + $0x8] sm:$0xff] %v6421_v1 }
  0xfd   : > { %458 = vst [vmem:[#allocation4 + $0x10] sm:$0xff] %v6421_v1  ;;  %459 = vst [vmem:[#allocation4 + $0x18] sm:$0xff] %v6421_v1 }
  0xfe   : > { %460 = vst [vmem:[#allocation4 + $0x20] sm:$0xff] %v6421_v1  ;;  %461 = vst [vmem:[#allocation4 + $0x28] sm:$0xff] %v6421_v1 }
  0xff   : > { %462 = vst [vmem:[#allocation4 + $0x30] sm:$0xff] %v6421_v1  ;;  %463 = vst [vmem:[#allocation4 + $0x38] sm:$0xff] %v6421_v1 }
 0x100   : > { %464 = vst [vmem:[#allocation4 + $0x40] sm:$0xff] %v6421_v1  ;;  %465 = vst [vmem:[#allocation4 + $0x48] sm:$0xff] %v6421_v1 }
 0x101   : > { %466 = vst [vmem:[#allocation4 + $0x50] sm:$0xff] %v6421_v1  ;;  %467 = vst [vmem:[#allocation4 + $0x58] sm:$0xff] %v6421_v1 }
 0x102   : > { %468 = vst [vmem:[#allocation4 + $0x60] sm:$0xff] %v6421_v1  ;;  %469 = vst [vmem:[#allocation4 + $0x68] sm:$0xff] %v6421_v1 }
 0x103   : > { %470 = vst [vmem:[#allocation4 + $0x70] sm:$0xff] %v6421_v1  ;;  %471 = vst [vmem:[#allocation4 + $0x78] sm:$0xff] %v6421_v1 }
 0x104   : > { %472 = vst [vmem:[#allocation4 + $0x80] sm:$0xff] %v6421_v1  ;;  %473 = vst [vmem:[#allocation4 + $0x88] sm:$0xff] %v6421_v1 }
 0x105   : > { %474 = vst [vmem:[#allocation4 + $0x90] sm:$0xff] %v6421_v1  ;;  %475 = vst [vmem:[#allocation4 + $0x98] sm:$0xff] %v6421_v1 }
 0x106   : > { %476 = vst [vmem:[#allocation4 + $0xa0] sm:$0xff] %v6421_v1  ;;  %477 = vst [vmem:[#allocation4 + $0xa8] sm:$0xff] %v6421_v1 }
 0x107   : > { %478 = vst [vmem:[#allocation4 + $0xb0] sm:$0xff] %v6421_v1  ;;  %479 = vst [vmem:[#allocation4 + $0xb8] sm:$0xff] %v6421_v1 }
 0x108   : > { %480 = vst [vmem:[#allocation4 + $0xc0] sm:$0xff] %v6421_v1  ;;  %481 = vst [vmem:[#allocation4 + $0xc8] sm:$0xff] %v6421_v1 }
 0x109   : > { %482 = vst [vmem:[#allocation4 + $0xd0] sm:$0xff] %v6421_v1  ;;  %483 = vst [vmem:[#allocation4 + $0xd8] sm:$0xff] %v6421_v1 }
 0x10a   : > { %484 = vst [vmem:[#allocation4 + $0xe0] sm:$0xff] %v6421_v1  ;;  %485 = vst [vmem:[#allocation4 + $0xe8] sm:$0xff] %v6421_v1 }
 0x10b   : > { %486 = vst [vmem:[#allocation4 + $0xf0] sm:$0xff] %v6421_v1  ;;  %487 = vst [vmem:[#allocation4 + $0xf8] sm:$0xff] %v6421_v1 }
 0x10c PF: > { %p4960_p7 = scmp.ge.s32.totalorder %s6860_s22, %s6858_s26 }
 0x10e   : > { %491 = sbr.rel (%p4960_p7) target bundleno = 1138 (0x472), region = 64 }
 0x115   : > { %v5694_v2 = vld [vmem:[%s6840_s3] sm:$0xff]   ;;  %v5696_v4 = vld [vmem:[%s6840_s3 + $0x8] sm:$0xff]   ;;  %v5698_v6 = vld [vmem:[%s6840_s3 + $0x10] sm:$0xff]   ;;  %v6422_v53 = vmov 0   ;;  %vm1582_vm1 = vcmask 7168  }
 0x116   : > { %v5695_v3 = vld [vmem:[%s6840_s3 + $0x40] sm:$0xff]   ;;  %5273 = vmatprep.subr.bf16.mxu0 %v5694_v2  ;;  %v5697_v5 = vld [vmem:[%s6840_s3 + $0x48] sm:$0xff]   ;;  %v5699_v7 = vld [vmem:[%s6840_s3 + $0x50] sm:$0xff]   ;;  %5693 = vset.pattern.permute.xlu0 %v6422_v53 }
 0x117   : > { %5305 = vmatprep.subr.bf16.mxu1 %v5695_v3  ;;  %5274 = vmatpush3.bf16.xpose.msra.mxu0 %v5694_v2  ;;  %v5700_v8 = vld [vmem:[%s6840_s3 + $0x18] sm:$0xff]   ;;  %v5710_v10 = vld [vmem:[%s6832_s12] sm:$0xff]   ;;  %v5704_v14 = vld [vmem:[%s6840_s3 + $0x28] sm:$0xff]  }
 0x118   : > { %5306 = vmatpush3.bf16.xpose.msra.mxu1 %v5695_v3  ;;  %5275 = vmatprep.subr.bf16.mxu0 %v5696_v4  ;;  %v5701_v9 = vld [vmem:[%s6840_s3 + $0x58] sm:$0xff]   ;;  %v5711_v11 = vld [vmem:[%s6832_s12 + $0x40] sm:$0xff]   ;;  %v5705_v15 = vld [vmem:[%s6840_s3 + $0x68] sm:$0xff]  }
 0x119   : > { %5307 = vmatprep.subr.bf16.mxu1 %v5697_v5  ;;  %5289 = vmatprep.mubr.bf16.mxu0 %v5710_v10  ;;  %v5702_v12 = vld [vmem:[%s6840_s3 + $0x20] sm:$0xff]   ;;  %v5706_v16 = vld [vmem:[%s6840_s3 + $0x30] sm:$0xff]   ;;  %v5708_v18 = vld [vmem:[%s6840_s3 + $0x38] sm:$0xff]  }
 0x11a   : > { %5321 = vmatprep.mubr.bf16.mxu1 %v5711_v11  ;;  %v5703_v13 = vld [vmem:[%s6840_s3 + $0x60] sm:$0xff]   ;;  %v5707_v17 = vld [vmem:[%s6840_s3 + $0x70] sm:$0xff]   ;;  %v5709_v19 = vld [vmem:[%s6840_s3 + $0x78] sm:$0xff]   ;;  %5692 = vset.pattern.permute.xlu1 %v6422_v53 }
 0x11b   : > { %v5712_v20 = vld [vmem:[%s6832_s12 + $0x8] sm:$0xff]   ;;  %v5714_v22 = vld [vmem:[%s6832_s12 + $0x10] sm:$0xff]   ;;  %v5715_v24 = vld [vmem:[%s6832_s12 + $0x18] sm:$0xff]  }
 0x11c   : > { %v5713_v21 = vld [vmem:[%s6832_s12 + $0x48] sm:$0xff]   ;;  %v5716_v23 = vld [vmem:[%s6832_s12 + $0x50] sm:$0xff]   ;;  %v5717_v25 = vld [vmem:[%s6832_s12 + $0x58] sm:$0xff]  }
 0x11d   : > { %v5718_v26 = vld [vmem:[%s6832_s12 + $0x20] sm:$0xff]   ;;  %v5719_v28 = vld [vmem:[%s6832_s12 + $0x28] sm:$0xff]   ;;  %v5722_v30 = vld [vmem:[%s6832_s12 + $0x30] sm:$0xff]  }
 0x11e   : > { %v5720_v27 = vld [vmem:[%s6832_s12 + $0x60] sm:$0xff]   ;;  %v5721_v29 = vld [vmem:[%s6832_s12 + $0x68] sm:$0xff]   ;;  %v5724_v31 = vld [vmem:[%s6832_s12 + $0x70] sm:$0xff]  }
 0x11f   : > { %5276 = vmatpush3.bf16.xpose.msra.mxu0 %v5696_v4  ;;  %v5723_v32 = vld [vmem:[%s6832_s12 + $0x38] sm:$0xff]   ;;  %v7125_v3 = vld [vmem:[#allocation2 + $0x10] sm:$0xff]  ;;  %v7142_v11 = vld [vmem:[#allocation2] sm:$0xff] }
 0x120   : > { %5308 = vmatpush3.bf16.xpose.msra.mxu1 %v5697_v5  ;;  %5277 = vmatprep.subr.bf16.mxu0 %v5698_v6  ;;  %v5725_v33 = vld [vmem:[%s6832_s12 + $0x78] sm:$0xff]   ;;  %v7127_v4 = vld [vmem:[#allocation2 + $0x90] sm:$0xff]  ;;  %v5733_v10 = vld [vmem:[%s6847_s23 + $0x20] sm:$0xff]  }
 0x121   : > { %5309 = vmatprep.subr.bf16.mxu1 %v5699_v7  ;;  %v7192_v53 = vld [vmem:[#allocation2 + $0x38] sm:$0xff] }
 0x127   : > { %5278 = vmatpush3.bf16.xpose.msra.mxu0 %v5698_v6 }
 0x128   : > { %5310 = vmatpush3.bf16.xpose.msra.mxu1 %v5699_v7  ;;  %5279 = vmatprep.subr.bf16.mxu0 %v5700_v8 }
 0x129   : > { %5311 = vmatprep.subr.bf16.mxu1 %v5701_v9 }
 0x12f   : > { %5280 = vmatpush3.bf16.xpose.msra.mxu0 %v5700_v8 }
 0x130   : > { %5312 = vmatpush3.bf16.xpose.msra.mxu1 %v5701_v9  ;;  %5281 = vmatprep.subr.bf16.mxu0 %v5702_v12  ;;  %v7135_v9 = vld [vmem:[#allocation2 + $0x18] sm:$0xff] }
 0x131   : > { %5313 = vmatprep.subr.bf16.mxu1 %v5703_v13 }
 0x137   : > { %5282 = vmatpush3.bf16.xpose.msra.mxu0 %v5702_v12 }
 0x138   : > { %5314 = vmatpush3.bf16.xpose.msra.mxu1 %v5703_v13  ;;  %5283 = vmatprep.subr.bf16.mxu0 %v5704_v14 }
 0x139   : > { %5315 = vmatprep.subr.bf16.mxu1 %v5705_v15 }
 0x13f   : > { %5284 = vmatpush3.bf16.xpose.msra.mxu0 %v5704_v14 }
 0x140   : > { %5316 = vmatpush3.bf16.xpose.msra.mxu1 %v5705_v15  ;;  %5285 = vmatprep.subr.bf16.mxu0 %v5706_v16 }
 0x141   : > { %5317 = vmatprep.subr.bf16.mxu1 %v5707_v17 }
 0x147   : > { %5286 = vmatpush3.bf16.xpose.msra.mxu0 %v5706_v16 }
 0x148   : > { %5318 = vmatpush3.bf16.xpose.msra.mxu1 %v5707_v17  ;;  %5287 = vmatprep.subr.bf16.mxu0 %v5708_v18  ;;  %v7155_v17 = vld [vmem:[#allocation2 + $0x98] sm:$0xff] }
 0x149   : > { %5319 = vmatprep.subr.bf16.mxu1 %v5709_v19 }
 0x14f   : > { %5288 = vmatpush3.bf16.xpose.msra.mxu0 %v5708_v18  ;;  %v7159_v18 = vld [vmem:[#allocation2 + $0x80] sm:$0xff] }
 0x150   : > { %5320 = vmatpush3.bf16.xpose.msra.mxu1 %v5709_v19 }
 0x156   : > { %5290 = vmatmul.mubr.bf16.vlgmr.msra.gmra.mrb[0].mxu0 %v5712_v20  ;;  %v5726_v20 = vld [vmem:[%s6847_s23] sm:$0xff]  }
 0x157   : > { %5322 = vmatmul.mubr.bf16.vlgmr.msra.gmra.mrb[0].mxu1 %v5713_v21  ;;  %5293 = vmatprep.mubr.bf16.mxu0 %v5714_v22 }
 0x158   : > { %5325 = vmatprep.mubr.bf16.mxu1 %v5716_v23  ;;  %5337 = vmatprep.subr.bf16.mxu0 %v5726_v20 }
 0x159   : > { %5338 = vmatpush3.bf16.msra.mxu0 %v5726_v20 }
 0x15e   : > { %5294 = vmatmul.mubr.bf16.gmra.mrb[4].mxu0 %v5715_v24  ;;  %v7171_v24 = vld [vmem:[#allocation2 + $0x88] sm:$0xff] }
 0x15f   : > { %5326 = vmatmul.mubr.bf16.gmra.mrb[4].mxu1 %v5717_v25  ;;  %5297 = vmatprep.mubr.bf16.mxu0 %v5718_v26  ;;  %v7177_v26 = vld [vmem:[#allocation2 + $0x8] sm:$0xff] }
 0x160   : > { %5329 = vmatprep.mubr.bf16.mxu1 %v5720_v27  ;;  %v7226_v25 = vld [vmem:[#allocation2 + $0x28] sm:$0xff] }
 0x166   : > { %5298 = vmatmul.mubr.bf16.gmra.mrb[8].mxu0 %v5719_v28 }
 0x167   : > { %5330 = vmatmul.mubr.bf16.gmra.mrb[8].mxu1 %v5721_v29  ;;  %5301 = vmatprep.mubr.bf16.mxu0 %v5722_v30  ;;  %v5727_v29 = vld [vmem:[%s6847_s23 + $0x8] sm:$0xff]   ;;  %v5728_v30 = vld [vmem:[%s6847_s23 + $0x40] sm:$0xff]  }
 0x168   : > { %5333 = vmatprep.mubr.bf16.mxu1 %v5724_v31  ;;  %5339 = vmatprep.subr.bf16.mxu0 %v5727_v29 }
 0x169   : > { %5369 = vmatprep.subr.bf16.mxu1 %v5728_v30  ;;  %5340 = vmatpush3.bf16.msra.mxu0 %v5727_v29  ;;  %v7213_v29 = vld [vmem:[#allocation2 + $0xb0] sm:$0xff] }
 0x16a   : > { %5370 = vmatpush3.bf16.msra.mxu1 %v5728_v30 }
 0x16e   : > { %5302 = vmatmul.mubr.bf16.gmra.mrb[12].mxu0 %v5723_v32 }
 0x16f   : > { %5334 = vmatmul.mubr.bf16.gmra.mrb[12].mxu1 %v5725_v33 }
 0x229   : > { %v7029_v34 = vpop.f32.mrb[0].mxu0 }
 0x22a   : > { %9147 = vst [vmem:[#allocation34_spill] sm:$0xff] %v7029_v34  ;;  %v7031_v35 = vpop.f32.mrb[0].mxu1  ;;  %978 = vmax.xlane.f32.xlu1 %v7029_v34  ;;  %v7034_v36 = vpop.f32.mrb[1].mxu0  ;;  %v7397_v34 = vld [vmem:[#allocation2 + $0xe8] sm:$0xff] }
 0x22b   : > { %9148 = vst [vmem:[#allocation35_spill] sm:$0xff] %v7031_v35  ;;  %9149 = vst [vmem:[#allocation36_spill] sm:$0xff] %v7034_v36  ;;  %1010 = vmax.xlane.f32.xlu0 %v7031_v35  ;;  %v7037_v37 = vpop.f32.mrb[1].mxu1  ;;  %v7039_v38 = vpop.f32.mrb[2].mxu0 }
 0x22c   : > { %9150 = vst [vmem:[#allocation37_spill] sm:$0xff] %v7037_v37  ;;  %9151 = vst [vmem:[#allocation38_spill] sm:$0xff] %v7039_v38  ;;  %v7041_v39 = vpop.f32.mrb[2].mxu1  ;;  %v7043_v40 = vpop.f32.mrb[3].mxu0 }
 0x22d   : > { %9152 = vst [vmem:[#allocation39_spill] sm:$0xff] %v7041_v39  ;;  %9153 = vst [vmem:[#allocation40_spill] sm:$0xff] %v7043_v40  ;;  %v7045_v41 = vpop.f32.mrb[3].mxu1 }
 0x22e   : > { %9154 = vst [vmem:[#allocation41_spill] sm:$0xff] %v7045_v41  ;;  %980 = vmax.xlane.f32.xlu1 %v7039_v38  ;;  %v7401_v38 = vld [vmem:[#allocation2 + $0xe0] sm:$0xff] }
 0x22f   : > { %974 = vmax.xlane.f32.xlu0 %v7034_v36  ;;  %v7381_v36 = vld [vmem:[#allocation2 + $0x60] sm:$0xff] }
 0x230   : > { %9182 = vst [vmem:[#allocation69_spill] sm:$0xff] %v7381_v36 }
 0x231   : > { %v7049_v42 = vpop.f32.mrb[4].mxu0 }
 0x232   : > { %9155 = vst [vmem:[#allocation42_spill] sm:$0xff] %v7049_v42  ;;  %1012 = vmax.xlane.f32.xlu1 %v7041_v39  ;;  %v7052_v43 = vpop.f32.mrb[5].mxu0  ;;  %v7054_v44 = vpop.f32.mrb[4].mxu1  ;;  %v7375_v39 = vld [vmem:[#allocation2 + $0x68] sm:$0xff] }
 0x233   : > { %9156 = vst [vmem:[#allocation43_spill] sm:$0xff] %v7052_v43  ;;  %9157 = vst [vmem:[#allocation44_spill] sm:$0xff] %v7054_v44  ;;  %1006 = vmax.xlane.f32.xlu0 %v7037_v37  ;;  %v7057_v45 = vpop.f32.mrb[6].mxu0  ;;  %v7059_v46 = vpop.f32.mrb[5].mxu1 }
 0x234   : > { %9158 = vst [vmem:[#allocation45_spill] sm:$0xff] %v7057_v45  ;;  %9159 = vst [vmem:[#allocation46_spill] sm:$0xff] %v7059_v46  ;;  %v7061_v47 = vpop.f32.mrb[6].mxu1  ;;  %v7063_v48 = vpop.f32.mrb[7].mxu0 }
 0x235   : > { %9160 = vst [vmem:[#allocation47_spill] sm:$0xff] %v7061_v47  ;;  %9161 = vst [vmem:[#allocation48_spill] sm:$0xff] %v7063_v48  ;;  %v7065_v49 = vpop.f32.mrb[7].mxu1 }
 0x236   : > { %9162 = vst [vmem:[#allocation49_spill] sm:$0xff] %v7065_v49  ;;  %1008 = vmax.xlane.f32.xlu1 %v7045_v41 }
 0x237   : > { %976 = vmax.xlane.f32.xlu0 %v7043_v40 }
 0x239   : > { %v7069_v50 = vpop.f32.mrb[8].mxu0 }
 0x23a   : > { %9163 = vst [vmem:[#allocation50_spill] sm:$0xff] %v7069_v50  ;;  %988 = vmax.xlane.f32.xlu1 %v7057_v45  ;;  %v7072_v51 = vpop.f32.mrb[9].mxu0  ;;  %v7074_v52 = vpop.f32.mrb[8].mxu1 }
 0x23b   : > { %9164 = vst [vmem:[#allocation51_spill] sm:$0xff] %v7072_v51  ;;  %9165 = vst [vmem:[#allocation52_spill] sm:$0xff] %v7074_v52  ;;  %986 = vmax.xlane.f32.xlu0 %v7049_v42  ;;  %v7077_v54 = vpop.f32.mrb[10].mxu0  ;;  %v7079_v55 = vpop.f32.mrb[9].mxu1  ;;  %v7357_v42 = vld [vmem:[#allocation2 + $0xf8] sm:$0xff] }
 0x23c   : > { %9166 = vst [vmem:[#allocation53_spill] sm:$0xff] %v7077_v54  ;;  %9167 = vst [vmem:[#allocation54_spill] sm:$0xff] %v7079_v55  ;;  %v7081_v56 = vpop.f32.mrb[10].mxu1  ;;  %v7083_v57 = vpop.f32.mrb[11].mxu0 }
 0x23d   : > { %9168 = vst [vmem:[#allocation55_spill] sm:$0xff] %v7081_v56  ;;  %9169 = vst [vmem:[#allocation56_spill] sm:$0xff] %v7083_v57  ;;  %v7085_v58 = vpop.f32.mrb[11].mxu1 }
 0x23e   : > { %9170 = vst [vmem:[#allocation57_spill] sm:$0xff] %v7085_v58  ;;  %1020 = vmax.xlane.f32.xlu1 %v7061_v47  ;;  %v7339_v47 = vld [vmem:[#allocation2 + $0x78] sm:$0xff]  ;;  %9180 = vst [vmem:[#allocation67_spill] sm:$0xff] %v7357_v42 }
 0x23f   : > { %1018 = vmax.xlane.f32.xlu0 %v7054_v44  ;;  %v7361_v44 = vld [vmem:[#allocation2 + $0xf0] sm:$0xff] }
 0x240   : > { %9181 = vst [vmem:[#allocation68_spill] sm:$0xff] %v7361_v44 }
 0x241   : > { %v7089_v59 = vpop.f32.mrb[12].mxu0 }
 0x242   : > { %9171 = vst [vmem:[#allocation58_spill] sm:$0xff] %v7089_v59  ;;  %984 = vmax.xlane.f32.xlu1 %v7063_v48  ;;  %v7092_v60 = vpop.f32.mrb[13].mxu0  ;;  %v7094_v61 = vpop.f32.mrb[12].mxu1 }
 0x243   : > { %9172 = vst [vmem:[#allocation59_spill] sm:$0xff] %v7092_v60  ;;  %9173 = vst [vmem:[#allocation60_spill] sm:$0xff] %v7094_v61  ;;  %982 = vmax.xlane.f32.xlu0 %v7052_v43  ;;  %v7097_v62 = vpop.f32.mrb[14].mxu0  ;;  %v7099_v63 = vpop.f32.mrb[13].mxu1  ;;  %v7343_v43 = vld [vmem:[#allocation2 + $0x70] sm:$0xff] }
 0x244   : > { %9174 = vst [vmem:[#allocation61_spill] sm:$0xff] %v7097_v62  ;;  %9175 = vst [vmem:[#allocation62_spill] sm:$0xff] %v7099_v63  ;;  %v7101_v0 = vpop.f32.mrb[14].mxu1  ;;  %v7103_v1 = vpop.f32.mrb[15].mxu0 }
 0x245   : > { %9176 = vst [vmem:[#allocation63_spill] sm:$0xff] %v7101_v0  ;;  %9177 = vst [vmem:[#allocation64_spill] sm:$0xff] %v7103_v1  ;;  %v7105_v2 = vpop.f32.mrb[15].mxu1 }
 0x246   : > { %9178 = vst [vmem:[#allocation65_spill] sm:$0xff] %v7105_v2  ;;  %1016 = vmax.xlane.f32.xlu1 %v7065_v49  ;;  %v7306_v49 = vld [vmem:[#allocation2 + $0x40] sm:$0xff]  ;;  %9179 = vst [vmem:[#allocation66_spill] sm:$0xff] %v7343_v43 }
 0x247   : > { %1014 = vmax.xlane.f32.xlu0 %v7059_v46  ;;  %v7321_v46 = vld [vmem:[#allocation2 + $0xc8] sm:$0xff] }
 0x24a   : > { %996 = vmax.xlane.f32.xlu1 %v7077_v54  ;;  %v5741_v54 = vld [vmem:[%s6847_s23 + $0x78] sm:$0xff]  }
 0x24b   : > { %994 = vmax.xlane.f32.xlu0 %v7069_v50  ;;  %v5740_v50 = vld [vmem:[%s6847_s23 + $0x70] sm:$0xff]  }
 0x24e   : > { %1028 = vmax.xlane.f32.xlu1 %v7081_v56 }
 0x24f   : > { %1026 = vmax.xlane.f32.xlu0 %v7074_v52 }
 0x252   : > { %992 = vmax.xlane.f32.xlu1 %v7083_v57  ;;  %v5739_v57 = vld [vmem:[%s6847_s23 + $0x38] sm:$0xff]  }
 0x253   : > { %990 = vmax.xlane.f32.xlu0 %v7072_v51 }
 0x256   : > { %1024 = vmax.xlane.f32.xlu1 %v7085_v58 }
 0x257   : > { %1022 = vmax.xlane.f32.xlu0 %v7079_v55  ;;  %v5737_v55 = vld [vmem:[%s6847_s23 + $0x30] sm:$0xff]  }
 0x25a   : > { %1004 = vmax.xlane.f32.xlu1 %v7097_v62  ;;  %v5738_v62 = vld [vmem:[%s6847_s23 + $0x68] sm:$0xff]  }
 0x25b   : > { %1002 = vmax.xlane.f32.xlu0 %v7089_v59 }
 0x25e   : > { %1036 = vmax.xlane.f32.xlu1 %v7101_v0  ;;  %v5735_v0 = vld [vmem:[%s6847_s23 + $0x28] sm:$0xff]  }
 0x25f   : > { %1034 = vmax.xlane.f32.xlu0 %v7094_v61 }
 0x262   : > { %1000 = vmax.xlane.f32.xlu1 %v7103_v1  ;;  %v7264_v1 = vld [vmem:[#allocation2 + $0x58] sm:$0xff] }
 0x263   : > { %998 = vmax.xlane.f32.xlu0 %v7092_v60 }
 0x266   : > { %1032 = vmax.xlane.f32.xlu1 %v7105_v2 }
 0x267   : > { %1030 = vmax.xlane.f32.xlu0 %v7099_v63 }
 0x2b7   : > { %v979_v5 = vpop.xlane.xlu1 %978 }
 0x2b8   : > { %v1011_v6 = vpop.xlane.xlu0 %1010  ;;  %v7130_v7 = vmax.f32 %v7125_v3, %v979_v5  ;;  %v7196_v5 = vld [vmem:[#allocation2 + $0x30] sm:$0xff] }
 0x2b9   : > { %v7133_v8 = vmax.f32 %v7127_v4, %v1011_v6 }
 0x2ba   : > { %2243 = vst.msk [vmem:[#allocation2 + $0x10] sm:$0xff] %vm1582_vm1, %v7130_v7  ;;  %1178 = vperm.xlu1 %5692, %v7130_v7  }
 0x2bb   : > { %2259 = vst.msk [vmem:[#allocation2 + $0x90] sm:$0xff] %vm1582_vm1, %v7133_v8  ;;  %1258 = vperm.xlu0 %5693, %v7133_v8   ;;  %v981_v13 = vpop.xlane.xlu1 %980 }
 0x2bc   : > { %v975_v14 = vpop.xlane.xlu0 %974  ;;  %v7150_v15 = vmax.f32 %v7135_v9, %v981_v13  ;;  %v5729_v13 = vld [vmem:[%s6847_s23 + $0x10] sm:$0xff]  }
 0x2bd   : > { %v7153_v16 = vmax.f32 %v7142_v11, %v975_v14  ;;  %v5730_v14 = vld [vmem:[%s6847_s23 + $0x48] sm:$0xff]   ;;  %5341 = vmatprep.subr.bf16.mxu0 %v5729_v13 }
 0x2be   : > { %2244 = vst.msk [vmem:[#allocation2 + $0x18] sm:$0xff] %vm1582_vm1, %v7150_v15  ;;  %5371 = vmatprep.subr.bf16.mxu1 %v5730_v14  ;;  %5342 = vmatpush3.bf16.msra.mxu0 %v5729_v13  ;;  %v5734_v13 = vld [vmem:[%s6847_s23 + $0x58] sm:$0xff]  }
 0x2bf   : > { %2241 = vst.msk [vmem:[#allocation2] sm:$0xff] %vm1582_vm1, %v7153_v16  ;;  %1168 = vperm.xlu0 %5693, %v7153_v16   ;;  %v1013_v19 = vpop.xlane.xlu1 %1012  ;;  %5372 = vmatpush3.bf16.msra.mxu1 %v5730_v14  ;;  %v7232_v14 = vld [vmem:[#allocation2 + $0x20] sm:$0xff] }
 0x2c0   : > { %v1007_v21 = vpop.xlane.xlu0 %1006  ;;  %v7166_v22 = vmax.f32 %v7155_v17, %v1013_v19 }
 0x2c1   : > { %v7169_v23 = vmax.f32 %v7159_v18, %v1007_v21 }
 0x2c2   : > { %2260 = vst.msk [vmem:[#allocation2 + $0x98] sm:$0xff] %vm1582_vm1, %v7166_v22 }
 0x2c3   : > { %2257 = vst.msk [vmem:[#allocation2 + $0x80] sm:$0xff] %vm1582_vm1, %v7169_v23  ;;  %1248 = vperm.xlu1 %5692, %v7169_v23   ;;  %v1009_v28 = vpop.xlane.xlu1 %1008 }
 0x2c4   : > { %v7187_v31 = vmax.f32 %v7171_v24, %v1009_v28  ;;  %v977_v32 = vpop.xlane.xlu0 %976  ;;  %v7209_v28 = vld [vmem:[#allocation2 + $0xb8] sm:$0xff] }
 0x2c5   : > { %v7190_v33 = vmax.f32 %v7177_v26, %v977_v32  ;;  %v5731_v32 = vld [vmem:[%s6847_s23 + $0x18] sm:$0xff]  }
 0x2c6   : > { %2258 = vst.msk [vmem:[#allocation2 + $0x88] sm:$0xff] %vm1582_vm1, %v7187_v31  ;;  %5343 = vmatprep.subr.bf16.mxu0 %v5731_v32 }
 0x2c7   : > { %2242 = vst.msk [vmem:[#allocation2 + $0x8] sm:$0xff] %vm1582_vm1, %v7190_v33  ;;  %1183 = vperm.xlu1 %5692, %v7150_v15   ;;  %v989_v6 = vpop.xlane.xlu1 %988  ;;  %5344 = vmatpush3.bf16.msra.mxu0 %v5731_v32 }
 0x2c8   : > { %v987_v19 = vpop.xlane.xlu0 %986  ;;  %v7204_v20 = vmax.f32 %v7192_v53, %v989_v6  ;;  %v5732_v6 = vld [vmem:[%s6847_s23 + $0x50] sm:$0xff]   ;;  %5345 = vmatprep.subr.bf16.mxu0 %v5733_v10 }
 0x2c9   : > { %v7207_v21 = vmax.f32 %v7196_v5, %v987_v19  ;;  %5373 = vmatprep.subr.bf16.mxu1 %v5732_v6 }
 0x2ca   : > { %2248 = vst.msk [vmem:[#allocation2 + $0x38] sm:$0xff] %vm1582_vm1, %v7204_v20  ;;  %5374 = vmatpush3.bf16.msra.mxu1 %v5732_v6  ;;  %v7247_v6 = vld [vmem:[#allocation2 + $0xa8] sm:$0xff] }
 0x2cb   : > { %2247 = vst.msk [vmem:[#allocation2 + $0x30] sm:$0xff] %vm1582_vm1, %v7207_v21  ;;  %1263 = vperm.xlu1 %5692, %v7166_v22   ;;  %v1021_v30 = vpop.xlane.xlu1 %1020  ;;  %5375 = vmatprep.subr.bf16.mxu1 %v5734_v13 }
 0x2cc   : > { %v1019_v19 = vpop.xlane.xlu0 %1018  ;;  %v7221_v12 = vmax.f32 %v7209_v28, %v1021_v30  ;;  %v7251_v30 = vld [vmem:[#allocation2 + $0xa0] sm:$0xff]  ;;  %5346 = vmatpush3.bf16.msra.mxu0 %v5733_v10  ;;  %v7268_v10 = vld [vmem:[#allocation2 + $0x50] sm:$0xff] }
 0x2cd   : > { %v7224_v27 = vmax.f32 %v7213_v29, %v1019_v19  ;;  %5347 = vmatprep.subr.bf16.mxu0 %v5735_v0 }
 0x2ce   : > { %2264 = vst.msk [vmem:[#allocation2 + $0xb8] sm:$0xff] %vm1582_vm1, %v7221_v12  ;;  %5376 = vmatpush3.bf16.msra.mxu1 %v5734_v13 }
 0x2cf   : > { %2263 = vst.msk [vmem:[#allocation2 + $0xb0] sm:$0xff] %vm1582_vm1, %v7224_v27  ;;  %1173 = vperm.xlu1 %5692, %v7190_v33   ;;  %v985_v19 = vpop.xlane.xlu1 %984 }
 0x2d0   : > { %v983_v61 = vpop.xlane.xlu0 %982  ;;  %v7242_v63 = vmax.f32 %v7226_v25, %v985_v19  ;;  %5348 = vmatpush3.bf16.msra.mxu0 %v5735_v0  ;;  %v7282_v0 = vld [vmem:[#allocation2 + $0xd8] sm:$0xff] }
 0x2d1   : > { %v7245_v32 = vmax.f32 %v7232_v14, %v983_v61  ;;  %v5736_v61 = vld [vmem:[%s6847_s23 + $0x60] sm:$0xff]   ;;  %5349 = vmatprep.subr.bf16.mxu0 %v5737_v55 }
 0x2d2   : > { %2246 = vst.msk [vmem:[#allocation2 + $0x28] sm:$0xff] %vm1582_vm1, %v7242_v63  ;;  %5377 = vmatprep.subr.bf16.mxu1 %v5736_v61 }
 0x2d3   : > { %2245 = vst.msk [vmem:[#allocation2 + $0x20] sm:$0xff] %vm1582_vm1, %v7245_v32  ;;  %1253 = vperm.xlu1 %5692, %v7187_v31   ;;  %v1017_v19 = vpop.xlane.xlu1 %1016  ;;  %5378 = vmatpush3.bf16.msra.mxu1 %v5736_v61  ;;  %v7286_v61 = vld [vmem:[#allocation2 + $0xd0] sm:$0xff] }
 0x2d4   : > { %v1015_v60 = vpop.xlane.xlu0 %1014  ;;  %v7259_v2 = vmax.f32 %v7247_v6, %v1017_v19  ;;  %5379 = vmatprep.subr.bf16.mxu1 %v5738_v62  ;;  %5350 = vmatpush3.bf16.msra.mxu0 %v5737_v55 }
 0x2d5   : > { %v7262_v59 = vmax.f32 %v7251_v30, %v1015_v60  ;;  %5351 = vmatprep.subr.bf16.mxu0 %v5739_v57 }
 0x2d6   : > { %2262 = vst.msk [vmem:[#allocation2 + $0xa8] sm:$0xff] %vm1582_vm1, %v7259_v2 }
 0x2d7   : > { %2261 = vst.msk [vmem:[#allocation2 + $0xa0] sm:$0xff] %vm1582_vm1, %v7262_v59  ;;  %1268 = vperm.xlu0 %5693, %v7262_v59   ;;  %1198 = vperm.xlu1 %5692, %v7207_v21   ;;  %v997_v60 = vpop.xlane.xlu1 %996 }
 0x2d8   : > { %v995_v13 = vpop.xlane.xlu0 %994  ;;  %v7275_v19 = vmax.f32 %v7264_v1, %v997_v60  ;;  %5380 = vmatpush3.bf16.msra.mxu1 %v5738_v62  ;;  %v7302_v60 = vld [vmem:[#allocation2 + $0x48] sm:$0xff]  ;;  %5352 = vmatpush3.bf16.msra.mxu0 %v5739_v57 }
 0x2d9   : > { %v7280_v51 = vmax.f32 %v7268_v10, %v995_v13  ;;  %5381 = vmatprep.subr.bf16.mxu1 %v5740_v50 }
 0x2da   : > { %2252 = vst.msk [vmem:[#allocation2 + $0x58] sm:$0xff] %vm1582_vm1, %v7275_v19 }
 0x2db   : > { %2251 = vst.msk [vmem:[#allocation2 + $0x50] sm:$0xff] %vm1582_vm1, %v7280_v51  ;;  %1203 = vperm.xlu0 %5693, %v7204_v20   ;;  %1278 = vperm.xlu1 %5692, %v7224_v27   ;;  %v1029_v13 = vpop.xlane.xlu1 %1028 }
 0x2dc   : > { %v1027_v58 = vpop.xlane.xlu0 %1026  ;;  %v7295_v52 = vmax.f32 %v7282_v0, %v1029_v13  ;;  %5382 = vmatpush3.bf16.msra.mxu1 %v5740_v50  ;;  %v7325_v13 = vld [vmem:[#allocation2 + $0xc0] sm:$0xff] }
 0x2dd   : > { %v7300_v56 = vmax.f32 %v7286_v61, %v1027_v58  ;;  %5383 = vmatprep.subr.bf16.mxu1 %v5741_v54 }
 0x2de   : > { %2268 = vst.msk [vmem:[#allocation2 + $0xd8] sm:$0xff] %vm1582_vm1, %v7295_v52 }
 0x2df   : > { %2267 = vst.msk [vmem:[#allocation2 + $0xd0] sm:$0xff] %vm1582_vm1, %v7300_v56  ;;  %1283 = vperm.xlu0 %5693, %v7221_v12   ;;  %1188 = vperm.xlu1 %5692, %v7245_v32   ;;  %v993_v55 = vpop.xlane.xlu1 %992 }
 0x2e0   : > { %v991_v58 = vpop.xlane.xlu0 %990  ;;  %v7315_v62 = vmax.f32 %v7302_v60, %v993_v55  ;;  %5384 = vmatpush3.bf16.msra.mxu1 %v5741_v54 }
 0x2e1   : > { %v7319_v48 = vmax.f32 %v7306_v49, %v991_v58 }
 0x2e2   : > { %2250 = vst.msk [vmem:[#allocation2 + $0x48] sm:$0xff] %vm1582_vm1, %v7315_v62 }
 0x2e3   : > { %2249 = vst.msk [vmem:[#allocation2 + $0x40] sm:$0xff] %vm1582_vm1, %v7319_v48  ;;  %1223 = vperm.xlu0 %5693, %v7275_v19   ;;  %1193 = vperm.xlu1 %5692, %v7242_v63   ;;  %v1025_v50 = vpop.xlane.xlu1 %1024 }
 0x2e4   : > { %v1023_v57 = vpop.xlane.xlu0 %1022  ;;  %v7334_v55 = vmax.f32 %v7321_v46, %v1025_v50 }
 0x2e5   : > { %v7337_v58 = vmax.f32 %v7325_v13, %v1023_v57 }
 0x2e6   : > { %2266 = vst.msk [vmem:[#allocation2 + $0xc8] sm:$0xff] %vm1582_vm1, %v7334_v55 }
 0x2e7   : > { %2265 = vst.msk [vmem:[#allocation2 + $0xc0] sm:$0xff] %vm1582_vm1, %v7337_v58  ;;  %1303 = vperm.xlu0 %5693, %v7295_v52   ;;  %1273 = vperm.xlu1 %5692, %v7259_v2   ;;  %v1005_v54 = vpop.xlane.xlu1 %1004 }
 0x2e8   : > { %v1003_v50 = vpop.xlane.xlu0 %1002  ;;  %v7352_v57 = vmax.f32 %v7339_v47, %v1005_v54 }
 0x2e9   : > { %v7355_v45 = vmax.f32 %v7343_v43, %v1003_v50  ;;  %v1071_v43 = vsub.f32 %v7177_v26, %v7190_v33  ;;  %v1077_v26 = vsub.f32 %v7192_v53, %v7204_v20 }
 0x2ea   : > { %2256 = vst.msk [vmem:[#allocation2 + $0x78] sm:$0xff] %vm1582_vm1, %v7352_v57 }
 0x2eb   : > { %2255 = vst.msk [vmem:[#allocation2 + $0x70] sm:$0xff] %vm1582_vm1, %v7355_v45  ;;  %1213 = vperm.xlu0 %5693, %v7315_v62   ;;  %1218 = vperm.xlu1 %5692, %v7280_v51   ;;  %v1037_v54 = vpop.xlane.xlu1 %1036 }
 0x2ec   : > { %v1035_v50 = vpop.xlane.xlu0 %1034  ;;  %v7370_v40 = vmax.f32 %v7357_v42, %v1037_v54 }
 0x2ed   : > { %v7373_v37 = vmax.f32 %v7361_v44, %v1035_v50  ;;  %v1070_v50 = vsub.f32 %v7142_v11, %v7153_v16 }
 0x2ee   : > { %2272 = vst.msk [vmem:[#allocation2 + $0xf8] sm:$0xff] %vm1582_vm1, %v7370_v40 }
 0x2ef   : > { %2271 = vst.msk [vmem:[#allocation2 + $0xf0] sm:$0xff] %vm1582_vm1, %v7373_v37  ;;  %1293 = vperm.xlu0 %5693, %v7334_v55   ;;  %1298 = vperm.xlu1 %5692, %v7300_v56   ;;  %v1001_v54 = vpop.xlane.xlu1 %1000  ;;  %v1102_v16 = vmul.f32 1.442695, %v1070_v50  ;;  %v1104_v50 = vmul.f32 1.442695, %v1071_v43 }
 0x2f0   : > { %v999_v41 = vpop.xlane.xlu0 %998  ;;  %v7392_v42 = vmax.f32 %v7375_v39, %v1001_v54  ;;  %v1116_v43 = vmul.f32 1.442695, %v1077_v26  ;;  %v1081_v26 = vsub.f32 %v7264_v1, %v7275_v19  ;;  %v9188_v1 = vsub.f32 %v7213_v29, %v7224_v27 }
 0x2f1   : > { %v7395_v35 = vmax.f32 %v7381_v36, %v999_v41  ;;  %v1073_v41 = vsub.f32 %v7135_v9, %v7150_v15  ;;  %5742 = vpow2.f32 %v1102_v16  ;;  %v1075_v15 = vsub.f32 %v7226_v25, %v7242_v63 }
 0x2f2   : > { %2254 = vst.msk [vmem:[#allocation2 + $0x68] sm:$0xff] %vm1582_vm1, %v7392_v42  ;;  %v1087_v16 = vsub.f32 %v7171_v24, %v7187_v31  ;;  %v1074_v63 = vsub.f32 %v7232_v14, %v7245_v32  ;;  %v9184_v31 = vsub.f32 %v7155_v17, %v7166_v22  ;;  %v1091_v32 = vsub.f32 %v7247_v6, %v7259_v2 }
 0x2f3   : > { %2253 = vst.msk [vmem:[#allocation2 + $0x60] sm:$0xff] %vm1582_vm1, %v7395_v35  ;;  %1243 = vperm.xlu0 %5693, %v7352_v57   ;;  %1208 = vperm.xlu1 %5692, %v7319_v48   ;;  %v1033_v11 = vpop.xlane.xlu1 %1032  ;;  %v1108_v9 = vmul.f32 1.442695, %v1073_v41  ;;  %v1112_v33 = vmul.f32 1.442695, %v1075_v15  ;;  %v9186_v2 = vsub.f32 %v7127_v4, %v7133_v8 }
 0x2f4   : > { %v1031_v54 = vpop.xlane.xlu0 %1030  ;;  %v7410_v44 = vmax.f32 %v7397_v34, %v1033_v11  ;;  %v9183_v11 = vsub.f32 %v7125_v3, %v7130_v7  ;;  %v1136_v53 = vmul.f32 1.442695, %v1087_v16  ;;  %v1076_v3 = vsub.f32 %v7196_v5, %v7207_v21 }
 0x2f5   : > { %v7413_v36 = vmax.f32 %v7401_v38, %v1031_v54  ;;  %5744 = vpow2.f32 %v1108_v9  ;;  %v1110_v7 = vmul.f32 1.442695, %v1074_v63  ;;  %v1140_v20 = vmul.f32 1.442695, %v9184_v31 }
 0x2f6   : > { %2270 = vst.msk [vmem:[#allocation2 + $0xe8] sm:$0xff] %vm1582_vm1, %v7410_v44  ;;  %v1106_v54 = vmul.f32 1.442695, %v9183_v11  ;;  %5746 = vpow2.f32 %v1104_v50  ;;  %v1114_v14 = vmul.f32 1.442695, %v1076_v3  ;;  %v9185_v21 = vsub.f32 %v7159_v18, %v7169_v23 }
 0x2f7   : > { %2269 = vst.msk [vmem:[#allocation2 + $0xe0] sm:$0xff] %vm1582_vm1, %v7413_v36  ;;  %1288 = vperm.xlu1 %5692, %v7337_v58   ;;  %1233 = vperm.xlu0 %5693, %v7392_v42   ;;  %5748 = vpow2.f32 %v1112_v33  ;;  %v1144_v17 = vmul.f32 1.442695, %v1091_v32  ;;  %v1138_v6 = vmul.f32 1.442695, %v9186_v2  ;;  %v1090_v18 = vsub.f32 %v7251_v30, %v7262_v59 }
 0x2f8   : > { %5750 = vpow2.f32 %v1106_v54  ;;  %v1134_v9 = vmul.f32 1.442695, %v9185_v21  ;;  %v9187_v23 = vsub.f32 %v7209_v28, %v7221_v12  ;;  %v1124_v59 = vmul.f32 1.442695, %v1081_v26 }
 0x2f9   : > { %5752 = vpow2.f32 %v1116_v43  ;;  %v1142_v8 = vmul.f32 1.442695, %v1090_v18  ;;  %v1097_v12 = vsub.f32 %v7282_v0, %v7295_v52  ;;  %v1146_v19 = vmul.f32 1.442695, %v9188_v1 }
 0x2fa   : > { %5754 = vpow2.f32 %v1136_v53  ;;  %v1148_v50 = vmul.f32 1.442695, %v9187_v23  ;;  %v1079_v54 = vsub.f32 %v7302_v60, %v7315_v62  ;;  %v9189_v0 = vsub.f32 %v7268_v10, %v7280_v51 }
 0x2fb   : > { %1238 = vperm.xlu1 %5692, %v7355_v45   ;;  %1313 = vperm.xlu0 %5693, %v7410_v44   ;;  %v7438_v25 = vpop.eup %5742  ;;  %5756 = vpow2.f32 %v1110_v7  ;;  %v1156_v11 = vmul.f32 1.442695, %v1097_v12  ;;  %v1095_v43 = vsub.f32 %v7321_v46, %v7334_v55  ;;  %v9190_v62 = vsub.f32 %v7286_v61, %v7300_v56  ;;  %v9196_v12 = vld [vmem:[#allocation34_spill] sm:$0xff] }
 0x2fc   : > { %5758 = vpow2.f32 %v1140_v20  ;;  %v1122_v27 = vmul.f32 1.442695, %v9189_v0  ;;  %v1120_v29 = vmul.f32 1.442695, %v1079_v54  ;;  %v1085_v10 = vsub.f32 %v7339_v47, %v7352_v57 }
 0x2fd   : > { %5760 = vpow2.f32 %v1114_v14  ;;  %v1154_v53 = vmul.f32 1.442695, %v9190_v62  ;;  %v1152_v51 = vmul.f32 1.442695, %v1095_v43  ;;  %v9191_v55 = vsub.f32 %v7306_v49, %v7319_v48  ;;  %v9198_v43 = vld [vmem:[#allocation38_spill] sm:$0xff] }
 0x2fe   : > { %5762 = vpow2.f32 %v1134_v9  ;;  %v1132_v56 = vmul.f32 1.442695, %v1085_v10  ;;  %v1083_v61 = vsub.f32 %v7375_v39, %v7392_v42  ;;  %v9192_v57 = vsub.f32 %v7325_v13, %v7337_v58  ;;  %v9193_v42 = vld [vmem:[#allocation66_spill] sm:$0xff]  ;;  %v9195_v13 = vld [vmem:[#allocation69_spill] sm:$0xff]  ;;  %v9199_v10 = vld [vmem:[#allocation36_spill] sm:$0xff] }
 0x2ff   : > { %1228 = vperm.xlu1 %5692, %v7395_v35   ;;  %1323 = vperm.xlu0 %5693, %v7370_v40   ;;  %v7444_v24 = vpop.eup %5744  ;;  %5764 = vpow2.f32 %v1144_v17  ;;  %v1118_v7 = vmul.f32 1.442695, %v9191_v55  ;;  %v1099_v49 = vsub.f32 %v7397_v34, %v7410_v44  ;;  %v9194_v32 = vsub.f32 %v9193_v42, %v7355_v45 }
 0x300   : > { %v7453_v41 = vpop.eup %5746  ;;  %5766 = vpow2.f32 %v1138_v6  ;;  %v1150_v20 = vmul.f32 1.442695, %v9192_v57  ;;  %v1128_v48 = vmul.f32 1.442695, %v1083_v61  ;;  %v1082_v58 = vsub.f32 %v9195_v13, %v7395_v35 }
 0x301   : > { %v7455_v5 = vpop.eup %5748  ;;  %5768 = vpow2.f32 %v1148_v50  ;;  %v1130_v21 = vmul.f32 1.442695, %v9194_v32  ;;  %v1160_v9 = vmul.f32 1.442695, %v1099_v49  ;;  %v1098_v45 = vsub.f32 %v7401_v38, %v7413_v36  ;;  %v9202_v32 = vld [vmem:[#allocation40_spill] sm:$0xff] }
 0x302   : > { %v7462_v22 = vpop.eup %5750  ;;  %5770 = vpow2.f32 %v1142_v8  ;;  %v1126_v44 = vmul.f32 1.442695, %v1082_v58 }
 0x303   : > { %1308 = vperm.xlu1 %5692, %v7413_v36   ;;  %1649 = vperm.xlu0 %5693, %v7438_v25   ;;  %v7464_v15 = vpop.eup %5752  ;;  %5772 = vpow2.f32 %v1124_v59  ;;  %v1158_v35 = vmul.f32 1.442695, %v1098_v45 }
 0x304   : > { %v7478_v33 = vpop.eup %5754  ;;  %5774 = vpow2.f32 %v1146_v19 }
 0x305   : > { %v7480_v4 = vpop.eup %5756  ;;  %5776 = vpow2.f32 %v1156_v11  ;;  %v9197_v11 = vld [vmem:[#allocation35_spill] sm:$0xff] }
 0x306   : > { %v7486_v28 = vpop.eup %5758  ;;  %5778 = vpow2.f32 %v1122_v27 }
 0x307   : > { %1318 = vperm.xlu1 %5692, %v7373_v37   ;;  %1664 = vperm.xlu0 %5693, %v7444_v24   ;;  %v7488_v30 = vpop.eup %5760  ;;  %5780 = vpow2.f32 %v1120_v29 }
 0x308   : > { %v7497_v16 = vpop.eup %5762  ;;  %5782 = vpow2.f32 %v1154_v53 }
 0x309   : > { %v7499_v52 = vpop.eup %5764  ;;  %5784 = vpow2.f32 %v1152_v51 }
 0x30a   : > { %v7508_v63 = vpop.eup %5766  ;;  %5786 = vpow2.f32 %v1118_v7 }
 0x30b   : > { %1654 = vperm.xlu1 %5692, %v7453_v41   ;;  %1674 = vperm.xlu0 %5693, %v7455_v5   ;;  %v7510_v60 = vpop.eup %5768  ;;  %5788 = vpow2.f32 %v1132_v56  ;;  %v9200_v56 = vld [vmem:[#allocation39_spill] sm:$0xff] }
 0x30c   : > { %v7519_v3 = vpop.eup %5770  ;;  %5790 = vpow2.f32 %v1150_v20 }
 0x30d   : > { %v7521_v46 = vpop.eup %5772  ;;  %5792 = vpow2.f32 %v1128_v48  ;;  %v9201_v48 = vld [vmem:[#allocation37_spill] sm:$0xff] }
 0x30e   : > { %v7530_v31 = vpop.eup %5774  ;;  %5794 = vpow2.f32 %v1130_v21 }
 0x30f   : > { %1659 = vperm.xlu1 %5692, %v7462_v22   ;;  %1684 = vperm.xlu0 %5693, %v7464_v15   ;;  %v7532_v47 = vpop.eup %5776  ;;  %5796 = vpow2.f32 %v1160_v9 }
 0x310   : > { %v7541_v14 = vpop.eup %5778  ;;  %5798 = vpow2.f32 %v1126_v44  ;;  %v9203_v44 = vld [vmem:[#allocation41_spill] sm:$0xff] }
 0x311   : > { %v7543_v39 = vpop.eup %5780  ;;  %5800 = vpow2.f32 %v1158_v35 }
 0x312   : > { %v7552_v17 = vpop.eup %5782 }
 0x313   : > { %1669 = vperm.xlu1 %5692, %v7480_v4   ;;  %1734 = vperm.xlu0 %5693, %v7478_v33   ;;  %v7554_v34 = vpop.eup %5784 }
 0x314   : > { %v7560_v2 = vpop.eup %5786 }
 0x315   : > { %v7562_v6 = vpop.eup %5788 }
 0x316   : > { %v7566_v18 = vpop.eup %5790 }
 0x317   : > { %1679 = vperm.xlu1 %5692, %v7488_v30   ;;  %1744 = vperm.xlu0 %5693, %v7486_v28   ;;  %v7568_v23 = vpop.eup %5792 }
 0x318   : > { %v7572_v36 = vpop.eup %5794 }
 0x319   : > { %v7574_v38 = vpop.eup %5796 }
 0x31a   : > { %v7578_v50 = vpop.eup %5798 }
 0x31b   : > { %1729 = vperm.xlu1 %5692, %v7497_v16   ;;  %1754 = vperm.xlu0 %5693, %v7499_v52   ;;  %v7581_v59 = vpop.eup %5800 }
 0x31f   : > { %1739 = vperm.xlu1 %5692, %v7508_v63   ;;  %1764 = vperm.xlu0 %5693, %v7510_v60  }
 0x323   : > { %1749 = vperm.xlu1 %5692, %v7519_v3   ;;  %1704 = vperm.xlu0 %5693, %v7521_v46  }
 0x327   : > { %1759 = vperm.xlu1 %5692, %v7530_v31   ;;  %1784 = vperm.xlu0 %5693, %v7532_v47  }
 0x32b   : > { %1699 = vperm.xlu1 %5692, %v7541_v14   ;;  %1694 = vperm.xlu0 %5693, %v7543_v39  }
 0x32f   : > { %1779 = vperm.xlu1 %5692, %v7552_v17   ;;  %1774 = vperm.xlu0 %5693, %v7554_v34  }
 0x333   : > { %1689 = vperm.xlu1 %5692, %v7560_v2   ;;  %1724 = vperm.xlu0 %5693, %v7562_v6  }
 0x337   : > { %1769 = vperm.xlu1 %5692, %v7566_v18   ;;  %1714 = vperm.xlu0 %5693, %v7568_v23  }
 0x339   : > { %v1179_v26 = vpop.permute.xlu1 %1178 }
 0x33a   : > { %v1259_v8 = vpop.permute.xlu0 %1258  ;;  %v1328_v1 = vsub.f32 %v9196_v12, %v1179_v26 }
 0x33b   : > { %1719 = vperm.xlu1 %5692, %v7572_v36   ;;  %1794 = vperm.xlu0 %5693, %v7574_v38   ;;  %v1344_v54 = vsub.f32 %v9197_v11, %v1259_v8  ;;  %v9204_v11 = vld [vmem:[#allocation42_spill] sm:$0xff] }
 0x33c   : > { %v1362_v0 = vmul.f32 1.442695, %v1328_v1 }
 0x33d   : > { %v1394_v51 = vmul.f32 1.442695, %v1344_v54 }
 0x33e   : > { %v1169_v29 = vpop.permute.xlu0 %1168  ;;  %5802 = vpow2.f32 %v1362_v0 }
 0x33f   : > { %1709 = vperm.xlu1 %5692, %v7578_v50   ;;  %v1326_v55 = vsub.f32 %v9199_v10, %v1169_v29 }
 0x341   : > { %v1358_v20 = vmul.f32 1.442695, %v1326_v55  ;;  %v9206_v55 = vld [vmem:[#allocation44_spill] sm:$0xff] }
 0x342   : > { %v1249_v19 = vpop.permute.xlu1 %1248 }
 0x343   : > { %1789 = vperm.xlu1 %5692, %v7581_v59   ;;  %v1342_v49 = vsub.f32 %v9201_v48, %v1249_v19 }
 0x345   : > { %v1390_v58 = vmul.f32 1.442695, %v1342_v49 }
 0x346   : > { %v1184_v27 = vpop.permute.xlu1 %1183 }
 0x347   : > { %v1329_v62 = vsub.f32 %v9198_v43, %v1184_v27 }
 0x348   : > { %v5803_v35 = vpop.eup %5802 }
 0x349   : > { %v1364_v53 = vmul.f32 1.442695, %v1329_v62 }
 0x34a   : > { %v1264_v7 = vpop.permute.xlu1 %1263 }
 0x34b   : > { %5804 = vpow2.f32 %v1364_v53  ;;  %v1345_v61 = vsub.f32 %v9200_v56, %v1264_v7 }
 0x34c   : > { %5806 = vpow2.f32 %v1394_v51  ;;  %v9205_v51 = vld [vmem:[#allocation45_spill] sm:$0xff] }
 0x34d   : > { %v1396_v57 = vmul.f32 1.442695, %v1345_v61 }
 0x34e   : > { %v1174_v42 = vpop.permute.xlu1 %1173 }
 0x34f   : > { %5808 = vpow2.f32 %v1396_v57  ;;  %v1327_v21 = vsub.f32 %v9202_v32, %v1174_v42  ;;  %v9207_v32 = vld [vmem:[#allocation47_spill] sm:$0xff] }
 0x350   : > { %5810 = vpow2.f32 %v1358_v20 }
 0x351   : > { %v1360_v13 = vmul.f32 1.442695, %v1327_v21 }
 0x352   : > { %v1254_v9 = vpop.permute.xlu1 %1253 }
 0x353   : > { %5812 = vpow2.f32 %v1360_v13  ;;  %v1343_v45 = vsub.f32 %v9203_v44, %v1254_v9  ;;  %v9208_v13 = vld [vmem:[#allocation43_spill] sm:$0xff] }
 0x354   : > { %5814 = vpow2.f32 %v1390_v58 }
 0x355   : > { %v7592_v26 = vpop.eup %5804  ;;  %v1392_v8 = vmul.f32 1.442695, %v1343_v45 }
 0x356   : > { %v1269_v12 = vpop.permute.xlu0 %1268  ;;  %v1199_v1 = vpop.permute.xlu1 %1198  ;;  %v1840_v19 = vpack.c.bf16 %v7592_v26, %v5803_v35 }
 0x357   : > { %5816 = vpow2.f32 %v1392_v8  ;;  %v1332_v54 = vsub.f32 %v9204_v11, %v1199_v1  ;;  %v5807_v0 = vpop.eup %5806  ;;  %v9209_v11 = vld [vmem:[#allocation46_spill] sm:$0xff] }
 0x359   : > { %v7596_v27 = vpop.eup %5808  ;;  %v1370_v29 = vmul.f32 1.442695, %v1332_v54  ;;  %v1346_v54 = vsub.f32 %v9209_v11, %v1269_v12 }
 0x35a   : > { %v1204_v43 = vpop.permute.xlu0 %1203  ;;  %1490 = vadd.xlane.f32.xlu0 %v5803_v35  ;;  %v1279_v62 = vpop.permute.xlu1 %1278  ;;  %v1848_v53 = vpack.c.bf16 %v7596_v27, %v5807_v0 }
 0x35b   : > { %v1333_v10 = vsub.f32 %v9205_v51, %v1204_v43  ;;  %v1348_v7 = vsub.f32 %v9206_v55, %v1279_v62  ;;  %v5811_v56 = vpop.eup %5810  ;;  %5818 = vpow2.f32 %v1370_v29  ;;  %v9210_v29 = vld [vmem:[#allocation48_spill] sm:$0xff]  ;;  %v1398_v55 = vmul.f32 1.442695, %v1346_v54 }
 0x35d   : > { %v5813_v61 = vpop.eup %5812  ;;  %v1372_v57 = vmul.f32 1.442695, %v1333_v10  ;;  %v1402_v20 = vmul.f32 1.442695, %v1348_v7 }
 0x35e   : > { %v1284_v48 = vpop.permute.xlu0 %1283  ;;  %1522 = vadd.xlane.f32.xlu0 %v5807_v0  ;;  %v1189_v49 = vpop.permute.xlu1 %1188  ;;  %v1839_v42 = vpack.c.bf16 %v5813_v61, %v5811_v56 }
 0x35f   : > { %5820 = vpow2.f32 %v1372_v57  ;;  %v1349_v21 = vsub.f32 %v9207_v32, %v1284_v48  ;;  %v1330_v58 = vsub.f32 %v9208_v13, %v1189_v49  ;;  %v5815_v9 = vpop.eup %5814  ;;  %v9212_v57 = vld [vmem:[#allocation49_spill] sm:$0xff]  ;;  %v9213_v13 = vld [vmem:[#allocation55_spill] sm:$0xff] }
 0x360   : > { %5353 = vmatprep.mubr.bf16.mxu0 %v1839_v42  ;;  %5822 = vpow2.f32 %v1402_v20 }
 0x361   : > { %v5817_v44 = vpop.eup %5816  ;;  %v1404_v45 = vmul.f32 1.442695, %v1349_v21  ;;  %5354 = vmatmul.mubr.bf16.vlgmr.msra.gmra.mrb[16].mxu0 %v1840_v19  ;;  %v1366_v0 = vmul.f32 1.442695, %v1330_v58  ;;  %v9211_v19 = vld [vmem:[#allocation53_spill] sm:$0xff]  ;;  %v9214_v58 = vld [vmem:[#allocation50_spill] sm:$0xff] }
 0x362   : > { %v1224_v35 = vpop.permute.xlu0 %1223  ;;  %1518 = vadd.xlane.f32.xlu0 %v5815_v9  ;;  %v1194_v8 = vpop.permute.xlu1 %1193  ;;  %v1847_v1 = vpack.c.bf16 %v5817_v44, %v5815_v9 }
 0x363   : > { %5824 = vpow2.f32 %v1404_v45  ;;  %v1331_v43 = vsub.f32 %v9210_v29, %v1194_v8  ;;  %v1337_v7 = vsub.f32 %v9211_v19, %v1224_v35 }
 0x364   : > { %5385 = vmatprep.mubr.bf16.mxu1 %v1847_v1  ;;  %5826 = vpow2.f32 %v1366_v0  ;;  %v9215_v0 = vld [vmem:[#allocation56_spill] sm:$0xff] }
 0x365   : > { %v1368_v62 = vmul.f32 1.442695, %v1331_v43  ;;  %5386 = vmatmul.mubr.bf16.vlgmr.msra.gmra.mrb[16].mxu1 %v1848_v53  ;;  %v5819_v48 = vpop.eup %5818  ;;  %v1380_v53 = vmul.f32 1.442695, %v1337_v7  ;;  %v9216_v43 = vld [vmem:[#allocation52_spill] sm:$0xff] }
 0x366   : > { %v1304_v51 = vpop.permute.xlu0 %1303  ;;  %1488 = vadd.xlane.f32.xlu0 %v5813_v61  ;;  %v1274_v10 = vpop.permute.xlu1 %1273 }
 0x367   : > { %v1347_v20 = vsub.f32 %v9212_v57, %v1274_v10  ;;  %1486 = vadd.xlane.f32.xlu1 %v5811_v56  ;;  %5828 = vpow2.f32 %v1368_v62  ;;  %v1353_v61 = vsub.f32 %v9213_v13, %v1304_v51 }
 0x368   : > { %5830 = vpow2.f32 %v1398_v55  ;;  %v9217_v55 = vld [vmem:[#allocation57_spill] sm:$0xff] }
 0x369   : > { %v5821_v12 = vpop.eup %5820  ;;  %v1400_v49 = vmul.f32 1.442695, %v1347_v20  ;;  %v1412_v54 = vmul.f32 1.442695, %v1353_v61 }
 0x36a   : > { %v1214_v42 = vpop.permute.xlu0 %1213  ;;  %1498 = vadd.xlane.f32.xlu0 %v5819_v48  ;;  %v1219_v32 = vpop.permute.xlu1 %1218  ;;  %v1842_v21 = vpack.c.bf16 %v5821_v12, %v5819_v48  ;;  %v9218_v48 = vld [vmem:[#allocation51_spill] sm:$0xff] }
 0x36b   : > { %v1336_v9 = vsub.f32 %v9214_v58, %v1219_v32  ;;  %1492 = vadd.xlane.f32.xlu1 %v7592_v26  ;;  %v5823_v45 = vpop.eup %5822  ;;  %5832 = vpow2.f32 %v1400_v49  ;;  %v1335_v29 = vsub.f32 %v9215_v0, %v1214_v42 }
 0x36c   : > { %5834 = vpow2.f32 %v1380_v53 }
 0x36d   : > { %v5825_v35 = vpop.eup %5824  ;;  %v1378_v56 = vmul.f32 1.442695, %v1336_v9  ;;  %v1376_v20 = vmul.f32 1.442695, %v1335_v29  ;;  %v9219_v9 = vld [vmem:[#allocation61_spill] sm:$0xff] }
 0x36e   : > { %v1294_v8 = vpop.permute.xlu0 %1293  ;;  %1530 = vadd.xlane.f32.xlu0 %v5823_v45  ;;  %v1299_v1 = vpop.permute.xlu1 %1298  ;;  %v1850_v11 = vpack.c.bf16 %v5825_v35, %v5823_v45 }
 0x36f   : > { %v1352_v62 = vsub.f32 %v9216_v43, %v1299_v1  ;;  %1524 = vadd.xlane.f32.xlu1 %v7596_v27  ;;  %5836 = vpow2.f32 %v1378_v56  ;;  %v5827_v51 = vpop.eup %5826  ;;  %v1351_v19 = vsub.f32 %v9217_v55, %v1294_v8  ;;  %v9220_v56 = vld [vmem:[#allocation54_spill] sm:$0xff] }
 0x370   : > { %5838 = vpow2.f32 %v1412_v54 }
 0x371   : > { %v1410_v10 = vmul.f32 1.442695, %v1352_v62  ;;  %v5829_v26 = vpop.eup %5828  ;;  %v1408_v13 = vmul.f32 1.442695, %v1351_v19  ;;  %v9221_v62 = vld [vmem:[#allocation64_spill] sm:$0xff] }
 0x372   : > { %v1244_v7 = vpop.permute.xlu0 %1243  ;;  %1494 = vadd.xlane.f32.xlu0 %v5827_v51  ;;  %v1209_v57 = vpop.permute.xlu1 %1208  ;;  %v1841_v32 = vpack.c.bf16 %v5829_v26, %v5827_v51 }
 0x373   : > { %v1334_v49 = vsub.f32 %v9218_v48, %v1209_v57  ;;  %1520 = vadd.xlane.f32.xlu1 %v5817_v44  ;;  %5840 = vpow2.f32 %v1410_v10  ;;  %v5831_v42 = vpop.eup %5830  ;;  %v1341_v45 = vsub.f32 %v9219_v9, %v1244_v7  ;;  %v9222_v10 = vld [vmem:[#allocation58_spill] sm:$0xff] }
 0x374   : > { %5357 = vmatprep.mubr.bf16.mxu0 %v1841_v32  ;;  %5842 = vpow2.f32 %v1376_v20  ;;  %v9223_v20 = vld [vmem:[#allocation65_spill] sm:$0xff] }
 0x375   : > { %v1374_v53 = vmul.f32 1.442695, %v1334_v49  ;;  %v5833_v27 = vpop.eup %5832  ;;  %5358 = vmatmul.mubr.bf16.gmra.mrb[20].mxu0 %v1842_v21  ;;  %v1388_v21 = vmul.f32 1.442695, %v1341_v45  ;;  %v9225_v45 = vld [vmem:[#allocation63_spill] sm:$0xff] }
 0x376   : > { %v1234_v61 = vpop.permute.xlu0 %1233  ;;  %1526 = vadd.xlane.f32.xlu0 %v5831_v42  ;;  %v1289_v58 = vpop.permute.xlu1 %1288  ;;  %v1849_v1 = vpack.c.bf16 %v5833_v27, %v5831_v42  ;;  %v9224_v42 = vld [vmem:[#allocation59_spill] sm:$0xff] }
 0x377   : > { %v1350_v8 = vsub.f32 %v9220_v56, %v1289_v58  ;;  %1500 = vadd.xlane.f32.xlu1 %v5821_v12  ;;  %5844 = vpow2.f32 %v1374_v53  ;;  %v5835_v44 = vpop.eup %5834  ;;  %v1339_v51 = vsub.f32 %v9221_v62, %v1234_v61 }
 0x378   : > { %5389 = vmatprep.mubr.bf16.mxu1 %v1849_v1  ;;  %5846 = vpow2.f32 %v1408_v13  ;;  %v9226_v1 = vld [vmem:[#allocation62_spill] sm:$0xff] }
 0x379   : > { %v1406_v54 = vmul.f32 1.442695, %v1350_v8  ;;  %v5837_v0 = vpop.eup %5836  ;;  %5390 = vmatmul.mubr.bf16.gmra.mrb[20].mxu1 %v1850_v11  ;;  %v1384_v32 = vmul.f32 1.442695, %v1339_v51  ;;  %v9227_v51 = vld [vmem:[#allocation60_spill] sm:$0xff] }
 0x37a   : > { %v1314_v29 = vpop.permute.xlu0 %1313  ;;  %v1239_v43 = vpop.permute.xlu1 %1238  ;;  %1506 = vadd.xlane.f32.xlu0 %v5837_v0  ;;  %v1844_v19 = vpack.c.bf16 %v5835_v44, %v5837_v0 }
 0x37b   : > { %v1340_v55 = vsub.f32 %v9222_v10, %v1239_v43  ;;  %1532 = vadd.xlane.f32.xlu1 %v5825_v35  ;;  %5848 = vpow2.f32 %v1406_v54  ;;  %v5839_v12 = vpop.eup %5838  ;;  %v1355_v48 = vsub.f32 %v9223_v20, %v1314_v29 }
 0x37c   : > { %5850 = vpow2.f32 %v1388_v21 }
 0x37d   : > { %v1386_v7 = vmul.f32 1.442695, %v1340_v55  ;;  %v5841_v57 = vpop.eup %5840  ;;  %v1416_v9 = vmul.f32 1.442695, %v1355_v48 }
 0x37e   : > { %v1229_v49 = vpop.permute.xlu1 %1228  ;;  %v1324_v11 = vpop.permute.xlu0 %1323  ;;  %1538 = vadd.xlane.f32.xlu0 %v5841_v57  ;;  %v1852_v13 = vpack.c.bf16 %v5839_v12, %v5841_v57 }
 0x37f   : > { %v1338_v53 = vsub.f32 %v9224_v42, %v1229_v49  ;;  %1496 = vadd.xlane.f32.xlu1 %v5829_v26  ;;  %5852 = vpow2.f32 %v1386_v7  ;;  %v5843_v61 = vpop.eup %5842  ;;  %v1357_v56 = vsub.f32 %v9225_v45, %v1324_v11 }
 0x380   : > { %5854 = vpow2.f32 %v1384_v32 }
 0x381   : > { %v1382_v58 = vmul.f32 1.442695, %v1338_v53  ;;  %v5845_v35 = vpop.eup %5844  ;;  %v1420_v21 = vmul.f32 1.442695, %v1357_v56  ;;  %v9228_v56 = vld [vmem:[#allocation67_spill] sm:$0xff] }
 0x382   : > { %v1309_v8 = vpop.permute.xlu1 %1308  ;;  %1502 = vadd.xlane.f32.xlu0 %v5845_v35  ;;  %v1843_v0 = vpack.c.bf16 %v5843_v61, %v5845_v35  ;;  %v5847_v29 = vpop.eup %5846 }
 0x383   : > { %v1354_v54 = vsub.f32 %v9226_v1, %v1309_v8  ;;  %1528 = vadd.xlane.f32.xlu1 %v5833_v27  ;;  %5856 = vpow2.f32 %v1382_v58  ;;  %v9229_v8 = vsub.f32 %v9228_v56, %v7370_v40 }
 0x384   : > { %5361 = vmatprep.mubr.bf16.mxu0 %v1843_v0  ;;  %5858 = vpow2.f32 %v1416_v9 }
 0x385   : > { %v1414_v43 = vmul.f32 1.442695, %v1354_v54  ;;  %v5849_v26 = vpop.eup %5848  ;;  %5362 = vmatmul.mubr.bf16.gmra.mrb[24].mxu0 %v1844_v19  ;;  %v7624_v19 = vpop.permute.xlu0 %1649  ;;  %v1164_v1 = vmul.f32 1.442695, %v9229_v8  ;;  %v9230_v54 = vld [vmem:[#allocation68_spill] sm:$0xff] }
 0x386   : > { %v1319_v62 = vpop.permute.xlu1 %1318  ;;  %1534 = vadd.xlane.f32.xlu0 %v5849_v26  ;;  %v1851_v55 = vpack.c.bf16 %v5847_v29, %v5849_v26  ;;  %v5851_v7 = vpop.eup %5850  ;;  %v9231_v0 = vsub.f32 %v9230_v54, %v7373_v37  ;;  %v1424_v8 = vld [vmem:[#allocation3 + $0x10] sm:$0xff] }
 0x387   : > { %5860 = vpow2.f32 %v1414_v43  ;;  %v1356_v10 = vsub.f32 %v9227_v51, %v1319_v62  ;;  %1508 = vadd.xlane.f32.xlu1 %v5835_v44  ;;  %v1456_v54 = vmul.f32 %v7462_v22, %v1424_v8  ;;  %v1422_v8 = vld [vmem:[#allocation3] sm:$0xff] }
 0x388   : > { %5393 = vmatprep.mubr.bf16.mxu1 %v1851_v55  ;;  %5862 = vpow2.f32 %v1420_v21 }
 0x389   : > { %v1418_v57 = vmul.f32 1.442695, %v1356_v10  ;;  %v5853_v27 = vpop.eup %5852  ;;  %5394 = vmatmul.mubr.bf16.gmra.mrb[24].mxu1 %v1852_v13  ;;  %v7626_v13 = vpop.permute.xlu0 %1664 }
 0x38a   : > { %1514 = vadd.xlane.f32.xlu0 %v5853_v27  ;;  %v1846_v20 = vpack.c.bf16 %v5851_v7, %v5853_v27  ;;  %v5855_v48 = vpop.eup %5854 }
 0x38b   : > { %5864 = vpow2.f32 %v1418_v57  ;;  %1540 = vadd.xlane.f32.xlu1 %v5839_v12 }
 0x38c   : > { %5866 = vpow2.f32 %v1164_v1 }
 0x38d   : > { %v5857_v49 = vpop.eup %5856  ;;  %v7628_v35 = vpop.permute.xlu0 %1674 }
 0x38e   : > { %v1845_v32 = vpack.c.bf16 %v5855_v48, %v5857_v49  ;;  %v5859_v11 = vpop.eup %5858 }
 0x38f   : > { %1504 = vadd.xlane.f32.xlu1 %v5843_v61  ;;  %v7630_v61 = vpop.permute.xlu1 %1654 }
 0x390   : > { %5365 = vmatprep.mubr.bf16.mxu0 %v1845_v32 }
 0x391   : > { %v5861_v42 = vpop.eup %5860  ;;  %5366 = vmatmul.mubr.bf16.gmra.mrb[28].mxu0 %v1846_v20  ;;  %v7632_v9 = vpop.permute.xlu0 %1684 }
 0x392   : > { %v1853_v44 = vpack.c.bf16 %v5859_v11, %v5861_v42  ;;  %v5863_v53 = vpop.eup %5862 }
 0x393   : > { %1536 = vadd.xlane.f32.xlu1 %v5847_v29  ;;  %v7634_v45 = vpop.permute.xlu1 %1659  ;;  %v1162_v29 = vmul.f32 1.442695, %v9231_v0 }
 0x394   : > { %5397 = vmatprep.mubr.bf16.mxu1 %v1853_v44 }
 0x395   : > { %v5865_v58 = vpop.eup %5864  ;;  %v7642_v43 = vpop.permute.xlu0 %1734  ;;  %5868 = vpow2.f32 %v1162_v29  ;;  %v1440_v29 = vld [vmem:[#allocation3 + $0x90] sm:$0xff] }
 0x396   : > { %1546 = vadd.xlane.f32.xlu0 %v5865_v58  ;;  %v1854_v12 = vpack.c.bf16 %v5863_v53, %v5865_v58  ;;  %v7650_v51 = vpop.eup %5866 }
 0x397   : > { %1516 = vadd.xlane.f32.xlu1 %v5851_v7  ;;  %v7644_v26 = vpop.permute.xlu1 %1669 }
 0x398   : > { %5398 = vmatmul.mubr.bf16.gmra.mrb[28].mxu1 %v1854_v12 }
 0x399   : > { %v7646_v21 = vpop.permute.xlu0 %1744 }
 0x39a   : > { %1510 = vadd.xlane.f32.xlu0 %v5857_v49 }
 0x39b   : > { %1548 = vadd.xlane.f32.xlu1 %v5863_v53  ;;  %v7648_v62 = vpop.permute.xlu1 %1679 }
 0x39d   : > { %v7654_v40 = vpop.permute.xlu0 %1754 }
 0x39e   : > { %1542 = vadd.xlane.f32.xlu0 %v5861_v42 }
 0x39f   : > { %1512 = vadd.xlane.f32.xlu1 %v5855_v48  ;;  %v7652_v10 = vpop.eup %5868  ;;  %v7656_v55 = vpop.permute.xlu1 %1729 }
 0x3a1   : > { %v7660_v37 = vpop.permute.xlu0 %1764 }
 0x3a3   : > { %1544 = vadd.xlane.f32.xlu1 %v5859_v11  ;;  %v7662_v7 = vpop.permute.xlu1 %1739 }
 0x3a5   : > { %v7664_v57 = vpop.permute.xlu0 %1704 }
 0x3a6   : > { %9232 = vst [vmem:[#allocation66_spill] sm:$0xff] %v7664_v57 }
 0x3a7   : > { %v7666_v27 = vpop.permute.xlu1 %1749 }
 0x3a9   : > { %v7668_v20 = vpop.permute.xlu0 %1784 }
 0x3aa   : > { %9233 = vst [vmem:[#allocation69_spill] sm:$0xff] %v7668_v20 }
 0x3ab   : > { %v7670_v48 = vpop.permute.xlu1 %1759 }
 0x3ad   : > { %v7672_v49 = vpop.permute.xlu0 %1694 }
 0x3ae   : > { %9234 = vst [vmem:[#allocation34_spill] sm:$0xff] %v7672_v49 }
 0x3af   : > { %v7674_v32 = vpop.permute.xlu1 %1699 }
 0x3b1   : > { %v7676_v11 = vpop.permute.xlu0 %1774 }
 0x3b2   : > { %9235 = vst [vmem:[#allocation35_spill] sm:$0xff] %v7676_v11 }
 0x3b3   : > { %v7678_v42 = vpop.permute.xlu1 %1779 }
 0x3b4   : > { %1799 = vperm.xlu1 %5692, %v7652_v10   ;;  %1804 = vperm.xlu0 %5693, %v7650_v51   ;;  %9236 = vst [vmem:[#allocation38_spill] sm:$0xff] %v7678_v42 }
 0x3b5   : > { %v7680_v44 = vpop.permute.xlu0 %1724 }
 0x3b6   : > { %9237 = vst [vmem:[#allocation36_spill] sm:$0xff] %v7680_v44  ;;  %v1472_v44 = vmul.f32 %v7508_v63, %v1440_v29  ;;  %v1454_v63 = vmul.f32 %v7438_v25, %v1422_v8 }
 0x3b7   : > { %v7682_v53 = vpop.permute.xlu1 %1689 }
 0x3b9   : > { %v7684_v58 = vpop.permute.xlu0 %1714 }
 0x3ba   : > { %9238 = vst [vmem:[#allocation39_spill] sm:$0xff] %v7684_v58  ;;  %v1438_v58 = vld [vmem:[#allocation3 + $0x80] sm:$0xff] }
 0x3bb   : > { %v7686_v12 = vpop.permute.xlu1 %1769 }
 0x3bc   : > { %9239 = vst [vmem:[#allocation37_spill] sm:$0xff] %v7686_v12 }
 0x3bd   : > { %v7688_v56 = vpop.permute.xlu0 %1794 }
 0x3be   : > { %9240 = vst [vmem:[#allocation40_spill] sm:$0xff] %v7688_v56  ;;  %v1470_v56 = vmul.f32 %v7497_v16, %v1438_v58 }
 0x3bf   : > { %v7690_v1 = vpop.permute.xlu1 %1719 }
 0x3c0   : > { %9241 = vst [vmem:[#allocation41_spill] sm:$0xff] %v7690_v1  ;;  %v1423_v1 = vld [vmem:[#allocation3 + $0x8] sm:$0xff] }
 0x3c3   : > { %v7693_v20 = vpop.permute.xlu1 %1709 }
 0x3c7   : > { %v7699_v57 = vpop.permute.xlu1 %1789 }
 0x3c8   : > { %9242 = vst [vmem:[#allocation42_spill] sm:$0xff] %v7699_v57 }
 0x3e7   : > { %v1491_v0 = vpop.xlane.xlu0 %1490 }
 0x3e8   : > { %v1552_v11 = vadd.f32 %v1491_v0, %v1456_v54  ;;  %v1455_v54 = vmul.f32 %v7453_v41, %v1423_v1  ;;  %v1428_v0 = vld [vmem:[#allocation3 + $0x30] sm:$0xff]  ;;  %v1441_v1 = vld [vmem:[#allocation3 + $0x98] sm:$0xff] }
 0x3e9   : > { %v1460_v16 = vmul.f32 %v7488_v30, %v1428_v0  ;;  %v1426_v30 = vld [vmem:[#allocation3 + $0x20] sm:$0xff]  ;;  %v1439_v0 = vld [vmem:[#allocation3 + $0x88] sm:$0xff] }
 0x3ea   : > { %1585 = vst.msk [vmem:[#allocation3 + $0x10] sm:$0xff] %vm1582_vm1, %v1552_v11 }
 0x3eb   : > { %v1523_v42 = vpop.xlane.xlu0 %1522 }
 0x3ec   : > { %v1568_v49 = vadd.f32 %v1523_v42, %v1472_v44  ;;  %v1425_v44 = vld [vmem:[#allocation3 + $0x18] sm:$0xff] }
 0x3ee   : > { %1601 = vst.msk [vmem:[#allocation3 + $0x90] sm:$0xff] %vm1582_vm1, %v1568_v49 }
 0x3ef   : > { %v1519_v12 = vpop.xlane.xlu0 %1518 }
 0x3f0   : > { %v1566_v22 = vadd.f32 %v1519_v12, %v1470_v56  ;;  %v1457_v12 = vmul.f32 %v7444_v24, %v1425_v44  ;;  %v1444_v56 = vld [vmem:[#allocation3 + $0xb0] sm:$0xff]  ;;  %v1458_v24 = vmul.f32 %v7480_v4, %v1426_v30  ;;  %v1471_v44 = vmul.f32 %v7478_v33, %v1439_v0 }
 0x3f1   : > { %v1476_v25 = vmul.f32 %v7530_v31, %v1444_v56  ;;  %v1442_v31 = vld [vmem:[#allocation3 + $0xa0] sm:$0xff]  ;;  %v1448_v30 = vld [vmem:[#allocation3 + $0xd0] sm:$0xff] }
 0x3f2   : > { %1599 = vst.msk [vmem:[#allocation3 + $0x80] sm:$0xff] %vm1582_vm1, %v1566_v22 }
 0x3f3   : > { %v1489_v11 = vpop.xlane.xlu0 %1488 }
 0x3f4   : > { %v1551_v29 = vadd.f32 %v1489_v11, %v1455_v54  ;;  %v1487_v42 = vpop.xlane.xlu1 %1486  ;;  %v1473_v54 = vmul.f32 %v7486_v28, %v1441_v1  ;;  %v1474_v28 = vmul.f32 %v7519_v3, %v1442_v31  ;;  %v1445_v1 = vld [vmem:[#allocation3 + $0xb8] sm:$0xff] }
 0x3f5   : > { %v1550_v49 = vadd.f32 %v1487_v42, %v1454_v63 }
 0x3f6   : > { %1584 = vst.msk [vmem:[#allocation3 + $0x8] sm:$0xff] %vm1582_vm1, %v1551_v29 }
 0x3f7   : > { %1583 = vst.msk [vmem:[#allocation3] sm:$0xff] %vm1582_vm1, %v1550_v49  ;;  %v1499_v58 = vpop.xlane.xlu0 %1498 }
 0x3f8   : > { %v1556_v22 = vadd.f32 %v1499_v58, %v1460_v16  ;;  %v1493_v41 = vpop.xlane.xlu1 %1492  ;;  %v1429_v16 = vld [vmem:[#allocation3 + $0x38] sm:$0xff] }
 0x3f9   : > { %v1553_v57 = vadd.f32 %v1493_v41, %v1457_v12  ;;  %v1461_v56 = vmul.f32 %v7464_v15, %v1429_v16  ;;  %v1432_v41 = vld [vmem:[#allocation3 + $0x50] sm:$0xff]  ;;  %v1480_v15 = vmul.f32 %v7552_v17, %v1448_v30  ;;  %v1433_v17 = vld [vmem:[#allocation3 + $0x58] sm:$0xff]  ;;  %v1431_v30 = vld [vmem:[#allocation3 + $0x48] sm:$0xff] }
 0x3fa   : > { %1589 = vst.msk [vmem:[#allocation3 + $0x30] sm:$0xff] %vm1582_vm1, %v1556_v22  ;;  %v1464_v33 = vmul.f32 %v7541_v14, %v1432_v41  ;;  %v1443_v14 = vld [vmem:[#allocation3 + $0xa8] sm:$0xff] }
 0x3fb   : > { %1586 = vst.msk [vmem:[#allocation3 + $0x18] sm:$0xff] %vm1582_vm1, %v1553_v57  ;;  %v1531_v8 = vpop.xlane.xlu0 %1530 }
 0x3fc   : > { %v1572_v11 = vadd.f32 %v1531_v8, %v1476_v25  ;;  %v1525_v63 = vpop.xlane.xlu1 %1524  ;;  %v1477_v8 = vmul.f32 %v7510_v60, %v1445_v1  ;;  %v1436_v1 = vld [vmem:[#allocation3 + $0x70] sm:$0xff] }
 0x3fd   : > { %v1569_v29 = vadd.f32 %v1525_v63, %v1473_v54 }
 0x3fe   : > { %1605 = vst.msk [vmem:[#allocation3 + $0xb0] sm:$0xff] %vm1582_vm1, %v1572_v11  ;;  %v1427_v11 = vld [vmem:[#allocation3 + $0x28] sm:$0xff] }
 0x3ff   : > { %1602 = vst.msk [vmem:[#allocation3 + $0x98] sm:$0xff] %vm1582_vm1, %v1569_v29  ;;  %v1495_v42 = vpop.xlane.xlu0 %1494  ;;  %v1459_v29 = vmul.f32 %v7455_v5, %v1427_v11 }
 0x400   : > { %v1554_v49 = vadd.f32 %v1495_v42, %v1458_v24  ;;  %v1521_v57 = vpop.xlane.xlu1 %1520 }
 0x401   : > { %v1567_v58 = vadd.f32 %v1521_v57, %v1471_v44  ;;  %v1430_v44 = vld [vmem:[#allocation3 + $0x40] sm:$0xff]  ;;  %v1475_v57 = vmul.f32 %v7499_v52, %v1443_v14 }
 0x402   : > { %1587 = vst.msk [vmem:[#allocation3 + $0x20] sm:$0xff] %vm1582_vm1, %v1554_v49  ;;  %v1462_v49 = vmul.f32 %v7560_v2, %v1430_v44  ;;  %v1449_v2 = vld [vmem:[#allocation3 + $0xd8] sm:$0xff] }
 0x403   : > { %1600 = vst.msk [vmem:[#allocation3 + $0x88] sm:$0xff] %vm1582_vm1, %v1567_v58  ;;  %v1527_v12 = vpop.xlane.xlu0 %1526 }
 0x404   : > { %v1570_v4 = vadd.f32 %v1527_v12, %v1474_v28  ;;  %v1501_v22 = vpop.xlane.xlu1 %1500  ;;  %v1446_v28 = vld [vmem:[#allocation3 + $0xc0] sm:$0xff] }
 0x405   : > { %v1557_v25 = vadd.f32 %v1501_v22, %v1461_v56  ;;  %v1478_v56 = vmul.f32 %v7566_v18, %v1446_v28 }
 0x406   : > { %1603 = vst.msk [vmem:[#allocation3 + $0xa0] sm:$0xff] %vm1582_vm1, %v1570_v4  ;;  %v1465_v4 = vmul.f32 %v7521_v46, %v1433_v17  ;;  %v1463_v46 = vmul.f32 %v7543_v39, %v1431_v30  ;;  %v1633_v30 = vld [vmem:[#allocation4 + $0x90] sm:$0xff] }
 0x407   : > { %1590 = vst.msk [vmem:[#allocation3 + $0x38] sm:$0xff] %vm1582_vm1, %v1557_v25  ;;  %v1507_v54 = vpop.xlane.xlu0 %1506 }
 0x408   : > { %v1533_v3 = vpop.xlane.xlu1 %1532  ;;  %v1560_v63 = vadd.f32 %v1507_v54, %v1464_v33  ;;  %v1468_v33 = vmul.f32 %v7572_v36, %v1436_v1  ;;  %v1451_v1 = vld [vmem:[#allocation3 + $0xe8] sm:$0xff] }
 0x409   : > { %v1573_v0 = vadd.f32 %v1533_v3, %v1477_v8  ;;  %v1481_v8 = vmul.f32 %v7532_v47, %v1449_v2 }
 0x40a   : > { %1593 = vst.msk [vmem:[#allocation3 + $0x50] sm:$0xff] %vm1582_vm1, %v1560_v63 }
 0x40b   : > { %1606 = vst.msk [vmem:[#allocation3 + $0xb8] sm:$0xff] %vm1582_vm1, %v1573_v0  ;;  %v1539_v24 = vpop.xlane.xlu0 %1538  ;;  %v1447_v0 = vld [vmem:[#allocation3 + $0xc8] sm:$0xff] }
 0x40c   : > { %v1497_v42 = vpop.xlane.xlu1 %1496  ;;  %v1576_v31 = vadd.f32 %v1539_v24, %v1480_v15  ;;  %v1479_v36 = vmul.f32 %v7554_v34, %v1447_v0  ;;  %v1437_v24 = vld [vmem:[#allocation3 + $0x78] sm:$0xff] }
 0x40d   : > { %v1555_v60 = vadd.f32 %v1497_v42, %v1459_v29  ;;  %v1452_v29 = vld [vmem:[#allocation3 + $0xf0] sm:$0xff] }
 0x40e   : > { %1609 = vst.msk [vmem:[#allocation3 + $0xd0] sm:$0xff] %vm1582_vm1, %v1576_v31  ;;  %v1484_v44 = vmul.f32 %v7652_v10, %v1452_v29  ;;  %v1469_v31 = vmul.f32 %v7562_v6, %v1437_v24  ;;  %v1450_v10 = vld [vmem:[#allocation3 + $0xe0] sm:$0xff]  ;;  %v1825_v24 = vmul.f32 %v7662_v7, %v1633_v30 }
 0x40f   : > { %1588 = vst.msk [vmem:[#allocation3 + $0x28] sm:$0xff] %vm1582_vm1, %v1555_v60  ;;  %v1503_v16 = vpop.xlane.xlu0 %1502  ;;  %v1434_v60 = vld [vmem:[#allocation3 + $0x60] sm:$0xff]  ;;  %v1482_v6 = vmul.f32 %v7581_v59, %v1450_v10  ;;  %v1618_v59 = vld [vmem:[#allocation4 + $0x18] sm:$0xff] }
 0x410   : > { %v1529_v58 = vpop.xlane.xlu1 %1528  ;;  %v1558_v12 = vadd.f32 %v1503_v16, %v1462_v49  ;;  %v1466_v34 = vmul.f32 %v7578_v50, %v1434_v60  ;;  %v1623_v30 = vld [vmem:[#allocation4 + $0x40] sm:$0xff] }
 0x411   : > { %v1571_v5 = vadd.f32 %v1529_v58, %v1475_v57  ;;  %v1453_v57 = vld [vmem:[#allocation3 + $0xf8] sm:$0xff] }
 0x412   : > { %1591 = vst.msk [vmem:[#allocation3 + $0x40] sm:$0xff] %vm1582_vm1, %v1558_v12  ;;  %v1485_v28 = vmul.f32 %v7650_v51, %v1453_v57  ;;  %v1483_v51 = vmul.f32 %v7574_v38, %v1451_v1  ;;  %v1636_v1 = vld [vmem:[#allocation4 + $0xa8] sm:$0xff] }
 0x413   : > { %1604 = vst.msk [vmem:[#allocation3 + $0xa8] sm:$0xff] %vm1582_vm1, %v1571_v5  ;;  %v1535_v22 = vpop.xlane.xlu0 %1534  ;;  %v1435_v5 = vld [vmem:[#allocation3 + $0x68] sm:$0xff] }
 0x414   : > { %v1509_v41 = vpop.xlane.xlu1 %1508  ;;  %v1574_v25 = vadd.f32 %v1535_v22, %v1478_v56  ;;  %v1467_v22 = vmul.f32 %v7568_v23, %v1435_v5  ;;  %v1635_v5 = vld [vmem:[#allocation4 + $0xa0] sm:$0xff] }
 0x415   : > { %v1561_v52 = vadd.f32 %v1509_v41, %v1465_v4 }
 0x416   : > { %1607 = vst.msk [vmem:[#allocation3 + $0xc0] sm:$0xff] %vm1582_vm1, %v1574_v25  ;;  %v1617_v25 = vld [vmem:[#allocation4 + $0x10] sm:$0xff] }
 0x417   : > { %1594 = vst.msk [vmem:[#allocation3 + $0x58] sm:$0xff] %vm1582_vm1, %v1561_v52  ;;  %v1515_v54 = vpop.xlane.xlu0 %1514 }
 0x418   : > { %v1541_v3 = vpop.xlane.xlu1 %1540  ;;  %v1564_v18 = vadd.f32 %v1515_v54, %v1468_v33  ;;  %v1615_v33 = vld [vmem:[#allocation4] sm:$0xff]  ;;  %v1616_v54 = vld [vmem:[#allocation4 + $0x8] sm:$0xff] }
 0x419   : > { %v1577_v11 = vadd.f32 %v1541_v3, %v1481_v8  ;;  %v1809_v3 = vmul.f32 %v7634_v45, %v1617_v25  ;;  %v1807_v23 = vmul.f32 %v7624_v19, %v1615_v33  ;;  %v1808_v38 = vmul.f32 %v7630_v61, %v1616_v54 }
 0x41a   : > { %1597 = vst.msk [vmem:[#allocation3 + $0x70] sm:$0xff] %vm1582_vm1, %v1564_v18 }
 0x41b   : > { %1610 = vst.msk [vmem:[#allocation3 + $0xd8] sm:$0xff] %vm1582_vm1, %v1577_v11  ;;  %v1810_v11 = vmul.f32 %v7626_v13, %v1618_v59 }
 0x41c   : > { %v1505_v63 = vpop.xlane.xlu1 %1504 }
 0x41d   : > { %v1559_v15 = vadd.f32 %v1505_v63, %v1463_v46  ;;  %v1631_v46 = vld [vmem:[#allocation4 + $0x80] sm:$0xff] }
 0x41e   : > { %v1823_v19 = vmul.f32 %v7656_v55, %v1631_v46  ;;  %v1621_v55 = vld [vmem:[#allocation4 + $0x30] sm:$0xff] }
 0x41f   : > { %1592 = vst.msk [vmem:[#allocation3 + $0x48] sm:$0xff] %vm1582_vm1, %v1559_v15  ;;  %v1634_v15 = vld [vmem:[#allocation4 + $0x98] sm:$0xff]  ;;  %v1641_v46 = vld [vmem:[#allocation4 + $0xd0] sm:$0xff] }
 0x420   : > { %v1537_v47 = vpop.xlane.xlu1 %1536  ;;  %v1826_v13 = vmul.f32 %v7646_v21, %v1634_v15  ;;  %v1813_v21 = vmul.f32 %v7648_v62, %v1621_v55  ;;  %v1639_v15 = vld [vmem:[#allocation4 + $0xc0] sm:$0xff]  ;;  %v9248_v55 = vld [vmem:[#allocation35_spill] sm:$0xff] }
 0x421   : > { %v1575_v42 = vadd.f32 %v1537_v47, %v1479_v36  ;;  %v1632_v47 = vld [vmem:[#allocation4 + $0x88] sm:$0xff] }
 0x422   : > { %v1824_v61 = vmul.f32 %v7642_v43, %v1632_v47  ;;  %v1642_v47 = vld [vmem:[#allocation4 + $0xd8] sm:$0xff] }
 0x423   : > { %1608 = vst.msk [vmem:[#allocation3 + $0xc8] sm:$0xff] %vm1582_vm1, %v1575_v42  ;;  %v1547_v14 = vpop.xlane.xlu0 %1546 }
 0x424   : > { %v1580_v39 = vadd.f32 %v1547_v14, %v1484_v44  ;;  %v1517_v49 = vpop.xlane.xlu1 %1516 }
 0x425   : > { %v1565_v16 = vadd.f32 %v1517_v49, %v1469_v31 }
 0x426   : > { %1613 = vst.msk [vmem:[#allocation3 + $0xf0] sm:$0xff] %vm1582_vm1, %v1580_v39 }
 0x427   : > { %1598 = vst.msk [vmem:[#allocation3 + $0x78] sm:$0xff] %vm1582_vm1, %v1565_v16  ;;  %v1511_v58 = vpop.xlane.xlu0 %1510 }
 0x428   : > { %v1562_v17 = vadd.f32 %v1511_v58, %v1466_v34  ;;  %v1549_v12 = vpop.xlane.xlu1 %1548  ;;  %v1619_v34 = vld [vmem:[#allocation4 + $0x20] sm:$0xff]  ;;  %v1622_v58 = vld [vmem:[#allocation4 + $0x38] sm:$0xff] }
 0x429   : > { %v1581_v56 = vadd.f32 %v1549_v12, %v1485_v28  ;;  %v1620_v28 = vld [vmem:[#allocation4 + $0x28] sm:$0xff]  ;;  %v1811_v10 = vmul.f32 %v7644_v26, %v1619_v34  ;;  %v1814_v12 = vmul.f32 %v7632_v9, %v1622_v58  ;;  %v1827_v26 = vmul.f32 %v7666_v27, %v1635_v5  ;;  %v1625_v27 = vld [vmem:[#allocation4 + $0x50] sm:$0xff]  ;;  %v1630_v5 = vld [vmem:[#allocation4 + $0x78] sm:$0xff] }
 0x42a   : > { %1595 = vst.msk [vmem:[#allocation3 + $0x60] sm:$0xff] %vm1582_vm1, %v1562_v17  ;;  %v1637_v17 = vld [vmem:[#allocation4 + $0xb0] sm:$0xff] }
 0x42b   : > { %1614 = vst.msk [vmem:[#allocation3 + $0xf8] sm:$0xff] %vm1582_vm1, %v1581_v56  ;;  %v1543_v4 = vpop.xlane.xlu0 %1542 }
 0x42c   : > { %v1578_v50 = vadd.f32 %v1543_v4, %v1482_v6  ;;  %v1513_v41 = vpop.xlane.xlu1 %1512  ;;  %v1812_v4 = vmul.f32 %v7628_v35, %v1620_v28  ;;  %v1828_v35 = vmul.f32 %v7654_v40, %v1636_v1 }
 0x42d   : > { %v1563_v2 = vadd.f32 %v1513_v41, %v1467_v22  ;;  %v1638_v22 = vld [vmem:[#allocation4 + $0xb8] sm:$0xff] }
 0x42e   : > { %1611 = vst.msk [vmem:[#allocation3 + $0xe0] sm:$0xff] %vm1582_vm1, %v1578_v50  ;;  %v1830_v9 = vmul.f32 %v7660_v37, %v1638_v22  ;;  %v1817_v37 = vmul.f32 %v7674_v32, %v1625_v27  ;;  %v9252_v27 = vld [vmem:[#allocation42_spill] sm:$0xff] }
 0x42f   : > { %1596 = vst.msk [vmem:[#allocation3 + $0x68] sm:$0xff] %vm1582_vm1, %v1563_v2  ;;  %v1829_v2 = vmul.f32 %v7670_v48, %v1637_v17  ;;  %v1629_v17 = vld [vmem:[#allocation4 + $0x70] sm:$0xff] }
 0x430   : > { %v1545_v52 = vpop.xlane.xlu1 %1544 }
 0x431   : > { %v1579_v8 = vadd.f32 %v1545_v52, %v1483_v51 }
 0x433   : > { %1612 = vst.msk [vmem:[#allocation3 + $0xe8] sm:$0xff] %vm1582_vm1, %v1579_v8 }
 0x434   : > { %v5355_v18 = vpop.f32.mrb[16].mxu0 }
 0x435   : > { %v2179_v63 = vadd.f32 %v5355_v18, %v1809_v3  ;;  %v1969_v0 = vpop.f32.mrb[17].mxu0  ;;  %v1626_v18 = vld [vmem:[#allocation4 + $0x58] sm:$0xff] }
 0x436   : > { %v2177_v36 = vadd.f32 %v1969_v0, %v1807_v23  ;;  %v5356_v29 = vpop.f32.mrb[18].mxu0  ;;  %v9243_v0 = vld [vmem:[#allocation66_spill] sm:$0xff] }
 0x437   : > { %2211 = vst [vmem:[#allocation4 + $0x10] sm:$0xff] %v2179_v63  ;;  %v2180_v45 = vadd.f32 %v5356_v29, %v1810_v11  ;;  %v1972_v42 = vpop.f32.mrb[19].mxu0  ;;  %v1624_v11 = vld [vmem:[#allocation4 + $0x48] sm:$0xff]  ;;  %v1815_v63 = vmul.f32 %v7682_v53, %v1623_v30 }
 0x438   : > { %2209 = vst [vmem:[#allocation4] sm:$0xff] %v2177_v36  ;;  %v2178_v44 = vadd.f32 %v1972_v42, %v1808_v38  ;;  %v5387_v14 = vpop.f32.mrb[16].mxu1  ;;  %v1818_v38 = vmul.f32 %v9243_v0, %v1626_v18 }
 0x439   : > { %2212 = vst [vmem:[#allocation4 + $0x18] sm:$0xff] %v2180_v45  ;;  %v2195_v31 = vadd.f32 %v5387_v14, %v1825_v24  ;;  %v2114_v60 = vpop.f32.mrb[17].mxu1  ;;  %v9244_v24 = vld [vmem:[#allocation34_spill] sm:$0xff] }
 0x43a   : > { %2210 = vst [vmem:[#allocation4 + $0x8] sm:$0xff] %v2178_v44  ;;  %v2193_v39 = vadd.f32 %v2114_v60, %v1823_v19  ;;  %v5388_v49 = vpop.f32.mrb[18].mxu1  ;;  %v1816_v45 = vmul.f32 %v9244_v24, %v1624_v11  ;;  %v1640_v44 = vld [vmem:[#allocation4 + $0xc8] sm:$0xff]  ;;  %v9245_v14 = vld [vmem:[#allocation38_spill] sm:$0xff]  ;;  %v9246_v60 = vld [vmem:[#allocation37_spill] sm:$0xff] }
 0x43b   : > { %2227 = vst [vmem:[#allocation4 + $0x90] sm:$0xff] %v2195_v31  ;;  %v2196_v7 = vadd.f32 %v5388_v49, %v1826_v13  ;;  %v2117_v57 = vpop.f32.mrb[19].mxu1  ;;  %v1833_v13 = vmul.f32 %v9245_v14, %v1641_v46  ;;  %v9247_v49 = vld [vmem:[#allocation69_spill] sm:$0xff]  ;;  %v1832_v34 = vmul.f32 %v9248_v55, %v1640_v44 }
 0x43c   : > { %2225 = vst [vmem:[#allocation4 + $0x80] sm:$0xff] %v2193_v39  ;;  %v2194_v16 = vadd.f32 %v2117_v57, %v1824_v61  ;;  %v1831_v61 = vmul.f32 %v9246_v60, %v1639_v15 }
 0x43d   : > { %2228 = vst [vmem:[#allocation4 + $0x98] sm:$0xff] %v2196_v7  ;;  %v1834_v7 = vmul.f32 %v9247_v49, %v1642_v47 }
 0x43e   : > { %2226 = vst [vmem:[#allocation4 + $0x88] sm:$0xff] %v2194_v16 }
 0x448   : > { %v5359_v43 = vpop.f32.mrb[20].mxu0 }
 0x449   : > { %v2183_v56 = vadd.f32 %v5359_v43, %v1813_v21  ;;  %v1985_v6 = vpop.f32.mrb[21].mxu0 }
 0x44a   : > { %v2181_v50 = vadd.f32 %v1985_v6, %v1811_v10  ;;  %v5360_v41 = vpop.f32.mrb[22].mxu0  ;;  %v9249_v6 = vld [vmem:[#allocation41_spill] sm:$0xff] }
 0x44b   : > { %2215 = vst [vmem:[#allocation4 + $0x30] sm:$0xff] %v2183_v56  ;;  %v2184_v51 = vadd.f32 %v5360_v41, %v1814_v12  ;;  %v1988_v62 = vpop.f32.mrb[23].mxu0  ;;  %v1627_v12 = vld [vmem:[#allocation4 + $0x60] sm:$0xff]  ;;  %v1628_v56 = vld [vmem:[#allocation4 + $0x68] sm:$0xff]  ;;  %v9250_v41 = vld [vmem:[#allocation36_spill] sm:$0xff] }
 0x44c   : > { %2213 = vst [vmem:[#allocation4 + $0x20] sm:$0xff] %v2181_v50  ;;  %v2182_v25 = vadd.f32 %v1988_v62, %v1812_v4  ;;  %v5391_v52 = vpop.f32.mrb[20].mxu1  ;;  %v1821_v4 = vmul.f32 %v9249_v6, %v1629_v17  ;;  %v1819_v22 = vmul.f32 %v7693_v20, %v1627_v12  ;;  %v1822_v1 = vmul.f32 %v9250_v41, %v1630_v5  ;;  %v9251_v62 = vld [vmem:[#allocation39_spill] sm:$0xff] }
 0x44d   : > { %2216 = vst [vmem:[#allocation4 + $0x38] sm:$0xff] %v2184_v51  ;;  %v2199_v33 = vadd.f32 %v5391_v52, %v1829_v2  ;;  %v2130_v8 = vpop.f32.mrb[21].mxu1  ;;  %v1800_v52 = vpop.permute.xlu1 %1799  ;;  %v1644_v20 = vld [vmem:[#allocation4 + $0xe8] sm:$0xff] }
 0x44e   : > { %2214 = vst [vmem:[#allocation4 + $0x28] sm:$0xff] %v2182_v25  ;;  %v2197_v59 = vadd.f32 %v2130_v8, %v1827_v26  ;;  %v5392_v54 = vpop.f32.mrb[22].mxu1  ;;  %v1820_v26 = vmul.f32 %v9251_v62, %v1628_v56  ;;  %v1645_v25 = vld [vmem:[#allocation4 + $0xf0] sm:$0xff]  ;;  %v1643_v8 = vld [vmem:[#allocation4 + $0xe0] sm:$0xff] }
 0x44f   : > { %2231 = vst [vmem:[#allocation4 + $0xb0] sm:$0xff] %v2199_v33  ;;  %v2200_v48 = vadd.f32 %v5392_v54, %v1830_v9  ;;  %v2133_v3 = vpop.f32.mrb[23].mxu1  ;;  %v1646_v54 = vld [vmem:[#allocation4 + $0xf8] sm:$0xff]  ;;  %v1835_v30 = vmul.f32 %v9252_v27, %v1643_v8 }
 0x450   : > { %2229 = vst [vmem:[#allocation4 + $0xa0] sm:$0xff] %v2197_v59  ;;  %v2198_v23 = vadd.f32 %v2133_v3, %v1828_v35 }
 0x451   : > { %2232 = vst [vmem:[#allocation4 + $0xb8] sm:$0xff] %v2200_v48  ;;  %v1805_v48 = vpop.permute.xlu0 %1804 }
 0x452   : > { %2230 = vst [vmem:[#allocation4 + $0xa8] sm:$0xff] %v2198_v23  ;;  %v1837_v23 = vmul.f32 %v1800_v52, %v1645_v25  ;;  %v1838_v11 = vmul.f32 %v1805_v48, %v1646_v54 }
 0x458   : > { %v5363_v40 = vpop.f32.mrb[24].mxu0 }
 0x459   : > { %v2187_v36 = vadd.f32 %v5363_v40, %v1817_v37  ;;  %v2001_v29 = vpop.f32.mrb[25].mxu0 }
 0x45a   : > { %v2185_v42 = vadd.f32 %v2001_v29, %v1815_v63  ;;  %v5364_v19 = vpop.f32.mrb[26].mxu0  ;;  %v9253_v63 = vld [vmem:[#allocation40_spill] sm:$0xff] }
 0x45b   : > { %2219 = vst [vmem:[#allocation4 + $0x50] sm:$0xff] %v2187_v36  ;;  %v2188_v31 = vadd.f32 %v5364_v19, %v1818_v38  ;;  %v2004_v32 = vpop.f32.mrb[27].mxu0  ;;  %v1836_v40 = vmul.f32 %v9253_v63, %v1644_v20 }
 0x45c   : > { %2217 = vst [vmem:[#allocation4 + $0x40] sm:$0xff] %v2185_v42  ;;  %v2186_v53 = vadd.f32 %v2004_v32, %v1816_v45  ;;  %v5395_v39 = vpop.f32.mrb[24].mxu1 }
 0x45d   : > { %2220 = vst [vmem:[#allocation4 + $0x58] sm:$0xff] %v2188_v31  ;;  %v2203_v57 = vadd.f32 %v5395_v39, %v1833_v13  ;;  %v2146_v16 = vpop.f32.mrb[25].mxu1 }
 0x45e   : > { %2218 = vst [vmem:[#allocation4 + $0x48] sm:$0xff] %v2186_v53  ;;  %v2201_v58 = vadd.f32 %v2146_v16, %v1831_v61  ;;  %v5396_v28 = vpop.f32.mrb[26].mxu1 }
 0x45f   : > { %2235 = vst [vmem:[#allocation4 + $0xd0] sm:$0xff] %v2203_v57  ;;  %v2204_v21 = vadd.f32 %v5396_v28, %v1834_v7  ;;  %v2149_v10 = vpop.f32.mrb[27].mxu1 }
 0x460   : > { %2233 = vst [vmem:[#allocation4 + $0xc0] sm:$0xff] %v2201_v58  ;;  %v2202_v43 = vadd.f32 %v2149_v10, %v1832_v34 }
 0x461   : > { %2236 = vst [vmem:[#allocation4 + $0xd8] sm:$0xff] %v2204_v21 }
 0x462   : > { %2234 = vst [vmem:[#allocation4 + $0xc8] sm:$0xff] %v2202_v43 }
 0x464   : > { %v5367_v50 = vpop.f32.mrb[28].mxu0 }
 0x465   : > { %v2191_v2 = vadd.f32 %v5367_v50, %v1821_v4  ;;  %v2017_v51 = vpop.f32.mrb[29].mxu0 }
 0x466   : > { %v2189_v9 = vadd.f32 %v2017_v51, %v1819_v22  ;;  %v5368_v33 = vpop.f32.mrb[30].mxu0 }
 0x467   : > { %2223 = vst [vmem:[#allocation4 + $0x70] sm:$0xff] %v2191_v2  ;;  %v2192_v35 = vadd.f32 %v5368_v33, %v1822_v1  ;;  %v2020_v59 = vpop.f32.mrb[31].mxu0 }
 0x468   : > { %2221 = vst [vmem:[#allocation4 + $0x60] sm:$0xff] %v2189_v9  ;;  %v2190_v3 = vadd.f32 %v2020_v59, %v1820_v26 }
 0x469   : > { %2224 = vst [vmem:[#allocation4 + $0x78] sm:$0xff] %v2192_v35 }
 0x46a   : > { %2222 = vst [vmem:[#allocation4 + $0x68] sm:$0xff] %v2190_v3 }
 0x46b   : > { %v5399_v18 = vpop.f32.mrb[28].mxu1 }
 0x46c   : > { %v2207_v37 = vadd.f32 %v5399_v18, %v1837_v23  ;;  %v2162_v46 = vpop.f32.mrb[29].mxu1 }
 0x46d   : > { %v2205_v0 = vadd.f32 %v2162_v46, %v1835_v30  ;;  %v5400_v38 = vpop.f32.mrb[30].mxu1 }
 0x46e   : > { %2239 = vst [vmem:[#allocation4 + $0xf0] sm:$0xff] %v2207_v37  ;;  %v2208_v15 = vadd.f32 %v5400_v38, %v1838_v11  ;;  %v2165_v36 = vpop.f32.mrb[31].mxu1 }
 0x46f   : > { %2237 = vst [vmem:[#allocation4 + $0xe0] sm:$0xff] %v2205_v0  ;;  %v2206_v29 = vadd.f32 %v2165_v36, %v1836_v40 }
 0x470   : > { %2240 = vst [vmem:[#allocation4 + $0xf8] sm:$0xff] %v2208_v15 }
 0x471   : > { %2238 = vst [vmem:[#allocation4 + $0xe8] sm:$0xff] %v2206_v29 }
 0x472 PF: > { %p5009_p13 = scmp.ne.s32.totalorder %s6860_s22, %s6858_s26 }
 0x474   : > { %2276 = sbr.rel (%p5009_p13) target bundleno = 2431 (0x97f), region = 68 }
 0x47b   : > { %v5872_v47 = vld [vmem:[%s6840_s3] sm:$0xff]   ;;  %v5874_v45 = vld [vmem:[%s6840_s3 + $0x8] sm:$0xff]   ;;  %v5876_v19 = vld [vmem:[%s6840_s3 + $0x10] sm:$0xff]   ;;  %v2727_v50 = vlaneseq  ;;  %s9361_s4 = sld [smem:[#allocation111_spill]] }
 0x47c   : > { %v5873_v24 = vld [vmem:[%s6840_s3 + $0x40] sm:$0xff]   ;;  %5401 = vmatprep.subr.bf16.mxu0 %v5872_v47  ;;  %v5875_v42 = vld [vmem:[%s6840_s3 + $0x48] sm:$0xff]   ;;  %v5877_v44 = vld [vmem:[%s6840_s3 + $0x50] sm:$0xff]  }
 0x47d   : > { %5433 = vmatprep.subr.bf16.mxu1 %v5873_v24  ;;  %5402 = vmatpush3.bf16.xpose.msra.mxu0 %v5872_v47  ;;  %v5878_v14 = vld [vmem:[%s6840_s3 + $0x18] sm:$0xff]   ;;  %v5888_v31 = vld [vmem:[%s6832_s12] sm:$0xff]   ;;  %v5882_v53 = vld [vmem:[%s6840_s3 + $0x28] sm:$0xff]   ;;  %v7824_v41 = vshrl.u32 %v2727_v50, 7  ;;  %v7827_v2 = vand.u32 127, %v2727_v50 }
 0x47e   : > { %5434 = vmatpush3.bf16.xpose.msra.mxu1 %v5873_v24  ;;  %5403 = vmatprep.subr.bf16.mxu0 %v5874_v45  ;;  %v5879_v13 = vld [vmem:[%s6840_s3 + $0x58] sm:$0xff]   ;;  %v5889_v32 = vld [vmem:[%s6832_s12 + $0x40] sm:$0xff]   ;;  %v5883_v39 = vld [vmem:[%s6840_s3 + $0x68] sm:$0xff]  }
 0x47f   : > { %5435 = vmatprep.subr.bf16.mxu1 %v5875_v42  ;;  %5417 = vmatprep.mubr.bf16.mxu0 %v5888_v31  ;;  %v5880_v60 = vld [vmem:[%s6840_s3 + $0x20] sm:$0xff]   ;;  %v5884_v49 = vld [vmem:[%s6840_s3 + $0x30] sm:$0xff]   ;;  %v5886_v57 = vld [vmem:[%s6840_s3 + $0x38] sm:$0xff]   ;;  %v2730_v1 = vadd.s32 16, %v7824_v41  ;;  %v2731_v51 = vadd.s32 24, %v7824_v41  ;;  %vm2746_vm4 = vcmp.gt.s32.totalorder %v7827_v2, %v7824_v41  ;;  %v2729_v20 = vadd.s32 8, %v7824_v41 }
 0x480   : > { %5449 = vmatprep.mubr.bf16.mxu1 %v5889_v32  ;;  %v5881_v61 = vld [vmem:[%s6840_s3 + $0x60] sm:$0xff]   ;;  %v5885_v7 = vld [vmem:[%s6840_s3 + $0x70] sm:$0xff]   ;;  %v5887_v16 = vld [vmem:[%s6840_s3 + $0x78] sm:$0xff]   ;;  %v2735_v27 = vadd.s32 56, %v7824_v41  ;;  %v2734_v18 = vadd.s32 48, %v7824_v41  ;;  %v6423_v32 = vmov 0  }
 0x481   : > { %v5890_v55 = vld [vmem:[%s6832_s12 + $0x8] sm:$0xff]   ;;  %v5892_v58 = vld [vmem:[%s6832_s12 + $0x10] sm:$0xff]   ;;  %v5893_v21 = vld [vmem:[%s6832_s12 + $0x18] sm:$0xff]   ;;  %vm2748_vm2 = vcmp.gt.s32.totalorder %v7827_v2, %v2730_v1  ;;  %vm2749_vm3 = vcmp.gt.s32.totalorder %v7827_v2, %v2731_v51  ;;  %vm2747_vm5 = vcmp.gt.s32.totalorder %v7827_v2, %v2729_v20  ;;  %5870 = vset.pattern.permute.xlu0 %v6423_v32  ;;  %5871 = vset.pattern.permute.xlu1 %v6423_v32  ;;  %v2737_v1 = vadd.s32 72, %v7824_v41 }
 0x482   : > { %v5891_v34 = vld [vmem:[%s6832_s12 + $0x48] sm:$0xff]   ;;  %v5894_v28 = vld [vmem:[%s6832_s12 + $0x50] sm:$0xff]   ;;  %v5895_v10 = vld [vmem:[%s6832_s12 + $0x58] sm:$0xff]   ;;  %vm2753_vm6 = vcmp.gt.s32.totalorder %v7827_v2, %v2735_v27  ;;  %vm2752_vm7 = vcmp.gt.s32.totalorder %v7827_v2, %v2734_v18  ;;  %v2736_v51 = vadd.s32 64, %v7824_v41  ;;  %v2743_v20 = vadd.s32 120, %v7824_v41 }
 0x483   : > { %v5896_v17 = vld [vmem:[%s6832_s12 + $0x20] sm:$0xff]   ;;  %v5897_v12 = vld [vmem:[%s6832_s12 + $0x28] sm:$0xff]   ;;  %v5900_v56 = vld [vmem:[%s6832_s12 + $0x30] sm:$0xff]   ;;  %vm2755_vm13 = vcmp.gt.s32.totalorder %v7827_v2, %v2737_v1 }
 0x484   : > { %v5898_v43 = vld [vmem:[%s6832_s12 + $0x60] sm:$0xff]   ;;  %v5899_v5 = vld [vmem:[%s6832_s12 + $0x68] sm:$0xff]   ;;  %v5902_v6 = vld [vmem:[%s6832_s12 + $0x70] sm:$0xff]   ;;  %vm2754_vm14 = vcmp.gt.s32.totalorder %v7827_v2, %v2736_v51  ;;  %vm2761_vm1 = vcmp.gt.s32.totalorder %v7827_v2, %v2743_v20 }
 0x485   : > { %5404 = vmatpush3.bf16.xpose.msra.mxu0 %v5874_v45  ;;  %v5901_v4 = vld [vmem:[%s6832_s12 + $0x38] sm:$0xff]   ;;  %v5905_v32 = vld [vmem:[%s6847_s23 + $0x8] sm:$0xff]  }
 0x486   : > { %5436 = vmatpush3.bf16.xpose.msra.mxu1 %v5875_v42  ;;  %5405 = vmatprep.subr.bf16.mxu0 %v5876_v19  ;;  %v5903_v22 = vld [vmem:[%s6832_s12 + $0x78] sm:$0xff]   ;;  %v2733_v42 = vadd.s32 40, %v7824_v41 }
 0x487   : > { %5437 = vmatprep.subr.bf16.mxu1 %v5877_v44 }
 0x488   : > { %vm2751_vm8 = vcmp.gt.s32.totalorder %v7827_v2, %v2733_v42 }
 0x48d   : > { %5406 = vmatpush3.bf16.xpose.msra.mxu0 %v5876_v19  ;;  %v2732_v19 = vadd.s32 32, %v7824_v41 }
 0x48e   : > { %5438 = vmatpush3.bf16.xpose.msra.mxu1 %v5877_v44  ;;  %5407 = vmatprep.subr.bf16.mxu0 %v5878_v14 }
 0x48f   : > { %5439 = vmatprep.subr.bf16.mxu1 %v5879_v13  ;;  %vm2750_vm9 = vcmp.gt.s32.totalorder %v7827_v2, %v2732_v19  ;;  %v7990_v19 = vld [vmem:[#allocation2 + $0x18] sm:$0xff] }
 0x495   : > { %5408 = vmatpush3.bf16.xpose.msra.mxu0 %v5878_v14 }
 0x496   : > { %5440 = vmatpush3.bf16.xpose.msra.mxu1 %v5879_v13  ;;  %5409 = vmatprep.subr.bf16.mxu0 %v5880_v60 }
 0x497   : > { %5441 = vmatprep.subr.bf16.mxu1 %v5881_v61 }
 0x49d   : > { %5410 = vmatpush3.bf16.xpose.msra.mxu0 %v5880_v60 }
 0x49e   : > { %5442 = vmatpush3.bf16.xpose.msra.mxu1 %v5881_v61  ;;  %5411 = vmatprep.subr.bf16.mxu0 %v5882_v53 }
 0x49f   : > { %5443 = vmatprep.subr.bf16.mxu1 %v5883_v39 }
 0x4a5   : > { %5412 = vmatpush3.bf16.xpose.msra.mxu0 %v5882_v53 }
 0x4a6   : > { %5444 = vmatpush3.bf16.xpose.msra.mxu1 %v5883_v39  ;;  %5413 = vmatprep.subr.bf16.mxu0 %v5884_v49 }
 0x4a7   : > { %5445 = vmatprep.subr.bf16.mxu1 %v5885_v7 }
 0x4ad   : > { %5414 = vmatpush3.bf16.xpose.msra.mxu0 %v5884_v49 }
 0x4ae   : > { %5446 = vmatpush3.bf16.xpose.msra.mxu1 %v5885_v7  ;;  %5415 = vmatprep.subr.bf16.mxu0 %v5886_v57 }
 0x4af   : > { %5447 = vmatprep.subr.bf16.mxu1 %v5887_v16 }
 0x4b5   : > { %5416 = vmatpush3.bf16.xpose.msra.mxu0 %v5886_v57 }
 0x4b6   : > { %5448 = vmatpush3.bf16.xpose.msra.mxu1 %v5887_v16  ;;  %v2739_v16 = vadd.s32 88, %v7824_v41 }
 0x4b8   : > { %vm2757_vm10 = vcmp.gt.s32.totalorder %v7827_v2, %v2739_v16  ;;  %v8010_v16 = vld [vmem:[#allocation2 + $0x98] sm:$0xff] }
 0x4bc   : > { %5418 = vmatmul.mubr.bf16.vlgmr.msra.gmra.mrb[0].mxu0 %v5890_v55 }
 0x4bd   : > { %5450 = vmatmul.mubr.bf16.vlgmr.msra.gmra.mrb[0].mxu1 %v5891_v34  ;;  %5421 = vmatprep.mubr.bf16.mxu0 %v5892_v58  ;;  %v2741_v34 = vadd.s32 104, %v7824_v41  ;;  %v2738_v58 = vadd.s32 80, %v7824_v41 }
 0x4be   : > { %5453 = vmatprep.mubr.bf16.mxu1 %v5894_v28 }
 0x4bf   : > { %vm2759_vm11 = vcmp.gt.s32.totalorder %v7827_v2, %v2741_v34  ;;  %vm2756_vm12 = vcmp.gt.s32.totalorder %v7827_v2, %v2738_v58  ;;  %v8017_v34 = vld [vmem:[#allocation2 + $0x80] sm:$0xff] }
 0x4c4   : > { %5422 = vmatmul.mubr.bf16.gmra.mrb[4].mxu0 %v5893_v21 }
 0x4c5   : > { %5454 = vmatmul.mubr.bf16.gmra.mrb[4].mxu1 %v5895_v10  ;;  %5425 = vmatprep.mubr.bf16.mxu0 %v5896_v17 }
 0x4c6   : > { %5457 = vmatprep.mubr.bf16.mxu1 %v5898_v43 }
 0x4cc   : > { %5426 = vmatmul.mubr.bf16.gmra.mrb[8].mxu0 %v5897_v12 }
 0x4cd   : > { %5458 = vmatmul.mubr.bf16.gmra.mrb[8].mxu1 %v5899_v5  ;;  %5429 = vmatprep.mubr.bf16.mxu0 %v5900_v56 }
 0x4ce   : > { %5461 = vmatprep.mubr.bf16.mxu1 %v5902_v6 }
 0x4d4   : > { %5430 = vmatmul.mubr.bf16.gmra.mrb[12].mxu0 %v5901_v4 }
 0x4d5   : > { %5462 = vmatmul.mubr.bf16.gmra.mrb[12].mxu1 %v5903_v22 }
 0x58f   : > { %v5419_v62 = vpop.f32.mrb[0].mxu0 }
 0x590   : > { %v5451_v26 = vpop.f32.mrb[0].mxu1  ;;  %v2471_v25 = vpop.f32.mrb[1].mxu0  ;;  %v7832_v52 = vsel %vm2748_vm2, -1e+30, %v5419_v62 }
 0x591   : > { %v2664_v9 = vpop.f32.mrb[1].mxu1  ;;  %v7834_v33 = vsel %vm2748_vm2, -1e+30, %v5451_v26  ;;  %2862 = vmax.xlane.f32.xlu1 %v7832_v52  ;;  %v5420_v8 = vpop.f32.mrb[2].mxu0  ;;  %v7844_v3 = vsel %vm2746_vm4, -1e+30, %v2471_v25 }
 0x592   : > { %9254 = vst [vmem:[#allocation70_spill] sm:$0xff] %v7834_v33  ;;  %2894 = vmax.xlane.f32.xlu0 %v7834_v33  ;;  %v5452_v35 = vpop.f32.mrb[2].mxu1  ;;  %v2474_v59 = vpop.f32.mrb[3].mxu0  ;;  %v7842_v54 = vsel %vm2749_vm3, -1e+30, %v5420_v8  ;;  %v2742_v8 = vadd.s32 112, %v7824_v41 }
 0x593   : > { %v2667_v48 = vpop.f32.mrb[3].mxu1  ;;  %v7852_v30 = vsel %vm2749_vm3, -1e+30, %v5452_v35  ;;  %v7855_v46 = vsel %vm2746_vm4, -1e+30, %v2664_v9  ;;  %v2740_v35 = vadd.s32 96, %v7824_v41 }
 0x594   : > { %9255 = vst [vmem:[#allocation71_spill] sm:$0xff] %v7852_v30  ;;  %9256 = vst [vmem:[#allocation72_spill] sm:$0xff] %v7855_v46  ;;  %v7861_v36 = vsel %vm2747_vm5, -1e+30, %v2667_v48  ;;  %v7865_v29 = vsel %vm2747_vm5, -1e+30, %v2474_v59  ;;  %vm2760_vm15 = vcmp.gt.s32.totalorder %v7827_v2, %v2742_v8 }
 0x595   : > { %2864 = vmax.xlane.f32.xlu1 %v7842_v54  ;;  %9257 = vst [vmem:[#allocation73_spill] sm:$0xff] %v7861_v36  ;;  %vm2758_vm0 = vcmp.gt.s32.totalorder %v7827_v2, %v2740_v35  ;;  %vm3466_vm2 = vcmask 7168   ;;  %v5907_v8 = vld [vmem:[%s6847_s23 + $0x18] sm:$0xff]  }
 0x596   : > { %2858 = vmax.xlane.f32.xlu0 %v7844_v3 }
 0x597   : > { %v5423_v23 = vpop.f32.mrb[4].mxu0 }
 0x598   : > { %v5455_v11 = vpop.f32.mrb[4].mxu1  ;;  %v2487_v37 = vpop.f32.mrb[5].mxu0  ;;  %v7874_v24 = vsel %vm2752_vm7, -1e+30, %v5423_v23 }
 0x599   : > { %2896 = vmax.xlane.f32.xlu1 %v7852_v30  ;;  %v2680_v63 = vpop.f32.mrb[5].mxu1  ;;  %v5424_v40 = vpop.f32.mrb[6].mxu0  ;;  %v7886_v39 = vsel %vm2752_vm7, -1e+30, %v5455_v11  ;;  %v7898_v57 = vsel %vm2750_vm9, -1e+30, %v2487_v37 }
 0x59a   : > { %2890 = vmax.xlane.f32.xlu0 %v7855_v46  ;;  %v2490_v0 = vpop.f32.mrb[7].mxu0  ;;  %v5456_v38 = vpop.f32.mrb[6].mxu1  ;;  %v7870_v47 = vsel %vm2753_vm6, -1e+30, %v5424_v40  ;;  %9259 = vst [vmem:[#allocation75_spill] sm:$0xff] %v7886_v39  ;;  %v7979_v40 = vld [vmem:[#allocation2 + $0x10] sm:$0xff] }
 0x59b   : > { %v2683_v15 = vpop.f32.mrb[7].mxu1  ;;  %v7882_v60 = vsel %vm2753_vm6, -1e+30, %v5456_v38  ;;  %v7894_v7 = vsel %vm2751_vm8, -1e+30, %v2490_v0  ;;  %v7981_v0 = vld [vmem:[#allocation2 + $0x90] sm:$0xff] }
 0x59c   : > { %9258 = vst [vmem:[#allocation74_spill] sm:$0xff] %v7882_v60  ;;  %v7907_v43 = vsel %vm2751_vm8, -1e+30, %v2683_v15  ;;  %v7911_v56 = vsel %vm2750_vm9, -1e+30, %v2680_v63  ;;  %v5904_v15 = vld [vmem:[%s6847_s23] sm:$0xff]  }
 0x59d   : > { %2892 = vmax.xlane.f32.xlu1 %v7861_v36  ;;  %9260 = vst [vmem:[#allocation76_spill] sm:$0xff] %v7907_v43  ;;  %9261 = vst [vmem:[#allocation77_spill] sm:$0xff] %v7911_v56  ;;  %5465 = vmatprep.subr.bf16.mxu1 %v5904_v15  ;;  %v8217_v36 = vld [vmem:[#allocation2 + $0x78] sm:$0xff] }
 0x59e   : > { %2860 = vmax.xlane.f32.xlu0 %v7865_v29  ;;  %5466 = vmatpush3.bf16.msra.mxu1 %v5904_v15  ;;  %v8048_v15 = vld [vmem:[#allocation2 + $0x38] sm:$0xff]  ;;  %9286 = vst [vmem:[#allocation102_spill] sm:$0xff] %v8217_v36 }
 0x59f   : > { %v5427_v45 = vpop.f32.mrb[8].mxu0  ;;  %5467 = vmatprep.subr.bf16.mxu1 %v5905_v32  ;;  %9276 = vst [vmem:[#allocation92_spill] sm:$0xff] %v8048_v15  ;;  %v8260_v46 = vld [vmem:[#allocation2 + $0xf8] sm:$0xff] }
 0x5a0   : > { %v5459_v44 = vpop.f32.mrb[8].mxu1  ;;  %v2503_v14 = vpop.f32.mrb[9].mxu0  ;;  %v7924_v50 = vsel %vm2756_vm12, -1e+30, %v5427_v45  ;;  %9289 = vst [vmem:[#allocation105_spill] sm:$0xff] %v8260_v46 }
 0x5a1   : > { %2872 = vmax.xlane.f32.xlu1 %v7870_v47  ;;  %v2696_v13 = vpop.f32.mrb[9].mxu1  ;;  %v5428_v31 = vpop.f32.mrb[10].mxu0  ;;  %v7932_v26 = vsel %vm2756_vm12, -1e+30, %v5459_v44  ;;  %v7940_v9 = vsel %vm2754_vm14, -1e+30, %v2503_v14 }
 0x5a2   : > { %2870 = vmax.xlane.f32.xlu0 %v7874_v24  ;;  %v2506_v61 = vpop.f32.mrb[11].mxu0  ;;  %v5460_v53 = vpop.f32.mrb[10].mxu1  ;;  %v7922_v22 = vsel %vm2757_vm10, -1e+30, %v5428_v31  ;;  %9265 = vst [vmem:[#allocation81_spill] sm:$0xff] %v7932_v26  ;;  %v7997_v14 = vld [vmem:[#allocation2] sm:$0xff]  ;;  %5468 = vmatpush3.bf16.msra.mxu1 %v5905_v32 }
 0x5a3   : > { %v2699_v49 = vpop.f32.mrb[11].mxu1  ;;  %9263 = vst [vmem:[#allocation79_spill] sm:$0xff] %v7922_v22  ;;  %v7930_v62 = vsel %vm2757_vm10, -1e+30, %v5460_v53  ;;  %v7938_v25 = vsel %vm2755_vm13, -1e+30, %v2506_v61 }
 0x5a4   : > { %9264 = vst [vmem:[#allocation80_spill] sm:$0xff] %v7930_v62  ;;  %9266 = vst [vmem:[#allocation82_spill] sm:$0xff] %v7938_v25  ;;  %v7946_v59 = vsel %vm2755_vm13, -1e+30, %v2699_v49  ;;  %v7948_v48 = vsel %vm2754_vm14, -1e+30, %v2696_v13 }
 0x5a5   : > { %2904 = vmax.xlane.f32.xlu1 %v7882_v60  ;;  %9267 = vst [vmem:[#allocation83_spill] sm:$0xff] %v7946_v59  ;;  %9268 = vst [vmem:[#allocation84_spill] sm:$0xff] %v7948_v48  ;;  %v8181_v60 = vld [vmem:[#allocation2 + $0xc0] sm:$0xff] }
 0x5a6   : > { %2902 = vmax.xlane.f32.xlu0 %v7886_v39  ;;  %v8143_v39 = vld [vmem:[#allocation2 + $0xd0] sm:$0xff] }
 0x5a7   : > { %v5431_v55 = vpop.f32.mrb[12].mxu0 }
 0x5a8   : > { %v2519_v28 = vpop.f32.mrb[13].mxu0  ;;  %v5463_v21 = vpop.f32.mrb[12].mxu1  ;;  %v7957_v27 = vsel %vm2760_vm15, -1e+30, %v5431_v55  ;;  %v8141_v55 = vld [vmem:[#allocation2 + $0xd8] sm:$0xff] }
 0x5a9   : > { %2868 = vmax.xlane.f32.xlu1 %v7894_v7  ;;  %v2712_v10 = vpop.f32.mrb[13].mxu1  ;;  %v5432_v17 = vpop.f32.mrb[14].mxu0  ;;  %9270 = vst [vmem:[#allocation86_spill] sm:$0xff] %v7957_v27  ;;  %v7964_v18 = vsel %vm2758_vm0, -1e+30, %v2519_v28  ;;  %9281 = vst [vmem:[#allocation97_spill] sm:$0xff] %v8141_v55 }
 0x5aa   : > { %2866 = vmax.xlane.f32.xlu0 %v7898_v57  ;;  %v2522_v12 = vpop.f32.mrb[15].mxu0  ;;  %v5464_v5 = vpop.f32.mrb[14].mxu1  ;;  %v7955_v23 = vsel %vm2758_vm0, -1e+30, %v2712_v10  ;;  %v7962_v41 = vsel %vm2761_vm1, -1e+30, %v5432_v17 }
 0x5ab   : > { %v2715_v6 = vpop.f32.mrb[15].mxu1  ;;  %9269 = vst [vmem:[#allocation85_spill] sm:$0xff] %v7955_v23  ;;  %9271 = vst [vmem:[#allocation87_spill] sm:$0xff] %v7962_v41  ;;  %v7970_v11 = vsel %vm2759_vm11, -1e+30, %v2522_v12 }
 0x5ac   : > { %v7918_v4 = vsel %vm2759_vm11, -1e+30, %v2715_v6  ;;  %9272 = vst [vmem:[#allocation88_spill] sm:$0xff] %v7964_v18  ;;  %9273 = vst [vmem:[#allocation89_spill] sm:$0xff] %v7970_v11  ;;  %v7973_v37 = vsel %vm2760_vm15, -1e+30, %v5463_v21 }
 0x5ad   : > { %9262 = vst [vmem:[#allocation78_spill] sm:$0xff] %v7918_v4  ;;  %2900 = vmax.xlane.f32.xlu1 %v7907_v43  ;;  %9274 = vst [vmem:[#allocation90_spill] sm:$0xff] %v7973_v37  ;;  %v7976_v63 = vsel %vm2761_vm1, -1e+30, %v5464_v5  ;;  %v5906_v21 = vld [vmem:[%s6847_s23 + $0x10] sm:$0xff]   ;;  %v8031_v5 = vld [vmem:[#allocation2 + $0x88] sm:$0xff] }
 0x5ae   : > { %2898 = vmax.xlane.f32.xlu0 %v7911_v56  ;;  %9275 = vst [vmem:[#allocation91_spill] sm:$0xff] %v7976_v63  ;;  %5469 = vmatprep.subr.bf16.mxu1 %v5906_v21  ;;  %v8035_v6 = vld [vmem:[#allocation2 + $0x8] sm:$0xff] }
 0x5af   : > { %5470 = vmatpush3.bf16.msra.mxu1 %v5906_v21 }
 0x5b0   : > { %5471 = vmatprep.subr.bf16.mxu1 %v5907_v8 }
 0x5b1   : > { %2880 = vmax.xlane.f32.xlu1 %v7922_v22 }
 0x5b2   : > { %2878 = vmax.xlane.f32.xlu0 %v7924_v50 }
 0x5b3   : > { %5472 = vmatpush3.bf16.msra.mxu1 %v5907_v8  ;;  %v8068_v8 = vld [vmem:[#allocation2 + $0xb0] sm:$0xff] }
 0x5b5   : > { %2912 = vmax.xlane.f32.xlu1 %v7930_v62 }
 0x5b6   : > { %2910 = vmax.xlane.f32.xlu0 %v7932_v26  ;;  %v8122_v26 = vld [vmem:[#allocation2 + $0x58] sm:$0xff] }
 0x5b7   : > { %9280 = vst [vmem:[#allocation96_spill] sm:$0xff] %v8122_v26 }
 0x5b9   : > { %2876 = vmax.xlane.f32.xlu1 %v7938_v25  ;;  %v8235_v25 = vld [vmem:[#allocation2 + $0x68] sm:$0xff] }
 0x5ba   : > { %2874 = vmax.xlane.f32.xlu0 %v7940_v9 }
 0x5bd   : > { %2908 = vmax.xlane.f32.xlu1 %v7946_v59 }
 0x5be   : > { %2906 = vmax.xlane.f32.xlu0 %v7948_v48 }
 0x5c1   : > { %2914 = vmax.xlane.f32.xlu1 %v7955_v23  ;;  %v8102_v23 = vld [vmem:[#allocation2 + $0xa8] sm:$0xff] }
 0x5c2   : > { %2886 = vmax.xlane.f32.xlu0 %v7957_v27 }
 0x5c5   : > { %2888 = vmax.xlane.f32.xlu1 %v7962_v41  ;;  %v8179_v41 = vld [vmem:[#allocation2 + $0xc8] sm:$0xff] }
 0x5c6   : > { %2882 = vmax.xlane.f32.xlu0 %v7964_v18  ;;  %9283 = vst [vmem:[#allocation99_spill] sm:$0xff] %v8179_v41 }
 0x5c9   : > { %2884 = vmax.xlane.f32.xlu1 %v7970_v11 }
 0x5cd   : > { %2918 = vmax.xlane.f32.xlu1 %v7973_v37  ;;  %v8104_v37 = vld [vmem:[#allocation2 + $0xa0] sm:$0xff] }
 0x5d1   : > { %2920 = vmax.xlane.f32.xlu1 %v7976_v63 }
 0x61e   : > { %v2863_v38 = vpop.xlane.xlu1 %2862 }
 0x61f   : > { %v2895_v2 = vpop.xlane.xlu0 %2894  ;;  %v7985_v45 = vmax.f32 %v7979_v40, %v2863_v38 }
 0x620   : > { %v7988_v42 = vmax.f32 %v7981_v0, %v2895_v2  ;;  %v8052_v2 = vld [vmem:[#allocation2 + $0x30] sm:$0xff] }
 0x621   : > { %4127 = vst.msk [vmem:[#allocation2 + $0x10] sm:$0xff] %vm3466_vm2, %v7985_v45  ;;  %3062 = vperm.xlu1 %5871, %v7985_v45  }
 0x622   : > { %4143 = vst.msk [vmem:[#allocation2 + $0x90] sm:$0xff] %vm3466_vm2, %v7988_v42  ;;  %v2865_v31 = vpop.xlane.xlu1 %2864 }
 0x623   : > { %v2859_v61 = vpop.xlane.xlu0 %2858  ;;  %v8005_v53 = vmax.f32 %v7990_v19, %v2865_v31  ;;  %v5910_v31 = vld [vmem:[%s6847_s23 + $0x30] sm:$0xff]  }
 0x624   : > { %v8008_v49 = vmax.f32 %v7997_v14, %v2859_v61  ;;  %v5908_v61 = vld [vmem:[%s6847_s23 + $0x20] sm:$0xff]  }
 0x625   : > { %4128 = vst.msk [vmem:[#allocation2 + $0x18] sm:$0xff] %vm3466_vm2, %v8005_v53  ;;  %3067 = vperm.xlu1 %5871, %v8005_v53   ;;  %5473 = vmatprep.subr.bf16.mxu1 %v5908_v61 }
 0x626   : > { %4125 = vst.msk [vmem:[#allocation2] sm:$0xff] %vm3466_vm2, %v8008_v49  ;;  %3052 = vperm.xlu0 %5870, %v8008_v49   ;;  %v2897_v28 = vpop.xlane.xlu1 %2896  ;;  %5474 = vmatpush3.bf16.msra.mxu1 %v5908_v61  ;;  %v8088_v61 = vld [vmem:[#allocation2 + $0x20] sm:$0xff] }
 0x627   : > { %v2891_v10 = vpop.xlane.xlu0 %2890  ;;  %v8026_v17 = vmax.f32 %v8010_v16, %v2897_v28 }
 0x628   : > { %v8029_v12 = vmax.f32 %v8017_v34, %v2891_v10 }
 0x629   : > { %4144 = vst.msk [vmem:[#allocation2 + $0x98] sm:$0xff] %vm3466_vm2, %v8026_v17 }
 0x62a   : > { %4141 = vst.msk [vmem:[#allocation2 + $0x80] sm:$0xff] %vm3466_vm2, %v8029_v12  ;;  %v2893_v51 = vpop.xlane.xlu1 %2892 }
 0x62b   : > { %v8043_v35 = vmax.f32 %v8031_v5, %v2893_v51  ;;  %v2861_v20 = vpop.xlane.xlu0 %2860  ;;  %v8066_v51 = vld [vmem:[#allocation2 + $0xb8] sm:$0xff] }
 0x62c   : > { %v8046_v38 = vmax.f32 %v8035_v6, %v2861_v20  ;;  %9278 = vst [vmem:[#allocation94_spill] sm:$0xff] %v8066_v51  ;;  %v8086_v20 = vld [vmem:[#allocation2 + $0x28] sm:$0xff] }
 0x62d   : > { %4142 = vst.msk [vmem:[#allocation2 + $0x88] sm:$0xff] %vm3466_vm2, %v8043_v35  ;;  %9279 = vst [vmem:[#allocation95_spill] sm:$0xff] %v8086_v20 }
 0x62e   : > { %4126 = vst.msk [vmem:[#allocation2 + $0x8] sm:$0xff] %vm3466_vm2, %v8046_v38  ;;  %3057 = vperm.xlu1 %5871, %v8046_v38   ;;  %v2873_v32 = vpop.xlane.xlu1 %2872 }
 0x62f   : > { %v2871_v28 = vpop.xlane.xlu0 %2870  ;;  %v8061_v21 = vmax.f32 %v8048_v15, %v2873_v32 }
 0x630   : > { %v8064_v10 = vmax.f32 %v8052_v2, %v2871_v28  ;;  %v5909_v28 = vld [vmem:[%s6847_s23 + $0x28] sm:$0xff]  }
 0x631   : > { %9277 = vst [vmem:[#allocation93_spill] sm:$0xff] %v8061_v21  ;;  %4132 = vst.msk [vmem:[#allocation2 + $0x38] sm:$0xff] %vm3466_vm2, %v8061_v21  ;;  %5475 = vmatprep.subr.bf16.mxu1 %v5909_v28 }
 0x632   : > { %4131 = vst.msk [vmem:[#allocation2 + $0x30] sm:$0xff] %vm3466_vm2, %v8064_v10  ;;  %v2905_v32 = vpop.xlane.xlu1 %2904  ;;  %5476 = vmatpush3.bf16.msra.mxu1 %v5909_v28 }
 0x633   : > { %v2903_v1 = vpop.xlane.xlu0 %2902  ;;  %v8081_v44 = vmax.f32 %v8066_v51, %v2905_v32  ;;  %5477 = vmatprep.subr.bf16.mxu1 %v5910_v31 }
 0x634   : > { %v8084_v13 = vmax.f32 %v8068_v8, %v2903_v1 }
 0x635   : > { %4148 = vst.msk [vmem:[#allocation2 + $0xb8] sm:$0xff] %vm3466_vm2, %v8081_v44 }
 0x636   : > { %4147 = vst.msk [vmem:[#allocation2 + $0xb0] sm:$0xff] %vm3466_vm2, %v8084_v13  ;;  %v2869_v32 = vpop.xlane.xlu1 %2868  ;;  %5478 = vmatpush3.bf16.msra.mxu1 %v5910_v31  ;;  %v8124_v31 = vld [vmem:[#allocation2 + $0x50] sm:$0xff] }
 0x637   : > { %v2867_v1 = vpop.xlane.xlu0 %2866  ;;  %v8097_v58 = vmax.f32 %v8086_v20, %v2869_v32 }
 0x638   : > { %v8100_v63 = vmax.f32 %v8088_v61, %v2867_v1  ;;  %v5911_v1 = vld [vmem:[%s6847_s23 + $0x38] sm:$0xff]  }
 0x639   : > { %4130 = vst.msk [vmem:[#allocation2 + $0x28] sm:$0xff] %vm3466_vm2, %v8097_v58  ;;  %5479 = vmatprep.subr.bf16.mxu1 %v5911_v1 }
 0x63a   : > { %4129 = vst.msk [vmem:[#allocation2 + $0x20] sm:$0xff] %vm3466_vm2, %v8100_v63  ;;  %3072 = vperm.xlu1 %5871, %v8100_v63   ;;  %v2901_v32 = vpop.xlane.xlu1 %2900  ;;  %5480 = vmatpush3.bf16.msra.mxu1 %v5911_v1  ;;  %v8160_v1 = vld [vmem:[#allocation2 + $0x48] sm:$0xff] }
 0x63b   : > { %v2899_v62 = vpop.xlane.xlu0 %2898  ;;  %v8117_v59 = vmax.f32 %v8102_v23, %v2901_v32  ;;  %9282 = vst [vmem:[#allocation98_spill] sm:$0xff] %v8160_v1 }
 0x63c   : > { %v8120_v28 = vmax.f32 %v8104_v37, %v2899_v62 }
 0x63d   : > { %4146 = vst.msk [vmem:[#allocation2 + $0xa8] sm:$0xff] %vm3466_vm2, %v8117_v59 }
 0x63e   : > { %4145 = vst.msk [vmem:[#allocation2 + $0xa0] sm:$0xff] %vm3466_vm2, %v8120_v28  ;;  %3082 = vperm.xlu1 %5871, %v8064_v10   ;;  %v2881_v62 = vpop.xlane.xlu1 %2880 }
 0x63f   : > { %v2879_v32 = vpop.xlane.xlu0 %2878  ;;  %v8136_v48 = vmax.f32 %v8122_v26, %v2881_v62  ;;  %v8163_v26 = vld [vmem:[#allocation2 + $0x40] sm:$0xff] }
 0x640   : > { %v8139_v43 = vmax.f32 %v8124_v31, %v2879_v32 }
 0x641   : > { %4136 = vst.msk [vmem:[#allocation2 + $0x58] sm:$0xff] %vm3466_vm2, %v8136_v48 }
 0x642   : > { %4135 = vst.msk [vmem:[#allocation2 + $0x50] sm:$0xff] %vm3466_vm2, %v8139_v43  ;;  %3087 = vperm.xlu1 %5871, %v8061_v21   ;;  %v2913_v62 = vpop.xlane.xlu1 %2912 }
 0x643   : > { %v2911_v32 = vpop.xlane.xlu0 %2910  ;;  %v8155_v30 = vmax.f32 %v8141_v55, %v2913_v62  ;;  %v8198_v55 = vld [vmem:[#allocation2 + $0xe0] sm:$0xff] }
 0x644   : > { %v8158_v56 = vmax.f32 %v8143_v39, %v2911_v32 }
 0x645   : > { %2916 = vmax.xlane.f32.xlu0 %v7918_v4  ;;  %4152 = vst.msk [vmem:[#allocation2 + $0xd8] sm:$0xff] %vm3466_vm2, %v8155_v30 }
 0x646   : > { %4151 = vst.msk [vmem:[#allocation2 + $0xd0] sm:$0xff] %vm3466_vm2, %v8158_v56  ;;  %v2877_v62 = vpop.xlane.xlu1 %2876 }
 0x647   : > { %v2875_v32 = vpop.xlane.xlu0 %2874  ;;  %v8174_v33 = vmax.f32 %v8160_v1, %v2877_v62  ;;  %v8200_v1 = vld [vmem:[#allocation2 + $0x70] sm:$0xff] }
 0x648   : > { %v8177_v4 = vmax.f32 %v8163_v26, %v2875_v32  ;;  %9284 = vst [vmem:[#allocation100_spill] sm:$0xff] %v8200_v1 }
 0x649   : > { %4134 = vst.msk [vmem:[#allocation2 + $0x48] sm:$0xff] %vm3466_vm2, %v8174_v33 }
 0x64a   : > { %4133 = vst.msk [vmem:[#allocation2 + $0x40] sm:$0xff] %vm3466_vm2, %v8177_v4  ;;  %3092 = vperm.xlu1 %5871, %v8177_v4   ;;  %v2909_v62 = vpop.xlane.xlu1 %2908 }
 0x64b   : > { %v2907_v32 = vpop.xlane.xlu0 %2906  ;;  %v8193_v21 = vmax.f32 %v8179_v41, %v2909_v62  ;;  %v8219_v41 = vld [vmem:[#allocation2 + $0x60] sm:$0xff] }
 0x64c   : > { %v8196_v15 = vmax.f32 %v8181_v60, %v2907_v32 }
 0x64d   : > { %4150 = vst.msk [vmem:[#allocation2 + $0xc8] sm:$0xff] %vm3466_vm2, %v8193_v21 }
 0x64e   : > { %4149 = vst.msk [vmem:[#allocation2 + $0xc0] sm:$0xff] %vm3466_vm2, %v8196_v15  ;;  %3102 = vperm.xlu1 %5871, %v8139_v43   ;;  %v2915_v62 = vpop.xlane.xlu1 %2914 }
 0x64f   : > { %v2887_v32 = vpop.xlane.xlu0 %2886  ;;  %v8212_v27 = vmax.f32 %v8198_v55, %v2915_v62 }
 0x650   : > { %v8215_v22 = vmax.f32 %v8200_v1, %v2887_v32  ;;  %v8249_v1 = vld [vmem:[#allocation2 + $0xf0] sm:$0xff] }
 0x651   : > { %4153 = vst.msk [vmem:[#allocation2 + $0xe0] sm:$0xff] %vm3466_vm2, %v8212_v27  ;;  %9288 = vst [vmem:[#allocation104_spill] sm:$0xff] %v8249_v1 }
 0x652   : > { %9285 = vst [vmem:[#allocation101_spill] sm:$0xff] %v8215_v22  ;;  %4139 = vst.msk [vmem:[#allocation2 + $0x70] sm:$0xff] %vm3466_vm2, %v8215_v22  ;;  %v2889_v62 = vpop.xlane.xlu1 %2888 }
 0x653   : > { %v2883_v20 = vpop.xlane.xlu0 %2882  ;;  %v8230_v32 = vmax.f32 %v8217_v36, %v2889_v62 }
 0x654   : > { %v8233_v51 = vmax.f32 %v8219_v41, %v2883_v20 }
 0x655   : > { %9287 = vst [vmem:[#allocation103_spill] sm:$0xff] %v8230_v32  ;;  %4140 = vst.msk [vmem:[#allocation2 + $0x78] sm:$0xff] %vm3466_vm2, %v8230_v32 }
 0x656   : > { %4137 = vst.msk [vmem:[#allocation2 + $0x60] sm:$0xff] %vm3466_vm2, %v8233_v51  ;;  %3112 = vperm.xlu1 %5871, %v8233_v51   ;;  %v2885_v62 = vpop.xlane.xlu1 %2884 }
 0x657   : > { %v8247_v20 = vmax.f32 %v8235_v25, %v2885_v62 }
 0x659   : > { %4138 = vst.msk [vmem:[#allocation2 + $0x68] sm:$0xff] %vm3466_vm2, %v8247_v20 }
 0x65a   : > { %3122 = vperm.xlu1 %5871, %v8215_v22   ;;  %v2919_v18 = vpop.xlane.xlu1 %2918 }
 0x65b   : > { %3077 = vperm.xlu0 %5870, %v8097_v58   ;;  %v8258_v36 = vmax.f32 %v8249_v1, %v2919_v18  ;;  %v8276_v18 = vld [vmem:[%s6847_s23 + $0x40] sm:$0xff]  }
 0x65c   : > { %5497 = vmatprep.subr.bf16.mxu1 %v8276_v18 }
 0x65d   : > { %4155 = vst.msk [vmem:[#allocation2 + $0xf0] sm:$0xff] %vm3466_vm2, %v8258_v36 }
 0x65e   : > { %3132 = vperm.xlu1 %5871, %v8029_v12   ;;  %v2921_v11 = vpop.xlane.xlu1 %2920 }
 0x65f   : > { %3097 = vperm.xlu0 %5870, %v8174_v33   ;;  %v8269_v22 = vmax.f32 %v8260_v46, %v2921_v11  ;;  %v2971_v11 = vsub.f32 %v8031_v5, %v8043_v35  ;;  %v9290_v46 = vsub.f32 %v7997_v14, %v8008_v49  ;;  %v9291_v5 = vsub.f32 %v7981_v0, %v7988_v42 }
 0x660   : > { %v9293_v0 = vsub.f32 %v8104_v37, %v8120_v28  ;;  %v9295_v37 = vsub.f32 %v8068_v8, %v8084_v13 }
 0x661   : > { %4156 = vst.msk [vmem:[#allocation2 + $0xf8] sm:$0xff] %vm3466_vm2, %v8269_v22  ;;  %v3020_v62 = vmul.f32 1.442695, %v2971_v11  ;;  %v2986_v1 = vmul.f32 1.442695, %v9290_v46  ;;  %v9297_v11 = vsub.f32 %v8143_v39, %v8158_v56 }
 0x662   : > { %3142 = vperm.xlu1 %5871, %v7988_v42   ;;  %v3026_v42 = vmul.f32 1.442695, %v9293_v0 }
 0x663   : > { %3107 = vperm.xlu0 %5870, %v8136_v48   ;;  %5936 = vpow2.f32 %v3020_v62 }
 0x664   : > { %5938 = vpow2.f32 %v2986_v1 }
 0x666   : > { %3152 = vperm.xlu1 %5871, %v8120_v28   ;;  %v3030_v28 = vmul.f32 1.442695, %v9295_v37 }
 0x667   : > { %3117 = vperm.xlu0 %5870, %v8247_v20  }
 0x66a   : > { %3162 = vperm.xlu1 %5871, %v8084_v13   ;;  %v3038_v13 = vmul.f32 1.442695, %v9297_v11 }
 0x66b   : > { %3127 = vperm.xlu0 %5870, %v8230_v32   ;;  %v3022_v32 = vmul.f32 1.442695, %v9291_v5  ;;  %v9298_v5 = vsub.f32 %v8124_v31, %v8139_v43  ;;  %v9301_v31 = vsub.f32 %v8198_v55, %v8212_v27 }
 0x66d   : > { %5940 = vpow2.f32 %v3022_v32  ;;  %v8302_v46 = vpop.eup %5936 }
 0x66e   : > { %3172 = vperm.xlu1 %5871, %v8196_v15   ;;  %v8309_v49 = vpop.eup %5938 }
 0x66f   : > { %3137 = vperm.xlu0 %5870, %v8043_v35   ;;  %v9292_v35 = vsub.f32 %v7979_v40, %v7985_v45  ;;  %v9294_v40 = vsub.f32 %v8088_v61, %v8100_v63  ;;  %v9296_v63 = vsub.f32 %v8052_v2, %v8064_v10  ;;  %v9299_v10 = vsub.f32 %v8181_v60, %v8196_v15 }
 0x671   : > { %v2990_v14 = vmul.f32 1.442695, %v9292_v35  ;;  %v2994_v45 = vmul.f32 1.442695, %v9294_v40  ;;  %v2998_v61 = vmul.f32 1.442695, %v9296_v63  ;;  %v9302_v40 = vsub.f32 %v8219_v41, %v8233_v51 }
 0x672   : > { %3182 = vperm.xlu1 %5871, %v8158_v56   ;;  %v3006_v35 = vmul.f32 1.442695, %v9298_v5  ;;  %v9300_v56 = vsub.f32 %v8163_v26, %v8177_v4 }
 0x673   : > { %3147 = vperm.xlu0 %5870, %v8026_v17   ;;  %5942 = vpow2.f32 %v2990_v14  ;;  %v3034_v14 = vmul.f32 1.442695, %v9299_v10  ;;  %v3010_v4 = vmul.f32 1.442695, %v9302_v40  ;;  %v5915_v40 = vld [vmem:[%s6847_s23 + $0x58] sm:$0xff]  }
 0x674   : > { %5944 = vpow2.f32 %v3026_v42  ;;  %v3002_v0 = vmul.f32 1.442695, %v9300_v56  ;;  %v3042_v42 = vmul.f32 1.442695, %v9301_v31  ;;  %v5913_v31 = vld [vmem:[%s6847_s23 + $0x48] sm:$0xff]  }
 0x675   : > { %5946 = vpow2.f32 %v2994_v45 }
 0x676   : > { %3192 = vperm.xlu1 %5871, %v8212_v27   ;;  %5948 = vpow2.f32 %v3030_v28 }
 0x677   : > { %3157 = vperm.xlu0 %5870, %v8117_v59   ;;  %v8316_v1 = vpop.eup %5940  ;;  %5950 = vpow2.f32 %v2998_v61 }
 0x678   : > { %5952 = vpow2.f32 %v3038_v13 }
 0x679   : > { %5954 = vpow2.f32 %v3006_v35 }
 0x67a   : > { %3202 = vperm.xlu1 %5871, %v8258_v36   ;;  %5956 = vpow2.f32 %v3034_v14 }
 0x67b   : > { %3167 = vperm.xlu0 %5870, %v8081_v44   ;;  %5958 = vpow2.f32 %v3002_v0 }
 0x67c   : > { %5960 = vpow2.f32 %v3042_v42 }
 0x67d   : > { %v8322_v32 = vpop.eup %5942  ;;  %5962 = vpow2.f32 %v3010_v4 }
 0x67e   : > { %3618 = vperm.xlu1 %5871, %v8302_v46   ;;  %v8328_v62 = vpop.eup %5944 }
 0x67f   : > { %3177 = vperm.xlu0 %5870, %v8193_v21   ;;  %v8334_v8 = vpop.eup %5946 }
 0x680   : > { %v8340_v2 = vpop.eup %5948 }
 0x681   : > { %v8346_v39 = vpop.eup %5950 }
 0x682   : > { %3533 = vperm.xlu1 %5871, %v8309_v49   ;;  %v8352_v43 = vpop.eup %5952 }
 0x683   : > { %3187 = vperm.xlu0 %5870, %v8155_v30   ;;  %v8358_v15 = vpop.eup %5954 }
 0x684   : > { %v8364_v26 = vpop.eup %5956 }
 0x685   : > { %v8368_v55 = vpop.eup %5958 }
 0x686   : > { %3623 = vperm.xlu1 %5871, %v8316_v1   ;;  %v8373_v51 = vpop.eup %5960 }
 0x687   : > { %v8377_v35 = vpop.eup %5962 }
 0x688   : > { %9303 = vst [vmem:[#allocation106_spill] sm:$0xff] %v8377_v35 }
 0x68a   : > { %3543 = vperm.xlu1 %5871, %v8322_v32  }
 0x68e   : > { %3633 = vperm.xlu1 %5871, %v8328_v62  }
 0x692   : > { %3553 = vperm.xlu1 %5871, %v8334_v8  }
 0x696   : > { %3643 = vperm.xlu1 %5871, %v8340_v2  }
 0x69a   : > { %3563 = vperm.xlu1 %5871, %v8346_v39  }
 0x69e   : > { %3663 = vperm.xlu1 %5871, %v8352_v43  }
 0x6a0   : > { %v3063_v60 = vpop.permute.xlu1 %3062 }
 0x6a1   : > { %v3212_v63 = vsub.f32 %v7832_v52, %v3063_v60  ;;  %v5914_v60 = vld [vmem:[%s6847_s23 + $0x50] sm:$0xff]  }
 0x6a2   : > { %3583 = vperm.xlu1 %5871, %v8358_v15  }
 0x6a3   : > { %v3246_v5 = vmul.f32 1.442695, %v3212_v63  ;;  %v5917_v63 = vld [vmem:[%s6847_s23 + $0x68] sm:$0xff]  }
 0x6a4   : > { %v3068_v45 = vpop.permute.xlu1 %3067 }
 0x6a5   : > { %v3053_v37 = vpop.permute.xlu0 %3052  ;;  %v3213_v27 = vsub.f32 %v7842_v54, %v3068_v45  ;;  %v5916_v45 = vld [vmem:[%s6847_s23 + $0x60] sm:$0xff]  }
 0x6a6   : > { %3653 = vperm.xlu1 %5871, %v8364_v26   ;;  %v3210_v28 = vsub.f32 %v7844_v3, %v3053_v37 }
 0x6a7   : > { %v3248_v41 = vmul.f32 1.442695, %v3213_v27  ;;  %v9304_v27 = vsub.f32 %v8017_v34, %v8029_v12 }
 0x6a8   : > { %v3242_v61 = vmul.f32 1.442695, %v3210_v28 }
 0x6a9   : > { %5964 = vpow2.f32 %v3248_v41  ;;  %v3018_v28 = vmul.f32 1.442695, %v9304_v27  ;;  %v8401_v41 = vld [vmem:[#allocation2 + $0xe8] sm:$0xff] }
 0x6aa   : > { %3573 = vperm.xlu1 %5871, %v8368_v55   ;;  %5966 = vpow2.f32 %v3242_v61  ;;  %v2973_v61 = vsub.f32 %v8010_v16, %v8026_v17 }
 0x6ac   : > { %v3024_v16 = vmul.f32 1.442695, %v2973_v61 }
 0x6ad   : > { %v3058_v11 = vpop.permute.xlu1 %3057 }
 0x6ae   : > { %v3211_v13 = vsub.f32 %v7865_v29, %v3058_v11  ;;  %3673 = vperm.xlu1 %5871, %v8373_v51   ;;  %v9305_v11 = vsub.f32 %v8035_v6, %v8046_v38  ;;  %v5919_v6 = vld [vmem:[%s6847_s23 + $0x78] sm:$0xff]   ;;  %v9306_v38 = vsub.f32 %v7990_v19, %v8005_v53 }
 0x6b0   : > { %v3244_v54 = vmul.f32 1.442695, %v3211_v13  ;;  %v2988_v13 = vmul.f32 1.442695, %v9305_v11 }
 0x6b2   : > { %5968 = vpow2.f32 %v3244_v54  ;;  %3593 = vperm.xlu1 %5871, %v8377_v35   ;;  %v5918_v54 = vld [vmem:[%s6847_s23 + $0x70] sm:$0xff]  }
 0x6b3   : > { %5970 = vpow2.f32 %v3246_v5  ;;  %v8380_v52 = vpop.eup %5964 }
 0x6b4   : > { %v8382_v3 = vpop.eup %5966  ;;  %5972 = vpow2.f32 %v3018_v28 }
 0x6b5   : > { %5974 = vpow2.f32 %v2988_v13  ;;  %v9310_v13 = vld [vmem:[#allocation94_spill] sm:$0xff] }
 0x6b6   : > { %5976 = vpow2.f32 %v3024_v16 }
 0x6b9   : > { %v3073_v29 = vpop.permute.xlu1 %3072 }
 0x6ba   : > { %v3214_v12 = vsub.f32 %v7898_v57, %v3073_v29  ;;  %v9307_v57 = vsub.f32 %v8102_v23, %v8117_v59 }
 0x6bc   : > { %v8384_v10 = vpop.eup %5968  ;;  %v3028_v29 = vmul.f32 1.442695, %v9307_v57  ;;  %v9314_v57 = vld [vmem:[#allocation79_spill] sm:$0xff] }
 0x6bd   : > { %v8386_v14 = vpop.eup %5970  ;;  %v3723_v56 = vpack.c.bf16 %v8384_v10, %v8382_v3  ;;  %v3083_v42 = vpop.permute.xlu1 %3082 }
 0x6be   : > { %v3724_v0 = vpack.c.bf16 %v8380_v52, %v8386_v14  ;;  %v8428_v53 = vpop.eup %5972 }
 0x6bf   : > { %5481 = vmatprep.mubr.bf16.mxu1 %v3723_v56  ;;  %v8434_v61 = vpop.eup %5974 }
 0x6c0   : > { %5482 = vmatmul.mubr.bf16.vlgmr.msra.gmra.mrb[16].mxu1 %v3724_v0  ;;  %v2992_v0 = vmul.f32 1.442695, %v9306_v38 }
 0x6c1   : > { %5498 = vmatpush3.bf16.msra.mxu1 %v8276_v18  ;;  %v3088_v4 = vpop.permute.xlu1 %3087 }
 0x6c2   : > { %5499 = vmatprep.subr.bf16.mxu1 %v5913_v31  ;;  %v3217_v17 = vsub.f32 %v7870_v47, %v3088_v4  ;;  %5978 = vpow2.f32 %v2992_v0 }
 0x6c3   : > { %5980 = vpow2.f32 %v3028_v29 }
 0x6c4   : > { %v3256_v47 = vmul.f32 1.442695, %v3217_v17 }
 0x6c5   : > { %5500 = vmatpush3.bf16.msra.mxu1 %v5913_v31  ;;  %v3216_v31 = vsub.f32 %v7874_v24, %v3083_v42 }
 0x6c6   : > { %5501 = vmatprep.subr.bf16.mxu1 %v5914_v60 }
 0x6c7   : > { %v3254_v59 = vmul.f32 1.442695, %v3216_v31  ;;  %v8444_v31 = vpop.eup %5976 }
 0x6c9   : > { %5502 = vmatpush3.bf16.msra.mxu1 %v5914_v60  ;;  %v3093_v37 = vpop.permute.xlu1 %3092  ;;  %v3250_v60 = vmul.f32 1.442695, %v3214_v12 }
 0x6ca   : > { %5503 = vmatprep.subr.bf16.mxu1 %v5915_v40 }
 0x6cb   : > { %5982 = vpow2.f32 %v3250_v60 }
 0x6cc   : > { %5984 = vpow2.f32 %v3256_v47 }
 0x6cd   : > { %5504 = vmatpush3.bf16.msra.mxu1 %v5915_v40  ;;  %v3103_v18 = vpop.permute.xlu1 %3102  ;;  %v3218_v40 = vsub.f32 %v7940_v9, %v3093_v37  ;;  %v9308_v37 = vld [vmem:[#allocation72_spill] sm:$0xff] }
 0x6ce   : > { %5505 = vmatprep.subr.bf16.mxu1 %v5916_v45  ;;  %v3220_v42 = vsub.f32 %v7924_v50, %v3103_v18  ;;  %v9313_v18 = vld [vmem:[#allocation88_spill] sm:$0xff] }
 0x6cf   : > { %v3258_v24 = vmul.f32 1.442695, %v3218_v40 }
 0x6d0   : > { %v3262_v50 = vmul.f32 1.442695, %v3220_v42 }
 0x6d1   : > { %5506 = vmatpush3.bf16.msra.mxu1 %v5916_v45 }
 0x6d2   : > { %v2917_v5 = vpop.xlane.xlu0 %2916  ;;  %5507 = vmatprep.subr.bf16.mxu1 %v5917_v63 }
 0x6d3   : > { %v8410_v34 = vmax.f32 %v8401_v41, %v2917_v5  ;;  %v2977_v5 = vsub.f32 %v9310_v13, %v8081_v44  ;;  %v8446_v44 = vpop.eup %5978 }
 0x6d4   : > { %v8449_v40 = vpop.eup %5980 }
 0x6d5   : > { %4154 = vst.msk [vmem:[#allocation2 + $0xe8] sm:$0xff] %vm3466_vm2, %v8410_v34  ;;  %3197 = vperm.xlu0 %5870, %v8410_v34   ;;  %v3113_v56 = vpop.permute.xlu1 %3112  ;;  %5508 = vmatpush3.bf16.msra.mxu1 %v5917_v63  ;;  %v9309_v63 = vld [vmem:[#allocation82_spill] sm:$0xff]  ;;  %v3032_v60 = vmul.f32 1.442695, %v2977_v5 }
 0x6d6   : > { %5509 = vmatprep.subr.bf16.mxu1 %v5918_v54 }
 0x6d9   : > { %3207 = vperm.xlu0 %5870, %v8269_v22   ;;  %v3123_v45 = vpop.permute.xlu1 %3122  ;;  %5510 = vmatpush3.bf16.msra.mxu1 %v5918_v54  ;;  %v9311_v54 = vld [vmem:[#allocation95_spill] sm:$0xff] }
 0x6da   : > { %v3078_v4 = vpop.permute.xlu0 %3077  ;;  %5511 = vmatprep.subr.bf16.mxu1 %v5919_v6  ;;  %v9312_v12 = vsub.f32 %v9311_v54, %v8097_v58 }
 0x6db   : > { %v3215_v19 = vsub.f32 %v7894_v7, %v3078_v4 }
 0x6dc   : > { %v2996_v16 = vmul.f32 1.442695, %v9312_v12 }
 0x6dd   : > { %v3252_v23 = vmul.f32 1.442695, %v3215_v19  ;;  %3613 = vperm.xlu0 %5870, %v8428_v53   ;;  %v3133_v9 = vpop.permute.xlu1 %3132  ;;  %5512 = vmatpush3.bf16.msra.mxu1 %v5919_v6  ;;  %v3222_v6 = vsub.f32 %v9313_v18, %v3113_v56  ;;  %v9315_v56 = vld [vmem:[#allocation86_spill] sm:$0xff] }
 0x6de   : > { %v3226_v27 = vsub.f32 %v9308_v37, %v3133_v9  ;;  %v3098_v28 = vpop.permute.xlu0 %3097  ;;  %v3224_v4 = vsub.f32 %v9315_v56, %v3123_v45  ;;  %v9317_v37 = vld [vmem:[#allocation92_spill] sm:$0xff] }
 0x6df   : > { %5986 = vpow2.f32 %v3252_v23  ;;  %v3219_v7 = vsub.f32 %v9309_v63, %v3098_v28  ;;  %v3266_v47 = vmul.f32 1.442695, %v3222_v6 }
 0x6e0   : > { %5988 = vpow2.f32 %v3254_v59  ;;  %v3274_v11 = vmul.f32 1.442695, %v3226_v27  ;;  %v8452_v59 = vpop.eup %5982  ;;  %v9318_v27 = vld [vmem:[#allocation93_spill] sm:$0xff]  ;;  %v3270_v13 = vmul.f32 1.442695, %v3224_v4 }
 0x6e1   : > { %5990 = vpow2.f32 %v3258_v24  ;;  %v3260_v17 = vmul.f32 1.442695, %v3219_v7  ;;  %3538 = vperm.xlu0 %5870, %v8434_v61   ;;  %v3143_v0 = vpop.permute.xlu1 %3142  ;;  %v9316_v24 = vld [vmem:[#allocation89_spill] sm:$0xff]  ;;  %v8455_v9 = vpop.eup %5984  ;;  %v9319_v28 = vsub.f32 %v9317_v37, %v9318_v27 }
 0x6e2   : > { %5992 = vpow2.f32 %v3274_v11  ;;  %v3108_v38 = vpop.permute.xlu0 %3107 }
 0x6e3   : > { %5994 = vpow2.f32 %v3260_v17  ;;  %v3221_v29 = vsub.f32 %v9314_v57, %v3108_v38  ;;  %v3000_v63 = vmul.f32 1.442695, %v9319_v28  ;;  %v9321_v57 = vld [vmem:[#allocation97_spill] sm:$0xff]  ;;  %v9325_v28 = vld [vmem:[#allocation96_spill] sm:$0xff] }
 0x6e4   : > { %5996 = vpow2.f32 %v2996_v16  ;;  %v9320_v16 = vld [vmem:[#allocation87_spill] sm:$0xff] }
 0x6e5   : > { %v3264_v58 = vmul.f32 1.442695, %v3221_v29  ;;  %3628 = vperm.xlu0 %5870, %v8444_v31   ;;  %5998 = vpow2.f32 %v3262_v50  ;;  %v3153_v7 = vpop.permute.xlu1 %3152  ;;  %v9322_v29 = vsub.f32 %v9321_v57, %v8155_v30 }
 0x6e6   : > { %v3118_v19 = vpop.permute.xlu0 %3117 }
 0x6e7   : > { %6000 = vpow2.f32 %v3264_v58  ;;  %v3223_v23 = vsub.f32 %v9316_v24, %v3118_v19  ;;  %v9323_v58 = vld [vmem:[#allocation70_spill] sm:$0xff] }
 0x6e8   : > { %6002 = vpow2.f32 %v3032_v60  ;;  %v3040_v60 = vmul.f32 1.442695, %v9322_v29 }
 0x6e9   : > { %v8457_v42 = vpop.eup %5986  ;;  %v3268_v11 = vmul.f32 1.442695, %v3223_v23  ;;  %3548 = vperm.xlu0 %5870, %v8446_v44   ;;  %6004 = vpow2.f32 %v3266_v47  ;;  %v3228_v47 = vsub.f32 %v9323_v58, %v3143_v0  ;;  %v3163_v24 = vpop.permute.xlu1 %3162  ;;  %v9324_v23 = vld [vmem:[#allocation73_spill] sm:$0xff]  ;;  %v9326_v0 = vsub.f32 %v9325_v28, %v8136_v48  ;;  %v9329_v58 = vld [vmem:[#allocation99_spill] sm:$0xff] }
 0x6ea   : > { %v8463_v45 = vpop.eup %5988  ;;  %v3128_v5 = vpop.permute.xlu0 %3127  ;;  %v3725_v54 = vpack.c.bf16 %v8457_v42, %v8452_v59 }
 0x6eb   : > { %v8467_v12 = vpop.eup %5990  ;;  %6006 = vpow2.f32 %v3268_v11  ;;  %v3225_v17 = vsub.f32 %v9320_v16, %v3128_v5  ;;  %v3726_v50 = vpack.c.bf16 %v8455_v9, %v8463_v45  ;;  %v9327_v5 = vld [vmem:[#allocation77_spill] sm:$0xff] }
 0x6ec   : > { %v8472_v18 = vpop.eup %5992  ;;  %5485 = vmatprep.mubr.bf16.mxu1 %v3725_v54  ;;  %6008 = vpow2.f32 %v3000_v63  ;;  %v3008_v63 = vmul.f32 1.442695, %v9326_v0  ;;  %v3230_v54 = vsub.f32 %v9327_v5, %v3153_v7 }
 0x6ed   : > { %v8474_v6 = vpop.eup %5994  ;;  %v3272_v38 = vmul.f32 1.442695, %v3225_v17  ;;  %3638 = vperm.xlu0 %5870, %v8449_v40   ;;  %5486 = vmatmul.mubr.bf16.gmra.mrb[20].mxu1 %v3726_v50  ;;  %6010 = vpow2.f32 %v3270_v13  ;;  %v3278_v13 = vmul.f32 1.442695, %v3228_v47 }
 0x6ee   : > { %3402 = vadd.xlane.f32.xlu1 %v8472_v18  ;;  %v3138_v56 = vpop.permute.xlu0 %3137  ;;  %v3727_v4 = vpack.c.bf16 %v8474_v6, %v8467_v12  ;;  %v8484_v19 = vpop.eup %5996 }
 0x6ef   : > { %6012 = vpow2.f32 %v3272_v38  ;;  %v3227_v37 = vsub.f32 %v9324_v23, %v3138_v56  ;;  %v8487_v27 = vpop.eup %5998  ;;  %v9328_v38 = vld [vmem:[#allocation71_spill] sm:$0xff]  ;;  %v3173_v56 = vpop.permute.xlu1 %3172 }
 0x6f0   : > { %5489 = vmatprep.mubr.bf16.mxu1 %v3727_v4  ;;  %6014 = vpow2.f32 %v3040_v60  ;;  %v9330_v60 = vsub.f32 %v9329_v58, %v8193_v21  ;;  %v3282_v4 = vmul.f32 1.442695, %v3230_v54  ;;  %v9331_v23 = vld [vmem:[#allocation75_spill] sm:$0xff]  ;;  %v9335_v58 = vld [vmem:[#allocation84_spill] sm:$0xff] }
 0x6f1   : > { %v8489_v30 = vpop.eup %6000  ;;  %v3276_v11 = vmul.f32 1.442695, %v3227_v37  ;;  %3558 = vperm.xlu0 %5870, %v8484_v19   ;;  %v3232_v37 = vsub.f32 %v9331_v23, %v3163_v24  ;;  %v2983_v24 = vsub.f32 %v8401_v41, %v8410_v34 }
 0x6f2   : > { %v3148_v16 = vpop.permute.xlu0 %3147  ;;  %v3728_v17 = vpack.c.bf16 %v8489_v30, %v8487_v27  ;;  %v8498_v50 = vpop.eup %6002  ;;  %v3036_v47 = vmul.f32 1.442695, %v9330_v60  ;;  %v3234_v60 = vsub.f32 %v9335_v58, %v3173_v56 }
 0x6f3   : > { %6016 = vpow2.f32 %v3276_v11  ;;  %v3229_v57 = vsub.f32 %v9328_v38, %v3148_v16  ;;  %v8501_v29 = vpop.eup %6004  ;;  %v9333_v38 = vld [vmem:[#allocation98_spill] sm:$0xff]  ;;  %v3044_v41 = vmul.f32 1.442695, %v2983_v24 }
 0x6f4   : > { %6018 = vpow2.f32 %v3008_v63  ;;  %v9332_v63 = vld [vmem:[#allocation76_spill] sm:$0xff]  ;;  %v3290_v56 = vmul.f32 1.442695, %v3234_v60 }
 0x6f5   : > { %v8503_v48 = vpop.eup %6006  ;;  %v3280_v7 = vmul.f32 1.442695, %v3229_v57  ;;  %3648 = vperm.xlu0 %5870, %v8498_v50   ;;  %5490 = vmatmul.mubr.bf16.gmra.mrb[24].mxu1 %v3728_v17  ;;  %6020 = vpow2.f32 %v3278_v13  ;;  %v9334_v13 = vsub.f32 %v9333_v38, %v8174_v33  ;;  %v3286_v57 = vmul.f32 1.442695, %v3232_v37 }
 0x6f6   : > { %v3158_v28 = vpop.permute.xlu0 %3157  ;;  %v3729_v0 = vpack.c.bf16 %v8503_v48, %v8501_v29  ;;  %v8512_v11 = vpop.eup %6008 }
 0x6f7   : > { %6022 = vpow2.f32 %v3280_v7  ;;  %v3231_v5 = vsub.f32 %v9332_v63, %v3158_v28  ;;  %v8515_v21 = vpop.eup %6010  ;;  %v3004_v54 = vmul.f32 1.442695, %v9334_v13  ;;  %v3183_v28 = vpop.permute.xlu1 %3182 }
 0x6f8   : > { %5493 = vmatprep.mubr.bf16.mxu1 %v3729_v0  ;;  %6024 = vpow2.f32 %v3036_v47  ;;  %v9336_v0 = vld [vmem:[#allocation74_spill] sm:$0xff] }
 0x6f9   : > { %v8517_v16 = vpop.eup %6012  ;;  %v3284_v17 = vmul.f32 1.442695, %v3231_v5  ;;  %3568 = vperm.xlu0 %5870, %v8512_v11   ;;  %6026 = vpow2.f32 %v3282_v4  ;;  %v9337_v4 = vld [vmem:[#allocation81_spill] sm:$0xff] }
 0x6fa   : > { %v3168_v7 = vpop.permute.xlu0 %3167  ;;  %v3730_v23 = vpack.c.bf16 %v8517_v16, %v8515_v21  ;;  %v8529_v63 = vpop.eup %6014  ;;  %v3236_v37 = vsub.f32 %v9337_v4, %v3183_v28 }
 0x6fb   : > { %6028 = vpow2.f32 %v3284_v17  ;;  %v3233_v33 = vsub.f32 %v9336_v0, %v3168_v7  ;;  %v9338_v17 = vld [vmem:[#allocation83_spill] sm:$0xff] }
 0x6fc   : > { %6030 = vpow2.f32 %v3004_v54 }
 0x6fd   : > { %v8531_v47 = vpop.eup %6016  ;;  %v3288_v34 = vmul.f32 1.442695, %v3233_v33  ;;  %3668 = vperm.xlu0 %5870, %v8529_v63   ;;  %5494 = vmatmul.mubr.bf16.gmra.mrb[28].mxu1 %v3730_v23  ;;  %6032 = vpow2.f32 %v3286_v57  ;;  %v3294_v57 = vmul.f32 1.442695, %v3236_v37 }
 0x6fe   : > { %v3178_v5 = vpop.permute.xlu0 %3177  ;;  %v3731_v38 = vpack.c.bf16 %v8531_v47, %v8472_v18  ;;  %v8537_v13 = vpop.eup %6018  ;;  %v9339_v18 = vld [vmem:[#allocation80_spill] sm:$0xff] }
 0x6ff   : > { %6034 = vpow2.f32 %v3288_v34  ;;  %v3235_v58 = vsub.f32 %v9338_v17, %v3178_v5  ;;  %v6021_v7 = vpop.eup %6020 }
 0x700   : > { %5513 = vmatprep.mubr.bf16.mxu1 %v3731_v38  ;;  %6036 = vpow2.f32 %v3044_v41 }
 0x701   : > { %v6023_v54 = vpop.eup %6022  ;;  %v3292_v24 = vmul.f32 1.442695, %v3235_v58  ;;  %3588 = vperm.xlu0 %5870, %v8537_v13   ;;  %6038 = vpow2.f32 %v3290_v56 }
 0x702   : > { %v3188_v60 = vpop.permute.xlu0 %3187  ;;  %3408 = vadd.xlane.f32.xlu1 %v6023_v54  ;;  %v3732_v23 = vpack.c.bf16 %v6023_v54, %v6021_v7  ;;  %v8541_v28 = vpop.eup %6024 }
 0x703   : > { %6040 = vpow2.f32 %v3292_v24  ;;  %v3237_v0 = vsub.f32 %v9339_v18, %v3188_v60  ;;  %v6027_v33 = vpop.eup %6026 }
 0x704   : > { %6042 = vpow2.f32 %v3294_v57 }
 0x705   : > { %v6029_v34 = vpop.eup %6028  ;;  %v3296_v4 = vmul.f32 1.442695, %v3237_v0  ;;  %3658 = vperm.xlu0 %5870, %v8541_v28   ;;  %5514 = vmatmul.mubr.bf16.vlgmr.msra.gmra.mrb[32].mxu1 %v3732_v23 }
 0x706   : > { %3376 = vadd.xlane.f32.xlu1 %v8380_v52  ;;  %v3733_v41 = vpack.c.bf16 %v6029_v34, %v6027_v33  ;;  %v8546_v56 = vpop.eup %6030 }
 0x707   : > { %6044 = vpow2.f32 %v3296_v4  ;;  %v6033_v37 = vpop.eup %6032  ;;  %v9342_v4 = vld [vmem:[#allocation85_spill] sm:$0xff] }
 0x708   : > { %5517 = vmatprep.mubr.bf16.mxu1 %v3733_v41 }
 0x709   : > { %v6035_v5 = vpop.eup %6034  ;;  %3578 = vperm.xlu0 %5870, %v8546_v56  }
 0x70a   : > { %3372 = vadd.xlane.f32.xlu1 %v8384_v10  ;;  %v3734_v38 = vpack.c.bf16 %v6035_v5, %v6033_v37  ;;  %v8550_v17 = vpop.eup %6036  ;;  %v3193_v10 = vpop.permute.xlu1 %3192 }
 0x70b   : > { %9340 = vst [vmem:[#allocation72_spill] sm:$0xff] %v8550_v17  ;;  %v6039_v58 = vpop.eup %6038 }
 0x70d   : > { %v6041_v54 = vpop.eup %6040  ;;  %3678 = vperm.xlu0 %5870, %v8550_v17   ;;  %5518 = vmatmul.mubr.bf16.gmra.mrb[36].mxu1 %v3734_v38 }
 0x70e   : > { %3416 = vadd.xlane.f32.xlu1 %v6035_v5  ;;  %v3735_v52 = vpack.c.bf16 %v6041_v54, %v6039_v58  ;;  %v6043_v24 = vpop.eup %6042  ;;  %v3203_v23 = vpop.permute.xlu1 %3202 }
 0x710   : > { %5521 = vmatprep.mubr.bf16.mxu1 %v3735_v52  ;;  %v9344_v52 = vld [vmem:[#allocation91_spill] sm:$0xff] }
 0x711   : > { %v6045_v57 = vpop.eup %6044 }
 0x712   : > { %3384 = vadd.xlane.f32.xlu1 %v8455_v9  ;;  %v3736_v60 = vpack.c.bf16 %v6045_v57, %v6043_v24  ;;  %v8556_v18 = vpop.permute.xlu1 %3618 }
 0x715   : > { %5522 = vmatmul.mubr.bf16.gmra.mrb[40].mxu1 %v3736_v60 }
 0x716   : > { %3412 = vadd.xlane.f32.xlu1 %v6029_v34  ;;  %v8559_v0 = vpop.permute.xlu1 %3533 }
 0x71a   : > { %3380 = vadd.xlane.f32.xlu1 %v8457_v42  ;;  %v8563_v9 = vpop.permute.xlu1 %3623 }
 0x71e   : > { %3424 = vadd.xlane.f32.xlu1 %v6045_v57  ;;  %v8566_v42 = vpop.permute.xlu1 %3543 }
 0x722   : > { %3392 = vadd.xlane.f32.xlu1 %v8489_v30  ;;  %v8569_v30 = vpop.permute.xlu1 %3633 }
 0x726   : > { %3420 = vadd.xlane.f32.xlu1 %v6041_v54 }
 0x72a   : > { %3388 = vadd.xlane.f32.xlu1 %v8474_v6  ;;  %v8571_v6 = vpop.permute.xlu1 %3553 }
 0x72c   : > { %3406 = vadd.xlane.f32.xlu0 %v6021_v7  ;;  %v9341_v7 = vld [vmem:[#allocation90_spill] sm:$0xff] }
 0x72e   : > { %v8575_v34 = vpop.permute.xlu1 %3643 }
 0x730   : > { %3374 = vadd.xlane.f32.xlu0 %v8386_v14  ;;  %v3240_v14 = vsub.f32 %v9341_v7, %v3203_v23 }
 0x732   : > { %v8579_v41 = vpop.permute.xlu1 %3563 }
 0x734   : > { %3370 = vadd.xlane.f32.xlu0 %v8382_v3  ;;  %v3302_v3 = vmul.f32 1.442695, %v3240_v14 }
 0x736   : > { %6046 = vpow2.f32 %v3302_v3  ;;  %v8583_v54 = vpop.permute.xlu1 %3663 }
 0x738   : > { %3404 = vadd.xlane.f32.xlu0 %v8531_v47  ;;  %v3238_v47 = vsub.f32 %v9342_v4, %v3193_v10 }
 0x73a   : > { %v8586_v60 = vpop.permute.xlu1 %3583 }
 0x73c   : > { %3414 = vadd.xlane.f32.xlu0 %v6033_v37 }
 0x73e   : > { %v8589_v7 = vpop.permute.xlu1 %3653 }
 0x740   : > { %3382 = vadd.xlane.f32.xlu0 %v8463_v45  ;;  %v3298_v45 = vmul.f32 1.442695, %v3238_v47  ;;  %v6047_v57 = vpop.eup %6046 }
 0x742   : > { %6048 = vpow2.f32 %v3298_v45  ;;  %v8592_v3 = vpop.permute.xlu1 %3573 }
 0x744   : > { %3410 = vadd.xlane.f32.xlu0 %v6027_v33  ;;  %v9343_v33 = vld [vmem:[#allocation78_spill] sm:$0xff] }
 0x746   : > { %v8600_v45 = vpop.permute.xlu1 %3673 }
 0x747   : > { %9346 = vst [vmem:[#allocation82_spill] sm:$0xff] %v8600_v45 }
 0x748   : > { %3378 = vadd.xlane.f32.xlu0 %v8452_v59 }
 0x74c   : > { %3422 = vadd.xlane.f32.xlu0 %v6043_v24 }
 0x750   : > { %3390 = vadd.xlane.f32.xlu0 %v8487_v27 }
 0x754   : > { %v3198_v37 = vpop.permute.xlu0 %3197  ;;  %3418 = vadd.xlane.f32.xlu0 %v6039_v58  ;;  %v6049_v58 = vpop.eup %6048 }
 0x755   : > { %v3239_v5 = vsub.f32 %v9343_v33, %v3198_v37  ;;  %v3322_v33 = vld [vmem:[#allocation3 + $0x80] sm:$0xff] }
 0x757   : > { %v3300_v38 = vmul.f32 1.442695, %v3239_v5 }
 0x758   : > { %v3208_v59 = vpop.permute.xlu0 %3207  ;;  %3386 = vadd.xlane.f32.xlu0 %v8467_v12 }
 0x759   : > { %6050 = vpow2.f32 %v3300_v38  ;;  %v3241_v24 = vsub.f32 %v9344_v52, %v3208_v59 }
 0x75b   : > { %v3304_v27 = vmul.f32 1.442695, %v3241_v24 }
 0x75c   : > { %3430 = vadd.xlane.f32.xlu0 %v6047_v57  ;;  %v8595_v4 = vpop.permute.xlu0 %3613 }
 0x75d   : > { %6052 = vpow2.f32 %v3304_v27  ;;  %v3501_v27 = vld [vmem:[#allocation4 + $0x10] sm:$0xff] }
 0x760   : > { %3398 = vadd.xlane.f32.xlu0 %v8515_v21  ;;  %v9345_v21 = vsub.f32 %v8235_v25, %v8247_v20  ;;  %v3539_v37 = vpop.permute.xlu0 %3538 }
 0x762   : > { %v3012_v47 = vmul.f32 1.442695, %v9345_v21  ;;  %v3693_v21 = vmul.f32 %v8566_v42, %v3501_v27 }
 0x763   : > { %v6051_v10 = vpop.eup %6050 }
 0x764   : > { %3426 = vadd.xlane.f32.xlu0 %v6049_v58  ;;  %v3737_v23 = vpack.c.bf16 %v6051_v10, %v6049_v58  ;;  %6054 = vpow2.f32 %v3012_v47  ;;  %v8605_v5 = vpop.permute.xlu0 %3628  ;;  %v3500_v47 = vld [vmem:[#allocation4 + $0x8] sm:$0xff] }
 0x766   : > { %5525 = vmatprep.mubr.bf16.mxu1 %v3737_v23 }
 0x767   : > { %v6053_v12 = vpop.eup %6052 }
 0x768   : > { %3432 = vadd.xlane.f32.xlu1 %v6053_v12  ;;  %3394 = vadd.xlane.f32.xlu0 %v8501_v29  ;;  %v3738_v14 = vpack.c.bf16 %v6053_v12, %v6047_v57  ;;  %v8603_v29 = vpop.permute.xlu1 %3593  ;;  %v3549_v25 = vpop.permute.xlu0 %3548  ;;  %v3502_v12 = vld [vmem:[#allocation4 + $0x18] sm:$0xff] }
 0x76a   : > { %5526 = vmatmul.mubr.bf16.gmra.mrb[44].mxu1 %v3738_v14 }
 0x76c   : > { %3400 = vadd.xlane.f32.xlu1 %v8517_v16  ;;  %v3354_v16 = vmul.f32 %v8428_v53, %v3322_v33  ;;  %v8612_v20 = vpop.permute.xlu0 %3638  ;;  %v3499_v53 = vld [vmem:[#allocation4] sm:$0xff] }
 0x76e   : > { %v8608_v52 = vpop.eup %6054 }
 0x76f   : > { %9347 = vst [vmem:[#allocation94_spill] sm:$0xff] %v8608_v52 }
 0x770   : > { %3428 = vadd.xlane.f32.xlu1 %v6051_v10  ;;  %v8614_v24 = vpop.permute.xlu0 %3558  ;;  %v3309_v10 = vld [vmem:[#allocation3 + $0x18] sm:$0xff] }
 0x771   : > { %v3341_v33 = vmul.f32 %v8446_v44, %v3309_v10 }
 0x774   : > { %3396 = vadd.xlane.f32.xlu1 %v8503_v48  ;;  %v3325_v48 = vld [vmem:[#allocation3 + $0x98] sm:$0xff]  ;;  %v8617_v14 = vpop.permute.xlu0 %3648 }
 0x775   : > { %v3357_v57 = vmul.f32 %v8444_v31, %v3325_v48  ;;  %v3307_v31 = vld [vmem:[#allocation3 + $0x8] sm:$0xff]  ;;  %v3694_v48 = vmul.f32 %v3549_v25, %v3502_v12 }
 0x778   : > { %v8632_v27 = vpop.permute.xlu0 %3568 }
 0x77b   : > { %v3403_v38 = vpop.xlane.xlu1 %3402 }
 0x77c   : > { %v3450_v59 = vadd.f32 %v3403_v38, %v3354_v16  ;;  %v3691_v16 = vmul.f32 %v8559_v0, %v3499_v53  ;;  %v3339_v0 = vmul.f32 %v8434_v61, %v3307_v31 }
 0x77e   : > { %3483 = vst.msk [vmem:[#allocation3 + $0x80] sm:$0xff] %vm3466_vm2, %v3450_v59  ;;  %3598 = vperm.xlu0 %5870, %v8608_v52  }
 0x78f   : > { %v3409_v58 = vpop.xlane.xlu1 %3408 }
 0x790   : > { %v3453_v23 = vadd.f32 %v3409_v58, %v3357_v57  ;;  %v3692_v58 = vmul.f32 %v3539_v37, %v3500_v47  ;;  %v3329_v37 = vld [vmem:[#allocation3 + $0xb8] sm:$0xff] }
 0x792   : > { %3486 = vst.msk [vmem:[#allocation3 + $0x98] sm:$0xff] %vm3466_vm2, %v3453_v23 }
 0x793   : > { %v5483_v38 = vpop.f32.mrb[16].mxu1  ;;  %v3377_v59 = vpop.xlane.xlu1 %3376 }
 0x794   : > { %v8623_v45 = vadd.f32 %v5483_v38, %v3693_v21  ;;  %v3437_v52 = vadd.f32 %v3377_v59, %v3341_v33  ;;  %v3853_v57 = vpop.f32.mrb[17].mxu1  ;;  %v8641_v21 = vpop.permute.xlu0 %3668  ;;  %v3327_v38 = vld [vmem:[#allocation3 + $0xa8] sm:$0xff] }
 0x795   : > { %v8625_v17 = vadd.f32 %v3853_v57, %v3691_v16  ;;  %v5484_v35 = vpop.f32.mrb[18].mxu1  ;;  %v3359_v31 = vmul.f32 %v8449_v40, %v3327_v38  ;;  %v3311_v57 = vld [vmem:[#allocation3 + $0x28] sm:$0xff] }
 0x796   : > { %4095 = vst [vmem:[#allocation4 + $0x10] sm:$0xff] %v8623_v45  ;;  %3470 = vst.msk [vmem:[#allocation3 + $0x18] sm:$0xff] %vm3466_vm2, %v3437_v52  ;;  %v8629_v42 = vadd.f32 %v5484_v35, %v3694_v48  ;;  %v3856_v44 = vpop.f32.mrb[19].mxu1  ;;  %v3361_v35 = vmul.f32 %v8498_v50, %v3329_v37  ;;  %v3313_v52 = vld [vmem:[#allocation3 + $0x38] sm:$0xff] }
 0x797   : > { %4093 = vst [vmem:[#allocation4] sm:$0xff] %v8625_v17  ;;  %v8635_v25 = vadd.f32 %v3856_v44, %v3692_v58  ;;  %v3373_v10 = vpop.xlane.xlu1 %3372  ;;  %v3345_v33 = vmul.f32 %v8512_v11, %v3313_v52  ;;  %v3333_v11 = vld [vmem:[#allocation3 + $0xd8] sm:$0xff] }
 0x798   : > { %4096 = vst [vmem:[#allocation4 + $0x18] sm:$0xff] %v8629_v42  ;;  %v3435_v53 = vadd.f32 %v3373_v10, %v3339_v0  ;;  %v8647_v48 = vpop.permute.xlu0 %3588  ;;  %v3343_v0 = vmul.f32 %v8484_v19, %v3311_v57  ;;  %v3365_v40 = vmul.f32 %v8529_v63, %v3333_v11  ;;  %v3324_v57 = vld [vmem:[#allocation3 + $0x90] sm:$0xff] }
 0x799   : > { %v4176_v23 = vld [vmem:[#allocation3 + $0x98] sm:$0xff]  ;;  %4094 = vst [vmem:[#allocation4 + $0x8] sm:$0xff] %v8635_v25  ;;  %v3308_v11 = vld [vmem:[#allocation3 + $0x10] sm:$0xff] }
 0x79a   : > { %6056 = vrcp.f32 %v4176_v23  ;;  %3468 = vst.msk [vmem:[#allocation3 + $0x8] sm:$0xff] %vm3466_vm2, %v3435_v53 }
 0x79b   : > { %v3417_v61 = vpop.xlane.xlu1 %3416 }
 0x79c   : > { %v3457_v12 = vadd.f32 %v3417_v61, %v3361_v35  ;;  %v8651_v23 = vpop.permute.xlu0 %3658  ;;  %v3317_v61 = vld [vmem:[#allocation3 + $0x58] sm:$0xff] }
 0x79d   : > { %v4160_v47 = vld [vmem:[#allocation3 + $0x18] sm:$0xff] }
 0x79e   : > { %6058 = vrcp.f32 %v4160_v47  ;;  %3490 = vst.msk [vmem:[#allocation3 + $0xb8] sm:$0xff] %vm3466_vm2, %v3457_v12  ;;  %v3349_v12 = vmul.f32 %v8537_v13, %v3317_v61  ;;  %v3306_v61 = vld [vmem:[#allocation3] sm:$0xff] }
 0x79f   : > { %v3385_v16 = vpop.xlane.xlu1 %3384 }
 0x7a0   : > { %v3441_v59 = vadd.f32 %v3385_v16, %v3345_v33  ;;  %v8657_v47 = vpop.permute.xlu0 %3578  ;;  %v3331_v33 = vld [vmem:[#allocation3 + $0xc8] sm:$0xff] }
 0x7a1   : > { %v3363_v38 = vmul.f32 %v8541_v28, %v3331_v33  ;;  %v3505_v28 = vld [vmem:[#allocation4 + $0x30] sm:$0xff] }
 0x7a2   : > { %3474 = vst.msk [vmem:[#allocation3 + $0x38] sm:$0xff] %vm3466_vm2, %v3441_v59 }
 0x7a3   : > { %v3413_v50 = vpop.xlane.xlu1 %3412 }
 0x7a4   : > { %v6057_v58 = vpop.eup %6056  ;;  %v3455_v44 = vadd.f32 %v3413_v50, %v3359_v31  ;;  %v3315_v31 = vld [vmem:[#allocation3 + $0x48] sm:$0xff]  ;;  %v8661_v63 = vpop.permute.xlu0 %3678 }
 0x7a5   : > { %4382 = vperm.xlu0 %5870, %v6057_v58   ;;  %v3347_v58 = vmul.f32 %v8546_v56, %v3315_v31  ;;  %v3697_v56 = vmul.f32 %v8579_v41, %v3505_v28  ;;  %v3507_v28 = vld [vmem:[#allocation4 + $0x40] sm:$0xff] }
 0x7a6   : > { %3488 = vst.msk [vmem:[#allocation3 + $0xa8] sm:$0xff] %vm3466_vm2, %v3455_v44 }
 0x7a7   : > { %v3381_v10 = vpop.xlane.xlu1 %3380 }
 0x7a8   : > { %v6059_v37 = vpop.eup %6058  ;;  %v3439_v53 = vadd.f32 %v3381_v10, %v3343_v0  ;;  %v3356_v0 = vmul.f32 %v8316_v1, %v3324_v57 }
 0x7a9   : > { %4302 = vperm.xlu0 %5870, %v6059_v37  }
 0x7aa   : > { %3472 = vst.msk [vmem:[#allocation3 + $0x28] sm:$0xff] %vm3466_vm2, %v3439_v53  ;;  %v3340_v53 = vmul.f32 %v8322_v32, %v3308_v11  ;;  %v3509_v11 = vld [vmem:[#allocation4 + $0x50] sm:$0xff] }
 0x7ab   : > { %v3425_v35 = vpop.xlane.xlu1 %3424 }
 0x7ac   : > { %v3461_v52 = vadd.f32 %v3425_v35, %v3365_v40  ;;  %v3503_v40 = vld [vmem:[#allocation4 + $0x20] sm:$0xff] }
 0x7ad   : > { %v3695_v1 = vmul.f32 %v8571_v6, %v3503_v40  ;;  %v3328_v40 = vld [vmem:[#allocation3 + $0xb0] sm:$0xff] }
 0x7ae   : > { %3494 = vst.msk [vmem:[#allocation3 + $0xd8] sm:$0xff] %vm3466_vm2, %v3461_v52  ;;  %v3506_v52 = vld [vmem:[#allocation4 + $0x38] sm:$0xff] }
 0x7af   : > { %v3393_v19 = vpop.xlane.xlu1 %3392 }
 0x7b0   : > { %v3445_v16 = vadd.f32 %v3393_v19, %v3349_v12  ;;  %v3504_v19 = vld [vmem:[#allocation4 + $0x28] sm:$0xff] }
 0x7b1   : > { %v3696_v57 = vmul.f32 %v8614_v24, %v3504_v19  ;;  %v3508_v19 = vld [vmem:[#allocation4 + $0x48] sm:$0xff] }
 0x7b2   : > { %3478 = vst.msk [vmem:[#allocation3 + $0x58] sm:$0xff] %vm3466_vm2, %v3445_v16  ;;  %v3338_v16 = vmul.f32 %v8309_v49, %v3306_v61  ;;  %v3510_v61 = vld [vmem:[#allocation4 + $0x58] sm:$0xff] }
 0x7b3   : > { %v3421_v59 = vpop.xlane.xlu1 %3420 }
 0x7b4   : > { %v3459_v50 = vadd.f32 %v3421_v59, %v3363_v38  ;;  %v3698_v38 = vmul.f32 %v8632_v27, %v3506_v52  ;;  %v5922_v27 = vld [vmem:[#allocation15 + $0x48] sm:$0xff]  }
 0x7b6   : > { %3492 = vst.msk [vmem:[#allocation3 + $0xc8] sm:$0xff] %vm3466_vm2, %v3459_v50  ;;  %v3323_v50 = vld [vmem:[#allocation3 + $0x88] sm:$0xff] }
 0x7b7   : > { %v3389_v13 = vpop.xlane.xlu1 %3388 }
 0x7b8   : > { %v3443_v44 = vadd.f32 %v3389_v13, %v3347_v58 }
 0x7b9   : > { %v3407_v10 = vpop.xlane.xlu0 %3406 }
 0x7ba   : > { %3476 = vst.msk [vmem:[#allocation3 + $0x48] sm:$0xff] %vm3466_vm2, %v3443_v44  ;;  %v3452_v37 = vadd.f32 %v3407_v10, %v3356_v0  ;;  %v5920_v44 = vld [vmem:[#allocation15 + $0x40] sm:$0xff]  }
 0x7bb   : > { %v5921_v10 = vld [vmem:[#allocation15] sm:$0xff]   ;;  %5209 = vmatprep.subr.bf16.mxu0 %v5920_v44 }
 0x7bc   : > { %3485 = vst.msk [vmem:[#allocation3 + $0x90] sm:$0xff] %vm3466_vm2, %v3452_v37  ;;  %v3355_v37 = vmul.f32 %v8302_v46, %v3323_v50  ;;  %5210 = vmatpush3.bf16.msra.mxu0 %v5921_v10  ;;  %v3699_v46 = vmul.f32 %v8592_v3, %v3507_v28 }
 0x7bd   : > { %v3375_v35 = vpop.xlane.xlu0 %3374  ;;  %5211 = vmatprep.subr.bf16.mxu0 %v5922_v27  ;;  %v3511_v27 = vld [vmem:[#allocation4 + $0x60] sm:$0xff] }
 0x7be   : > { %v3436_v12 = vadd.f32 %v3375_v35, %v3340_v53  ;;  %v5923_v35 = vld [vmem:[#allocation15 + $0x8] sm:$0xff]  }
 0x7c0   : > { %3469 = vst.msk [vmem:[#allocation3 + $0x10] sm:$0xff] %vm3466_vm2, %v3436_v12  ;;  %v5487_v33 = vpop.f32.mrb[20].mxu1  ;;  %v5924_v12 = vld [vmem:[#allocation15 + $0x50] sm:$0xff]   ;;  %5212 = vmatpush3.bf16.msra.mxu0 %v5923_v35 }
 0x7c1   : > { %v8674_v59 = vadd.f32 %v5487_v33, %v3697_v56  ;;  %v3869_v32 = vpop.f32.mrb[21].mxu1  ;;  %v3371_v31 = vpop.xlane.xlu0 %3370  ;;  %v3701_v56 = vmul.f32 %v8586_v60, %v3509_v11  ;;  %v5925_v60 = vld [vmem:[#allocation15 + $0x10] sm:$0xff]   ;;  %5213 = vmatprep.subr.bf16.mxu0 %v5924_v12  ;;  %v4158_v12 = vld [vmem:[#allocation3 + $0x8] sm:$0xff] }
 0x7c2   : > { %v8677_v58 = vadd.f32 %v3869_v32, %v3695_v1  ;;  %v3434_v41 = vadd.f32 %v3371_v31, %v3338_v16  ;;  %v5488_v13 = vpop.f32.mrb[22].mxu1  ;;  %v3360_v16 = vmul.f32 %v8340_v2, %v3328_v40  ;;  %v3702_v32 = vmul.f32 %v8647_v48, %v3510_v61  ;;  %v5926_v40 = vld [vmem:[#allocation15 + $0x58] sm:$0xff]  }
 0x7c3   : > { %v4175_v6 = vld [vmem:[#allocation3 + $0x90] sm:$0xff]  ;;  %4099 = vst [vmem:[#allocation4 + $0x30] sm:$0xff] %v8674_v59  ;;  %v8680_v0 = vadd.f32 %v5488_v13, %v3698_v38  ;;  %v3872_v49 = vpop.f32.mrb[23].mxu1  ;;  %v4173_v38 = vld [vmem:[#allocation3 + $0x80] sm:$0xff]  ;;  %v3700_v13 = vmul.f32 %v8657_v47, %v3508_v19  ;;  %v5927_v61 = vld [vmem:[#allocation15 + $0x18] sm:$0xff]  }
 0x7c4   : > { %6060 = vrcp.f32 %v4175_v6  ;;  %4097 = vst [vmem:[#allocation4 + $0x20] sm:$0xff] %v8677_v58  ;;  %3467 = vst.msk [vmem:[#allocation3] sm:$0xff] %vm3466_vm2, %v3434_v41  ;;  %v8684_v24 = vadd.f32 %v3872_v49, %v3696_v57  ;;  %v3312_v41 = vld [vmem:[#allocation3 + $0x30] sm:$0xff]  ;;  %5214 = vmatpush3.bf16.msra.mxu0 %v5925_v60 }
 0x7c5   : > { %4100 = vst [vmem:[#allocation4 + $0x38] sm:$0xff] %v8680_v0  ;;  %v3405_v53 = vpop.xlane.xlu0 %3404  ;;  %v3344_v47 = vmul.f32 %v8346_v39, %v3312_v41  ;;  %5215 = vmatprep.subr.bf16.mxu0 %v5926_v40  ;;  %v5929_v41 = vld [vmem:[#allocation15 + $0x20] sm:$0xff]   ;;  %v3517_v60 = vld [vmem:[#allocation4 + $0x90] sm:$0xff]  ;;  %v3516_v40 = vld [vmem:[#allocation4 + $0x88] sm:$0xff] }
 0x7c6   : > { %4098 = vst [vmem:[#allocation4 + $0x28] sm:$0xff] %v8684_v24  ;;  %v3451_v52 = vadd.f32 %v3405_v53, %v3355_v37  ;;  %v3326_v37 = vld [vmem:[#allocation3 + $0xa0] sm:$0xff] }
 0x7c7   : > { %v4159_v1 = vld [vmem:[#allocation3 + $0x10] sm:$0xff] }
 0x7c8   : > { %6062 = vrcp.f32 %v4159_v1  ;;  %3484 = vst.msk [vmem:[#allocation3 + $0x88] sm:$0xff] %vm3466_vm2, %v3451_v52  ;;  %v5491_v33 = vpop.f32.mrb[24].mxu1  ;;  %v3703_v52 = vmul.f32 %v8603_v29, %v3511_v27  ;;  %5216 = vmatpush3.bf16.msra.mxu0 %v5927_v61  ;;  %v5928_v29 = vld [vmem:[#allocation15 + $0x60] sm:$0xff]  }
 0x7c9   : > { %v8694_v31 = vadd.f32 %v5491_v33, %v3701_v56  ;;  %v3885_v50 = vpop.f32.mrb[25].mxu1  ;;  %v3415_v57 = vpop.xlane.xlu0 %3414  ;;  %6064 = vrcp.f32 %v4173_v38  ;;  %v3358_v56 = vmul.f32 %v8328_v62, %v3326_v37  ;;  %v4180_v62 = vld [vmem:[#allocation3 + $0xb8] sm:$0xff]  ;;  %5217 = vmatprep.subr.bf16.mxu0 %v5928_v29 }
 0x7ca   : > { %v8697_v44 = vadd.f32 %v3885_v50, %v3699_v46  ;;  %v3456_v3 = vadd.f32 %v3415_v57, %v3360_v16  ;;  %v5492_v6 = vpop.f32.mrb[26].mxu1  ;;  %v3310_v46 = vld [vmem:[#allocation3 + $0x20] sm:$0xff]  ;;  %v3518_v37 = vld [vmem:[#allocation4 + $0x98] sm:$0xff] }
 0x7cb   : > { %4103 = vst [vmem:[#allocation4 + $0x50] sm:$0xff] %v8694_v31  ;;  %v8700_v2 = vadd.f32 %v5492_v6, %v3702_v32  ;;  %v3888_v49 = vpop.f32.mrb[27].mxu1  ;;  %v4157_v48 = vld [vmem:[#allocation3] sm:$0xff] }
 0x7cc   : > { %4101 = vst [vmem:[#allocation4 + $0x40] sm:$0xff] %v8697_v44  ;;  %3489 = vst.msk [vmem:[#allocation3 + $0xb0] sm:$0xff] %vm3466_vm2, %v3456_v3  ;;  %v8704_v10 = vadd.f32 %v3888_v49, %v3700_v13  ;;  %6066 = vrcp.f32 %v4157_v48  ;;  %v3342_v13 = vmul.f32 %v8334_v8, %v3310_v46  ;;  %v3515_v3 = vld [vmem:[#allocation4 + $0x80] sm:$0xff]  ;;  %v3332_v49 = vld [vmem:[#allocation3 + $0xd0] sm:$0xff]  ;;  %5218 = vmatpush3.bf16.msra.mxu0 %v5929_v41 }
 0x7cd   : > { %4104 = vst [vmem:[#allocation4 + $0x58] sm:$0xff] %v8700_v2  ;;  %v3383_v11 = vpop.xlane.xlu0 %3382  ;;  %v5931_v8 = vld [vmem:[#allocation15 + $0x28] sm:$0xff]   ;;  %v9351_v46 = vld [vmem:[#allocation101_spill] sm:$0xff] }
 0x7ce   : > { %v6061_v28 = vpop.eup %6060  ;;  %4102 = vst [vmem:[#allocation4 + $0x48] sm:$0xff] %v8704_v10  ;;  %v3440_v53 = vadd.f32 %v3383_v11, %v3344_v47  ;;  %v9348_v47 = vld [vmem:[#allocation104_spill] sm:$0xff] }
 0x7cf   : > { %v4174_v35 = vld [vmem:[#allocation3 + $0x88] sm:$0xff]  ;;  %4377 = vperm.xlu1 %5871, %v6061_v28   ;;  %v9349_v27 = vsub.f32 %v9348_v47, %v8258_v36  ;;  %v3364_v36 = vmul.f32 %v8352_v43, %v3332_v49  ;;  %v5933_v47 = vld [vmem:[#allocation15 + $0x30] sm:$0xff]  }
 0x7d0   : > { %6068 = vrcp.f32 %v4174_v35  ;;  %3473 = vst.msk [vmem:[#allocation3 + $0x30] sm:$0xff] %vm3466_vm2, %v3440_v53  ;;  %v8711_v39 = vpop.f32.mrb[28].mxu1  ;;  %v5930_v53 = vld [vmem:[#allocation15 + $0x68] sm:$0xff]   ;;  %v3709_v35 = vmul.f32 %v8563_v9, %v3517_v60  ;;  %v3710_v9 = vmul.f32 %v8605_v5, %v3518_v37 }
 0x7d1   : > { %v3901_v19 = vpop.f32.mrb[29].mxu1  ;;  %v3411_v1 = vpop.xlane.xlu0 %3410  ;;  %6070 = vrcp.f32 %v4158_v12  ;;  %v3046_v11 = vmul.f32 1.442695, %v9349_v27  ;;  %v4164_v12 = vld [vmem:[#allocation3 + $0x38] sm:$0xff]  ;;  %5219 = vmatprep.subr.bf16.mxu0 %v5930_v53  ;;  %v3521_v27 = vld [vmem:[#allocation4 + $0xb0] sm:$0xff]  ;;  %v4178_v37 = vld [vmem:[#allocation3 + $0xa8] sm:$0xff] }
 0x7d2   : > { %v6063_v33 = vpop.eup %6062  ;;  %v8714_v16 = vadd.f32 %v3901_v19, %v3703_v52  ;;  %v3454_v38 = vadd.f32 %v3411_v1, %v3358_v56  ;;  %v8716_v32 = vpop.f32.mrb[30].mxu1  ;;  %v3707_v52 = vmul.f32 %v8595_v4, %v3515_v3  ;;  %v9350_v1 = vld [vmem:[#allocation100_spill] sm:$0xff]  ;;  %5220 = vmatpush3.bf16.msra.mxu0 %v5931_v8  ;;  %v3519_v53 = vld [vmem:[#allocation4 + $0xa0] sm:$0xff]  ;;  %v9353_v8 = vld [vmem:[#allocation105_spill] sm:$0xff] }
 0x7d3   : > { %v4179_v50 = vld [vmem:[#allocation3 + $0xb0] sm:$0xff]  ;;  %v8718_v57 = vpop.f32.mrb[31].mxu1  ;;  %4297 = vperm.xlu1 %5871, %v6063_v33   ;;  %v6065_v48 = vpop.eup %6064  ;;  %v9352_v33 = vsub.f32 %v9350_v1, %v9351_v46  ;;  %v5935_v46 = vld [vmem:[#allocation15 + $0x38] sm:$0xff]  }
 0x7d4   : > { %6072 = vrcp.f32 %v4179_v50  ;;  %4105 = vst [vmem:[#allocation4 + $0x60] sm:$0xff] %v8714_v16  ;;  %3487 = vst.msk [vmem:[#allocation3 + $0xa0] sm:$0xff] %vm3466_vm2, %v3454_v38  ;;  %v3316_v4 = vld [vmem:[#allocation3 + $0x50] sm:$0xff] }
 0x7d5   : > { %v3379_v6 = vpop.xlane.xlu0 %3378  ;;  %6074 = vrcp.f32 %v4180_v62  ;;  %v3014_v38 = vmul.f32 1.442695, %v9352_v33  ;;  %v3708_v62 = vmul.f32 %v8556_v18, %v3516_v40  ;;  %v3711_v33 = vmul.f32 %v8569_v30, %v3519_v53 }
 0x7d6   : > { %v3438_v28 = vadd.f32 %v3379_v6, %v3342_v13  ;;  %v6067_v19 = vpop.eup %6066  ;;  %v5932_v6 = vld [vmem:[#allocation15 + $0x70] sm:$0xff]  }
 0x7d7   : > { %v4163_v61 = vld [vmem:[#allocation3 + $0x30] sm:$0xff]  ;;  %4367 = vperm.xlu1 %5871, %v6065_v48   ;;  %5221 = vmatprep.subr.bf16.mxu0 %v5932_v6 }
 0x7d8   : > { %6076 = vrcp.f32 %v4163_v61  ;;  %3471 = vst.msk [vmem:[#allocation3 + $0x20] sm:$0xff] %vm3466_vm2, %v3438_v28  ;;  %v5515_v56 = vpop.f32.mrb[32].mxu1  ;;  %5222 = vmatpush3.bf16.msra.mxu0 %v5933_v47 }
 0x7d9   : > { %v8734_v29 = vadd.f32 %v5515_v56, %v3709_v35  ;;  %v3998_v50 = vpop.f32.mrb[33].mxu1  ;;  %v3423_v41 = vpop.xlane.xlu0 %3422  ;;  %6078 = vpow2.f32 %v3046_v11  ;;  %v3348_v11 = vmul.f32 %v8358_v15, %v3316_v4  ;;  %v3330_v35 = vld [vmem:[#allocation3 + $0xc0] sm:$0xff]  ;;  %v3713_v15 = vmul.f32 %v8575_v34, %v3521_v27 }
 0x7da   : > { %v6069_v60 = vpop.eup %6068  ;;  %v8737_v13 = vadd.f32 %v3998_v50, %v3707_v52  ;;  %v3460_v43 = vadd.f32 %v3423_v41, %v3364_v36  ;;  %v5516_v3 = vpop.f32.mrb[34].mxu1  ;;  %6080 = vrcp.f32 %v4164_v12  ;;  %v2985_v52 = vsub.f32 %v9353_v8, %v8269_v22  ;;  %v3522_v12 = vld [vmem:[#allocation4 + $0xb8] sm:$0xff] }
 0x7db   : > { %v4177_v49 = vld [vmem:[#allocation3 + $0xa0] sm:$0xff]  ;;  %4111 = vst [vmem:[#allocation4 + $0x90] sm:$0xff] %v8734_v29  ;;  %v8740_v5 = vadd.f32 %v5516_v3, %v3710_v9  ;;  %v4001_v48 = vpop.f32.mrb[35].mxu1  ;;  %4287 = vperm.xlu1 %5871, %v6067_v19   ;;  %4372 = vperm.xlu0 %5870, %v6069_v60   ;;  %v6071_v28 = vpop.eup %6070  ;;  %v5934_v36 = vld [vmem:[#allocation15 + $0x78] sm:$0xff]   ;;  %v3520_v19 = vld [vmem:[#allocation4 + $0xa8] sm:$0xff]  ;;  %v3714_v41 = vmul.f32 %v8617_v14, %v3522_v12 }
 0x7dc   : > { %6082 = vrcp.f32 %v4177_v49  ;;  %4109 = vst [vmem:[#allocation4 + $0x80] sm:$0xff] %v8737_v13  ;;  %3493 = vst.msk [vmem:[#allocation3 + $0xd0] sm:$0xff] %vm3466_vm2, %v3460_v43  ;;  %v8744_v18 = vadd.f32 %v4001_v48, %v3708_v62  ;;  %v4162_v9 = vld [vmem:[#allocation3 + $0x28] sm:$0xff]  ;;  %5223 = vmatprep.subr.bf16.mxu0 %v5934_v36  ;;  %v3314_v62 = vld [vmem:[#allocation3 + $0x40] sm:$0xff]  ;;  %v3048_v3 = vmul.f32 1.442695, %v2985_v52  ;;  %v3712_v30 = vmul.f32 %v8612_v20, %v3520_v19 }
 0x7dd   : > { %4112 = vst [vmem:[#allocation4 + $0x98] sm:$0xff] %v8740_v5  ;;  %v3391_v40 = vpop.xlane.xlu0 %3390  ;;  %6084 = vpow2.f32 %v3014_v38  ;;  %v3362_v38 = vmul.f32 %v8364_v26, %v3330_v35  ;;  %5224 = vmatpush3.bf16.msra.mxu0 %v5935_v46  ;;  %v9354_v52 = vld [vmem:[#allocation102_spill] sm:$0xff]  ;;  %v9355_v12 = vld [vmem:[#allocation103_spill] sm:$0xff] }
 0x7de   : > { %v6073_v61 = vpop.eup %6072  ;;  %4110 = vst [vmem:[#allocation4 + $0x88] sm:$0xff] %v8744_v18  ;;  %v3444_v56 = vadd.f32 %v3391_v40, %v3348_v11  ;;  %6086 = vrcp.f32 %v4178_v37  ;;  %v3525_v37 = vld [vmem:[#allocation4 + $0xd0] sm:$0xff]  ;;  %v4184_v11 = vld [vmem:[#allocation3 + $0xd8] sm:$0xff]  ;;  %v3523_v40 = vld [vmem:[#allocation4 + $0xc0] sm:$0xff] }
 0x7df   : > { %v4161_v1 = vld [vmem:[#allocation3 + $0x20] sm:$0xff]  ;;  %4397 = vperm.xlu1 %5871, %v6073_v61   ;;  %4292 = vperm.xlu0 %5870, %v6071_v28   ;;  %v6075_v50 = vpop.eup %6074  ;;  %v3346_v28 = vmul.f32 %v8368_v55, %v3314_v62  ;;  %v3336_v61 = vld [vmem:[#allocation3 + $0xf0] sm:$0xff]  ;;  %v3524_v46 = vld [vmem:[#allocation4 + $0xc8] sm:$0xff] }
 0x7e0   : > { %6088 = vrcp.f32 %v4161_v1  ;;  %3477 = vst.msk [vmem:[#allocation3 + $0x50] sm:$0xff] %vm3466_vm2, %v3444_v56  ;;  %v5519_v22 = vpop.f32.mrb[36].mxu1  ;;  %v9356_v56 = vsub.f32 %v9354_v52, %v9355_v12  ;;  %v3717_v1 = vmul.f32 %v8583_v54, %v3525_v37  ;;  %v4182_v37 = vld [vmem:[#allocation3 + $0xc8] sm:$0xff] }
 0x7e1   : > { %v8756_v34 = vadd.f32 %v5519_v22, %v3713_v15  ;;  %v4014_v4 = vpop.f32.mrb[37].mxu1  ;;  %v3419_v60 = vpop.xlane.xlu0 %3418  ;;  %6090 = vrcp.f32 %v4162_v9  ;;  %v3526_v15 = vld [vmem:[#allocation4 + $0xd8] sm:$0xff]  ;;  %v3715_v9 = vmul.f32 %v8589_v7, %v3523_v40  ;;  %v3334_v40 = vld [vmem:[#allocation3 + $0xe0] sm:$0xff] }
 0x7e2   : > { %v6077_v43 = vpop.eup %6076  ;;  %v8759_v6 = vadd.f32 %v4014_v4, %v3711_v33  ;;  %v3458_v49 = vadd.f32 %v3419_v60, %v3362_v38  ;;  %v5520_v48 = vpop.f32.mrb[38].mxu1  ;;  %v3016_v36 = vmul.f32 1.442695, %v9356_v56  ;;  %v4168_v22 = vld [vmem:[#allocation3 + $0x58] sm:$0xff]  ;;  %v3718_v4 = vmul.f32 %v8641_v21, %v3526_v15 }
 0x7e3   : > { %v4183_v26 = vld [vmem:[#allocation3 + $0xd0] sm:$0xff]  ;;  %4115 = vst [vmem:[#allocation4 + $0xb0] sm:$0xff] %v8756_v34  ;;  %v8762_v47 = vadd.f32 %v5520_v48, %v3714_v41  ;;  %v4017_v14 = vpop.f32.mrb[39].mxu1  ;;  %4317 = vperm.xlu1 %5871, %v6077_v43   ;;  %4402 = vperm.xlu0 %5870, %v6075_v50   ;;  %v8764_v27 = vpop.eup %6078  ;;  %v3366_v12 = vmul.f32 %v8373_v51, %v3334_v40  ;;  %v3321_v51 = vld [vmem:[#allocation3 + $0x78] sm:$0xff] }
 0x7e4   : > { %6092 = vrcp.f32 %v4183_v26  ;;  %4113 = vst [vmem:[#allocation4 + $0xa0] sm:$0xff] %v8759_v6  ;;  %3491 = vst.msk [vmem:[#allocation3 + $0xc0] sm:$0xff] %vm3466_vm2, %v3458_v49  ;;  %v8768_v20 = vadd.f32 %v4017_v14, %v3712_v30  ;;  %v6081_v53 = vpop.eup %6080  ;;  %v3368_v50 = vmul.f32 %v8764_v27, %v3336_v61  ;;  %v3320_v43 = vld [vmem:[#allocation3 + $0x70] sm:$0xff]  ;;  %v3716_v30 = vmul.f32 %v8651_v23, %v3524_v46 }
 0x7e5   : > { %4116 = vst [vmem:[#allocation4 + $0xb8] sm:$0xff] %v8762_v47  ;;  %v3387_v35 = vpop.xlane.xlu0 %3386  ;;  %6094 = vpow2.f32 %v3048_v3 }
 0x7e6   : > { %v6083_v8 = vpop.eup %6082  ;;  %4114 = vst [vmem:[#allocation4 + $0xa8] sm:$0xff] %v8768_v20  ;;  %v3442_v19 = vadd.f32 %v3387_v35, %v3346_v28  ;;  %6096 = vrcp.f32 %v4184_v11 }
 0x7e7   : > { %v4167_v55 = vld [vmem:[#allocation3 + $0x50] sm:$0xff]  ;;  %4387 = vperm.xlu1 %5871, %v6083_v8   ;;  %4322 = vperm.xlu0 %5870, %v6081_v53   ;;  %v8777_v33 = vpop.eup %6084 }
 0x7e8   : > { %6098 = vrcp.f32 %v4167_v55  ;;  %3475 = vst.msk [vmem:[#allocation3 + $0x40] sm:$0xff] %vm3466_vm2, %v3442_v19  ;;  %v5523_v38 = vpop.f32.mrb[40].mxu1  ;;  %v6087_v41 = vpop.eup %6086  ;;  %v3352_v11 = vmul.f32 %v8777_v33, %v3320_v43  ;;  %v3318_v19 = vld [vmem:[#allocation3 + $0x60] sm:$0xff] }
 0x7e9   : > { %v8783_v54 = vadd.f32 %v5523_v38, %v3717_v1  ;;  %v4030_v60 = vpop.f32.mrb[41].mxu1  ;;  %v3431_v62 = vpop.xlane.xlu0 %3430  ;;  %6100 = vpow2.f32 %v3016_v36  ;;  %v4166_v36 = vld [vmem:[#allocation3 + $0x48] sm:$0xff]  ;;  %v3337_v1 = vld [vmem:[#allocation3 + $0xf8] sm:$0xff] }
 0x7ea   : > { %v6089_v3 = vpop.eup %6088  ;;  %v8786_v7 = vadd.f32 %v4030_v60, %v3715_v9  ;;  %v3464_v49 = vadd.f32 %v3431_v62, %v3368_v50  ;;  %v5524_v48 = vpop.f32.mrb[42].mxu1  ;;  %6102 = vrcp.f32 %v4168_v22  ;;  %v9357_v22 = vld [vmem:[#allocation106_spill] sm:$0xff] }
 0x7eb   : > { %v4181_v26 = vld [vmem:[#allocation3 + $0xc0] sm:$0xff]  ;;  %4119 = vst [vmem:[#allocation4 + $0xd0] sm:$0xff] %v8783_v54  ;;  %v8789_v14 = vadd.f32 %v5524_v48, %v3718_v4  ;;  %v4033_v21 = vpop.f32.mrb[43].mxu1  ;;  %4307 = vperm.xlu1 %5871, %v6089_v3   ;;  %4392 = vperm.xlu0 %5870, %v6087_v41   ;;  %v6091_v28 = vpop.eup %6090  ;;  %v3350_v38 = vmul.f32 %v9357_v22, %v3318_v19 }
 0x7ec   : > { %6104 = vrcp.f32 %v4181_v26  ;;  %4117 = vst [vmem:[#allocation4 + $0xc0] sm:$0xff] %v8786_v7  ;;  %3497 = vst.msk [vmem:[#allocation3 + $0xf0] sm:$0xff] %vm3466_vm2, %v3464_v49  ;;  %v8793_v23 = vadd.f32 %v4033_v21, %v3716_v30  ;;  %v3335_v26 = vld [vmem:[#allocation3 + $0xe8] sm:$0xff] }
 0x7ed   : > { %4120 = vst [vmem:[#allocation4 + $0xd8] sm:$0xff] %v8789_v14  ;;  %v3399_v53 = vpop.xlane.xlu0 %3398  ;;  %6106 = vrcp.f32 %v4182_v37 }
 0x7ee   : > { %v6093_v35 = vpop.eup %6092  ;;  %4118 = vst [vmem:[#allocation4 + $0xc8] sm:$0xff] %v8793_v23  ;;  %v3448_v61 = vadd.f32 %v3399_v53, %v3352_v11  ;;  %v9358_v53 = vld [vmem:[#allocation72_spill] sm:$0xff] }
 0x7ef   : > { %v4165_v8 = vld [vmem:[#allocation3 + $0x40] sm:$0xff]  ;;  %4417 = vperm.xlu1 %5871, %v6093_v35   ;;  %4312 = vperm.xlu0 %5870, %v6091_v28   ;;  %v6095_v52 = vpop.eup %6094  ;;  %v3512_v28 = vld [vmem:[#allocation4 + $0x68] sm:$0xff]  ;;  %v3367_v40 = vmul.f32 %v9358_v53, %v3335_v26 }
 0x7f0   : > { %6108 = vrcp.f32 %v4165_v8  ;;  %3481 = vst.msk [vmem:[#allocation3 + $0x70] sm:$0xff] %vm3466_vm2, %v3448_v61  ;;  %v6097_v56 = vpop.eup %6096  ;;  %v3369_v50 = vmul.f32 %v6095_v52, %v3337_v1  ;;  %v3319_v8 = vld [vmem:[#allocation3 + $0x68] sm:$0xff]  ;;  %v9359_v1 = vld [vmem:[#allocation94_spill] sm:$0xff] }
 0x7f1   : > { %v3427_v15 = vpop.xlane.xlu0 %3426  ;;  %6110 = vrcp.f32 %v4166_v36 }
 0x7f2   : > { %v6099_v46 = vpop.eup %6098  ;;  %v3462_v55 = vadd.f32 %v3427_v15, %v3366_v12 }
 0x7f3   : > { %4337 = vperm.xlu1 %5871, %v6099_v46   ;;  %4422 = vperm.xlu0 %5870, %v6097_v56   ;;  %v6101_v9 = vpop.eup %6100  ;;  %v3351_v46 = vmul.f32 %v9359_v1, %v3319_v8 }
 0x7f4   : > { %3495 = vst.msk [vmem:[#allocation3 + $0xe0] sm:$0xff] %vm3466_vm2, %v3462_v55  ;;  %v6103_v41 = vpop.eup %6102  ;;  %v3353_v30 = vmul.f32 %v6101_v9, %v3321_v51  ;;  %v4187_v55 = vld [vmem:[#allocation3 + $0xf0] sm:$0xff] }
 0x7f5   : > { %v3395_v4 = vpop.xlane.xlu0 %3394  ;;  %v3433_v60 = vpop.xlane.xlu1 %3432 }
 0x7f6   : > { %v6105_v62 = vpop.eup %6104  ;;  %v3446_v43 = vadd.f32 %v3395_v4, %v3350_v38  ;;  %v3465_v3 = vadd.f32 %v3433_v60, %v3369_v50 }
 0x7f7   : > { %4407 = vperm.xlu1 %5871, %v6105_v62   ;;  %4342 = vperm.xlu0 %5870, %v6103_v41   ;;  %v6107_v49 = vpop.eup %6106  ;;  %v4171_v50 = vld [vmem:[#allocation3 + $0x70] sm:$0xff] }
 0x7f8   : > { %3479 = vst.msk [vmem:[#allocation3 + $0x60] sm:$0xff] %vm3466_vm2, %v3446_v43  ;;  %3498 = vst.msk [vmem:[#allocation3 + $0xf8] sm:$0xff] %vm3466_vm2, %v3465_v3 }
 0x7f9   : > { %v3401_v48 = vpop.xlane.xlu1 %3400 }
 0x7fa   : > { %v6109_v21 = vpop.eup %6108  ;;  %v3449_v37 = vadd.f32 %v3401_v48, %v3353_v30  ;;  %v3527_v30 = vld [vmem:[#allocation4 + $0xe0] sm:$0xff] }
 0x7fb   : > { %v4185_v11 = vld [vmem:[#allocation3 + $0xe0] sm:$0xff]  ;;  %4327 = vperm.xlu1 %5871, %v6109_v21   ;;  %4412 = vperm.xlu0 %5870, %v6107_v49   ;;  %v6111_v12 = vpop.eup %6110  ;;  %v3528_v49 = vld [vmem:[#allocation4 + $0xe8] sm:$0xff] }
 0x7fc   : > { %6112 = vrcp.f32 %v4185_v11  ;;  %3482 = vst.msk [vmem:[#allocation3 + $0x78] sm:$0xff] %vm3466_vm2, %v3449_v37  ;;  %v9360_v48 = vld [vmem:[#allocation82_spill] sm:$0xff]  ;;  %v3720_v11 = vmul.f32 %v8661_v63, %v3528_v49 }
 0x7fd   : > { %v3599_v35 = vpop.permute.xlu0 %3598  ;;  %v3429_v61 = vpop.xlane.xlu1 %3428  ;;  %v3719_v26 = vmul.f32 %v9360_v48, %v3527_v30 }
 0x7fe   : > { %v3704_v56 = vmul.f32 %v3599_v35, %v3512_v28  ;;  %v3463_v36 = vadd.f32 %v3429_v61, %v3367_v40 }
 0x7ff   : > { %v4169_v15 = vld [vmem:[#allocation3 + $0x60] sm:$0xff]  ;;  %3683 = vperm.xlu1 %5871, %v8764_v27   ;;  %4332 = vperm.xlu0 %5870, %v6111_v12   ;;  %v4188_v60 = vld [vmem:[#allocation3 + $0xf8] sm:$0xff] }
 0x800   : > { %6114 = vrcp.f32 %v4169_v15  ;;  %v8808_v19 = vadd.f32 %v8718_v57, %v3704_v56  ;;  %3496 = vst.msk [vmem:[#allocation3 + $0xe8] sm:$0xff] %vm3466_vm2, %v3463_v36 }
 0x801   : > { %v3397_v22 = vpop.xlane.xlu1 %3396  ;;  %6116 = vrcp.f32 %v4187_v55 }
 0x802   : > { %4106 = vst [vmem:[#allocation4 + $0x68] sm:$0xff] %v8808_v19  ;;  %v3447_v38 = vadd.f32 %v3397_v22, %v3351_v46  ;;  %6118 = vrcp.f32 %v4171_v50 }
 0x803   : > { %3603 = vperm.xlu1 %5871, %v8777_v33   ;;  %3688 = vperm.xlu0 %5870, %v6095_v52   ;;  %v4172_v52 = vld [vmem:[#allocation3 + $0x78] sm:$0xff] }
 0x804   : > { %3480 = vst.msk [vmem:[#allocation3 + $0x68] sm:$0xff] %vm3466_vm2, %v3447_v38 }
 0x806   : > { %v6113_v27 = vpop.eup %6112 }
 0x807   : > { %v4186_v57 = vld [vmem:[#allocation3 + $0xe8] sm:$0xff]  ;;  %4427 = vperm.xlu1 %5871, %v6113_v27   ;;  %3608 = vperm.xlu0 %5870, %v6101_v9  }
 0x808   : > { %6120 = vrcp.f32 %v4186_v57 }
 0x80a   : > { %v6115_v41 = vpop.eup %6114 }
 0x80b   : > { %v4170_v4 = vld [vmem:[#allocation3 + $0x68] sm:$0xff]  ;;  %4347 = vperm.xlu1 %5871, %v6115_v41   ;;  %v6117_v51 = vpop.eup %6116 }
 0x80c   : > { %6122 = vrcp.f32 %v4170_v4  ;;  %v6119_v33 = vpop.eup %6118 }
 0x80d   : > { %6124 = vrcp.f32 %v4188_v60 }
 0x80e   : > { %6126 = vrcp.f32 %v4172_v52 }
 0x80f   : > { %4437 = vperm.xlu1 %5871, %v6117_v51  }
 0x812   : > { %v6121_v62 = vpop.eup %6120 }
 0x813   : > { %4357 = vperm.xlu1 %5871, %v6119_v33   ;;  %4432 = vperm.xlu0 %5870, %v6121_v62  }
 0x816   : > { %v6123_v43 = vpop.eup %6122 }
 0x817   : > { %4352 = vperm.xlu0 %5870, %v6123_v43   ;;  %v6125_v3 = vpop.eup %6124 }
 0x818   : > { %v6127_v9 = vpop.eup %6126 }
 0x81b   : > { %4442 = vperm.xlu0 %5870, %v6125_v3  }
 0x81f   : > { %4362 = vperm.xlu0 %5870, %v6127_v9  }
 0x824   : > { %v4383_v8 = vpop.permute.xlu0 %4382 }
 0x825   : > { %v4464_v41 = vmul.f32 %v4383_v8, %v8740_v5 }
 0x828   : > { %v4303_v56 = vpop.permute.xlu0 %4302 }
 0x83d   : > { %v8816_v21 = vpop.f32.mrb[44].mxu1 }
 0x83e   : > { %v4046_v37 = vpop.f32.mrb[45].mxu1 }
 0x83f   : > { %v8819_v28 = vadd.f32 %v4046_v37, %v3719_v26  ;;  %v8821_v53 = vpop.f32.mrb[46].mxu1 }
 0x840   : > { %v4049_v40 = vpop.f32.mrb[47].mxu1 }
 0x841   : > { %4121 = vst [vmem:[#allocation4 + $0xe0] sm:$0xff] %v8819_v28  ;;  %v8824_v35 = vadd.f32 %v4049_v40, %v3720_v11 }
 0x843   : > { %4122 = vst [vmem:[#allocation4 + $0xe8] sm:$0xff] %v8824_v35 }
 0x84e   : > { %v4378_v61 = vpop.permute.xlu1 %4377 }
 0x84f   : > { %v4463_v22 = vmul.f32 %v4378_v61, %v8734_v29  ;;  %v4448_v29 = vmul.f32 %v4303_v56, %v8629_v42 }
 0x851   : > { %v4494_v60 = vpack.c.bf16 %v4464_v41, %v4463_v22  ;;  %v3530_v22 = vld [vmem:[#allocation4 + $0xf8] sm:$0xff] }
 0x852   : > { %v4298_v12 = vpop.permute.xlu1 %4297 }
 0x856   : > { %v4368_v36 = vpop.permute.xlu1 %4367 }
 0x857   : > { %v4461_v63 = vmul.f32 %v4368_v36, %v8737_v13  ;;  %v4447_v13 = vmul.f32 %v4298_v12, %v8623_v45 }
 0x859   : > { %v4478_v62 = vpack.c.bf16 %v4448_v29, %v4447_v13 }
 0x85a   : > { %v4373_v15 = vpop.permute.xlu0 %4372  ;;  %v4288_v1 = vpop.permute.xlu1 %4287 }
 0x85b   : > { %v4462_v46 = vmul.f32 %v4373_v15, %v8744_v18  ;;  %v4445_v27 = vmul.f32 %v4288_v1, %v8625_v17 }
 0x85d   : > { %v4493_v55 = vpack.c.bf16 %v4462_v46, %v4461_v63 }
 0x85e   : > { %v4293_v38 = vpop.permute.xlu0 %4292  ;;  %v4398_v50 = vpop.permute.xlu1 %4397 }
 0x85f   : > { %v4446_v57 = vmul.f32 %v4293_v38, %v8635_v25  ;;  %4692 = vmatprep.mubr.bf16.mxu0 %v4493_v55  ;;  %v4467_v42 = vmul.f32 %v4398_v50, %v8756_v34  ;;  %v3529_v34 = vld [vmem:[#allocation4 + $0xf0] sm:$0xff] }
 0x860   : > { %v3513_v38 = vld [vmem:[#allocation4 + $0x70] sm:$0xff] }
 0x861   : > { %v4477_v4 = vpack.c.bf16 %v4446_v57, %v4445_v27 }
 0x862   : > { %v4403_v51 = vpop.permute.xlu0 %4402  ;;  %v4318_v33 = vpop.permute.xlu1 %4317 }
 0x863   : > { %4693 = vmatmul.mubr.bf16.vlgmr.msra.gmra.mrb[16].mxu0 %v4477_v4  ;;  %v4468_v9 = vmul.f32 %v4403_v51, %v8762_v47  ;;  %v4451_v47 = vmul.f32 %v4318_v33, %v8674_v59 }
 0x864   : > { %4700 = vmatprep.mubr.bf16.mxu0 %v4494_v60 }
 0x865   : > { %v4496_v37 = vpack.c.bf16 %v4468_v9, %v4467_v42 }
 0x866   : > { %v4323_v18 = vpop.permute.xlu0 %4322  ;;  %v4388_v52 = vpop.permute.xlu1 %4387 }
 0x867   : > { %v4465_v25 = vmul.f32 %v4388_v52, %v8759_v6  ;;  %v4452_v6 = vmul.f32 %v4323_v18, %v8680_v0 }
 0x869   : > { %v4480_v8 = vpack.c.bf16 %v4452_v6, %v4451_v47 }
 0x86a   : > { %v4393_v43 = vpop.permute.xlu0 %4392  ;;  %v4308_v17 = vpop.permute.xlu1 %4307 }
 0x86b   : > { %v4466_v3 = vmul.f32 %v4393_v43, %v8768_v20  ;;  %4701 = vmatmul.mubr.bf16.gmra.mrb[20].mxu0 %v4478_v62  ;;  %v4449_v48 = vmul.f32 %v4308_v17, %v8677_v58 }
 0x86d   : > { %v4495_v5 = vpack.c.bf16 %v4466_v3, %v4465_v25 }
 0x86e   : > { %v4313_v30 = vpop.permute.xlu0 %4312  ;;  %v4418_v49 = vpop.permute.xlu1 %4417 }
 0x86f   : > { %v4450_v45 = vmul.f32 %v4313_v30, %v8684_v24  ;;  %4708 = vmatprep.mubr.bf16.mxu0 %v4495_v5  ;;  %v4471_v59 = vmul.f32 %v4418_v49, %v8783_v54 }
 0x871   : > { %v4479_v26 = vpack.c.bf16 %v4450_v45, %v4449_v48 }
 0x872   : > { %v4423_v11 = vpop.permute.xlu0 %4422  ;;  %v4338_v40 = vpop.permute.xlu1 %4337 }
 0x873   : > { %4709 = vmatmul.mubr.bf16.gmra.mrb[24].mxu0 %v4479_v26  ;;  %v4472_v15 = vmul.f32 %v4423_v11, %v8789_v14  ;;  %v4455_v51 = vmul.f32 %v4338_v40, %v8694_v31 }
 0x874   : > { %4716 = vmatprep.mubr.bf16.mxu0 %v4496_v37 }
 0x875   : > { %v4498_v50 = vpack.c.bf16 %v4472_v15, %v4471_v59 }
 0x876   : > { %v4343_v20 = vpop.permute.xlu0 %4342  ;;  %v4408_v61 = vpop.permute.xlu1 %4407 }
 0x877   : > { %v4469_v24 = vmul.f32 %v4408_v61, %v8786_v7 }
 0x87a   : > { %v4413_v12 = vpop.permute.xlu0 %4412  ;;  %v4328_v58 = vpop.permute.xlu1 %4327 }
 0x87b   : > { %v4470_v56 = vmul.f32 %v4413_v12, %v8793_v23  ;;  %4717 = vmatmul.mubr.bf16.gmra.mrb[28].mxu0 %v4480_v8  ;;  %v4453_v0 = vmul.f32 %v4328_v58, %v8697_v44  ;;  %v3514_v44 = vld [vmem:[#allocation4 + $0x78] sm:$0xff] }
 0x87d   : > { %v4497_v36 = vpack.c.bf16 %v4470_v56, %v4469_v24 }
 0x87e   : > { %v4333_v1 = vpop.permute.xlu0 %4332  ;;  %v3684_v63 = vpop.permute.xlu1 %3683 }
 0x87f   : > { %v4454_v46 = vmul.f32 %v4333_v1, %v8704_v10  ;;  %v3721_v55 = vmul.f32 %v3684_v63, %v3529_v34  ;;  %4724 = vmatprep.mubr.bf16.mxu0 %v4497_v36  ;;  %v4456_v10 = vmul.f32 %v4343_v20, %v8700_v2 }
 0x881   : > { %v4481_v7 = vpack.c.bf16 %v4454_v46, %v4453_v0  ;;  %v4091_v23 = vadd.f32 %v8816_v21, %v3721_v55  ;;  %v4482_v33 = vpack.c.bf16 %v4456_v10, %v4455_v51 }
 0x882   : > { %v3689_v27 = vpop.permute.xlu0 %3688  ;;  %v3604_v57 = vpop.permute.xlu1 %3603 }
 0x883   : > { %4123 = vst [vmem:[#allocation4 + $0xf0] sm:$0xff] %v4091_v23  ;;  %v3722_v14 = vmul.f32 %v3689_v27, %v3530_v22  ;;  %v3705_v41 = vmul.f32 %v3604_v57, %v3513_v38  ;;  %4725 = vmatmul.mubr.bf16.gmra.mrb[32].mxu0 %v4481_v7 }
 0x884   : > { %4732 = vmatprep.mubr.bf16.mxu0 %v4498_v50 }
 0x885   : > { %v4092_v4 = vadd.f32 %v8821_v53, %v3722_v14  ;;  %v4075_v54 = vadd.f32 %v8711_v39, %v3705_v41 }
 0x886   : > { %v3609_v60 = vpop.permute.xlu0 %3608  ;;  %v4428_v18 = vpop.permute.xlu1 %4427 }
 0x887   : > { %4124 = vst [vmem:[#allocation4 + $0xf8] sm:$0xff] %v4092_v4  ;;  %4107 = vst [vmem:[#allocation4 + $0x70] sm:$0xff] %v4075_v54  ;;  %v3706_v21 = vmul.f32 %v3609_v60, %v3514_v44  ;;  %v4473_v2 = vmul.f32 %v4428_v18, %v8819_v28 }
 0x889   : > { %v4076_v13 = vadd.f32 %v8716_v32, %v3706_v21 }
 0x88a   : > { %v4348_v52 = vpop.permute.xlu1 %4347 }
 0x88b   : > { %4108 = vst [vmem:[#allocation4 + $0x78] sm:$0xff] %v4076_v13  ;;  %4733 = vmatmul.mubr.bf16.gmra.mrb[36].mxu0 %v4482_v33  ;;  %v4457_v31 = vmul.f32 %v4348_v52, %v8714_v16  ;;  %v8862_v16 = vld [vmem:[%s9361_s4] ss:$0 sm:$0xff] }
 0x88e   : > { %v4438_v39 = vpop.permute.xlu1 %4437 }
 0x88f   : > { %v4475_v32 = vmul.f32 %v4438_v39, %v4091_v23 }
 0x892   : > { %v4433_v29 = vpop.permute.xlu0 %4432  ;;  %v4358_v9 = vpop.permute.xlu1 %4357 }
 0x893   : > { %v4474_v53 = vmul.f32 %v4433_v29, %v8824_v35  ;;  %v4459_v28 = vmul.f32 %v4358_v9, %v4075_v54 }
 0x895   : > { %v4499_v62 = vpack.c.bf16 %v4474_v53, %v4473_v2 }
 0x896   : > { %v4353_v43 = vpop.permute.xlu0 %4352 }
 0x897   : > { %v4458_v17 = vmul.f32 %v4353_v43, %v8808_v19  ;;  %4740 = vmatprep.mubr.bf16.mxu0 %v4499_v62 }
 0x899   : > { %v4483_v25 = vpack.c.bf16 %v4458_v17, %v4457_v31 }
 0x89a   : > { %v4443_v3 = vpop.permute.xlu0 %4442 }
 0x89b   : > { %v4476_v5 = vmul.f32 %v4443_v3, %v4092_v4  ;;  %4741 = vmatmul.mubr.bf16.gmra.mrb[40].mxu0 %v4483_v25 }
 0x89d   : > { %v4500_v30 = vpack.c.bf16 %v4476_v5, %v4475_v32 }
 0x89e   : > { %v4363_v49 = vpop.permute.xlu0 %4362 }
 0x89f   : > { %v4460_v35 = vmul.f32 %v4363_v49, %v4076_v13  ;;  %4748 = vmatprep.mubr.bf16.mxu0 %v4500_v30 }
 0x8a1   : > { %v4484_v48 = vpack.c.bf16 %v4460_v35, %v4459_v28 }
 0x8a3   : > { %4749 = vmatmul.mubr.bf16.gmra.mrb[44].mxu0 %v4484_v48 }
 0x936   : > { %v5225_v45 = vpop.f32.mrb[16].mxu0 }
 0x937   : > { %v5226_v19 = vpop.f32.mrb[17].mxu0 }
 0x938   : > { %v5227_v42 = vadd.f32 %v5226_v19, %v5225_v45  ;;  %v5228_v26 = vpop.f32.mrb[18].mxu0 }
 0x939   : > { %v5229_v37 = vpop.f32.mrb[19].mxu0 }
 0x93a   : > { %v4695_v11 = vadd.f32 %v5227_v42, %v8862_v16  ;;  %v5230_v40 = vadd.f32 %v5229_v37, %v5228_v26 }
 0x93c   : > { %4757 = vst [vmem:[%s6864_s25] sm:$0xff] %v4695_v11  ;;  %v4698_v6 = vadd.f32 %v5230_v40, %v8862_v16 }
 0x93e   : > { %4758 = vst [vmem:[%s6864_s25 + $0x8] sm:$0xff] %v4698_v6  ;;  %v5231_v20 = vpop.f32.mrb[20].mxu0 }
 0x93f   : > { %v5232_v61 = vpop.f32.mrb[21].mxu0 }
 0x940   : > { %v5233_v47 = vadd.f32 %v5232_v61, %v5231_v20  ;;  %v5234_v8 = vpop.f32.mrb[22].mxu0 }
 0x941   : > { %v5235_v12 = vpop.f32.mrb[23].mxu0 }
 0x942   : > { %v4703_v58 = vadd.f32 %v5233_v47, %v8862_v16  ;;  %v5236_v24 = vadd.f32 %v5235_v12, %v5234_v8 }
 0x944   : > { %4759 = vst [vmem:[%s6864_s25 + $0x10] sm:$0xff] %v4703_v58  ;;  %v4706_v56 = vadd.f32 %v5236_v24, %v8862_v16 }
 0x946   : > { %4760 = vst [vmem:[%s6864_s25 + $0x18] sm:$0xff] %v4706_v56  ;;  %v5237_v34 = vpop.f32.mrb[24].mxu0 }
 0x947   : > { %v5238_v36 = vpop.f32.mrb[25].mxu0 }
 0x948   : > { %v5239_v15 = vadd.f32 %v5238_v36, %v5237_v34  ;;  %v5240_v1 = vpop.f32.mrb[26].mxu0 }
 0x949   : > { %v5241_v63 = vpop.f32.mrb[27].mxu0 }
 0x94a   : > { %v4711_v0 = vadd.f32 %v5239_v15, %v8862_v16  ;;  %v5242_v46 = vadd.f32 %v5241_v63, %v5240_v1 }
 0x94c   : > { %4761 = vst [vmem:[%s6864_s25 + $0x20] sm:$0xff] %v4711_v0  ;;  %v4714_v55 = vadd.f32 %v5242_v46, %v8862_v16 }
 0x94e   : > { %4762 = vst [vmem:[%s6864_s25 + $0x28] sm:$0xff] %v4714_v55  ;;  %v5243_v59 = vpop.f32.mrb[28].mxu0 }
 0x94f   : > { %v5244_v22 = vpop.f32.mrb[29].mxu0 }
 0x950   : > { %v5245_v38 = vadd.f32 %v5244_v22, %v5243_v59  ;;  %v5246_v7 = vpop.f32.mrb[30].mxu0 }
 0x951   : > { %v5247_v23 = vpop.f32.mrb[31].mxu0 }
 0x952   : > { %v4719_v50 = vadd.f32 %v5245_v38, %v8862_v16  ;;  %v5248_v27 = vadd.f32 %v5247_v23, %v5246_v7 }
 0x954   : > { %4763 = vst [vmem:[%s6864_s25 + $0x30] sm:$0xff] %v4719_v50  ;;  %v4722_v57 = vadd.f32 %v5248_v27, %v8862_v16 }
 0x956   : > { %4764 = vst [vmem:[%s6864_s25 + $0x38] sm:$0xff] %v4722_v57  ;;  %v5249_v14 = vpop.f32.mrb[32].mxu0 }
 0x957   : > { %v5250_v41 = vpop.f32.mrb[33].mxu0 }
 0x958   : > { %v5251_v44 = vadd.f32 %v5250_v41, %v5249_v14  ;;  %v5252_v10 = vpop.f32.mrb[34].mxu0 }
 0x959   : > { %v5253_v4 = vpop.f32.mrb[35].mxu0 }
 0x95a   : > { %v4727_v54 = vadd.f32 %v5251_v44, %v8862_v16  ;;  %v5254_v60 = vadd.f32 %v5253_v4, %v5252_v10 }
 0x95c   : > { %4765 = vst [vmem:[%s6864_s25 + $0x40] sm:$0xff] %v4727_v54  ;;  %v4730_v51 = vadd.f32 %v5254_v60, %v8862_v16 }
 0x95e   : > { %4766 = vst [vmem:[%s6864_s25 + $0x48] sm:$0xff] %v4730_v51  ;;  %v5255_v21 = vpop.f32.mrb[36].mxu0 }
 0x95f   : > { %v5256_v33 = vpop.f32.mrb[37].mxu0 }
 0x960   : > { %v5257_v13 = vadd.f32 %v5256_v33, %v5255_v21  ;;  %v5258_v18 = vpop.f32.mrb[38].mxu0 }
 0x961   : > { %v5259_v52 = vpop.f32.mrb[39].mxu0 }
 0x962   : > { %v4735_v29 = vadd.f32 %v5257_v13, %v8862_v16  ;;  %v5260_v2 = vadd.f32 %v5259_v52, %v5258_v18 }
 0x964   : > { %4767 = vst [vmem:[%s6864_s25 + $0x50] sm:$0xff] %v4735_v29  ;;  %v4738_v53 = vadd.f32 %v5260_v2, %v8862_v16 }
 0x966   : > { %4768 = vst [vmem:[%s6864_s25 + $0x58] sm:$0xff] %v4738_v53 }
 0x96e   : > { %v5261_v62 = vpop.f32.mrb[40].mxu0 }
 0x96f   : > { %v5262_v39 = vpop.f32.mrb[41].mxu0 }
 0x970   : > { %v5263_v43 = vadd.f32 %v5262_v39, %v5261_v62  ;;  %v5264_v31 = vpop.f32.mrb[42].mxu0 }
 0x971   : > { %v5265_v17 = vpop.f32.mrb[43].mxu0 }
 0x972   : > { %v4743_v25 = vadd.f32 %v5263_v43, %v8862_v16  ;;  %v5266_v3 = vadd.f32 %v5265_v17, %v5264_v31 }
 0x974   : > { %4769 = vst [vmem:[%s6864_s25 + $0x60] sm:$0xff] %v4743_v25  ;;  %v4746_v32 = vadd.f32 %v5266_v3, %v8862_v16 }
 0x976   : > { %4770 = vst [vmem:[%s6864_s25 + $0x68] sm:$0xff] %v4746_v32  ;;  %v5267_v5 = vpop.f32.mrb[44].mxu0 }
 0x977   : > { %v5268_v9 = vpop.f32.mrb[45].mxu0 }
 0x978   : > { %v5269_v30 = vadd.f32 %v5268_v9, %v5267_v5  ;;  %v5270_v49 = vpop.f32.mrb[46].mxu0 }
 0x979   : > { %v5271_v28 = vpop.f32.mrb[47].mxu0 }
 0x97a   : > { %v4751_v35 = vadd.f32 %v5269_v30, %v8862_v16  ;;  %v5272_v48 = vadd.f32 %v5271_v28, %v5270_v49 }
 0x97c   : > { %4771 = vst [vmem:[%s6864_s25 + $0x70] sm:$0xff] %v4751_v35  ;;  %v4754_v45 = vadd.f32 %v5272_v48, %v8862_v16 }
 0x97e   : > { %4772 = vst [vmem:[%s6864_s25 + $0x78] sm:$0xff] %v4754_v45 }
 0x97f PF: > { %s4781_s27 = sld [smem:[#allocation7]]  ;;  %s9362_s30 = sld [smem:[#allocation28_spill]] }
 0x980   : > { %s4790_s8 = sshll.u32 %s6864_s25, 4  ;;  %s9363_s9 = sld [smem:[#allocation112_spill]]  ;;  %s8898_s8 = int_to_ptr.vmem [resolvable:$true] %s4790_s8 }
 0x981   : > { %s8907_s23 = scalar_lea.sflag [#allocation11], %s373_s20  ;;  %s6246_s26 = scalar_lea.vmem %s8898_s8, 2048 }
 0x982   : > { %p6247_p5 = scmp.ne.s32.totalorder %s8898_s8, %s6246_s26  ;;  %p9365_p3 = scmp.ne.s32.totalorder %s9114_s0, 0 }
 0x983   : > { %s6424_s22 = smov [#allocation17]  }
 0x984   : > { %p6248_p9 = pnand %p6247_p5, %p9365_p3  ;;  %s6250_s7 = sshll.u32 %s6424_s22, 4  ;;  %s6251_s7 = int_to_ptr.vmem [resolvable:$false] %s6250_s7 }
 0x985   : > { %s5077_s12 = sshll.u32 %s9362_s30, 4  ;;  %s5076_s24 = sshll.u32 %s4781_s27, 4 }
 0x986   : > { %s4787_s2 = sadd.s32 %s5077_s12, %s5076_s24  ;;  %s9364_s19 = smov %s9363_s9 }
 0x987   : > { %s5078_s6 = sshll.u32 %s4787_s2, 7  ;;  %p6249_p1 = pneg %p6248_p9 }
 0x988   : > { %s8903_s18 = scalar_lea.hbm %s9363_s9, %s5078_s6  ;;  %s6252_s25 = scalar_lea.vmem %s6251_s7, 4096 }
 0x989   : > { %p6253_p10 = scmp.lt.s32.totalorder %s8898_s8, %s6251_s7  ;;  %p6254_p6 = scmp.lt.s32.totalorder %s6252_s25, %s6246_s26 }
 0x98b   : > { %p6255_p12 = por %p6254_p6, %p6253_p10 }
 0x98d   : > { %p6256_p2 = pnand %p6255_p12, %p6249_p1 }
 0x98f   : > { %6259 = shalt.err (!%p6256_p2)
}
 0x990   : > { %s6260_s20 = scalar_lea.hbm %s8903_s18, 2048  ;;  %s6264_s4 = scalar_lea.hbm %s9364_s19, 4096 }
 0x991   : > { %p6261_p0 = scmp.ne.s32.totalorder %s8903_s18, %s6260_s20  ;;  %p6265_p4 = scmp.lt.u32.totalorder %s8903_s18, %s9364_s19 }
 0x992   : > { %p6266_p7 = scmp.lt.u32.totalorder %s6264_s4, %s6260_s20  ;;  %p6268_p5 = scmp.lt.u32.totalorder %s6260_s20, %s8903_s18 }
 0x993   : > { %p6262_p8 = pnand %p6261_p0, %p9365_p3 }
 0x994   : > { %p6267_p13 = por %p6266_p7, %p6265_p4 }
 0x995   : > { %p6263_p11 = pneg %p6262_p8 }
 0x996   : > { %p6269_p9 = por %p6268_p5, %p6267_p13 }
 0x998   : > { %p6270_p1 = pnand %p6269_p9, %p6263_p11 }
 0x99a   : > { %6273 = shalt.err (!%p6270_p1)
}
 0x99b   : > { %s6425_s12 = smov 128   ;;  %s6426_s24 = smov 8  }
 0x99c   : > { %5539 = dma.vmem_to_hbm [thread:$0]  (%p9365_p3), %s8898_s8, 2048, %s8903_s18, %s8907_s23, %s6425_s12, %s6425_s12, %s6426_s24  }
 0x99d PF: > { %s9366_s2 = sld [smem:[#allocation32_spill]]  ;;  %s4805_s6 = sand.u32 1, %s6356_s28  }
 0x99e   : > { %p9368_p6 = scmp.ge.s32.totalorder %s6412_s17, 2  ;;  %s4806_s15 = scalar_lea.sflag [#allocation11], %s4805_s6 }
 0x9a3   : > { %p9367_p10 = scmp.ne.s32.totalorder %s9366_s2, 0 }
 0x9a5   : > { %p5556_p12 = pnand %p9368_p6, %p9367_p10 }
 0x9a7   : > { %6351 = dma.done.wait (!%p5556_p12), %s4806_s15, 2048  }
 0x9a8   : > { %6353 = vsyncadd (!%p5556_p12), %s4806_s15, 4294965248  ;;  %s29_s17 = sadd.s32 1, %s6412_s17   ;;  %s9370_s0 = sld [smem:[#allocation23_spill]] }
 0x9a9   : > { %p8937_p2 = scmp.ge.s32.totalorder %s29_s17, 4   ;;  %s9371_s30 = sld [smem:[#allocation30_spill]] }
 0x9aa   : > { %s9372_s8 = sld [smem:[#allocation25_spill]]  ;;  %s9373_s9 = sld [smem:[#allocation26_spill]] }
 0x9ab   : > { %s9374_s18 = sld [smem:[#allocation27_spill]]  ;;  %s9375_s11 = sld [smem:[#allocation31_spill]] }
 0x9ac   : > { %s9376_s23 = sld [smem:[#allocation33_spill]]  ;;  %s9377_s26 = sld [smem:[#allocation29_spill]] }
 0x9ad   : > { %s9378_s28 = smov %s6360_s29  ;;  %s9384_s12 = smov %s6396_s13 }
 0x9ae   : > { %s9379_s29 = smov %s9370_s0  ;;  %s9385_s13 = smov %s6400_s14 }
 0x9af   : > { %s9387_s15 = smov %s6408_s16  ;;  %28 = sbr.rel (!%p8937_p2) target bundleno = 23 (0x17), region = 125 }
 0x9b0   : > { %s9380_s0 = smov %s9373_s9  ;;  %s9381_s9 = smov %s6772_s1 }
 0x9b1   : > { %s9382_s1 = smov %s6384_s10  ;;  %s9383_s10 = smov %s9374_s18 }
 0x9b2   : > { %s9386_s14 = smov %s9376_s23  ;;  %s9388_s16 = smov %s9377_s26 }
 0x9b6   :  { %4811 = vsyncpa [#allocation10], 1 }
 0x9b7   :  { %4813 = vsyncpa [#allocation10 + $0x1], 1 }
 0x9b8   :  { %4814 = vsyncpa [#allocation13], 1 }
 0x9b9   :  { %4816 = vsyncpa [#allocation13 + $0x1], 1 }
 0x9ba   :  { %4817 = vsyncpa [#allocation16], 1 }
 0x9bb   :  { %4818 = vsyncpa [#allocation11], 1 }
 0x9bc   :  { %4820 = vsyncpa [#allocation11 + $0x1], 1 }

// kernel: tpu_custom_call.1
= control target key start
LH: loop header
LB: loop body
LE: loop exit
PB: predicated region body
PF: predicated region fallthrough
CT: control target
= control target key end

     0   :  { %s8987_s0 = inlined_call_operand.<no memory space> [shape: s32[1], index: 0, kind: input, shape index: {}]   ;;  %s8988_s1 = inlined_call_operand.<no memory space> [shape: s32[1], index: 1, kind: input, shape index: {}]   ;;  %s8989_s2 = inlined_call_operand.hbm [shape: bf16[2,2,128,128], index: 2, kind: input, shape index: {}]   ;;  %s8990_s3 = inlined_call_operand.hbm [shape: bf16[2,2,128,128], index: 3, kind: input, shape index: {}]   ;;  %s8991_s4 = inlined_call_operand.hbm [shape: bf16[2,2,128,128], index: 4, kind: input, shape index: {}]   ;;  %s8992_s5 = inlined_call_operand.hbm [shape: bf16[256,128], index: 5, kind: input, shape index: {}]   ;;  %s8993_s6 = inlined_call_operand.vmem [shape: f32[1,128], index: 6, kind: input, shape index: {}]   ;;  %s8994_s7 = inlined_call_operand.hbm [shape: f32[2,128,128], index: 7, kind: output, shape index: {}]  }
   0x1   :  { %9093 = sst [smem:[#allocation107_spill]] %s8989_s2 }
   0x2   :  { %9094 = sst [smem:[#allocation108_spill]] %s8990_s3 }
   0x3   :  { %9095 = sst [smem:[#allocation109_spill]] %s8991_s4 }
   0x4   :  { %9096 = sst [smem:[#allocation110_spill]] %s8992_s5 }
   0x5   :  { %9097 = sst [smem:[#allocation111_spill]] %s8993_s6 }
   0x6   :  { %9098 = sst [smem:[#allocation112_spill]] %s8994_s7 }
   0x7   :  { %12 = sst [smem:[#allocation7]] %s8987_s0 }
   0x8   :  { %13 = sst [smem:[#allocation8]] %s8988_s1 }
   0x9   :  { %14 = vsyncpa [#allocation10], 0 }
   0xa   :  { %16 = vsyncpa [#allocation10 + $0x1], 0 }
   0xb   :  { %17 = vsyncpa [#allocation13], 0 }
   0xc   :  { %19 = vsyncpa [#allocation13 + $0x1], 0 }
   0xd   :  { %20 = vsyncpa [#allocation16], 0 }
   0xe   :  { %21 = vsyncpa [#allocation11], 0 }
   0xf   :  { %23 = vsyncpa [#allocation11 + $0x1], 0  ;;  %s6473_s28 = smov 0   ;;  %s6475_s29 = smov 0  }
  0x10   :  { %s6477_s30 = smov 0   ;;  %s6479_s8 = smov 0  }
  0x11   :  { %s6481_s0 = smov 0   ;;  %s6483_s9 = smov 0  }
  0x12   :  { %s6485_s1 = smov 0   ;;  %s6487_s10 = smov 0  }
  0x13   :  { %s6489_s11 = smov 0   ;;  %s6491_s12 = smov 0  }
  0x14   :  { %s6493_s13 = smov 0   ;;  %s6495_s14 = smov 0  }
  0x15   :  { %s6497_s15 = smov 0   ;;  %s6499_s16 = smov 0  }
  0x16   :  { %s6501_s17 = smov 0  }
  0x17 LB: > { %9099 = sst [smem:[#allocation23_spill]] %s6364_s30  ;;  %s41_s18 = sadd.s32 1, %s6408_s16  ;;  %s6412_s17 = sphi %s6501_s17, %s29_s17   ;;  %s6408_s16 = sphi %s6499_s16, %s9388_s16   ;;  %s6404_s15 = sphi %s6497_s15, %s9387_s15   ;;  %s6400_s14 = sphi %s6495_s14, %s9386_s14   ;;  %s6396_s13 = sphi %s6493_s13, %s9385_s13   ;;  %s6392_s12 = sphi %s6491_s12, %s9384_s12   ;;  %s6388_s11 = sphi %s6489_s11, %s9375_s11   ;;  %s6384_s10 = sphi %s6487_s10, %s9383_s10   ;;  %s6380_s1 = sphi %s6485_s1, %s9382_s1   ;;  %s6376_s9 = sphi %s6483_s9, %s9381_s9   ;;  %s6372_s0 = sphi %s6481_s0, %s9380_s0   ;;  %s6368_s8 = sphi %s6479_s8, %s9372_s8   ;;  %s6364_s30 = sphi %s6477_s30, %s9371_s30   ;;  %s6360_s29 = sphi %s6475_s29, %s9379_s29   ;;  %s6356_s28 = sphi %s6473_s28, %s9378_s28  }
  0x18   : > { %9100 = sst [smem:[#allocation24_spill]] %s6368_s8  ;;  %s6549_s19 = sld [smem:[#allocation7]] }
  0x19   : > { %9101 = sst [smem:[#allocation25_spill]] %s6372_s0  ;;  %p43_p0 = scmp.ge.s32.totalorder %s41_s18, 2 }
  0x1a   : > { %9102 = sst [smem:[#allocation26_spill]] %s6376_s9  ;;  %p9001_p1 = scmp.eq.s32.totalorder %s6412_s17, 0 }
  0x1b   : > { %9103 = sst [smem:[#allocation27_spill]] %s6388_s11  ;;  %s75_s20 = sld [smem:[#allocation8]] }
  0x1c   : > { %9104 = sst [smem:[#allocation28_spill]] %s6404_s15  ;;  %s82_s21 = sadd.s32 1, %s6388_s11 }
  0x1d   : > { %s9390_s18 = smov (%p43_p0, %s41_s18), 0  ;;  %p89_p2 = scmp.ne.s32.totalorder %s6388_s11, %s6384_s10 }
  0x1e   : > { %9105 = sst [smem:[#allocation29_spill]] %s9390_s18  ;;  %s47_s22 = ssub.s32 %s6408_s16, %s9390_s18 }
  0x1f   : > { %s184_s23 = sadd.s32 1, %s6364_s30  ;;  %p6564_p4 = por %p89_p2, %p9001_p1 }
  0x20   : > { %p6568_p5 = scmp.eq.s32.totalorder %s47_s22, 0  ;;  %p9000_p7 = scmp.lt.s32.totalorder %s6412_s17, 2 }
  0x21   : > { %s9003_s18 = sshll.u32 %s6408_s16, 5  ;;  %s261_s7 = sand.u32 1, %s6412_s17  }
  0x22   : > { %s9107_s25 = scalar_select %p6568_p5, 1, 0 }
  0x23   : > { %s6576_s26 = scalar_select %p6568_p5, %s6364_s30, %s184_s23  }
  0x24   : > { %s6581_s27 = scalar_select %p6568_p5, %s6388_s11, %s82_s21  }
  0x25   : > { %9108 = sst [smem:[#allocation30_spill]] %s6576_s26  ;;  %s263_s15 = sand.u32 1, %s6388_s11  }
  0x26   : > { %9109 = sst [smem:[#allocation31_spill]] %s6581_s27  ;;  %s4945_s6 = sshll.u32 %s263_s15, 7 }
  0x27   : > { %s4946_s22 = sshll.u32 %s75_s20, 4  ;;  %s265_s8 = scalar_lea.vmem [#allocation12], %s4945_s6 }
  0x28   : > { %s6589_s4 = sadd.s32 %s4946_s22, %s9003_s18  ;;  %s275_s0 = sshll.u32 %s265_s8, 4  ;;  %s6592_s0 = int_to_ptr.vmem [resolvable:$true] %s275_s0 }
  0x29   : > { %s9002_s9 = sshll.u32 %s6589_s4, 6  ;;  %s9110_s3 = sld [smem:[#allocation108_spill]] }
  0x2a   : > { %p6605_p8 = pnand %p9000_p7, %p6564_p4  ;;  %s6609_s6 = scalar_lea.sflag [#allocation13], %s261_s7 }
  0x2c   : > { %p6130_p10 = pneg %p6605_p8 }
  0x2f   : > { %s6599_s27 = scalar_lea.hbm %s9110_s3, %s9002_s9  ;;  %s6133_s22 = scalar_lea.hbm %s9110_s3, 4096 }
  0x30   : > { %s6128_s8 = scalar_lea.hbm %s6599_s27, 2048  ;;  %p6134_p13 = scmp.lt.u32.totalorder %s6599_s27, %s9110_s3 }
  0x31   : > { %p6129_p9 = scmp.ne.s32.totalorder %s6599_s27, %s6128_s8  ;;  %p6135_p0 = scmp.lt.u32.totalorder %s6133_s22, %s6128_s8 }
  0x32   : > { %p6137_p4 = scmp.lt.u32.totalorder %s6128_s8, %s6599_s27 }
  0x33   : > { %p6131_p11 = pnand %p6130_p10, %p6129_p9  ;;  %p6136_p2 = por %p6135_p0, %p6134_p13 }
  0x35   : > { %p6132_p12 = pneg %p6131_p11  ;;  %p6138_p6 = por %p6137_p4, %p6136_p2 }
  0x37   : > { %p6139_p7 = pnand %p6138_p6, %p6132_p12 }
  0x39   : > { %6142 = shalt.err (!%p6139_p7)
}
  0x3a   : > { %s6143_s7 = scalar_lea.vmem %s6592_s0, 2048  ;;  %s6414_s20 = smov [#allocation12]  }
  0x3b   : > { %p6144_p9 = scmp.ne.s32.totalorder %s6592_s0, %s6143_s7  ;;  %s6148_s24 = sshll.u32 %s6414_s20, 4  ;;  %s6149_s24 = int_to_ptr.vmem [resolvable:$false] %s6148_s24 }
  0x3c   : > { %s6150_s23 = scalar_lea.vmem %s6149_s24, 4096  ;;  %p6151_p3 = scmp.lt.s32.totalorder %s6592_s0, %s6149_s24 }
  0x3d   : > { %p6146_p11 = pnand %p6144_p9, %p6130_p10  ;;  %p6152_p13 = scmp.lt.s32.totalorder %s6150_s23, %s6143_s7 }
  0x3f   : > { %p6147_p1 = pneg %p6146_p11  ;;  %p6153_p0 = por %p6152_p13, %p6151_p3 }
  0x41   : > { %p6154_p2 = pnand %p6153_p0, %p6147_p1 }
  0x43   : > { %6157 = shalt.err (!%p6154_p2)
}
  0x44   : > { %s9004_s8 = smov 64   ;;  %s9006_s22 = smov 4  }
  0x45   : > { %5551 = dma.hbm_to_vmem [thread:$0]  (!%p6605_p8), %s6599_s27, 2048, %s6592_s0, %s6609_s6, %s9004_s8, %s9004_s8, %s9006_s22  }
  0x46   : > { %s6641_s21 = sadd.s32 4294967295, %s6412_s17   ;;  %s4937_s7 = sadd.s32 4294967294, %s6412_s17  }
  0x47   : > { %p9009_p1 = scmp.eq.s32.totalorder %s6641_s21, 0  ;;  %p194_p3 = scmp.ne.s32.totalorder %s6364_s30, %s6360_s29 }
  0x48   : > { %p195_p6 = scmp.eq.s32.totalorder %s6641_s21, 1  ;;  %p9112_p7 = scmp.ne.s32.totalorder %s6384_s10, %s6380_s1 }
  0x49   : > { %p200_p12 = scmp.ne.s32.totalorder %s6360_s29, %s6356_s28  ;;  %p201_p8 = scmp.eq.s32.totalorder %s4937_s7, 1 }
  0x4a   : > { %p6653_p10 = por %p9112_p7, %p9009_p1  ;;  %p6659_p4 = por %p195_p6, %p194_p3 }
  0x4b   : > { %p4938_p9 = scmp.ge.s32.totalorder %s6412_s17, 1  ;;  %p208_p11 = scmp.lt.s32.totalorder %s6412_s17, 3 }
  0x4c   : > { %s9113_s20 = scalar_select %p6653_p10, 1, 0 }
  0x4d   : > { %s9114_s0 = scalar_select %p6659_p4, 1, 0 }
  0x4e   : > { %p6665_p13 = por %p201_p8, %p200_p12  ;;  %p6669_p0 = pnand %p4938_p9, %p208_p11 }
  0x4f   : > { %s6417_s1 = smov [#allocation15]   ;;  %s52_s7 = sadd.s32 1, %s6400_s14 }
  0x50   : > { %s9115_s27 = scalar_select %p6665_p13, 1, 0 }
  0x51   : > { %s9117_s15 = scalar_select %p6669_p0, 1, 0 }
  0x52   : > { %9116 = sst [smem:[#allocation32_spill]] %s9115_s27  ;;  %s220_s24 = sshll.u32 %s6417_s1, 4  ;;  %s221_s24 = int_to_ptr.vmem [resolvable:$true] %s220_s24 }
  0x53   : > { %p5541_p2 = pneg %p6669_p0  ;;  %s9119_s5 = sld [smem:[#allocation110_spill]] }
  0x55   : > { %p6677_p3 = pnand %p5541_p2, %p9009_p1 }
  0x57   : > { %p6160_p7 = pneg %p6677_p3 }
  0x59   : > { %s6158_s8 = scalar_lea.hbm %s9119_s5, 2048 }
  0x5a   : > { %p6159_p6 = scmp.ne.s32.totalorder %s9119_s5, %s6158_s8  ;;  %p6165_p9 = scmp.lt.u32.totalorder %s6158_s8, %s9119_s5 }
  0x5c   : > { %p6161_p12 = pnand %p6160_p7, %p6159_p6 }
  0x5e   : > { %p6162_p8 = pneg %p6161_p12 }
  0x60   : > { %p6167_p11 = pnand %p6165_p9, %p6162_p8 }
  0x62   : > { %6170 = shalt.err (!%p6167_p11)
}
  0x63   : > { %s6171_s26 = scalar_lea.vmem %s221_s24, 2048  ;;  %p6179_p4 = scmp.lt.s32.totalorder %s221_s24, %s221_s24 }
  0x64   : > { %p6172_p2 = scmp.ne.s32.totalorder %s221_s24, %s6171_s26  ;;  %p6180_p10 = scmp.lt.s32.totalorder %s6171_s26, %s6171_s26 }
  0x66   : > { %p6174_p1 = pnand %p6172_p2, %p6160_p7  ;;  %p6181_p0 = por %p6180_p10, %p6179_p4 }
  0x68   : > { %p6175_p13 = pneg %p6174_p1 }
  0x6a   : > { %p6182_p5 = pnand %p6181_p0, %p6175_p13 }
  0x6c   : > { %6185 = shalt.err (!%p6182_p5)
}
  0x6d   : > { %s9120_s3 = smov 4   ;;  %s9121_s9 = smov 64  }
  0x6e   : > { %5544 = dma.hbm_to_vmem [thread:$0]  (!%p6677_p3), %s9119_s5, 2048, %s221_s24, [#allocation16], %s9121_s9, %s9121_s9, %s9120_s3  }
  0x6f   : > { %p9122_p5 = scmp.ne.s32.totalorder %s9107_s25, 0  ;;  %p59_p1 = scmp.ne.s32.totalorder %s6400_s14, %s6396_s13 }
  0x70   : > { %p65_p10 = scmp.ne.s32.totalorder %s6396_s13, %s6392_s12  ;;  %s237_s26 = sand.u32 1, %s6400_s14  }
  0x71   : > { %s6704_s11 = scalar_select %p9122_p5, %s6400_s14, %s52_s7  }
  0x72   : > { %s4942_s8 = sshll.u32 %s6549_s19, 4  ;;  %p9124_p4 = scmp.eq.s32.totalorder %s6412_s17, 0 }
  0x73   : > { %9123 = sst [smem:[#allocation33_spill]] %s6704_s11  ;;  %p9125_p0 = scmp.eq.s32.totalorder %s6641_s21, 0 }
  0x74   : > { %p61_p13 = por %p9124_p4, %p59_p1  ;;  %s4941_s1 = sshll.u32 %s237_s26, 7 }
  0x75   : > { %p6716_p6 = por %p9125_p0, %p65_p10  ;;  %s9127_s18 = sshll.u32 %s6408_s16, 5 }
  0x76   : > { %s248_s22 = sadd.s32 %s9127_s18, %s4942_s8  ;;  %s241_s27 = scalar_lea.vmem [#allocation9], %s4941_s1 }
  0x77   : > { %s9126_s23 = scalar_select %p6716_p6, 1, 0 }
  0x78   : > { %s4944_s30 = sshll.u32 %s248_s22, 6  ;;  %s251_s24 = sshll.u32 %s241_s27, 4  ;;  %s6727_s24 = int_to_ptr.vmem [resolvable:$true] %s251_s24 }
  0x79   : > { %s9128_s2 = sld [smem:[#allocation107_spill]]  ;;  %p9129_p3 = scmp.lt.s32.totalorder %s6412_s17, 2 }
  0x7a   : > { %s6735_s19 = scalar_lea.sflag [#allocation10], %s237_s26 }
  0x7b   : > { %p6731_p7 = pnand %p9129_p3, %p61_p13 }
  0x7d   : > { %p6188_p8 = pneg %p6731_p7 }
  0x7f   : > { %s6725_s11 = scalar_lea.hbm %s9128_s2, %s4944_s30  ;;  %s6191_s8 = scalar_lea.hbm %s9128_s2, 4096 }
  0x80   : > { %s6186_s27 = scalar_lea.hbm %s6725_s11, 2048  ;;  %p6192_p2 = scmp.lt.u32.totalorder %s6725_s11, %s9128_s2 }
  0x81   : > { %p6187_p12 = scmp.ne.s32.totalorder %s6725_s11, %s6186_s27  ;;  %p6193_p1 = scmp.lt.u32.totalorder %s6191_s8, %s6186_s27 }
  0x82   : > { %p6195_p4 = scmp.lt.u32.totalorder %s6186_s27, %s6725_s11 }
  0x83   : > { %p6189_p9 = pnand %p6188_p8, %p6187_p12  ;;  %p6194_p10 = por %p6193_p1, %p6192_p2 }
  0x85   : > { %p6190_p11 = pneg %p6189_p9  ;;  %p6196_p13 = por %p6195_p4, %p6194_p10 }
  0x87   : > { %p6197_p0 = pnand %p6196_p13, %p6190_p11 }
  0x89   : > { %6200 = shalt.err (!%p6197_p0)
}
  0x8a   : > { %s6201_s26 = scalar_lea.vmem %s6727_s24, 2048  ;;  %s6418_s22 = smov [#allocation9]  }
  0x8b   : > { %p6202_p3 = scmp.ne.s32.totalorder %s6727_s24, %s6201_s26  ;;  %s6206_s7 = sshll.u32 %s6418_s22, 4  ;;  %s6207_s7 = int_to_ptr.vmem [resolvable:$false] %s6206_s7 }
  0x8c   : > { %s6208_s5 = scalar_lea.vmem %s6207_s7, 4096  ;;  %p6209_p6 = scmp.lt.s32.totalorder %s6727_s24, %s6207_s7 }
  0x8d   : > { %p6204_p12 = pnand %p6202_p3, %p6188_p8  ;;  %p6210_p2 = scmp.lt.s32.totalorder %s6208_s5, %s6201_s26 }
  0x8f   : > { %p6205_p9 = pneg %p6204_p12  ;;  %p6211_p1 = por %p6210_p2, %p6209_p6 }
  0x91   : > { %p6212_p10 = pnand %p6211_p1, %p6205_p9 }
  0x93   : > { %6215 = shalt.err (!%p6212_p10)
}
  0x94   : > { %s9131_s27 = sld [smem:[#allocation26_spill]]  ;;  %s9132_s30 = sld [smem:[#allocation25_spill]] }
  0x95   : > { %s9133_s8 = sld [smem:[#allocation24_spill]]  ;;  %p9134_p8 = scmp.eq.s32.totalorder %s6412_s17, 0 }
  0x96   : > { %5548 = dma.hbm_to_vmem [thread:$0]  (!%p6731_p7), %s6725_s11, 2048, %s6727_s24, %s6735_s19, %s9121_s9, %s9121_s9, %s9120_s3  }
  0x97   : > { %s9135_s26 = sshll.u32 %s6589_s4, 6  ;;  %s9136_s5 = sld [smem:[#allocation109_spill]] }
  0x98   : > { %p9137_p13 = scmp.eq.s32.totalorder %s6641_s21, 0 }
  0x9a   : > { %s112_s12 = sadd.s32 1, %s9131_s27  ;;  %p119_p6 = scmp.ne.s32.totalorder %s9131_s27, %s9132_s30 }
  0x9b   : > { %s6772_s1 = scalar_select %p9122_p5, %s9131_s27, %s112_s12  }
  0x9c   : > { %p121_p11 = por %p119_p6, %p9134_p8  ;;  %p125_p4 = scmp.ne.s32.totalorder %s9132_s30, %s9133_s8 }
  0x9d   : > { %s287_s18 = sand.u32 1, %s9131_s27   ;;  %s6784_s2 = scalar_lea.hbm %s9136_s5, %s9135_s26 }
  0x9e   : > { %p6788_p7 = por %p125_p4, %p9137_p13  ;;  %s4949_s25 = sshll.u32 %s287_s18, 7 }
  0x9f   : > { %p9139_p5 = scmp.lt.s32.totalorder %s6412_s17, 2  ;;  %s289_s4 = scalar_lea.vmem [#allocation14], %s4949_s25 }
  0xa0   : > { %s299_s19 = sshll.u32 %s289_s4, 4  ;;  %s6216_s27 = scalar_lea.hbm %s6784_s2, 2048  ;;  %s6798_s19 = int_to_ptr.vmem [resolvable:$true] %s299_s19 }
  0xa1   : > { %p6794_p0 = pnand %p9139_p5, %p121_p11  ;;  %p6217_p3 = scmp.ne.s32.totalorder %s6784_s2, %s6216_s27 }
  0xa2   : > { %s6221_s12 = scalar_lea.hbm %s9136_s5, 4096  ;;  %p6222_p1 = scmp.lt.u32.totalorder %s6784_s2, %s9136_s5 }
  0xa3   : > { %p6218_p12 = pneg %p6794_p0  ;;  %p6223_p10 = scmp.lt.u32.totalorder %s6221_s12, %s6216_s27 }
  0xa4   : > { %p6225_p8 = scmp.lt.u32.totalorder %s6216_s27, %s6784_s2 }
  0xa5   : > { %p6219_p9 = pnand %p6218_p12, %p6217_p3  ;;  %p6224_p6 = por %p6223_p10, %p6222_p1 }
  0xa7   : > { %p6220_p2 = pneg %p6219_p9  ;;  %p6226_p11 = por %p6225_p8, %p6224_p6 }
  0xa9   : > { %p6227_p4 = pnand %p6226_p11, %p6220_p2 }
  0xab   : > { %6230 = shalt.err (!%p6227_p4)
}
  0xac   : > { %s6231_s22 = scalar_lea.vmem %s6798_s19, 2048  ;;  %s6419_s7 = smov [#allocation14]  }
  0xad   : > { %p6232_p13 = scmp.ne.s32.totalorder %s6798_s19, %s6231_s22  ;;  %s6236_s25 = sshll.u32 %s6419_s7, 4  ;;  %s6237_s25 = int_to_ptr.vmem [resolvable:$false] %s6236_s25 }
  0xae   : > { %s6238_s4 = scalar_lea.vmem %s6237_s25, 4096  ;;  %p6239_p9 = scmp.lt.s32.totalorder %s6798_s19, %s6237_s25 }
  0xaf   : > { %p6234_p5 = pnand %p6232_p13, %p6218_p12  ;;  %p6240_p1 = scmp.lt.s32.totalorder %s6238_s4, %s6231_s22 }
  0xb1   : > { %p6235_p3 = pneg %p6234_p5  ;;  %p6241_p10 = por %p6240_p1, %p6239_p9 }
  0xb3   : > { %p6242_p6 = pnand %p6241_p10, %p6235_p3 }
  0xb5   : > { %6245 = shalt.err (!%p6242_p6)
}
  0xb6   : > { %5554 = dma.hbm_to_vmem [thread:$0]  (!%p6794_p0), %s6784_s2, 2048, %s6798_s19, %s6609_s6, %s9121_s9, %s9121_s9, %s9120_s3  }
  0xb7   : > { %p9141_p12 = scmp.ne.s32.totalorder %s9117_s15, 0 }
  0xb8   : > { %s313_s27 = sand.u32 (!%p9141_p12), 1, %s6396_s13   ;;  %p9142_p2 = scmp.ne.s32.totalorder (!%p9141_p12), %s9126_s23, 0 }
  0xb9   : > { %311 = sbr.rel (%p9141_p12) target bundleno = 2461 (0x99d), region = 40  ;;  %s4954_s30 = sshll.u32 (!%p9141_p12), %s313_s27, 7 }
  0xba   : > { %s314_s8 = scalar_lea.sflag (!%p9141_p12), [#allocation10], %s313_s27  ;;  %s6832_s12 = scalar_lea.vmem (!%p9141_p12), [#allocation9], %s4954_s30 }
  0xc0   : > { %6335 = dma.done.wait (%p9142_p2), %s314_s8, 2048  }
  0xc1   : > { %6337 = vsyncadd (%p9142_p2), %s314_s8, 4294965248  ;;  %s322_s24 = sand.u32 1, %s6641_s21   ;;  %s324_s2 = sand.u32 1, %s6384_s10  }
  0xc2   : > { %s4955_s6 = sshll.u32 %s324_s2, 7  ;;  %s323_s15 = scalar_lea.sflag [#allocation13], %s322_s24 }
  0xc3   : > { %s6840_s3 = scalar_lea.vmem [#allocation12], %s4955_s6  ;;  %p9143_p0 = scmp.ne.s32.totalorder %s9113_s20, 0 }
  0xc5   : > { %6339 = dma.done.wait (%p9143_p0), %s323_s15, 2048  }
  0xc6   : > { %6341 = vsyncadd (%p9143_p0), %s323_s15, 4294965248  ;;  %s9144_s9 = sld [smem:[#allocation25_spill]] }
  0xcc   : > { %s333_s19 = sand.u32 1, %s9144_s9  }
  0xcd   : > { %s4956_s18 = sshll.u32 %s333_s19, 7 }
  0xce   : > { %s6847_s23 = scalar_lea.vmem [#allocation14], %s4956_s18 }
  0xcf   : > { %6343 = dma.done.wait (%p6788_p7), %s323_s15, 2048  }
  0xd0   : > { %6345 = vsyncadd (%p6788_p7), %s323_s15, 4294965248  ;;  %p9145_p8 = scmp.eq.s32.totalorder %s6641_s21, 0 }
  0xd2   : > { %6347 = dma.done.wait (%p9145_p8), [#allocation16], 2048   ;;  %p9146_p11 = pmov %p9145_p8 }
  0xd3   : > { %s373_s20 = sand.u32 1, %s6360_s29   ;;  %s6858_s26 = sld [smem:[#allocation7]] }
  0xd4   : > { %6349 = vsyncadd (%p9146_p11), [#allocation16], 4294965248  ;;  %s6860_s22 = sld [smem:[#allocation8]]  ;;  %s4958_s7 = sshll.u32 %s373_s20, 7 }
  0xd5   : > { %s6864_s25 = scalar_lea.vmem [#allocation17], %s4958_s7 }
  0xda   : > { %p4959_p4 = scmp.ne.s32.totalorder %s6860_s22, 0 }
  0xdb   : > { %vm391_vm0 = vcmask (!%p4959_p4), 7168   ;;  %v6420_v0 = vmov (!%p4959_p4), -1e+30   ;;  %v6421_v1 = vmov (!%p4959_p4), 0.0  }
  0xdc   : > { %390 = sbr.rel (%p4959_p4) target bundleno = 268 (0x10c), region = 60  ;;  %392 = vst.msk [vmem:[#allocation2] sm:$0xff] (!%p4959_p4), %vm391_vm0, %v6420_v0  ;;  %393 = vst.msk [vmem:[#allocation2 + $0x8] sm:$0xff] (!%p4959_p4), %vm391_vm0, %v6420_v0 }
  0xdd   : > { %394 = vst.msk [vmem:[#allocation2 + $0x10] sm:$0xff] (!%p4959_p4), %vm391_vm0, %v6420_v0  ;;  %395 = vst.msk [vmem:[#allocation2 + $0x18] sm:$0xff] (!%p4959_p4), %vm391_vm0, %v6420_v0 }
  0xde   : > { %396 = vst.msk [vmem:[#allocation2 + $0x20] sm:$0xff] (!%p4959_p4), %vm391_vm0, %v6420_v0  ;;  %397 = vst.msk [vmem:[#allocation2 + $0x28] sm:$0xff] (!%p4959_p4), %vm391_vm0, %v6420_v0 }
  0xdf   : > { %398 = vst.msk [vmem:[#allocation2 + $0x30] sm:$0xff] (!%p4959_p4), %vm391_vm0, %v6420_v0  ;;  %399 = vst.msk [vmem:[#allocation2 + $0x38] sm:$0xff] (!%p4959_p4), %vm391_vm0, %v6420_v0 }
  0xe0   : > { %400 = vst.msk [vmem:[#allocation2 + $0x40] sm:$0xff] (!%p4959_p4), %vm391_vm0, %v6420_v0  ;;  %401 = vst.msk [vmem:[#allocation2 + $0x48] sm:$0xff] (!%p4959_p4), %vm391_vm0, %v6420_v0 }
  0xe1   : > { %402 = vst.msk [vmem:[#allocation2 + $0x50] sm:$0xff] (!%p4959_p4), %vm391_vm0, %v6420_v0  ;;  %403 = vst.msk [vmem:[#allocation2 + $0x58] sm:$0xff] (!%p4959_p4), %vm391_vm0, %v6420_v0 }
  0xe2   : > { %404 = vst.msk [vmem:[#allocation2 + $0x60] sm:$0xff] (!%p4959_p4), %vm391_vm0, %v6420_v0  ;;  %405 = vst.msk [vmem:[#allocation2 + $0x68] sm:$0xff] (!%p4959_p4), %vm391_vm0, %v6420_v0 }
  0xe3   : > { %406 = vst.msk [vmem:[#allocation2 + $0x70] sm:$0xff] %vm391_vm0, %v6420_v0  ;;  %407 = vst.msk [vmem:[#allocation2 + $0x78] sm:$0xff] %vm391_vm0, %v6420_v0 }
  0xe4   : > { %408 = vst.msk [vmem:[#allocation2 + $0x80] sm:$0xff] %vm391_vm0, %v6420_v0  ;;  %409 = vst.msk [vmem:[#allocation2 + $0x88] sm:$0xff] %vm391_vm0, %v6420_v0 }
  0xe5   : > { %410 = vst.msk [vmem:[#allocation2 + $0x90] sm:$0xff] %vm391_vm0, %v6420_v0  ;;  %411 = vst.msk [vmem:[#allocation2 + $0x98] sm:$0xff] %vm391_vm0, %v6420_v0 }
  0xe6   : > { %412 = vst.msk [vmem:[#allocation2 + $0xa0] sm:$0xff] %vm391_vm0, %v6420_v0  ;;  %413 = vst.msk [vmem:[#allocation2 + $0xa8] sm:$0xff] %vm391_vm0, %v6420_v0 }
  0xe7   : > { %414 = vst.msk [vmem:[#allocation2 + $0xb0] sm:$0xff] %vm391_vm0, %v6420_v0  ;;  %415 = vst.msk [vmem:[#allocation2 + $0xb8] sm:$0xff] %vm391_vm0, %v6420_v0 }
  0xe8   : > { %416 = vst.msk [vmem:[#allocation2 + $0xc0] sm:$0xff] %vm391_vm0, %v6420_v0  ;;  %417 = vst.msk [vmem:[#allocation2 + $0xc8] sm:$0xff] %vm391_vm0, %v6420_v0 }
  0xe9   : > { %418 = vst.msk [vmem:[#allocation2 + $0xd0] sm:$0xff] %vm391_vm0, %v6420_v0  ;;  %419 = vst.msk [vmem:[#allocation2 + $0xd8] sm:$0xff] %vm391_vm0, %v6420_v0 }
  0xea   : > { %420 = vst.msk [vmem:[#allocation2 + $0xe0] sm:$0xff] %vm391_vm0, %v6420_v0  ;;  %421 = vst.msk [vmem:[#allocation2 + $0xe8] sm:$0xff] %vm391_vm0, %v6420_v0 }
  0xeb   : > { %422 = vst.msk [vmem:[#allocation2 + $0xf0] sm:$0xff] %vm391_vm0, %v6420_v0  ;;  %423 = vst.msk [vmem:[#allocation2 + $0xf8] sm:$0xff] %vm391_vm0, %v6420_v0 }
  0xec   : > { %424 = vst.msk [vmem:[#allocation3] sm:$0xff] %vm391_vm0, %v6421_v1  ;;  %425 = vst.msk [vmem:[#allocation3 + $0x8] sm:$0xff] %vm391_vm0, %v6421_v1 }
  0xed   : > { %426 = vst.msk [vmem:[#allocation3 + $0x10] sm:$0xff] %vm391_vm0, %v6421_v1  ;;  %427 = vst.msk [vmem:[#allocation3 + $0x18] sm:$0xff] %vm391_vm0, %v6421_v1 }
  0xee   : > { %428 = vst.msk [vmem:[#allocation3 + $0x20] sm:$0xff] %vm391_vm0, %v6421_v1  ;;  %429 = vst.msk [vmem:[#allocation3 + $0x28] sm:$0xff] %vm391_vm0, %v6421_v1 }
  0xef   : > { %430 = vst.msk [vmem:[#allocation3 + $0x30] sm:$0xff] %vm391_vm0, %v6421_v1  ;;  %431 = vst.msk [vmem:[#allocation3 + $0x38] sm:$0xff] %vm391_vm0, %v6421_v1 }
  0xf0   : > { %432 = vst.msk [vmem:[#allocation3 + $0x40] sm:$0xff] %vm391_vm0, %v6421_v1  ;;  %433 = vst.msk [vmem:[#allocation3 + $0x48] sm:$0xff] %vm391_vm0, %v6421_v1 }
  0xf1   : > { %434 = vst.msk [vmem:[#allocation3 + $0x50] sm:$0xff] %vm391_vm0, %v6421_v1  ;;  %435 = vst.msk [vmem:[#allocation3 + $0x58] sm:$0xff] %vm391_vm0, %v6421_v1 }
  0xf2   : > { %436 = vst.msk [vmem:[#allocation3 + $0x60] sm:$0xff] %vm391_vm0, %v6421_v1  ;;  %437 = vst.msk [vmem:[#allocation3 + $0x68] sm:$0xff] %vm391_vm0, %v6421_v1 }
  0xf3   : > { %438 = vst.msk [vmem:[#allocation3 + $0x70] sm:$0xff] %vm391_vm0, %v6421_v1  ;;  %439 = vst.msk [vmem:[#allocation3 + $0x78] sm:$0xff] %vm391_vm0, %v6421_v1 }
  0xf4   : > { %440 = vst.msk [vmem:[#allocation3 + $0x80] sm:$0xff] %vm391_vm0, %v6421_v1  ;;  %441 = vst.msk [vmem:[#allocation3 + $0x88] sm:$0xff] %vm391_vm0, %v6421_v1 }
  0xf5   : > { %442 = vst.msk [vmem:[#allocation3 + $0x90] sm:$0xff] %vm391_vm0, %v6421_v1  ;;  %443 = vst.msk [vmem:[#allocation3 + $0x98] sm:$0xff] %vm391_vm0, %v6421_v1 }
  0xf6   : > { %444 = vst.msk [vmem:[#allocation3 + $0xa0] sm:$0xff] %vm391_vm0, %v6421_v1  ;;  %445 = vst.msk [vmem:[#allocation3 + $0xa8] sm:$0xff] %vm391_vm0, %v6421_v1 }
  0xf7   : > { %446 = vst.msk [vmem:[#allocation3 + $0xb0] sm:$0xff] %vm391_vm0, %v6421_v1  ;;  %447 = vst.msk [vmem:[#allocation3 + $0xb8] sm:$0xff] %vm391_vm0, %v6421_v1 }
  0xf8   : > { %448 = vst.msk [vmem:[#allocation3 + $0xc0] sm:$0xff] %vm391_vm0, %v6421_v1  ;;  %449 = vst.msk [vmem:[#allocation3 + $0xc8] sm:$0xff] %vm391_vm0, %v6421_v1 }
  0xf9   : > { %450 = vst.msk [vmem:[#allocation3 + $0xd0] sm:$0xff] %vm391_vm0, %v6421_v1  ;;  %451 = vst.msk [vmem:[#allocation3 + $0xd8] sm:$0xff] %vm391_vm0, %v6421_v1 }
  0xfa   : > { %452 = vst.msk [vmem:[#allocation3 + $0xe0] sm:$0xff] %vm391_vm0, %v6421_v1  ;;  %453 = vst.msk [vmem:[#allocation3 + $0xe8] sm:$0xff] %vm391_vm0, %v6421_v1 }
  0xfb   : > { %454 = vst.msk [vmem:[#allocation3 + $0xf0] sm:$0xff] %vm391_vm0, %v6421_v1  ;;  %455 = vst.msk [vmem:[#allocation3 + $0xf8] sm:$0xff] %vm391_vm0, %v6421_v1 }
  0xfc   : > { %456 = vst [vmem:[#allocation4] sm:$0xff] %v6421_v1  ;;  %457 = vst [vmem:[#allocation4 + $0x8] sm:$0xff] %v6421_v1 }
  0xfd   : > { %458 = vst [vmem:[#allocation4 + $0x10] sm:$0xff] %v6421_v1  ;;  %459 = vst [vmem:[#allocation4 + $0x18] sm:$0xff] %v6421_v1 }
  0xfe   : > { %460 = vst [vmem:[#allocation4 + $0x20] sm:$0xff] %v6421_v1  ;;  %461 = vst [vmem:[#allocation4 + $0x28] sm:$0xff] %v6421_v1 }
  0xff   : > { %462 = vst [vmem:[#allocation4 + $0x30] sm:$0xff] %v6421_v1  ;;  %463 = vst [vmem:[#allocation4 + $0x38] sm:$0xff] %v6421_v1 }
 0x100   : > { %464 = vst [vmem:[#allocation4 + $0x40] sm:$0xff] %v6421_v1  ;;  %465 = vst [vmem:[#allocation4 + $0x48] sm:$0xff] %v6421_v1 }
 0x101   : > { %466 = vst [vmem:[#allocation4 + $0x50] sm:$0xff] %v6421_v1  ;;  %467 = vst [vmem:[#allocation4 + $0x58] sm:$0xff] %v6421_v1 }
 0x102   : > { %468 = vst [vmem:[#allocation4 + $0x60] sm:$0xff] %v6421_v1  ;;  %469 = vst [vmem:[#allocation4 + $0x68] sm:$0xff] %v6421_v1 }
 0x103   : > { %470 = vst [vmem:[#allocation4 + $0x70] sm:$0xff] %v6421_v1  ;;  %471 = vst [vmem:[#allocation4 + $0x78] sm:$0xff] %v6421_v1 }
 0x104   : > { %472 = vst [vmem:[#allocation4 + $0x80] sm:$0xff] %v6421_v1  ;;  %473 = vst [vmem:[#allocation4 + $0x88] sm:$0xff] %v6421_v1 }
 0x105   : > { %474 = vst [vmem:[#allocation4 + $0x90] sm:$0xff] %v6421_v1  ;;  %475 = vst [vmem:[#allocation4 + $0x98] sm:$0xff] %v6421_v1 }
 0x106   : > { %476 = vst [vmem:[#allocation4 + $0xa0] sm:$0xff] %v6421_v1  ;;  %477 = vst [vmem:[#allocation4 + $0xa8] sm:$0xff] %v6421_v1 }
 0x107   : > { %478 = vst [vmem:[#allocation4 + $0xb0] sm:$0xff] %v6421_v1  ;;  %479 = vst [vmem:[#allocation4 + $0xb8] sm:$0xff] %v6421_v1 }
 0x108   : > { %480 = vst [vmem:[#allocation4 + $0xc0] sm:$0xff] %v6421_v1  ;;  %481 = vst [vmem:[#allocation4 + $0xc8] sm:$0xff] %v6421_v1 }
 0x109   : > { %482 = vst [vmem:[#allocation4 + $0xd0] sm:$0xff] %v6421_v1  ;;  %483 = vst [vmem:[#allocation4 + $0xd8] sm:$0xff] %v6421_v1 }
 0x10a   : > { %484 = vst [vmem:[#allocation4 + $0xe0] sm:$0xff] %v6421_v1  ;;  %485 = vst [vmem:[#allocation4 + $0xe8] sm:$0xff] %v6421_v1 }
 0x10b   : > { %486 = vst [vmem:[#allocation4 + $0xf0] sm:$0xff] %v6421_v1  ;;  %487 = vst [vmem:[#allocation4 + $0xf8] sm:$0xff] %v6421_v1 }
 0x10c PF: > { %p4960_p7 = scmp.ge.s32.totalorder %s6860_s22, %s6858_s26 }
 0x10e   : > { %491 = sbr.rel (%p4960_p7) target bundleno = 1138 (0x472), region = 64 }
 0x115   : > { %v5694_v2 = vld [vmem:[%s6840_s3] sm:$0xff]   ;;  %v5696_v4 = vld [vmem:[%s6840_s3 + $0x8] sm:$0xff]   ;;  %v5698_v6 = vld [vmem:[%s6840_s3 + $0x10] sm:$0xff]   ;;  %v6422_v53 = vmov 0   ;;  %vm1582_vm1 = vcmask 7168  }
 0x116   : > { %v5695_v3 = vld [vmem:[%s6840_s3 + $0x40] sm:$0xff]   ;;  %5273 = vmatprep.subr.bf16.mxu0 %v5694_v2  ;;  %v5697_v5 = vld [vmem:[%s6840_s3 + $0x48] sm:$0xff]   ;;  %v5699_v7 = vld [vmem:[%s6840_s3 + $0x50] sm:$0xff]   ;;  %5693 = vset.pattern.permute.xlu0 %v6422_v53 }
 0x117   : > { %5305 = vmatprep.subr.bf16.mxu1 %v5695_v3  ;;  %5274 = vmatpush3.bf16.xpose.msra.mxu0 %v5694_v2  ;;  %v5700_v8 = vld [vmem:[%s6840_s3 + $0x18] sm:$0xff]   ;;  %v5710_v10 = vld [vmem:[%s6832_s12] sm:$0xff]   ;;  %v5704_v14 = vld [vmem:[%s6840_s3 + $0x28] sm:$0xff]  }
 0x118   : > { %5306 = vmatpush3.bf16.xpose.msra.mxu1 %v5695_v3  ;;  %5275 = vmatprep.subr.bf16.mxu0 %v5696_v4  ;;  %v5701_v9 = vld [vmem:[%s6840_s3 + $0x58] sm:$0xff]   ;;  %v5711_v11 = vld [vmem:[%s6832_s12 + $0x40] sm:$0xff]   ;;  %v5705_v15 = vld [vmem:[%s6840_s3 + $0x68] sm:$0xff]  }
 0x119   : > { %5307 = vmatprep.subr.bf16.mxu1 %v5697_v5  ;;  %5289 = vmatprep.mubr.bf16.mxu0 %v5710_v10  ;;  %v5702_v12 = vld [vmem:[%s6840_s3 + $0x20] sm:$0xff]   ;;  %v5706_v16 = vld [vmem:[%s6840_s3 + $0x30] sm:$0xff]   ;;  %v5708_v18 = vld [vmem:[%s6840_s3 + $0x38] sm:$0xff]  }
 0x11a   : > { %5321 = vmatprep.mubr.bf16.mxu1 %v5711_v11  ;;  %v5703_v13 = vld [vmem:[%s6840_s3 + $0x60] sm:$0xff]   ;;  %v5707_v17 = vld [vmem:[%s6840_s3 + $0x70] sm:$0xff]   ;;  %v5709_v19 = vld [vmem:[%s6840_s3 + $0x78] sm:$0xff]   ;;  %5692 = vset.pattern.permute.xlu1 %v6422_v53 }
 0x11b   : > { %v5712_v20 = vld [vmem:[%s6832_s12 + $0x8] sm:$0xff]   ;;  %v5714_v22 = vld [vmem:[%s6832_s12 + $0x10] sm:$0xff]   ;;  %v5715_v24 = vld [vmem:[%s6832_s12 + $0x18] sm:$0xff]  }
 0x11c   : > { %v5713_v21 = vld [vmem:[%s6832_s12 + $0x48] sm:$0xff]   ;;  %v5716_v23 = vld [vmem:[%s6832_s12 + $0x50] sm:$0xff]   ;;  %v5717_v25 = vld [vmem:[%s6832_s12 + $0x58] sm:$0xff]  }
 0x11d   : > { %v5718_v26 = vld [vmem:[%s6832_s12 + $0x20] sm:$0xff]   ;;  %v5719_v28 = vld [vmem:[%s6832_s12 + $0x28] sm:$0xff]   ;;  %v5722_v30 = vld [vmem:[%s6832_s12 + $0x30] sm:$0xff]  }
 0x11e   : > { %v5720_v27 = vld [vmem:[%s6832_s12 + $0x60] sm:$0xff]   ;;  %v5721_v29 = vld [vmem:[%s6832_s12 + $0x68] sm:$0xff]   ;;  %v5724_v31 = vld [vmem:[%s6832_s12 + $0x70] sm:$0xff]  }
 0x11f   : > { %5276 = vmatpush3.bf16.xpose.msra.mxu0 %v5696_v4  ;;  %v5723_v32 = vld [vmem:[%s6832_s12 + $0x38] sm:$0xff]   ;;  %v7125_v3 = vld [vmem:[#allocation2 + $0x10] sm:$0xff]  ;;  %v7142_v11 = vld [vmem:[#allocation2] sm:$0xff] }
 0x120   : > { %5308 = vmatpush3.bf16.xpose.msra.mxu1 %v5697_v5  ;;  %5277 = vmatprep.subr.bf16.mxu0 %v5698_v6  ;;  %v5725_v33 = vld [vmem:[%s6832_s12 + $0x78] sm:$0xff]   ;;  %v7127_v4 = vld [vmem:[#allocation2 + $0x90] sm:$0xff]  ;;  %v5733_v10 = vld [vmem:[%s6847_s23 + $0x20] sm:$0xff]  }
 0x121   : > { %5309 = vmatprep.subr.bf16.mxu1 %v5699_v7  ;;  %v7192_v53 = vld [vmem:[#allocation2 + $0x38] sm:$0xff] }
 0x127   : > { %5278 = vmatpush3.bf16.xpose.msra.mxu0 %v5698_v6 }
 0x128   : > { %5310 = vmatpush3.bf16.xpose.msra.mxu1 %v5699_v7  ;;  %5279 = vmatprep.subr.bf16.mxu0 %v5700_v8 }
 0x129   : > { %5311 = vmatprep.subr.bf16.mxu1 %v5701_v9 }
 0x12f   : > { %5280 = vmatpush3.bf16.xpose.msra.mxu0 %v5700_v8 }
 0x130   : > { %5312 = vmatpush3.bf16.xpose.msra.mxu1 %v5701_v9  ;;  %5281 = vmatprep.subr.bf16.mxu0 %v5702_v12  ;;  %v7135_v9 = vld [vmem:[#allocation2 + $0x18] sm:$0xff] }
 0x131   : > { %5313 = vmatprep.subr.bf16.mxu1 %v5703_v13 }
 0x137   : > { %5282 = vmatpush3.bf16.xpose.msra.mxu0 %v5702_v12 }
 0x138   : > { %5314 = vmatpush3.bf16.xpose.msra.mxu1 %v5703_v13  ;;  %5283 = vmatprep.subr.bf16.mxu0 %v5704_v14 }
 0x139   : > { %5315 = vmatprep.subr.bf16.mxu1 %v5705_v15 }
 0x13f   : > { %5284 = vmatpush3.bf16.xpose.msra.mxu0 %v5704_v14 }
 0x140   : > { %5316 = vmatpush3.bf16.xpose.msra.mxu1 %v5705_v15  ;;  %5285 = vmatprep.subr.bf16.mxu0 %v5706_v16 }
 0x141   : > { %5317 = vmatprep.subr.bf16.mxu1 %v5707_v17 }
 0x147   : > { %5286 = vmatpush3.bf16.xpose.msra.mxu0 %v5706_v16 }
 0x148   : > { %5318 = vmatpush3.bf16.xpose.msra.mxu1 %v5707_v17  ;;  %5287 = vmatprep.subr.bf16.mxu0 %v5708_v18  ;;  %v7155_v17 = vld [vmem:[#allocation2 + $0x98] sm:$0xff] }
 0x149   : > { %5319 = vmatprep.subr.bf16.mxu1 %v5709_v19 }
 0x14f   : > { %5288 = vmatpush3.bf16.xpose.msra.mxu0 %v5708_v18  ;;  %v7159_v18 = vld [vmem:[#allocation2 + $0x80] sm:$0xff] }
 0x150   : > { %5320 = vmatpush3.bf16.xpose.msra.mxu1 %v5709_v19 }
 0x156   : > { %5290 = vmatmul.mubr.bf16.vlgmr.msra.gmra.mrb[0].mxu0 %v5712_v20  ;;  %v5726_v20 = vld [vmem:[%s6847_s23] sm:$0xff]  }
 0x157   : > { %5322 = vmatmul.mubr.bf16.vlgmr.msra.gmra.mrb[0].mxu1 %v5713_v21  ;;  %5293 = vmatprep.mubr.bf16.mxu0 %v5714_v22 }
 0x158   : > { %5325 = vmatprep.mubr.bf16.mxu1 %v5716_v23  ;;  %5337 = vmatprep.subr.bf16.mxu0 %v5726_v20 }
 0x159   : > { %5338 = vmatpush3.bf16.msra.mxu0 %v5726_v20 }
 0x15e   : > { %5294 = vmatmul.mubr.bf16.gmra.mrb[4].mxu0 %v5715_v24  ;;  %v7171_v24 = vld [vmem:[#allocation2 + $0x88] sm:$0xff] }
 0x15f   : > { %5326 = vmatmul.mubr.bf16.gmra.mrb[4].mxu1 %v5717_v25  ;;  %5297 = vmatprep.mubr.bf16.mxu0 %v5718_v26  ;;  %v7177_v26 = vld [vmem:[#allocation2 + $0x8] sm:$0xff] }
 0x160   : > { %5329 = vmatprep.mubr.bf16.mxu1 %v5720_v27  ;;  %v7226_v25 = vld [vmem:[#allocation2 + $0x28] sm:$0xff] }
 0x166   : > { %5298 = vmatmul.mubr.bf16.gmra.mrb[8].mxu0 %v5719_v28 }
 0x167   : > { %5330 = vmatmul.mubr.bf16.gmra.mrb[8].mxu1 %v5721_v29  ;;  %5301 = vmatprep.mubr.bf16.mxu0 %v5722_v30  ;;  %v5727_v29 = vld [vmem:[%s6847_s23 + $0x8] sm:$0xff]   ;;  %v5728_v30 = vld [vmem:[%s6847_s23 + $0x40] sm:$0xff]  }
 0x168   : > { %5333 = vmatprep.mubr.bf16.mxu1 %v5724_v31  ;;  %5339 = vmatprep.subr.bf16.mxu0 %v5727_v29 }
 0x169   : > { %5369 = vmatprep.subr.bf16.mxu1 %v5728_v30  ;;  %5340 = vmatpush3.bf16.msra.mxu0 %v5727_v29  ;;  %v7213_v29 = vld [vmem:[#allocation2 + $0xb0] sm:$0xff] }
 0x16a   : > { %5370 = vmatpush3.bf16.msra.mxu1 %v5728_v30 }
 0x16e   : > { %5302 = vmatmul.mubr.bf16.gmra.mrb[12].mxu0 %v5723_v32 }
 0x16f   : > { %5334 = vmatmul.mubr.bf16.gmra.mrb[12].mxu1 %v5725_v33 }
 0x229   : > { %v7029_v34 = vpop.f32.mrb[0].mxu0 }
 0x22a   : > { %9147 = vst [vmem:[#allocation34_spill] sm:$0xff] %v7029_v34  ;;  %v7031_v35 = vpop.f32.mrb[0].mxu1  ;;  %978 = vmax.xlane.f32.xlu1 %v7029_v34  ;;  %v7034_v36 = vpop.f32.mrb[1].mxu0  ;;  %v7397_v34 = vld [vmem:[#allocation2 + $0xe8] sm:$0xff] }
 0x22b   : > { %9148 = vst [vmem:[#allocation35_spill] sm:$0xff] %v7031_v35  ;;  %9149 = vst [vmem:[#allocation36_spill] sm:$0xff] %v7034_v36  ;;  %1010 = vmax.xlane.f32.xlu0 %v7031_v35  ;;  %v7037_v37 = vpop.f32.mrb[1].mxu1  ;;  %v7039_v38 = vpop.f32.mrb[2].mxu0 }
 0x22c   : > { %9150 = vst [vmem:[#allocation37_spill] sm:$0xff] %v7037_v37  ;;  %9151 = vst [vmem:[#allocation38_spill] sm:$0xff] %v7039_v38  ;;  %v7041_v39 = vpop.f32.mrb[2].mxu1  ;;  %v7043_v40 = vpop.f32.mrb[3].mxu0 }
 0x22d   : > { %9152 = vst [vmem:[#allocation39_spill] sm:$0xff] %v7041_v39  ;;  %9153 = vst [vmem:[#allocation40_spill] sm:$0xff] %v7043_v40  ;;  %v7045_v41 = vpop.f32.mrb[3].mxu1 }
 0x22e   : > { %9154 = vst [vmem:[#allocation41_spill] sm:$0xff] %v7045_v41  ;;  %980 = vmax.xlane.f32.xlu1 %v7039_v38  ;;  %v7401_v38 = vld [vmem:[#allocation2 + $0xe0] sm:$0xff] }
 0x22f   : > { %974 = vmax.xlane.f32.xlu0 %v7034_v36  ;;  %v7381_v36 = vld [vmem:[#allocation2 + $0x60] sm:$0xff] }
 0x230   : > { %9182 = vst [vmem:[#allocation69_spill] sm:$0xff] %v7381_v36 }
 0x231   : > { %v7049_v42 = vpop.f32.mrb[4].mxu0 }
 0x232   : > { %9155 = vst [vmem:[#allocation42_spill] sm:$0xff] %v7049_v42  ;;  %1012 = vmax.xlane.f32.xlu1 %v7041_v39  ;;  %v7052_v43 = vpop.f32.mrb[5].mxu0  ;;  %v7054_v44 = vpop.f32.mrb[4].mxu1  ;;  %v7375_v39 = vld [vmem:[#allocation2 + $0x68] sm:$0xff] }
 0x233   : > { %9156 = vst [vmem:[#allocation43_spill] sm:$0xff] %v7052_v43  ;;  %9157 = vst [vmem:[#allocation44_spill] sm:$0xff] %v7054_v44  ;;  %1006 = vmax.xlane.f32.xlu0 %v7037_v37  ;;  %v7057_v45 = vpop.f32.mrb[6].mxu0  ;;  %v7059_v46 = vpop.f32.mrb[5].mxu1 }
 0x234   : > { %9158 = vst [vmem:[#allocation45_spill] sm:$0xff] %v7057_v45  ;;  %9159 = vst [vmem:[#allocation46_spill] sm:$0xff] %v7059_v46  ;;  %v7061_v47 = vpop.f32.mrb[6].mxu1  ;;  %v7063_v48 = vpop.f32.mrb[7].mxu0 }
 0x235   : > { %9160 = vst [vmem:[#allocation47_spill] sm:$0xff] %v7061_v47  ;;  %9161 = vst [vmem:[#allocation48_spill] sm:$0xff] %v7063_v48  ;;  %v7065_v49 = vpop.f32.mrb[7].mxu1 }
 0x236   : > { %9162 = vst [vmem:[#allocation49_spill] sm:$0xff] %v7065_v49  ;;  %1008 = vmax.xlane.f32.xlu1 %v7045_v41 }
 0x237   : > { %976 = vmax.xlane.f32.xlu0 %v7043_v40 }
 0x239   : > { %v7069_v50 = vpop.f32.mrb[8].mxu0 }
 0x23a   : > { %9163 = vst [vmem:[#allocation50_spill] sm:$0xff] %v7069_v50  ;;  %988 = vmax.xlane.f32.xlu1 %v7057_v45  ;;  %v7072_v51 = vpop.f32.mrb[9].mxu0  ;;  %v7074_v52 = vpop.f32.mrb[8].mxu1 }
 0x23b   : > { %9164 = vst [vmem:[#allocation51_spill] sm:$0xff] %v7072_v51  ;;  %9165 = vst [vmem:[#allocation52_spill] sm:$0xff] %v7074_v52  ;;  %986 = vmax.xlane.f32.xlu0 %v7049_v42  ;;  %v7077_v54 = vpop.f32.mrb[10].mxu0  ;;  %v7079_v55 = vpop.f32.mrb[9].mxu1  ;;  %v7357_v42 = vld [vmem:[#allocation2 + $0xf8] sm:$0xff] }
 0x23c   : > { %9166 = vst [vmem:[#allocation53_spill] sm:$0xff] %v7077_v54  ;;  %9167 = vst [vmem:[#allocation54_spill] sm:$0xff] %v7079_v55  ;;  %v7081_v56 = vpop.f32.mrb[10].mxu1  ;;  %v7083_v57 = vpop.f32.mrb[11].mxu0 }
 0x23d   : > { %9168 = vst [vmem:[#allocation55_spill] sm:$0xff] %v7081_v56  ;;  %9169 = vst [vmem:[#allocation56_spill] sm:$0xff] %v7083_v57  ;;  %v7085_v58 = vpop.f32.mrb[11].mxu1 }
 0x23e   : > { %9170 = vst [vmem:[#allocation57_spill] sm:$0xff] %v7085_v58  ;;  %1020 = vmax.xlane.f32.xlu1 %v7061_v47  ;;  %v7339_v47 = vld [vmem:[#allocation2 + $0x78] sm:$0xff]  ;;  %9180 = vst [vmem:[#allocation67_spill] sm:$0xff] %v7357_v42 }
 0x23f   : > { %1018 = vmax.xlane.f32.xlu0 %v7054_v44  ;;  %v7361_v44 = vld [vmem:[#allocation2 + $0xf0] sm:$0xff] }
 0x240   : > { %9181 = vst [vmem:[#allocation68_spill] sm:$0xff] %v7361_v44 }
 0x241   : > { %v7089_v59 = vpop.f32.mrb[12].mxu0 }
 0x242   : > { %9171 = vst [vmem:[#allocation58_spill] sm:$0xff] %v7089_v59  ;;  %984 = vmax.xlane.f32.xlu1 %v7063_v48  ;;  %v7092_v60 = vpop.f32.mrb[13].mxu0  ;;  %v7094_v61 = vpop.f32.mrb[12].mxu1 }
 0x243   : > { %9172 = vst [vmem:[#allocation59_spill] sm:$0xff] %v7092_v60  ;;  %9173 = vst [vmem:[#allocation60_spill] sm:$0xff] %v7094_v61  ;;  %982 = vmax.xlane.f32.xlu0 %v7052_v43  ;;  %v7097_v62 = vpop.f32.mrb[14].mxu0  ;;  %v7099_v63 = vpop.f32.mrb[13].mxu1  ;;  %v7343_v43 = vld [vmem:[#allocation2 + $0x70] sm:$0xff] }
 0x244   : > { %9174 = vst [vmem:[#allocation61_spill] sm:$0xff] %v7097_v62  ;;  %9175 = vst [vmem:[#allocation62_spill] sm:$0xff] %v7099_v63  ;;  %v7101_v0 = vpop.f32.mrb[14].mxu1  ;;  %v7103_v1 = vpop.f32.mrb[15].mxu0 }
 0x245   : > { %9176 = vst [vmem:[#allocation63_spill] sm:$0xff] %v7101_v0  ;;  %9177 = vst [vmem:[#allocation64_spill] sm:$0xff] %v7103_v1  ;;  %v7105_v2 = vpop.f32.mrb[15].mxu1 }
 0x246   : > { %9178 = vst [vmem:[#allocation65_spill] sm:$0xff] %v7105_v2  ;;  %1016 = vmax.xlane.f32.xlu1 %v7065_v49  ;;  %v7306_v49 = vld [vmem:[#allocation2 + $0x40] sm:$0xff]  ;;  %9179 = vst [vmem:[#allocation66_spill] sm:$0xff] %v7343_v43 }
 0x247   : > { %1014 = vmax.xlane.f32.xlu0 %v7059_v46  ;;  %v7321_v46 = vld [vmem:[#allocation2 + $0xc8] sm:$0xff] }
 0x24a   : > { %996 = vmax.xlane.f32.xlu1 %v7077_v54  ;;  %v5741_v54 = vld [vmem:[%s6847_s23 + $0x78] sm:$0xff]  }
 0x24b   : > { %994 = vmax.xlane.f32.xlu0 %v7069_v50  ;;  %v5740_v50 = vld [vmem:[%s6847_s23 + $0x70] sm:$0xff]  }
 0x24e   : > { %1028 = vmax.xlane.f32.xlu1 %v7081_v56 }
 0x24f   : > { %1026 = vmax.xlane.f32.xlu0 %v7074_v52 }
 0x252   : > { %992 = vmax.xlane.f32.xlu1 %v7083_v57  ;;  %v5739_v57 = vld [vmem:[%s6847_s23 + $0x38] sm:$0xff]  }
 0x253   : > { %990 = vmax.xlane.f32.xlu0 %v7072_v51 }
 0x256   : > { %1024 = vmax.xlane.f32.xlu1 %v7085_v58 }
 0x257   : > { %1022 = vmax.xlane.f32.xlu0 %v7079_v55  ;;  %v5737_v55 = vld [vmem:[%s6847_s23 + $0x30] sm:$0xff]  }
 0x25a   : > { %1004 = vmax.xlane.f32.xlu1 %v7097_v62  ;;  %v5738_v62 = vld [vmem:[%s6847_s23 + $0x68] sm:$0xff]  }
 0x25b   : > { %1002 = vmax.xlane.f32.xlu0 %v7089_v59 }
 0x25e   : > { %1036 = vmax.xlane.f32.xlu1 %v7101_v0  ;;  %v5735_v0 = vld [vmem:[%s6847_s23 + $0x28] sm:$0xff]  }
 0x25f   : > { %1034 = vmax.xlane.f32.xlu0 %v7094_v61 }
 0x262   : > { %1000 = vmax.xlane.f32.xlu1 %v7103_v1  ;;  %v7264_v1 = vld [vmem:[#allocation2 + $0x58] sm:$0xff] }
 0x263   : > { %998 = vmax.xlane.f32.xlu0 %v7092_v60 }
 0x266   : > { %1032 = vmax.xlane.f32.xlu1 %v7105_v2 }
 0x267   : > { %1030 = vmax.xlane.f32.xlu0 %v7099_v63 }
 0x2b7   : > { %v979_v5 = vpop.xlane.xlu1 %978 }
 0x2b8   : > { %v1011_v6 = vpop.xlane.xlu0 %1010  ;;  %v7130_v7 = vmax.f32 %v7125_v3, %v979_v5  ;;  %v7196_v5 = vld [vmem:[#allocation2 + $0x30] sm:$0xff] }
 0x2b9   : > { %v7133_v8 = vmax.f32 %v7127_v4, %v1011_v6 }
 0x2ba   : > { %2243 = vst.msk [vmem:[#allocation2 + $0x10] sm:$0xff] %vm1582_vm1, %v7130_v7  ;;  %1178 = vperm.xlu1 %5692, %v7130_v7  }
 0x2bb   : > { %2259 = vst.msk [vmem:[#allocation2 + $0x90] sm:$0xff] %vm1582_vm1, %v7133_v8  ;;  %1258 = vperm.xlu0 %5693, %v7133_v8   ;;  %v981_v13 = vpop.xlane.xlu1 %980 }
 0x2bc   : > { %v975_v14 = vpop.xlane.xlu0 %974  ;;  %v7150_v15 = vmax.f32 %v7135_v9, %v981_v13  ;;  %v5729_v13 = vld [vmem:[%s6847_s23 + $0x10] sm:$0xff]  }
 0x2bd   : > { %v7153_v16 = vmax.f32 %v7142_v11, %v975_v14  ;;  %v5730_v14 = vld [vmem:[%s6847_s23 + $0x48] sm:$0xff]   ;;  %5341 = vmatprep.subr.bf16.mxu0 %v5729_v13 }
 0x2be   : > { %2244 = vst.msk [vmem:[#allocation2 + $0x18] sm:$0xff] %vm1582_vm1, %v7150_v15  ;;  %5371 = vmatprep.subr.bf16.mxu1 %v5730_v14  ;;  %5342 = vmatpush3.bf16.msra.mxu0 %v5729_v13  ;;  %v5734_v13 = vld [vmem:[%s6847_s23 + $0x58] sm:$0xff]  }
 0x2bf   : > { %2241 = vst.msk [vmem:[#allocation2] sm:$0xff] %vm1582_vm1, %v7153_v16  ;;  %1168 = vperm.xlu0 %5693, %v7153_v16   ;;  %v1013_v19 = vpop.xlane.xlu1 %1012  ;;  %5372 = vmatpush3.bf16.msra.mxu1 %v5730_v14  ;;  %v7232_v14 = vld [vmem:[#allocation2 + $0x20] sm:$0xff] }
 0x2c0   : > { %v1007_v21 = vpop.xlane.xlu0 %1006  ;;  %v7166_v22 = vmax.f32 %v7155_v17, %v1013_v19 }
 0x2c1   : > { %v7169_v23 = vmax.f32 %v7159_v18, %v1007_v21 }
 0x2c2   : > { %2260 = vst.msk [vmem:[#allocation2 + $0x98] sm:$0xff] %vm1582_vm1, %v7166_v22 }
 0x2c3   : > { %2257 = vst.msk [vmem:[#allocation2 + $0x80] sm:$0xff] %vm1582_vm1, %v7169_v23  ;;  %1248 = vperm.xlu1 %5692, %v7169_v23   ;;  %v1009_v28 = vpop.xlane.xlu1 %1008 }
 0x2c4   : > { %v7187_v31 = vmax.f32 %v7171_v24, %v1009_v28  ;;  %v977_v32 = vpop.xlane.xlu0 %976  ;;  %v7209_v28 = vld [vmem:[#allocation2 + $0xb8] sm:$0xff] }
 0x2c5   : > { %v7190_v33 = vmax.f32 %v7177_v26, %v977_v32  ;;  %v5731_v32 = vld [vmem:[%s6847_s23 + $0x18] sm:$0xff]  }
 0x2c6   : > { %2258 = vst.msk [vmem:[#allocation2 + $0x88] sm:$0xff] %vm1582_vm1, %v7187_v31  ;;  %5343 = vmatprep.subr.bf16.mxu0 %v5731_v32 }
 0x2c7   : > { %2242 = vst.msk [vmem:[#allocation2 + $0x8] sm:$0xff] %vm1582_vm1, %v7190_v33  ;;  %1183 = vperm.xlu1 %5692, %v7150_v15   ;;  %v989_v6 = vpop.xlane.xlu1 %988  ;;  %5344 = vmatpush3.bf16.msra.mxu0 %v5731_v32 }
 0x2c8   : > { %v987_v19 = vpop.xlane.xlu0 %986  ;;  %v7204_v20 = vmax.f32 %v7192_v53, %v989_v6  ;;  %v5732_v6 = vld [vmem:[%s6847_s23 + $0x50] sm:$0xff]   ;;  %5345 = vmatprep.subr.bf16.mxu0 %v5733_v10 }
 0x2c9   : > { %v7207_v21 = vmax.f32 %v7196_v5, %v987_v19  ;;  %5373 = vmatprep.subr.bf16.mxu1 %v5732_v6 }
 0x2ca   : > { %2248 = vst.msk [vmem:[#allocation2 + $0x38] sm:$0xff] %vm1582_vm1, %v7204_v20  ;;  %5374 = vmatpush3.bf16.msra.mxu1 %v5732_v6  ;;  %v7247_v6 = vld [vmem:[#allocation2 + $0xa8] sm:$0xff] }
 0x2cb   : > { %2247 = vst.msk [vmem:[#allocation2 + $0x30] sm:$0xff] %vm1582_vm1, %v7207_v21  ;;  %1263 = vperm.xlu1 %5692, %v7166_v22   ;;  %v1021_v30 = vpop.xlane.xlu1 %1020  ;;  %5375 = vmatprep.subr.bf16.mxu1 %v5734_v13 }
 0x2cc   : > { %v1019_v19 = vpop.xlane.xlu0 %1018  ;;  %v7221_v12 = vmax.f32 %v7209_v28, %v1021_v30  ;;  %v7251_v30 = vld [vmem:[#allocation2 + $0xa0] sm:$0xff]  ;;  %5346 = vmatpush3.bf16.msra.mxu0 %v5733_v10  ;;  %v7268_v10 = vld [vmem:[#allocation2 + $0x50] sm:$0xff] }
 0x2cd   : > { %v7224_v27 = vmax.f32 %v7213_v29, %v1019_v19  ;;  %5347 = vmatprep.subr.bf16.mxu0 %v5735_v0 }
 0x2ce   : > { %2264 = vst.msk [vmem:[#allocation2 + $0xb8] sm:$0xff] %vm1582_vm1, %v7221_v12  ;;  %5376 = vmatpush3.bf16.msra.mxu1 %v5734_v13 }
 0x2cf   : > { %2263 = vst.msk [vmem:[#allocation2 + $0xb0] sm:$0xff] %vm1582_vm1, %v7224_v27  ;;  %1173 = vperm.xlu1 %5692, %v7190_v33   ;;  %v985_v19 = vpop.xlane.xlu1 %984 }
 0x2d0   : > { %v983_v61 = vpop.xlane.xlu0 %982  ;;  %v7242_v63 = vmax.f32 %v7226_v25, %v985_v19  ;;  %5348 = vmatpush3.bf16.msra.mxu0 %v5735_v0  ;;  %v7282_v0 = vld [vmem:[#allocation2 + $0xd8] sm:$0xff] }
 0x2d1   : > { %v7245_v32 = vmax.f32 %v7232_v14, %v983_v61  ;;  %v5736_v61 = vld [vmem:[%s6847_s23 + $0x60] sm:$0xff]   ;;  %5349 = vmatprep.subr.bf16.mxu0 %v5737_v55 }
 0x2d2   : > { %2246 = vst.msk [vmem:[#allocation2 + $0x28] sm:$0xff] %vm1582_vm1, %v7242_v63  ;;  %5377 = vmatprep.subr.bf16.mxu1 %v5736_v61 }
 0x2d3   : > { %2245 = vst.msk [vmem:[#allocation2 + $0x20] sm:$0xff] %vm1582_vm1, %v7245_v32  ;;  %1253 = vperm.xlu1 %5692, %v7187_v31   ;;  %v1017_v19 = vpop.xlane.xlu1 %1016  ;;  %5378 = vmatpush3.bf16.msra.mxu1 %v5736_v61  ;;  %v7286_v61 = vld [vmem:[#allocation2 + $0xd0] sm:$0xff] }
 0x2d4   : > { %v1015_v60 = vpop.xlane.xlu0 %1014  ;;  %v7259_v2 = vmax.f32 %v7247_v6, %v1017_v19  ;;  %5379 = vmatprep.subr.bf16.mxu1 %v5738_v62  ;;  %5350 = vmatpush3.bf16.msra.mxu0 %v5737_v55 }
 0x2d5   : > { %v7262_v59 = vmax.f32 %v7251_v30, %v1015_v60  ;;  %5351 = vmatprep.subr.bf16.mxu0 %v5739_v57 }
 0x2d6   : > { %2262 = vst.msk [vmem:[#allocation2 + $0xa8] sm:$0xff] %vm1582_vm1, %v7259_v2 }
 0x2d7   : > { %2261 = vst.msk [vmem:[#allocation2 + $0xa0] sm:$0xff] %vm1582_vm1, %v7262_v59  ;;  %1268 = vperm.xlu0 %5693, %v7262_v59   ;;  %1198 = vperm.xlu1 %5692, %v7207_v21   ;;  %v997_v60 = vpop.xlane.xlu1 %996 }
 0x2d8   : > { %v995_v13 = vpop.xlane.xlu0 %994  ;;  %v7275_v19 = vmax.f32 %v7264_v1, %v997_v60  ;;  %5380 = vmatpush3.bf16.msra.mxu1 %v5738_v62  ;;  %v7302_v60 = vld [vmem:[#allocation2 + $0x48] sm:$0xff]  ;;  %5352 = vmatpush3.bf16.msra.mxu0 %v5739_v57 }
 0x2d9   : > { %v7280_v51 = vmax.f32 %v7268_v10, %v995_v13  ;;  %5381 = vmatprep.subr.bf16.mxu1 %v5740_v50 }
 0x2da   : > { %2252 = vst.msk [vmem:[#allocation2 + $0x58] sm:$0xff] %vm1582_vm1, %v7275_v19 }
 0x2db   : > { %2251 = vst.msk [vmem:[#allocation2 + $0x50] sm:$0xff] %vm1582_vm1, %v7280_v51  ;;  %1203 = vperm.xlu0 %5693, %v7204_v20   ;;  %1278 = vperm.xlu1 %5692, %v7224_v27   ;;  %v1029_v13 = vpop.xlane.xlu1 %1028 }
 0x2dc   : > { %v1027_v58 = vpop.xlane.xlu0 %1026  ;;  %v7295_v52 = vmax.f32 %v7282_v0, %v1029_v13  ;;  %5382 = vmatpush3.bf16.msra.mxu1 %v5740_v50  ;;  %v7325_v13 = vld [vmem:[#allocation2 + $0xc0] sm:$0xff] }
 0x2dd   : > { %v7300_v56 = vmax.f32 %v7286_v61, %v1027_v58  ;;  %5383 = vmatprep.subr.bf16.mxu1 %v5741_v54 }
 0x2de   : > { %2268 = vst.msk [vmem:[#allocation2 + $0xd8] sm:$0xff] %vm1582_vm1, %v7295_v52 }
 0x2df   : > { %2267 = vst.msk [vmem:[#allocation2 + $0xd0] sm:$0xff] %vm1582_vm1, %v7300_v56  ;;  %1283 = vperm.xlu0 %5693, %v7221_v12   ;;  %1188 = vperm.xlu1 %5692, %v7245_v32   ;;  %v993_v55 = vpop.xlane.xlu1 %992 }
 0x2e0   : > { %v991_v58 = vpop.xlane.xlu0 %990  ;;  %v7315_v62 = vmax.f32 %v7302_v60, %v993_v55  ;;  %5384 = vmatpush3.bf16.msra.mxu1 %v5741_v54 }
 0x2e1   : > { %v7319_v48 = vmax.f32 %v7306_v49, %v991_v58 }
 0x2e2   : > { %2250 = vst.msk [vmem:[#allocation2 + $0x48] sm:$0xff] %vm1582_vm1, %v7315_v62 }
 0x2e3   : > { %2249 = vst.msk [vmem:[#allocation2 + $0x40] sm:$0xff] %vm1582_vm1, %v7319_v48  ;;  %1223 = vperm.xlu0 %5693, %v7275_v19   ;;  %1193 = vperm.xlu1 %5692, %v7242_v63   ;;  %v1025_v50 = vpop.xlane.xlu1 %1024 }
 0x2e4   : > { %v1023_v57 = vpop.xlane.xlu0 %1022  ;;  %v7334_v55 = vmax.f32 %v7321_v46, %v1025_v50 }
 0x2e5   : > { %v7337_v58 = vmax.f32 %v7325_v13, %v1023_v57 }
 0x2e6   : > { %2266 = vst.msk [vmem:[#allocation2 + $0xc8] sm:$0xff] %vm1582_vm1, %v7334_v55 }
 0x2e7   : > { %2265 = vst.msk [vmem:[#allocation2 + $0xc0] sm:$0xff] %vm1582_vm1, %v7337_v58  ;;  %1303 = vperm.xlu0 %5693, %v7295_v52   ;;  %1273 = vperm.xlu1 %5692, %v7259_v2   ;;  %v1005_v54 = vpop.xlane.xlu1 %1004 }
 0x2e8   : > { %v1003_v50 = vpop.xlane.xlu0 %1002  ;;  %v7352_v57 = vmax.f32 %v7339_v47, %v1005_v54 }
 0x2e9   : > { %v7355_v45 = vmax.f32 %v7343_v43, %v1003_v50  ;;  %v1071_v43 = vsub.f32 %v7177_v26, %v7190_v33  ;;  %v1077_v26 = vsub.f32 %v7192_v53, %v7204_v20 }
 0x2ea   : > { %2256 = vst.msk [vmem:[#allocation2 + $0x78] sm:$0xff] %vm1582_vm1, %v7352_v57 }
 0x2eb   : > { %2255 = vst.msk [vmem:[#allocation2 + $0x70] sm:$0xff] %vm1582_vm1, %v7355_v45  ;;  %1213 = vperm.xlu0 %5693, %v7315_v62   ;;  %1218 = vperm.xlu1 %5692, %v7280_v51   ;;  %v1037_v54 = vpop.xlane.xlu1 %1036 }
 0x2ec   : > { %v1035_v50 = vpop.xlane.xlu0 %1034  ;;  %v7370_v40 = vmax.f32 %v7357_v42, %v1037_v54 }
 0x2ed   : > { %v7373_v37 = vmax.f32 %v7361_v44, %v1035_v50  ;;  %v1070_v50 = vsub.f32 %v7142_v11, %v7153_v16 }
 0x2ee   : > { %2272 = vst.msk [vmem:[#allocation2 + $0xf8] sm:$0xff] %vm1582_vm1, %v7370_v40 }
 0x2ef   : > { %2271 = vst.msk [vmem:[#allocation2 + $0xf0] sm:$0xff] %vm1582_vm1, %v7373_v37  ;;  %1293 = vperm.xlu0 %5693, %v7334_v55   ;;  %1298 = vperm.xlu1 %5692, %v7300_v56   ;;  %v1001_v54 = vpop.xlane.xlu1 %1000  ;;  %v1102_v16 = vmul.f32 1.442695, %v1070_v50  ;;  %v1104_v50 = vmul.f32 1.442695, %v1071_v43 }
 0x2f0   : > { %v999_v41 = vpop.xlane.xlu0 %998  ;;  %v7392_v42 = vmax.f32 %v7375_v39, %v1001_v54  ;;  %v1116_v43 = vmul.f32 1.442695, %v1077_v26  ;;  %v1081_v26 = vsub.f32 %v7264_v1, %v7275_v19  ;;  %v9188_v1 = vsub.f32 %v7213_v29, %v7224_v27 }
 0x2f1   : > { %v7395_v35 = vmax.f32 %v7381_v36, %v999_v41  ;;  %v1073_v41 = vsub.f32 %v7135_v9, %v7150_v15  ;;  %5742 = vpow2.f32 %v1102_v16  ;;  %v1075_v15 = vsub.f32 %v7226_v25, %v7242_v63 }
 0x2f2   : > { %2254 = vst.msk [vmem:[#allocation2 + $0x68] sm:$0xff] %vm1582_vm1, %v7392_v42  ;;  %v1087_v16 = vsub.f32 %v7171_v24, %v7187_v31  ;;  %v1074_v63 = vsub.f32 %v7232_v14, %v7245_v32  ;;  %v9184_v31 = vsub.f32 %v7155_v17, %v7166_v22  ;;  %v1091_v32 = vsub.f32 %v7247_v6, %v7259_v2 }
 0x2f3   : > { %2253 = vst.msk [vmem:[#allocation2 + $0x60] sm:$0xff] %vm1582_vm1, %v7395_v35  ;;  %1243 = vperm.xlu0 %5693, %v7352_v57   ;;  %1208 = vperm.xlu1 %5692, %v7319_v48   ;;  %v1033_v11 = vpop.xlane.xlu1 %1032  ;;  %v1108_v9 = vmul.f32 1.442695, %v1073_v41  ;;  %v1112_v33 = vmul.f32 1.442695, %v1075_v15  ;;  %v9186_v2 = vsub.f32 %v7127_v4, %v7133_v8 }
 0x2f4   : > { %v1031_v54 = vpop.xlane.xlu0 %1030  ;;  %v7410_v44 = vmax.f32 %v7397_v34, %v1033_v11  ;;  %v9183_v11 = vsub.f32 %v7125_v3, %v7130_v7  ;;  %v1136_v53 = vmul.f32 1.442695, %v1087_v16  ;;  %v1076_v3 = vsub.f32 %v7196_v5, %v7207_v21 }
 0x2f5   : > { %v7413_v36 = vmax.f32 %v7401_v38, %v1031_v54  ;;  %5744 = vpow2.f32 %v1108_v9  ;;  %v1110_v7 = vmul.f32 1.442695, %v1074_v63  ;;  %v1140_v20 = vmul.f32 1.442695, %v9184_v31 }
 0x2f6   : > { %2270 = vst.msk [vmem:[#allocation2 + $0xe8] sm:$0xff] %vm1582_vm1, %v7410_v44  ;;  %v1106_v54 = vmul.f32 1.442695, %v9183_v11  ;;  %5746 = vpow2.f32 %v1104_v50  ;;  %v1114_v14 = vmul.f32 1.442695, %v1076_v3  ;;  %v9185_v21 = vsub.f32 %v7159_v18, %v7169_v23 }
 0x2f7   : > { %2269 = vst.msk [vmem:[#allocation2 + $0xe0] sm:$0xff] %vm1582_vm1, %v7413_v36  ;;  %1288 = vperm.xlu1 %5692, %v7337_v58   ;;  %1233 = vperm.xlu0 %5693, %v7392_v42   ;;  %5748 = vpow2.f32 %v1112_v33  ;;  %v1144_v17 = vmul.f32 1.442695, %v1091_v32  ;;  %v1138_v6 = vmul.f32 1.442695, %v9186_v2  ;;  %v1090_v18 = vsub.f32 %v7251_v30, %v7262_v59 }
 0x2f8   : > { %5750 = vpow2.f32 %v1106_v54  ;;  %v1134_v9 = vmul.f32 1.442695, %v9185_v21  ;;  %v9187_v23 = vsub.f32 %v7209_v28, %v7221_v12  ;;  %v1124_v59 = vmul.f32 1.442695, %v1081_v26 }
 0x2f9   : > { %5752 = vpow2.f32 %v1116_v43  ;;  %v1142_v8 = vmul.f32 1.442695, %v1090_v18  ;;  %v1097_v12 = vsub.f32 %v7282_v0, %v7295_v52  ;;  %v1146_v19 = vmul.f32 1.442695, %v9188_v1 }
 0x2fa   : > { %5754 = vpow2.f32 %v1136_v53  ;;  %v1148_v50 = vmul.f32 1.442695, %v9187_v23  ;;  %v1079_v54 = vsub.f32 %v7302_v60, %v7315_v62  ;;  %v9189_v0 = vsub.f32 %v7268_v10, %v7280_v51 }
 0x2fb   : > { %1238 = vperm.xlu1 %5692, %v7355_v45   ;;  %1313 = vperm.xlu0 %5693, %v7410_v44   ;;  %v7438_v25 = vpop.eup %5742  ;;  %5756 = vpow2.f32 %v1110_v7  ;;  %v1156_v11 = vmul.f32 1.442695, %v1097_v12  ;;  %v1095_v43 = vsub.f32 %v7321_v46, %v7334_v55  ;;  %v9190_v62 = vsub.f32 %v7286_v61, %v7300_v56  ;;  %v9196_v12 = vld [vmem:[#allocation34_spill] sm:$0xff] }
 0x2fc   : > { %5758 = vpow2.f32 %v1140_v20  ;;  %v1122_v27 = vmul.f32 1.442695, %v9189_v0  ;;  %v1120_v29 = vmul.f32 1.442695, %v1079_v54  ;;  %v1085_v10 = vsub.f32 %v7339_v47, %v7352_v57 }
 0x2fd   : > { %5760 = vpow2.f32 %v1114_v14  ;;  %v1154_v53 = vmul.f32 1.442695, %v9190_v62  ;;  %v1152_v51 = vmul.f32 1.442695, %v1095_v43  ;;  %v9191_v55 = vsub.f32 %v7306_v49, %v7319_v48  ;;  %v9198_v43 = vld [vmem:[#allocation38_spill] sm:$0xff] }
 0x2fe   : > { %5762 = vpow2.f32 %v1134_v9  ;;  %v1132_v56 = vmul.f32 1.442695, %v1085_v10  ;;  %v1083_v61 = vsub.f32 %v7375_v39, %v7392_v42  ;;  %v9192_v57 = vsub.f32 %v7325_v13, %v7337_v58  ;;  %v9193_v42 = vld [vmem:[#allocation66_spill] sm:$0xff]  ;;  %v9195_v13 = vld [vmem:[#allocation69_spill] sm:$0xff]  ;;  %v9199_v10 = vld [vmem:[#allocation36_spill] sm:$0xff] }
 0x2ff   : > { %1228 = vperm.xlu1 %5692, %v7395_v35   ;;  %1323 = vperm.xlu0 %5693, %v7370_v40   ;;  %v7444_v24 = vpop.eup %5744  ;;  %5764 = vpow2.f32 %v1144_v17  ;;  %v1118_v7 = vmul.f32 1.442695, %v9191_v55  ;;  %v1099_v49 = vsub.f32 %v7397_v34, %v7410_v44  ;;  %v9194_v32 = vsub.f32 %v9193_v42, %v7355_v45 }
 0x300   : > { %v7453_v41 = vpop.eup %5746  ;;  %5766 = vpow2.f32 %v1138_v6  ;;  %v1150_v20 = vmul.f32 1.442695, %v9192_v57  ;;  %v1128_v48 = vmul.f32 1.442695, %v1083_v61  ;;  %v1082_v58 = vsub.f32 %v9195_v13, %v7395_v35 }
 0x301   : > { %v7455_v5 = vpop.eup %5748  ;;  %5768 = vpow2.f32 %v1148_v50  ;;  %v1130_v21 = vmul.f32 1.442695, %v9194_v32  ;;  %v1160_v9 = vmul.f32 1.442695, %v1099_v49  ;;  %v1098_v45 = vsub.f32 %v7401_v38, %v7413_v36  ;;  %v9202_v32 = vld [vmem:[#allocation40_spill] sm:$0xff] }
 0x302   : > { %v7462_v22 = vpop.eup %5750  ;;  %5770 = vpow2.f32 %v1142_v8  ;;  %v1126_v44 = vmul.f32 1.442695, %v1082_v58 }
 0x303   : > { %1308 = vperm.xlu1 %5692, %v7413_v36   ;;  %1649 = vperm.xlu0 %5693, %v7438_v25   ;;  %v7464_v15 = vpop.eup %5752  ;;  %5772 = vpow2.f32 %v1124_v59  ;;  %v1158_v35 = vmul.f32 1.442695, %v1098_v45 }
 0x304   : > { %v7478_v33 = vpop.eup %5754  ;;  %5774 = vpow2.f32 %v1146_v19 }
 0x305   : > { %v7480_v4 = vpop.eup %5756  ;;  %5776 = vpow2.f32 %v1156_v11  ;;  %v9197_v11 = vld [vmem:[#allocation35_spill] sm:$0xff] }
 0x306   : > { %v7486_v28 = vpop.eup %5758  ;;  %5778 = vpow2.f32 %v1122_v27 }
 0x307   : > { %1318 = vperm.xlu1 %5692, %v7373_v37   ;;  %1664 = vperm.xlu0 %5693, %v7444_v24   ;;  %v7488_v30 = vpop.eup %5760  ;;  %5780 = vpow2.f32 %v1120_v29 }
 0x308   : > { %v7497_v16 = vpop.eup %5762  ;;  %5782 = vpow2.f32 %v1154_v53 }
 0x309   : > { %v7499_v52 = vpop.eup %5764  ;;  %5784 = vpow2.f32 %v1152_v51 }
 0x30a   : > { %v7508_v63 = vpop.eup %5766  ;;  %5786 = vpow2.f32 %v1118_v7 }
 0x30b   : > { %1654 = vperm.xlu1 %5692, %v7453_v41   ;;  %1674 = vperm.xlu0 %5693, %v7455_v5   ;;  %v7510_v60 = vpop.eup %5768  ;;  %5788 = vpow2.f32 %v1132_v56  ;;  %v9200_v56 = vld [vmem:[#allocation39_spill] sm:$0xff] }
 0x30c   : > { %v7519_v3 = vpop.eup %5770  ;;  %5790 = vpow2.f32 %v1150_v20 }
 0x30d   : > { %v7521_v46 = vpop.eup %5772  ;;  %5792 = vpow2.f32 %v1128_v48  ;;  %v9201_v48 = vld [vmem:[#allocation37_spill] sm:$0xff] }
 0x30e   : > { %v7530_v31 = vpop.eup %5774  ;;  %5794 = vpow2.f32 %v1130_v21 }
 0x30f   : > { %1659 = vperm.xlu1 %5692, %v7462_v22   ;;  %1684 = vperm.xlu0 %5693, %v7464_v15   ;;  %v7532_v47 = vpop.eup %5776  ;;  %5796 = vpow2.f32 %v1160_v9 }
 0x310   : > { %v7541_v14 = vpop.eup %5778  ;;  %5798 = vpow2.f32 %v1126_v44  ;;  %v9203_v44 = vld [vmem:[#allocation41_spill] sm:$0xff] }
 0x311   : > { %v7543_v39 = vpop.eup %5780  ;;  %5800 = vpow2.f32 %v1158_v35 }
 0x312   : > { %v7552_v17 = vpop.eup %5782 }
 0x313   : > { %1669 = vperm.xlu1 %5692, %v7480_v4   ;;  %1734 = vperm.xlu0 %5693, %v7478_v33   ;;  %v7554_v34 = vpop.eup %5784 }
 0x314   : > { %v7560_v2 = vpop.eup %5786 }
 0x315   : > { %v7562_v6 = vpop.eup %5788 }
 0x316   : > { %v7566_v18 = vpop.eup %5790 }
 0x317   : > { %1679 = vperm.xlu1 %5692, %v7488_v30   ;;  %1744 = vperm.xlu0 %5693, %v7486_v28   ;;  %v7568_v23 = vpop.eup %5792 }
 0x318   : > { %v7572_v36 = vpop.eup %5794 }
 0x319   : > { %v7574_v38 = vpop.eup %5796 }
 0x31a   : > { %v7578_v50 = vpop.eup %5798 }
 0x31b   : > { %1729 = vperm.xlu1 %5692, %v7497_v16   ;;  %1754 = vperm.xlu0 %5693, %v7499_v52   ;;  %v7581_v59 = vpop.eup %5800 }
 0x31f   : > { %1739 = vperm.xlu1 %5692, %v7508_v63   ;;  %1764 = vperm.xlu0 %5693, %v7510_v60  }
 0x323   : > { %1749 = vperm.xlu1 %5692, %v7519_v3   ;;  %1704 = vperm.xlu0 %5693, %v7521_v46  }
 0x327   : > { %1759 = vperm.xlu1 %5692, %v7530_v31   ;;  %1784 = vperm.xlu0 %5693, %v7532_v47  }
 0x32b   : > { %1699 = vperm.xlu1 %5692, %v7541_v14   ;;  %1694 = vperm.xlu0 %5693, %v7543_v39  }
 0x32f   : > { %1779 = vperm.xlu1 %5692, %v7552_v17   ;;  %1774 = vperm.xlu0 %5693, %v7554_v34  }
 0x333   : > { %1689 = vperm.xlu1 %5692, %v7560_v2   ;;  %1724 = vperm.xlu0 %5693, %v7562_v6  }
 0x337   : > { %1769 = vperm.xlu1 %5692, %v7566_v18   ;;  %1714 = vperm.xlu0 %5693, %v7568_v23  }
 0x339   : > { %v1179_v26 = vpop.permute.xlu1 %1178 }
 0x33a   : > { %v1259_v8 = vpop.permute.xlu0 %1258  ;;  %v1328_v1 = vsub.f32 %v9196_v12, %v1179_v26 }
 0x33b   : > { %1719 = vperm.xlu1 %5692, %v7572_v36   ;;  %1794 = vperm.xlu0 %5693, %v7574_v38   ;;  %v1344_v54 = vsub.f32 %v9197_v11, %v1259_v8  ;;  %v9204_v11 = vld [vmem:[#allocation42_spill] sm:$0xff] }
 0x33c   : > { %v1362_v0 = vmul.f32 1.442695, %v1328_v1 }
 0x33d   : > { %v1394_v51 = vmul.f32 1.442695, %v1344_v54 }
 0x33e   : > { %v1169_v29 = vpop.permute.xlu0 %1168  ;;  %5802 = vpow2.f32 %v1362_v0 }
 0x33f   : > { %1709 = vperm.xlu1 %5692, %v7578_v50   ;;  %v1326_v55 = vsub.f32 %v9199_v10, %v1169_v29 }
 0x341   : > { %v1358_v20 = vmul.f32 1.442695, %v1326_v55  ;;  %v9206_v55 = vld [vmem:[#allocation44_spill] sm:$0xff] }
 0x342   : > { %v1249_v19 = vpop.permute.xlu1 %1248 }
 0x343   : > { %1789 = vperm.xlu1 %5692, %v7581_v59   ;;  %v1342_v49 = vsub.f32 %v9201_v48, %v1249_v19 }
 0x345   : > { %v1390_v58 = vmul.f32 1.442695, %v1342_v49 }
 0x346   : > { %v1184_v27 = vpop.permute.xlu1 %1183 }
 0x347   : > { %v1329_v62 = vsub.f32 %v9198_v43, %v1184_v27 }
 0x348   : > { %v5803_v35 = vpop.eup %5802 }
 0x349   : > { %v1364_v53 = vmul.f32 1.442695, %v1329_v62 }
 0x34a   : > { %v1264_v7 = vpop.permute.xlu1 %1263 }
 0x34b   : > { %5804 = vpow2.f32 %v1364_v53  ;;  %v1345_v61 = vsub.f32 %v9200_v56, %v1264_v7 }
 0x34c   : > { %5806 = vpow2.f32 %v1394_v51  ;;  %v9205_v51 = vld [vmem:[#allocation45_spill] sm:$0xff] }
 0x34d   : > { %v1396_v57 = vmul.f32 1.442695, %v1345_v61 }
 0x34e   : > { %v1174_v42 = vpop.permute.xlu1 %1173 }
 0x34f   : > { %5808 = vpow2.f32 %v1396_v57  ;;  %v1327_v21 = vsub.f32 %v9202_v32, %v1174_v42  ;;  %v9207_v32 = vld [vmem:[#allocation47_spill] sm:$0xff] }
 0x350   : > { %5810 = vpow2.f32 %v1358_v20 }
 0x351   : > { %v1360_v13 = vmul.f32 1.442695, %v1327_v21 }
 0x352   : > { %v1254_v9 = vpop.permute.xlu1 %1253 }
 0x353   : > { %5812 = vpow2.f32 %v1360_v13  ;;  %v1343_v45 = vsub.f32 %v9203_v44, %v1254_v9  ;;  %v9208_v13 = vld [vmem:[#allocation43_spill] sm:$0xff] }
 0x354   : > { %5814 = vpow2.f32 %v1390_v58 }
 0x355   : > { %v7592_v26 = vpop.eup %5804  ;;  %v1392_v8 = vmul.f32 1.442695, %v1343_v45 }
 0x356   : > { %v1269_v12 = vpop.permute.xlu0 %1268  ;;  %v1199_v1 = vpop.permute.xlu1 %1198  ;;  %v1840_v19 = vpack.c.bf16 %v7592_v26, %v5803_v35 }
 0x357   : > { %5816 = vpow2.f32 %v1392_v8  ;;  %v1332_v54 = vsub.f32 %v9204_v11, %v1199_v1  ;;  %v5807_v0 = vpop.eup %5806  ;;  %v9209_v11 = vld [vmem:[#allocation46_spill] sm:$0xff] }
 0x359   : > { %v7596_v27 = vpop.eup %5808  ;;  %v1370_v29 = vmul.f32 1.442695, %v1332_v54  ;;  %v1346_v54 = vsub.f32 %v9209_v11, %v1269_v12 }
 0x35a   : > { %v1204_v43 = vpop.permute.xlu0 %1203  ;;  %1490 = vadd.xlane.f32.xlu0 %v5803_v35  ;;  %v1279_v62 = vpop.permute.xlu1 %1278  ;;  %v1848_v53 = vpack.c.bf16 %v7596_v27, %v5807_v0 }
 0x35b   : > { %v1333_v10 = vsub.f32 %v9205_v51, %v1204_v43  ;;  %v1348_v7 = vsub.f32 %v9206_v55, %v1279_v62  ;;  %v5811_v56 = vpop.eup %5810  ;;  %5818 = vpow2.f32 %v1370_v29  ;;  %v9210_v29 = vld [vmem:[#allocation48_spill] sm:$0xff]  ;;  %v1398_v55 = vmul.f32 1.442695, %v1346_v54 }
 0x35d   : > { %v5813_v61 = vpop.eup %5812  ;;  %v1372_v57 = vmul.f32 1.442695, %v1333_v10  ;;  %v1402_v20 = vmul.f32 1.442695, %v1348_v7 }
 0x35e   : > { %v1284_v48 = vpop.permute.xlu0 %1283  ;;  %1522 = vadd.xlane.f32.xlu0 %v5807_v0  ;;  %v1189_v49 = vpop.permute.xlu1 %1188  ;;  %v1839_v42 = vpack.c.bf16 %v5813_v61, %v5811_v56 }
 0x35f   : > { %5820 = vpow2.f32 %v1372_v57  ;;  %v1349_v21 = vsub.f32 %v9207_v32, %v1284_v48  ;;  %v1330_v58 = vsub.f32 %v9208_v13, %v1189_v49  ;;  %v5815_v9 = vpop.eup %5814  ;;  %v9212_v57 = vld [vmem:[#allocation49_spill] sm:$0xff]  ;;  %v9213_v13 = vld [vmem:[#allocation55_spill] sm:$0xff] }
 0x360   : > { %5353 = vmatprep.mubr.bf16.mxu0 %v1839_v42  ;;  %5822 = vpow2.f32 %v1402_v20 }
 0x361   : > { %v5817_v44 = vpop.eup %5816  ;;  %v1404_v45 = vmul.f32 1.442695, %v1349_v21  ;;  %5354 = vmatmul.mubr.bf16.vlgmr.msra.gmra.mrb[16].mxu0 %v1840_v19  ;;  %v1366_v0 = vmul.f32 1.442695, %v1330_v58  ;;  %v9211_v19 = vld [vmem:[#allocation53_spill] sm:$0xff]  ;;  %v9214_v58 = vld [vmem:[#allocation50_spill] sm:$0xff] }
 0x362   : > { %v1224_v35 = vpop.permute.xlu0 %1223  ;;  %1518 = vadd.xlane.f32.xlu0 %v5815_v9  ;;  %v1194_v8 = vpop.permute.xlu1 %1193  ;;  %v1847_v1 = vpack.c.bf16 %v5817_v44, %v5815_v9 }
 0x363   : > { %5824 = vpow2.f32 %v1404_v45  ;;  %v1331_v43 = vsub.f32 %v9210_v29, %v1194_v8  ;;  %v1337_v7 = vsub.f32 %v9211_v19, %v1224_v35 }
 0x364   : > { %5385 = vmatprep.mubr.bf16.mxu1 %v1847_v1  ;;  %5826 = vpow2.f32 %v1366_v0  ;;  %v9215_v0 = vld [vmem:[#allocation56_spill] sm:$0xff] }
 0x365   : > { %v1368_v62 = vmul.f32 1.442695, %v1331_v43  ;;  %5386 = vmatmul.mubr.bf16.vlgmr.msra.gmra.mrb[16].mxu1 %v1848_v53  ;;  %v5819_v48 = vpop.eup %5818  ;;  %v1380_v53 = vmul.f32 1.442695, %v1337_v7  ;;  %v9216_v43 = vld [vmem:[#allocation52_spill] sm:$0xff] }
 0x366   : > { %v1304_v51 = vpop.permute.xlu0 %1303  ;;  %1488 = vadd.xlane.f32.xlu0 %v5813_v61  ;;  %v1274_v10 = vpop.permute.xlu1 %1273 }
 0x367   : > { %v1347_v20 = vsub.f32 %v9212_v57, %v1274_v10  ;;  %1486 = vadd.xlane.f32.xlu1 %v5811_v56  ;;  %5828 = vpow2.f32 %v1368_v62  ;;  %v1353_v61 = vsub.f32 %v9213_v13, %v1304_v51 }
 0x368   : > { %5830 = vpow2.f32 %v1398_v55  ;;  %v9217_v55 = vld [vmem:[#allocation57_spill] sm:$0xff] }
 0x369   : > { %v5821_v12 = vpop.eup %5820  ;;  %v1400_v49 = vmul.f32 1.442695, %v1347_v20  ;;  %v1412_v54 = vmul.f32 1.442695, %v1353_v61 }
 0x36a   : > { %v1214_v42 = vpop.permute.xlu0 %1213  ;;  %1498 = vadd.xlane.f32.xlu0 %v5819_v48  ;;  %v1219_v32 = vpop.permute.xlu1 %1218  ;;  %v1842_v21 = vpack.c.bf16 %v5821_v12, %v5819_v48  ;;  %v9218_v48 = vld [vmem:[#allocation51_spill] sm:$0xff] }
 0x36b   : > { %v1336_v9 = vsub.f32 %v9214_v58, %v1219_v32  ;;  %1492 = vadd.xlane.f32.xlu1 %v7592_v26  ;;  %v5823_v45 = vpop.eup %5822  ;;  %5832 = vpow2.f32 %v1400_v49  ;;  %v1335_v29 = vsub.f32 %v9215_v0, %v1214_v42 }
 0x36c   : > { %5834 = vpow2.f32 %v1380_v53 }
 0x36d   : > { %v5825_v35 = vpop.eup %5824  ;;  %v1378_v56 = vmul.f32 1.442695, %v1336_v9  ;;  %v1376_v20 = vmul.f32 1.442695, %v1335_v29  ;;  %v9219_v9 = vld [vmem:[#allocation61_spill] sm:$0xff] }
 0x36e   : > { %v1294_v8 = vpop.permute.xlu0 %1293  ;;  %1530 = vadd.xlane.f32.xlu0 %v5823_v45  ;;  %v1299_v1 = vpop.permute.xlu1 %1298  ;;  %v1850_v11 = vpack.c.bf16 %v5825_v35, %v5823_v45 }
 0x36f   : > { %v1352_v62 = vsub.f32 %v9216_v43, %v1299_v1  ;;  %1524 = vadd.xlane.f32.xlu1 %v7596_v27  ;;  %5836 = vpow2.f32 %v1378_v56  ;;  %v5827_v51 = vpop.eup %5826  ;;  %v1351_v19 = vsub.f32 %v9217_v55, %v1294_v8  ;;  %v9220_v56 = vld [vmem:[#allocation54_spill] sm:$0xff] }
 0x370   : > { %5838 = vpow2.f32 %v1412_v54 }
 0x371   : > { %v1410_v10 = vmul.f32 1.442695, %v1352_v62  ;;  %v5829_v26 = vpop.eup %5828  ;;  %v1408_v13 = vmul.f32 1.442695, %v1351_v19  ;;  %v9221_v62 = vld [vmem:[#allocation64_spill] sm:$0xff] }
 0x372   : > { %v1244_v7 = vpop.permute.xlu0 %1243  ;;  %1494 = vadd.xlane.f32.xlu0 %v5827_v51  ;;  %v1209_v57 = vpop.permute.xlu1 %1208  ;;  %v1841_v32 = vpack.c.bf16 %v5829_v26, %v5827_v51 }
 0x373   : > { %v1334_v49 = vsub.f32 %v9218_v48, %v1209_v57  ;;  %1520 = vadd.xlane.f32.xlu1 %v5817_v44  ;;  %5840 = vpow2.f32 %v1410_v10  ;;  %v5831_v42 = vpop.eup %5830  ;;  %v1341_v45 = vsub.f32 %v9219_v9, %v1244_v7  ;;  %v9222_v10 = vld [vmem:[#allocation58_spill] sm:$0xff] }
 0x374   : > { %5357 = vmatprep.mubr.bf16.mxu0 %v1841_v32  ;;  %5842 = vpow2.f32 %v1376_v20  ;;  %v9223_v20 = vld [vmem:[#allocation65_spill] sm:$0xff] }
 0x375   : > { %v1374_v53 = vmul.f32 1.442695, %v1334_v49  ;;  %v5833_v27 = vpop.eup %5832  ;;  %5358 = vmatmul.mubr.bf16.gmra.mrb[20].mxu0 %v1842_v21  ;;  %v1388_v21 = vmul.f32 1.442695, %v1341_v45  ;;  %v9225_v45 = vld [vmem:[#allocation63_spill] sm:$0xff] }
 0x376   : > { %v1234_v61 = vpop.permute.xlu0 %1233  ;;  %1526 = vadd.xlane.f32.xlu0 %v5831_v42  ;;  %v1289_v58 = vpop.permute.xlu1 %1288  ;;  %v1849_v1 = vpack.c.bf16 %v5833_v27, %v5831_v42  ;;  %v9224_v42 = vld [vmem:[#allocation59_spill] sm:$0xff] }
 0x377   : > { %v1350_v8 = vsub.f32 %v9220_v56, %v1289_v58  ;;  %1500 = vadd.xlane.f32.xlu1 %v5821_v12  ;;  %5844 = vpow2.f32 %v1374_v53  ;;  %v5835_v44 = vpop.eup %5834  ;;  %v1339_v51 = vsub.f32 %v9221_v62, %v1234_v61 }
 0x378   : > { %5389 = vmatprep.mubr.bf16.mxu1 %v1849_v1  ;;  %5846 = vpow2.f32 %v1408_v13  ;;  %v9226_v1 = vld [vmem:[#allocation62_spill] sm:$0xff] }
 0x379   : > { %v1406_v54 = vmul.f32 1.442695, %v1350_v8  ;;  %v5837_v0 = vpop.eup %5836  ;;  %5390 = vmatmul.mubr.bf16.gmra.mrb[20].mxu1 %v1850_v11  ;;  %v1384_v32 = vmul.f32 1.442695, %v1339_v51  ;;  %v9227_v51 = vld [vmem:[#allocation60_spill] sm:$0xff] }
 0x37a   : > { %v1314_v29 = vpop.permute.xlu0 %1313  ;;  %v1239_v43 = vpop.permute.xlu1 %1238  ;;  %1506 = vadd.xlane.f32.xlu0 %v5837_v0  ;;  %v1844_v19 = vpack.c.bf16 %v5835_v44, %v5837_v0 }
 0x37b   : > { %v1340_v55 = vsub.f32 %v9222_v10, %v1239_v43  ;;  %1532 = vadd.xlane.f32.xlu1 %v5825_v35  ;;  %5848 = vpow2.f32 %v1406_v54  ;;  %v5839_v12 = vpop.eup %5838  ;;  %v1355_v48 = vsub.f32 %v9223_v20, %v1314_v29 }
 0x37c   : > { %5850 = vpow2.f32 %v1388_v21 }
 0x37d   : > { %v1386_v7 = vmul.f32 1.442695, %v1340_v55  ;;  %v5841_v57 = vpop.eup %5840  ;;  %v1416_v9 = vmul.f32 1.442695, %v1355_v48 }
 0x37e   : > { %v1229_v49 = vpop.permute.xlu1 %1228  ;;  %v1324_v11 = vpop.permute.xlu0 %1323  ;;  %1538 = vadd.xlane.f32.xlu0 %v5841_v57  ;;  %v1852_v13 = vpack.c.bf16 %v5839_v12, %v5841_v57 }
 0x37f   : > { %v1338_v53 = vsub.f32 %v9224_v42, %v1229_v49  ;;  %1496 = vadd.xlane.f32.xlu1 %v5829_v26  ;;  %5852 = vpow2.f32 %v1386_v7  ;;  %v5843_v61 = vpop.eup %5842  ;;  %v1357_v56 = vsub.f32 %v9225_v45, %v1324_v11 }
 0x380   : > { %5854 = vpow2.f32 %v1384_v32 }
 0x381   : > { %v1382_v58 = vmul.f32 1.442695, %v1338_v53  ;;  %v5845_v35 = vpop.eup %5844  ;;  %v1420_v21 = vmul.f32 1.442695, %v1357_v56  ;;  %v9228_v56 = vld [vmem:[#allocation67_spill] sm:$0xff] }
 0x382   : > { %v1309_v8 = vpop.permute.xlu1 %1308  ;;  %1502 = vadd.xlane.f32.xlu0 %v5845_v35  ;;  %v1843_v0 = vpack.c.bf16 %v5843_v61, %v5845_v35  ;;  %v5847_v29 = vpop.eup %5846 }
 0x383   : > { %v1354_v54 = vsub.f32 %v9226_v1, %v1309_v8  ;;  %1528 = vadd.xlane.f32.xlu1 %v5833_v27  ;;  %5856 = vpow2.f32 %v1382_v58  ;;  %v9229_v8 = vsub.f32 %v9228_v56, %v7370_v40 }
 0x384   : > { %5361 = vmatprep.mubr.bf16.mxu0 %v1843_v0  ;;  %5858 = vpow2.f32 %v1416_v9 }
 0x385   : > { %v1414_v43 = vmul.f32 1.442695, %v1354_v54  ;;  %v5849_v26 = vpop.eup %5848  ;;  %5362 = vmatmul.mubr.bf16.gmra.mrb[24].mxu0 %v1844_v19  ;;  %v7624_v19 = vpop.permute.xlu0 %1649  ;;  %v1164_v1 = vmul.f32 1.442695, %v9229_v8  ;;  %v9230_v54 = vld [vmem:[#allocation68_spill] sm:$0xff] }
 0x386   : > { %v1319_v62 = vpop.permute.xlu1 %1318  ;;  %1534 = vadd.xlane.f32.xlu0 %v5849_v26  ;;  %v1851_v55 = vpack.c.bf16 %v5847_v29, %v5849_v26  ;;  %v5851_v7 = vpop.eup %5850  ;;  %v9231_v0 = vsub.f32 %v9230_v54, %v7373_v37  ;;  %v1424_v8 = vld [vmem:[#allocation3 + $0x10] sm:$0xff] }
 0x387   : > { %5860 = vpow2.f32 %v1414_v43  ;;  %v1356_v10 = vsub.f32 %v9227_v51, %v1319_v62  ;;  %1508 = vadd.xlane.f32.xlu1 %v5835_v44  ;;  %v1456_v54 = vmul.f32 %v7462_v22, %v1424_v8  ;;  %v1422_v8 = vld [vmem:[#allocation3] sm:$0xff] }
 0x388   : > { %5393 = vmatprep.mubr.bf16.mxu1 %v1851_v55  ;;  %5862 = vpow2.f32 %v1420_v21 }
 0x389   : > { %v1418_v57 = vmul.f32 1.442695, %v1356_v10  ;;  %v5853_v27 = vpop.eup %5852  ;;  %5394 = vmatmul.mubr.bf16.gmra.mrb[24].mxu1 %v1852_v13  ;;  %v7626_v13 = vpop.permute.xlu0 %1664 }
 0x38a   : > { %1514 = vadd.xlane.f32.xlu0 %v5853_v27  ;;  %v1846_v20 = vpack.c.bf16 %v5851_v7, %v5853_v27  ;;  %v5855_v48 = vpop.eup %5854 }
 0x38b   : > { %5864 = vpow2.f32 %v1418_v57  ;;  %1540 = vadd.xlane.f32.xlu1 %v5839_v12 }
 0x38c   : > { %5866 = vpow2.f32 %v1164_v1 }
 0x38d   : > { %v5857_v49 = vpop.eup %5856  ;;  %v7628_v35 = vpop.permute.xlu0 %1674 }
 0x38e   : > { %v1845_v32 = vpack.c.bf16 %v5855_v48, %v5857_v49  ;;  %v5859_v11 = vpop.eup %5858 }
 0x38f   : > { %1504 = vadd.xlane.f32.xlu1 %v5843_v61  ;;  %v7630_v61 = vpop.permute.xlu1 %1654 }
 0x390   : > { %5365 = vmatprep.mubr.bf16.mxu0 %v1845_v32 }
 0x391   : > { %v5861_v42 = vpop.eup %5860  ;;  %5366 = vmatmul.mubr.bf16.gmra.mrb[28].mxu0 %v1846_v20  ;;  %v7632_v9 = vpop.permute.xlu0 %1684 }
 0x392   : > { %v1853_v44 = vpack.c.bf16 %v5859_v11, %v5861_v42  ;;  %v5863_v53 = vpop.eup %5862 }
 0x393   : > { %1536 = vadd.xlane.f32.xlu1 %v5847_v29  ;;  %v7634_v45 = vpop.permute.xlu1 %1659  ;;  %v1162_v29 = vmul.f32 1.442695, %v9231_v0 }
 0x394   : > { %5397 = vmatprep.mubr.bf16.mxu1 %v1853_v44 }
 0x395   : > { %v5865_v58 = vpop.eup %5864  ;;  %v7642_v43 = vpop.permute.xlu0 %1734  ;;  %5868 = vpow2.f32 %v1162_v29  ;;  %v1440_v29 = vld [vmem:[#allocation3 + $0x90] sm:$0xff] }
 0x396   : > { %1546 = vadd.xlane.f32.xlu0 %v5865_v58  ;;  %v1854_v12 = vpack.c.bf16 %v5863_v53, %v5865_v58  ;;  %v7650_v51 = vpop.eup %5866 }
 0x397   : > { %1516 = vadd.xlane.f32.xlu1 %v5851_v7  ;;  %v7644_v26 = vpop.permute.xlu1 %1669 }
 0x398   : > { %5398 = vmatmul.mubr.bf16.gmra.mrb[28].mxu1 %v1854_v12 }
 0x399   : > { %v7646_v21 = vpop.permute.xlu0 %1744 }
 0x39a   : > { %1510 = vadd.xlane.f32.xlu0 %v5857_v49 }
 0x39b   : > { %1548 = vadd.xlane.f32.xlu1 %v5863_v53  ;;  %v7648_v62 = vpop.permute.xlu1 %1679 }
 0x39d   : > { %v7654_v40 = vpop.permute.xlu0 %1754 }
 0x39e   : > { %1542 = vadd.xlane.f32.xlu0 %v5861_v42 }
 0x39f   : > { %1512 = vadd.xlane.f32.xlu1 %v5855_v48  ;;  %v7652_v10 = vpop.eup %5868  ;;  %v7656_v55 = vpop.permute.xlu1 %1729 }
 0x3a1   : > { %v7660_v37 = vpop.permute.xlu0 %1764 }
 0x3a3   : > { %1544 = vadd.xlane.f32.xlu1 %v5859_v11  ;;  %v7662_v7 = vpop.permute.xlu1 %1739 }
 0x3a5   : > { %v7664_v57 = vpop.permute.xlu0 %1704 }
 0x3a6   : > { %9232 = vst [vmem:[#allocation66_spill] sm:$0xff] %v7664_v57 }
 0x3a7   : > { %v7666_v27 = vpop.permute.xlu1 %1749 }
 0x3a9   : > { %v7668_v20 = vpop.permute.xlu0 %1784 }
 0x3aa   : > { %9233 = vst [vmem:[#allocation69_spill] sm:$0xff] %v7668_v20 }
 0x3ab   : > { %v7670_v48 = vpop.permute.xlu1 %1759 }
 0x3ad   : > { %v7672_v49 = vpop.permute.xlu0 %1694 }
 0x3ae   : > { %9234 = vst [vmem:[#allocation34_spill] sm:$0xff] %v7672_v49 }
 0x3af   : > { %v7674_v32 = vpop.permute.xlu1 %1699 }
 0x3b1   : > { %v7676_v11 = vpop.permute.xlu0 %1774 }
 0x3b2   : > { %9235 = vst [vmem:[#allocation35_spill] sm:$0xff] %v7676_v11 }
 0x3b3   : > { %v7678_v42 = vpop.permute.xlu1 %1779 }
 0x3b4   : > { %1799 = vperm.xlu1 %5692, %v7652_v10   ;;  %1804 = vperm.xlu0 %5693, %v7650_v51   ;;  %9236 = vst [vmem:[#allocation38_spill] sm:$0xff] %v7678_v42 }
 0x3b5   : > { %v7680_v44 = vpop.permute.xlu0 %1724 }
 0x3b6   : > { %9237 = vst [vmem:[#allocation36_spill] sm:$0xff] %v7680_v44  ;;  %v1472_v44 = vmul.f32 %v7508_v63, %v1440_v29  ;;  %v1454_v63 = vmul.f32 %v7438_v25, %v1422_v8 }
 0x3b7   : > { %v7682_v53 = vpop.permute.xlu1 %1689 }
 0x3b9   : > { %v7684_v58 = vpop.permute.xlu0 %1714 }
 0x3ba   : > { %9238 = vst [vmem:[#allocation39_spill] sm:$0xff] %v7684_v58  ;;  %v1438_v58 = vld [vmem:[#allocation3 + $0x80] sm:$0xff] }
 0x3bb   : > { %v7686_v12 = vpop.permute.xlu1 %1769 }
 0x3bc   : > { %9239 = vst [vmem:[#allocation37_spill] sm:$0xff] %v7686_v12 }
 0x3bd   : > { %v7688_v56 = vpop.permute.xlu0 %1794 }
 0x3be   : > { %9240 = vst [vmem:[#allocation40_spill] sm:$0xff] %v7688_v56  ;;  %v1470_v56 = vmul.f32 %v7497_v16, %v1438_v58 }
 0x3bf   : > { %v7690_v1 = vpop.permute.xlu1 %1719 }
 0x3c0   : > { %9241 = vst [vmem:[#allocation41_spill] sm:$0xff] %v7690_v1  ;;  %v1423_v1 = vld [vmem:[#allocation3 + $0x8] sm:$0xff] }
 0x3c3   : > { %v7693_v20 = vpop.permute.xlu1 %1709 }
 0x3c7   : > { %v7699_v57 = vpop.permute.xlu1 %1789 }
 0x3c8   : > { %9242 = vst [vmem:[#allocation42_spill] sm:$0xff] %v7699_v57 }
 0x3e7   : > { %v1491_v0 = vpop.xlane.xlu0 %1490 }
 0x3e8   : > { %v1552_v11 = vadd.f32 %v1491_v0, %v1456_v54  ;;  %v1455_v54 = vmul.f32 %v7453_v41, %v1423_v1  ;;  %v1428_v0 = vld [vmem:[#allocation3 + $0x30] sm:$0xff]  ;;  %v1441_v1 = vld [vmem:[#allocation3 + $0x98] sm:$0xff] }
 0x3e9   : > { %v1460_v16 = vmul.f32 %v7488_v30, %v1428_v0  ;;  %v1426_v30 = vld [vmem:[#allocation3 + $0x20] sm:$0xff]  ;;  %v1439_v0 = vld [vmem:[#allocation3 + $0x88] sm:$0xff] }
 0x3ea   : > { %1585 = vst.msk [vmem:[#allocation3 + $0x10] sm:$0xff] %vm1582_vm1, %v1552_v11 }
 0x3eb   : > { %v1523_v42 = vpop.xlane.xlu0 %1522 }
 0x3ec   : > { %v1568_v49 = vadd.f32 %v1523_v42, %v1472_v44  ;;  %v1425_v44 = vld [vmem:[#allocation3 + $0x18] sm:$0xff] }
 0x3ee   : > { %1601 = vst.msk [vmem:[#allocation3 + $0x90] sm:$0xff] %vm1582_vm1, %v1568_v49 }
 0x3ef   : > { %v1519_v12 = vpop.xlane.xlu0 %1518 }
 0x3f0   : > { %v1566_v22 = vadd.f32 %v1519_v12, %v1470_v56  ;;  %v1457_v12 = vmul.f32 %v7444_v24, %v1425_v44  ;;  %v1444_v56 = vld [vmem:[#allocation3 + $0xb0] sm:$0xff]  ;;  %v1458_v24 = vmul.f32 %v7480_v4, %v1426_v30  ;;  %v1471_v44 = vmul.f32 %v7478_v33, %v1439_v0 }
 0x3f1   : > { %v1476_v25 = vmul.f32 %v7530_v31, %v1444_v56  ;;  %v1442_v31 = vld [vmem:[#allocation3 + $0xa0] sm:$0xff]  ;;  %v1448_v30 = vld [vmem:[#allocation3 + $0xd0] sm:$0xff] }
 0x3f2   : > { %1599 = vst.msk [vmem:[#allocation3 + $0x80] sm:$0xff] %vm1582_vm1, %v1566_v22 }
 0x3f3   : > { %v1489_v11 = vpop.xlane.xlu0 %1488 }
 0x3f4   : > { %v1551_v29 = vadd.f32 %v1489_v11, %v1455_v54  ;;  %v1487_v42 = vpop.xlane.xlu1 %1486  ;;  %v1473_v54 = vmul.f32 %v7486_v28, %v1441_v1  ;;  %v1474_v28 = vmul.f32 %v7519_v3, %v1442_v31  ;;  %v1445_v1 = vld [vmem:[#allocation3 + $0xb8] sm:$0xff] }
 0x3f5   : > { %v1550_v49 = vadd.f32 %v1487_v42, %v1454_v63 }
 0x3f6   : > { %1584 = vst.msk [vmem:[#allocation3 + $0x8] sm:$0xff] %vm1582_vm1, %v1551_v29 }
 0x3f7   : > { %1583 = vst.msk [vmem:[#allocation3] sm:$0xff] %vm1582_vm1, %v1550_v49  ;;  %v1499_v58 = vpop.xlane.xlu0 %1498 }
 0x3f8   : > { %v1556_v22 = vadd.f32 %v1499_v58, %v1460_v16  ;;  %v1493_v41 = vpop.xlane.xlu1 %1492  ;;  %v1429_v16 = vld [vmem:[#allocation3 + $0x38] sm:$0xff] }
 0x3f9   : > { %v1553_v57 = vadd.f32 %v1493_v41, %v1457_v12  ;;  %v1461_v56 = vmul.f32 %v7464_v15, %v1429_v16  ;;  %v1432_v41 = vld [vmem:[#allocation3 + $0x50] sm:$0xff]  ;;  %v1480_v15 = vmul.f32 %v7552_v17, %v1448_v30  ;;  %v1433_v17 = vld [vmem:[#allocation3 + $0x58] sm:$0xff]  ;;  %v1431_v30 = vld [vmem:[#allocation3 + $0x48] sm:$0xff] }
 0x3fa   : > { %1589 = vst.msk [vmem:[#allocation3 + $0x30] sm:$0xff] %vm1582_vm1, %v1556_v22  ;;  %v1464_v33 = vmul.f32 %v7541_v14, %v1432_v41  ;;  %v1443_v14 = vld [vmem:[#allocation3 + $0xa8] sm:$0xff] }
 0x3fb   : > { %1586 = vst.msk [vmem:[#allocation3 + $0x18] sm:$0xff] %vm1582_vm1, %v1553_v57  ;;  %v1531_v8 = vpop.xlane.xlu0 %1530 }
 0x3fc   : > { %v1572_v11 = vadd.f32 %v1531_v8, %v1476_v25  ;;  %v1525_v63 = vpop.xlane.xlu1 %1524  ;;  %v1477_v8 = vmul.f32 %v7510_v60, %v1445_v1  ;;  %v1436_v1 = vld [vmem:[#allocation3 + $0x70] sm:$0xff] }
 0x3fd   : > { %v1569_v29 = vadd.f32 %v1525_v63, %v1473_v54 }
 0x3fe   : > { %1605 = vst.msk [vmem:[#allocation3 + $0xb0] sm:$0xff] %vm1582_vm1, %v1572_v11  ;;  %v1427_v11 = vld [vmem:[#allocation3 + $0x28] sm:$0xff] }
 0x3ff   : > { %1602 = vst.msk [vmem:[#allocation3 + $0x98] sm:$0xff] %vm1582_vm1, %v1569_v29  ;;  %v1495_v42 = vpop.xlane.xlu0 %1494  ;;  %v1459_v29 = vmul.f32 %v7455_v5, %v1427_v11 }
 0x400   : > { %v1554_v49 = vadd.f32 %v1495_v42, %v1458_v24  ;;  %v1521_v57 = vpop.xlane.xlu1 %1520 }
 0x401   : > { %v1567_v58 = vadd.f32 %v1521_v57, %v1471_v44  ;;  %v1430_v44 = vld [vmem:[#allocation3 + $0x40] sm:$0xff]  ;;  %v1475_v57 = vmul.f32 %v7499_v52, %v1443_v14 }
 0x402   : > { %1587 = vst.msk [vmem:[#allocation3 + $0x20] sm:$0xff] %vm1582_vm1, %v1554_v49  ;;  %v1462_v49 = vmul.f32 %v7560_v2, %v1430_v44  ;;  %v1449_v2 = vld [vmem:[#allocation3 + $0xd8] sm:$0xff] }
 0x403   : > { %1600 = vst.msk [vmem:[#allocation3 + $0x88] sm:$0xff] %vm1582_vm1, %v1567_v58  ;;  %v1527_v12 = vpop.xlane.xlu0 %1526 }
 0x404   : > { %v1570_v4 = vadd.f32 %v1527_v12, %v1474_v28  ;;  %v1501_v22 = vpop.xlane.xlu1 %1500  ;;  %v1446_v28 = vld [vmem:[#allocation3 + $0xc0] sm:$0xff] }
 0x405   : > { %v1557_v25 = vadd.f32 %v1501_v22, %v1461_v56  ;;  %v1478_v56 = vmul.f32 %v7566_v18, %v1446_v28 }
 0x406   : > { %1603 = vst.msk [vmem:[#allocation3 + $0xa0] sm:$0xff] %vm1582_vm1, %v1570_v4  ;;  %v1465_v4 = vmul.f32 %v7521_v46, %v1433_v17  ;;  %v1463_v46 = vmul.f32 %v7543_v39, %v1431_v30  ;;  %v1633_v30 = vld [vmem:[#allocation4 + $0x90] sm:$0xff] }
 0x407   : > { %1590 = vst.msk [vmem:[#allocation3 + $0x38] sm:$0xff] %vm1582_vm1, %v1557_v25  ;;  %v1507_v54 = vpop.xlane.xlu0 %1506 }
 0x408   : > { %v1533_v3 = vpop.xlane.xlu1 %1532  ;;  %v1560_v63 = vadd.f32 %v1507_v54, %v1464_v33  ;;  %v1468_v33 = vmul.f32 %v7572_v36, %v1436_v1  ;;  %v1451_v1 = vld [vmem:[#allocation3 + $0xe8] sm:$0xff] }
 0x409   : > { %v1573_v0 = vadd.f32 %v1533_v3, %v1477_v8  ;;  %v1481_v8 = vmul.f32 %v7532_v47, %v1449_v2 }
 0x40a   : > { %1593 = vst.msk [vmem:[#allocation3 + $0x50] sm:$0xff] %vm1582_vm1, %v1560_v63 }
 0x40b   : > { %1606 = vst.msk [vmem:[#allocation3 + $0xb8] sm:$0xff] %vm1582_vm1, %v1573_v0  ;;  %v1539_v24 = vpop.xlane.xlu0 %1538  ;;  %v1447_v0 = vld [vmem:[#allocation3 + $0xc8] sm:$0xff] }
 0x40c   : > { %v1497_v42 = vpop.xlane.xlu1 %1496  ;;  %v1576_v31 = vadd.f32 %v1539_v24, %v1480_v15  ;;  %v1479_v36 = vmul.f32 %v7554_v34, %v1447_v0  ;;  %v1437_v24 = vld [vmem:[#allocation3 + $0x78] sm:$0xff] }
 0x40d   : > { %v1555_v60 = vadd.f32 %v1497_v42, %v1459_v29  ;;  %v1452_v29 = vld [vmem:[#allocation3 + $0xf0] sm:$0xff] }
 0x40e   : > { %1609 = vst.msk [vmem:[#allocation3 + $0xd0] sm:$0xff] %vm1582_vm1, %v1576_v31  ;;  %v1484_v44 = vmul.f32 %v7652_v10, %v1452_v29  ;;  %v1469_v31 = vmul.f32 %v7562_v6, %v1437_v24  ;;  %v1450_v10 = vld [vmem:[#allocation3 + $0xe0] sm:$0xff]  ;;  %v1825_v24 = vmul.f32 %v7662_v7, %v1633_v30 }
 0x40f   : > { %1588 = vst.msk [vmem:[#allocation3 + $0x28] sm:$0xff] %vm1582_vm1, %v1555_v60  ;;  %v1503_v16 = vpop.xlane.xlu0 %1502  ;;  %v1434_v60 = vld [vmem:[#allocation3 + $0x60] sm:$0xff]  ;;  %v1482_v6 = vmul.f32 %v7581_v59, %v1450_v10  ;;  %v1618_v59 = vld [vmem:[#allocation4 + $0x18] sm:$0xff] }
 0x410   : > { %v1529_v58 = vpop.xlane.xlu1 %1528  ;;  %v1558_v12 = vadd.f32 %v1503_v16, %v1462_v49  ;;  %v1466_v34 = vmul.f32 %v7578_v50, %v1434_v60  ;;  %v1623_v30 = vld [vmem:[#allocation4 + $0x40] sm:$0xff] }
 0x411   : > { %v1571_v5 = vadd.f32 %v1529_v58, %v1475_v57  ;;  %v1453_v57 = vld [vmem:[#allocation3 + $0xf8] sm:$0xff] }
 0x412   : > { %1591 = vst.msk [vmem:[#allocation3 + $0x40] sm:$0xff] %vm1582_vm1, %v1558_v12  ;;  %v1485_v28 = vmul.f32 %v7650_v51, %v1453_v57  ;;  %v1483_v51 = vmul.f32 %v7574_v38, %v1451_v1  ;;  %v1636_v1 = vld [vmem:[#allocation4 + $0xa8] sm:$0xff] }
 0x413   : > { %1604 = vst.msk [vmem:[#allocation3 + $0xa8] sm:$0xff] %vm1582_vm1, %v1571_v5  ;;  %v1535_v22 = vpop.xlane.xlu0 %1534  ;;  %v1435_v5 = vld [vmem:[#allocation3 + $0x68] sm:$0xff] }
 0x414   : > { %v1509_v41 = vpop.xlane.xlu1 %1508  ;;  %v1574_v25 = vadd.f32 %v1535_v22, %v1478_v56  ;;  %v1467_v22 = vmul.f32 %v7568_v23, %v1435_v5  ;;  %v1635_v5 = vld [vmem:[#allocation4 + $0xa0] sm:$0xff] }
 0x415   : > { %v1561_v52 = vadd.f32 %v1509_v41, %v1465_v4 }
 0x416   : > { %1607 = vst.msk [vmem:[#allocation3 + $0xc0] sm:$0xff] %vm1582_vm1, %v1574_v25  ;;  %v1617_v25 = vld [vmem:[#allocation4 + $0x10] sm:$0xff] }
 0x417   : > { %1594 = vst.msk [vmem:[#allocation3 + $0x58] sm:$0xff] %vm1582_vm1, %v1561_v52  ;;  %v1515_v54 = vpop.xlane.xlu0 %1514 }
 0x418   : > { %v1541_v3 = vpop.xlane.xlu1 %1540  ;;  %v1564_v18 = vadd.f32 %v1515_v54, %v1468_v33  ;;  %v1615_v33 = vld [vmem:[#allocation4] sm:$0xff]  ;;  %v1616_v54 = vld [vmem:[#allocation4 + $0x8] sm:$0xff] }
 0x419   : > { %v1577_v11 = vadd.f32 %v1541_v3, %v1481_v8  ;;  %v1809_v3 = vmul.f32 %v7634_v45, %v1617_v25  ;;  %v1807_v23 = vmul.f32 %v7624_v19, %v1615_v33  ;;  %v1808_v38 = vmul.f32 %v7630_v61, %v1616_v54 }
 0x41a   : > { %1597 = vst.msk [vmem:[#allocation3 + $0x70] sm:$0xff] %vm1582_vm1, %v1564_v18 }
 0x41b   : > { %1610 = vst.msk [vmem:[#allocation3 + $0xd8] sm:$0xff] %vm1582_vm1, %v1577_v11  ;;  %v1810_v11 = vmul.f32 %v7626_v13, %v1618_v59 }
 0x41c   : > { %v1505_v63 = vpop.xlane.xlu1 %1504 }
 0x41d   : > { %v1559_v15 = vadd.f32 %v1505_v63, %v1463_v46  ;;  %v1631_v46 = vld [vmem:[#allocation4 + $0x80] sm:$0xff] }
 0x41e   : > { %v1823_v19 = vmul.f32 %v7656_v55, %v1631_v46  ;;  %v1621_v55 = vld [vmem:[#allocation4 + $0x30] sm:$0xff] }
 0x41f   : > { %1592 = vst.msk [vmem:[#allocation3 + $0x48] sm:$0xff] %vm1582_vm1, %v1559_v15  ;;  %v1634_v15 = vld [vmem:[#allocation4 + $0x98] sm:$0xff]  ;;  %v1641_v46 = vld [vmem:[#allocation4 + $0xd0] sm:$0xff] }
 0x420   : > { %v1537_v47 = vpop.xlane.xlu1 %1536  ;;  %v1826_v13 = vmul.f32 %v7646_v21, %v1634_v15  ;;  %v1813_v21 = vmul.f32 %v7648_v62, %v1621_v55  ;;  %v1639_v15 = vld [vmem:[#allocation4 + $0xc0] sm:$0xff]  ;;  %v9248_v55 = vld [vmem:[#allocation35_spill] sm:$0xff] }
 0x421   : > { %v1575_v42 = vadd.f32 %v1537_v47, %v1479_v36  ;;  %v1632_v47 = vld [vmem:[#allocation4 + $0x88] sm:$0xff] }
 0x422   : > { %v1824_v61 = vmul.f32 %v7642_v43, %v1632_v47  ;;  %v1642_v47 = vld [vmem:[#allocation4 + $0xd8] sm:$0xff] }
 0x423   : > { %1608 = vst.msk [vmem:[#allocation3 + $0xc8] sm:$0xff] %vm1582_vm1, %v1575_v42  ;;  %v1547_v14 = vpop.xlane.xlu0 %1546 }
 0x424   : > { %v1580_v39 = vadd.f32 %v1547_v14, %v1484_v44  ;;  %v1517_v49 = vpop.xlane.xlu1 %1516 }
 0x425   : > { %v1565_v16 = vadd.f32 %v1517_v49, %v1469_v31 }
 0x426   : > { %1613 = vst.msk [vmem:[#allocation3 + $0xf0] sm:$0xff] %vm1582_vm1, %v1580_v39 }
 0x427   : > { %1598 = vst.msk [vmem:[#allocation3 + $0x78] sm:$0xff] %vm1582_vm1, %v1565_v16  ;;  %v1511_v58 = vpop.xlane.xlu0 %1510 }
 0x428   : > { %v1562_v17 = vadd.f32 %v1511_v58, %v1466_v34  ;;  %v1549_v12 = vpop.xlane.xlu1 %1548  ;;  %v1619_v34 = vld [vmem:[#allocation4 + $0x20] sm:$0xff]  ;;  %v1622_v58 = vld [vmem:[#allocation4 + $0x38] sm:$0xff] }
 0x429   : > { %v1581_v56 = vadd.f32 %v1549_v12, %v1485_v28  ;;  %v1620_v28 = vld [vmem:[#allocation4 + $0x28] sm:$0xff]  ;;  %v1811_v10 = vmul.f32 %v7644_v26, %v1619_v34  ;;  %v1814_v12 = vmul.f32 %v7632_v9, %v1622_v58  ;;  %v1827_v26 = vmul.f32 %v7666_v27, %v1635_v5  ;;  %v1625_v27 = vld [vmem:[#allocation4 + $0x50] sm:$0xff]  ;;  %v1630_v5 = vld [vmem:[#allocation4 + $0x78] sm:$0xff] }
 0x42a   : > { %1595 = vst.msk [vmem:[#allocation3 + $0x60] sm:$0xff] %vm1582_vm1, %v1562_v17  ;;  %v1637_v17 = vld [vmem:[#allocation4 + $0xb0] sm:$0xff] }
 0x42b   : > { %1614 = vst.msk [vmem:[#allocation3 + $0xf8] sm:$0xff] %vm1582_vm1, %v1581_v56  ;;  %v1543_v4 = vpop.xlane.xlu0 %1542 }
 0x42c   : > { %v1578_v50 = vadd.f32 %v1543_v4, %v1482_v6  ;;  %v1513_v41 = vpop.xlane.xlu1 %1512  ;;  %v1812_v4 = vmul.f32 %v7628_v35, %v1620_v28  ;;  %v1828_v35 = vmul.f32 %v7654_v40, %v1636_v1 }
 0x42d   : > { %v1563_v2 = vadd.f32 %v1513_v41, %v1467_v22  ;;  %v1638_v22 = vld [vmem:[#allocation4 + $0xb8] sm:$0xff] }
 0x42e   : > { %1611 = vst.msk [vmem:[#allocation3 + $0xe0] sm:$0xff] %vm1582_vm1, %v1578_v50  ;;  %v1830_v9 = vmul.f32 %v7660_v37, %v1638_v22  ;;  %v1817_v37 = vmul.f32 %v7674_v32, %v1625_v27  ;;  %v9252_v27 = vld [vmem:[#allocation42_spill] sm:$0xff] }
 0x42f   : > { %1596 = vst.msk [vmem:[#allocation3 + $0x68] sm:$0xff] %vm1582_vm1, %v1563_v2  ;;  %v1829_v2 = vmul.f32 %v7670_v48, %v1637_v17  ;;  %v1629_v17 = vld [vmem:[#allocation4 + $0x70] sm:$0xff] }
 0x430   : > { %v1545_v52 = vpop.xlane.xlu1 %1544 }
 0x431   : > { %v1579_v8 = vadd.f32 %v1545_v52, %v1483_v51 }
 0x433   : > { %1612 = vst.msk [vmem:[#allocation3 + $0xe8] sm:$0xff] %vm1582_vm1, %v1579_v8 }
 0x434   : > { %v5355_v18 = vpop.f32.mrb[16].mxu0 }
 0x435   : > { %v2179_v63 = vadd.f32 %v5355_v18, %v1809_v3  ;;  %v1969_v0 = vpop.f32.mrb[17].mxu0  ;;  %v1626_v18 = vld [vmem:[#allocation4 + $0x58] sm:$0xff] }
 0x436   : > { %v2177_v36 = vadd.f32 %v1969_v0, %v1807_v23  ;;  %v5356_v29 = vpop.f32.mrb[18].mxu0  ;;  %v9243_v0 = vld [vmem:[#allocation66_spill] sm:$0xff] }
 0x437   : > { %2211 = vst [vmem:[#allocation4 + $0x10] sm:$0xff] %v2179_v63  ;;  %v2180_v45 = vadd.f32 %v5356_v29, %v1810_v11  ;;  %v1972_v42 = vpop.f32.mrb[19].mxu0  ;;  %v1624_v11 = vld [vmem:[#allocation4 + $0x48] sm:$0xff]  ;;  %v1815_v63 = vmul.f32 %v7682_v53, %v1623_v30 }
 0x438   : > { %2209 = vst [vmem:[#allocation4] sm:$0xff] %v2177_v36  ;;  %v2178_v44 = vadd.f32 %v1972_v42, %v1808_v38  ;;  %v5387_v14 = vpop.f32.mrb[16].mxu1  ;;  %v1818_v38 = vmul.f32 %v9243_v0, %v1626_v18 }
 0x439   : > { %2212 = vst [vmem:[#allocation4 + $0x18] sm:$0xff] %v2180_v45  ;;  %v2195_v31 = vadd.f32 %v5387_v14, %v1825_v24  ;;  %v2114_v60 = vpop.f32.mrb[17].mxu1  ;;  %v9244_v24 = vld [vmem:[#allocation34_spill] sm:$0xff] }
 0x43a   : > { %2210 = vst [vmem:[#allocation4 + $0x8] sm:$0xff] %v2178_v44  ;;  %v2193_v39 = vadd.f32 %v2114_v60, %v1823_v19  ;;  %v5388_v49 = vpop.f32.mrb[18].mxu1  ;;  %v1816_v45 = vmul.f32 %v9244_v24, %v1624_v11  ;;  %v1640_v44 = vld [vmem:[#allocation4 + $0xc8] sm:$0xff]  ;;  %v9245_v14 = vld [vmem:[#allocation38_spill] sm:$0xff]  ;;  %v9246_v60 = vld [vmem:[#allocation37_spill] sm:$0xff] }
 0x43b   : > { %2227 = vst [vmem:[#allocation4 + $0x90] sm:$0xff] %v2195_v31  ;;  %v2196_v7 = vadd.f32 %v5388_v49, %v1826_v13  ;;  %v2117_v57 = vpop.f32.mrb[19].mxu1  ;;  %v1833_v13 = vmul.f32 %v9245_v14, %v1641_v46  ;;  %v9247_v49 = vld [vmem:[#allocation69_spill] sm:$0xff]  ;;  %v1832_v34 = vmul.f32 %v9248_v55, %v1640_v44 }
 0x43c   : > { %2225 = vst [vmem:[#allocation4 + $0x80] sm:$0xff] %v2193_v39  ;;  %v2194_v16 = vadd.f32 %v2117_v57, %v1824_v61  ;;  %v1831_v61 = vmul.f32 %v9246_v60, %v1639_v15 }
 0x43d   : > { %2228 = vst [vmem:[#allocation4 + $0x98] sm:$0xff] %v2196_v7  ;;  %v1834_v7 = vmul.f32 %v9247_v49, %v1642_v47 }
 0x43e   : > { %2226 = vst [vmem:[#allocation4 + $0x88] sm:$0xff] %v2194_v16 }
 0x448   : > { %v5359_v43 = vpop.f32.mrb[20].mxu0 }
 0x449   : > { %v2183_v56 = vadd.f32 %v5359_v43, %v1813_v21  ;;  %v1985_v6 = vpop.f32.mrb[21].mxu0 }
 0x44a   : > { %v2181_v50 = vadd.f32 %v1985_v6, %v1811_v10  ;;  %v5360_v41 = vpop.f32.mrb[22].mxu0  ;;  %v9249_v6 = vld [vmem:[#allocation41_spill] sm:$0xff] }
 0x44b   : > { %2215 = vst [vmem:[#allocation4 + $0x30] sm:$0xff] %v2183_v56  ;;  %v2184_v51 = vadd.f32 %v5360_v41, %v1814_v12  ;;  %v1988_v62 = vpop.f32.mrb[23].mxu0  ;;  %v1627_v12 = vld [vmem:[#allocation4 + $0x60] sm:$0xff]  ;;  %v1628_v56 = vld [vmem:[#allocation4 + $0x68] sm:$0xff]  ;;  %v9250_v41 = vld [vmem:[#allocation36_spill] sm:$0xff] }
 0x44c   : > { %2213 = vst [vmem:[#allocation4 + $0x20] sm:$0xff] %v2181_v50  ;;  %v2182_v25 = vadd.f32 %v1988_v62, %v1812_v4  ;;  %v5391_v52 = vpop.f32.mrb[20].mxu1  ;;  %v1821_v4 = vmul.f32 %v9249_v6, %v1629_v17  ;;  %v1819_v22 = vmul.f32 %v7693_v20, %v1627_v12  ;;  %v1822_v1 = vmul.f32 %v9250_v41, %v1630_v5  ;;  %v9251_v62 = vld [vmem:[#allocation39_spill] sm:$0xff] }
 0x44d   : > { %2216 = vst [vmem:[#allocation4 + $0x38] sm:$0xff] %v2184_v51  ;;  %v2199_v33 = vadd.f32 %v5391_v52, %v1829_v2  ;;  %v2130_v8 = vpop.f32.mrb[21].mxu1  ;;  %v1800_v52 = vpop.permute.xlu1 %1799  ;;  %v1644_v20 = vld [vmem:[#allocation4 + $0xe8] sm:$0xff] }
 0x44e   : > { %2214 = vst [vmem:[#allocation4 + $0x28] sm:$0xff] %v2182_v25  ;;  %v2197_v59 = vadd.f32 %v2130_v8, %v1827_v26  ;;  %v5392_v54 = vpop.f32.mrb[22].mxu1  ;;  %v1820_v26 = vmul.f32 %v9251_v62, %v1628_v56  ;;  %v1645_v25 = vld [vmem:[#allocation4 + $0xf0] sm:$0xff]  ;;  %v1643_v8 = vld [vmem:[#allocation4 + $0xe0] sm:$0xff] }
 0x44f   : > { %2231 = vst [vmem:[#allocation4 + $0xb0] sm:$0xff] %v2199_v33  ;;  %v2200_v48 = vadd.f32 %v5392_v54, %v1830_v9  ;;  %v2133_v3 = vpop.f32.mrb[23].mxu1  ;;  %v1646_v54 = vld [vmem:[#allocation4 + $0xf8] sm:$0xff]  ;;  %v1835_v30 = vmul.f32 %v9252_v27, %v1643_v8 }
 0x450   : > { %2229 = vst [vmem:[#allocation4 + $0xa0] sm:$0xff] %v2197_v59  ;;  %v2198_v23 = vadd.f32 %v2133_v3, %v1828_v35 }
 0x451   : > { %2232 = vst [vmem:[#allocation4 + $0xb8] sm:$0xff] %v2200_v48  ;;  %v1805_v48 = vpop.permute.xlu0 %1804 }
 0x452   : > { %2230 = vst [vmem:[#allocation4 + $0xa8] sm:$0xff] %v2198_v23  ;;  %v1837_v23 = vmul.f32 %v1800_v52, %v1645_v25  ;;  %v1838_v11 = vmul.f32 %v1805_v48, %v1646_v54 }
 0x458   : > { %v5363_v40 = vpop.f32.mrb[24].mxu0 }
 0x459   : > { %v2187_v36 = vadd.f32 %v5363_v40, %v1817_v37  ;;  %v2001_v29 = vpop.f32.mrb[25].mxu0 }
 0x45a   : > { %v2185_v42 = vadd.f32 %v2001_v29, %v1815_v63  ;;  %v5364_v19 = vpop.f32.mrb[26].mxu0  ;;  %v9253_v63 = vld [vmem:[#allocation40_spill] sm:$0xff] }
 0x45b   : > { %2219 = vst [vmem:[#allocation4 + $0x50] sm:$0xff] %v2187_v36  ;;  %v2188_v31 = vadd.f32 %v5364_v19, %v1818_v38  ;;  %v2004_v32 = vpop.f32.mrb[27].mxu0  ;;  %v1836_v40 = vmul.f32 %v9253_v63, %v1644_v20 }
 0x45c   : > { %2217 = vst [vmem:[#allocation4 + $0x40] sm:$0xff] %v2185_v42  ;;  %v2186_v53 = vadd.f32 %v2004_v32, %v1816_v45  ;;  %v5395_v39 = vpop.f32.mrb[24].mxu1 }
 0x45d   : > { %2220 = vst [vmem:[#allocation4 + $0x58] sm:$0xff] %v2188_v31  ;;  %v2203_v57 = vadd.f32 %v5395_v39, %v1833_v13  ;;  %v2146_v16 = vpop.f32.mrb[25].mxu1 }
 0x45e   : > { %2218 = vst [vmem:[#allocation4 + $0x48] sm:$0xff] %v2186_v53  ;;  %v2201_v58 = vadd.f32 %v2146_v16, %v1831_v61  ;;  %v5396_v28 = vpop.f32.mrb[26].mxu1 }
 0x45f   : > { %2235 = vst [vmem:[#allocation4 + $0xd0] sm:$0xff] %v2203_v57  ;;  %v2204_v21 = vadd.f32 %v5396_v28, %v1834_v7  ;;  %v2149_v10 = vpop.f32.mrb[27].mxu1 }
 0x460   : > { %2233 = vst [vmem:[#allocation4 + $0xc0] sm:$0xff] %v2201_v58  ;;  %v2202_v43 = vadd.f32 %v2149_v10, %v1832_v34 }
 0x461   : > { %2236 = vst [vmem:[#allocation4 + $0xd8] sm:$0xff] %v2204_v21 }
 0x462   : > { %2234 = vst [vmem:[#allocation4 + $0xc8] sm:$0xff] %v2202_v43 }
 0x464   : > { %v5367_v50 = vpop.f32.mrb[28].mxu0 }
 0x465   : > { %v2191_v2 = vadd.f32 %v5367_v50, %v1821_v4  ;;  %v2017_v51 = vpop.f32.mrb[29].mxu0 }
 0x466   : > { %v2189_v9 = vadd.f32 %v2017_v51, %v1819_v22  ;;  %v5368_v33 = vpop.f32.mrb[30].mxu0 }
 0x467   : > { %2223 = vst [vmem:[#allocation4 + $0x70] sm:$0xff] %v2191_v2  ;;  %v2192_v35 = vadd.f32 %v5368_v33, %v1822_v1  ;;  %v2020_v59 = vpop.f32.mrb[31].mxu0 }
 0x468   : > { %2221 = vst [vmem:[#allocation4 + $0x60] sm:$0xff] %v2189_v9  ;;  %v2190_v3 = vadd.f32 %v2020_v59, %v1820_v26 }
 0x469   : > { %2224 = vst [vmem:[#allocation4 + $0x78] sm:$0xff] %v2192_v35 }
 0x46a   : > { %2222 = vst [vmem:[#allocation4 + $0x68] sm:$0xff] %v2190_v3 }
 0x46b   : > { %v5399_v18 = vpop.f32.mrb[28].mxu1 }
 0x46c   : > { %v2207_v37 = vadd.f32 %v5399_v18, %v1837_v23  ;;  %v2162_v46 = vpop.f32.mrb[29].mxu1 }
 0x46d   : > { %v2205_v0 = vadd.f32 %v2162_v46, %v1835_v30  ;;  %v5400_v38 = vpop.f32.mrb[30].mxu1 }
 0x46e   : > { %2239 = vst [vmem:[#allocation4 + $0xf0] sm:$0xff] %v2207_v37  ;;  %v2208_v15 = vadd.f32 %v5400_v38, %v1838_v11  ;;  %v2165_v36 = vpop.f32.mrb[31].mxu1 }
 0x46f   : > { %2237 = vst [vmem:[#allocation4 + $0xe0] sm:$0xff] %v2205_v0  ;;  %v2206_v29 = vadd.f32 %v2165_v36, %v1836_v40 }
 0x470   : > { %2240 = vst [vmem:[#allocation4 + $0xf8] sm:$0xff] %v2208_v15 }
 0x471   : > { %2238 = vst [vmem:[#allocation4 + $0xe8] sm:$0xff] %v2206_v29 }
 0x472 PF: > { %p5009_p13 = scmp.ne.s32.totalorder %s6860_s22, %s6858_s26 }
 0x474   : > { %2276 = sbr.rel (%p5009_p13) target bundleno = 2431 (0x97f), region = 68 }
 0x47b   : > { %v5872_v47 = vld [vmem:[%s6840_s3] sm:$0xff]   ;;  %v5874_v45 = vld [vmem:[%s6840_s3 + $0x8] sm:$0xff]   ;;  %v5876_v19 = vld [vmem:[%s6840_s3 + $0x10] sm:$0xff]   ;;  %v2727_v50 = vlaneseq  ;;  %s9361_s4 = sld [smem:[#allocation111_spill]] }
 0x47c   : > { %v5873_v24 = vld [vmem:[%s6840_s3 + $0x40] sm:$0xff]   ;;  %5401 = vmatprep.subr.bf16.mxu0 %v5872_v47  ;;  %v5875_v42 = vld [vmem:[%s6840_s3 + $0x48] sm:$0xff]   ;;  %v5877_v44 = vld [vmem:[%s6840_s3 + $0x50] sm:$0xff]  }
 0x47d   : > { %5433 = vmatprep.subr.bf16.mxu1 %v5873_v24  ;;  %5402 = vmatpush3.bf16.xpose.msra.mxu0 %v5872_v47  ;;  %v5878_v14 = vld [vmem:[%s6840_s3 + $0x18] sm:$0xff]   ;;  %v5888_v31 = vld [vmem:[%s6832_s12] sm:$0xff]   ;;  %v5882_v53 = vld [vmem:[%s6840_s3 + $0x28] sm:$0xff]   ;;  %v7824_v41 = vshrl.u32 %v2727_v50, 7  ;;  %v7827_v2 = vand.u32 127, %v2727_v50 }
 0x47e   : > { %5434 = vmatpush3.bf16.xpose.msra.mxu1 %v5873_v24  ;;  %5403 = vmatprep.subr.bf16.mxu0 %v5874_v45  ;;  %v5879_v13 = vld [vmem:[%s6840_s3 + $0x58] sm:$0xff]   ;;  %v5889_v32 = vld [vmem:[%s6832_s12 + $0x40] sm:$0xff]   ;;  %v5883_v39 = vld [vmem:[%s6840_s3 + $0x68] sm:$0xff]  }
 0x47f   : > { %5435 = vmatprep.subr.bf16.mxu1 %v5875_v42  ;;  %5417 = vmatprep.mubr.bf16.mxu0 %v5888_v31  ;;  %v5880_v60 = vld [vmem:[%s6840_s3 + $0x20] sm:$0xff]   ;;  %v5884_v49 = vld [vmem:[%s6840_s3 + $0x30] sm:$0xff]   ;;  %v5886_v57 = vld [vmem:[%s6840_s3 + $0x38] sm:$0xff]   ;;  %v2730_v1 = vadd.s32 16, %v7824_v41  ;;  %v2731_v51 = vadd.s32 24, %v7824_v41  ;;  %vm2746_vm4 = vcmp.gt.s32.totalorder %v7827_v2, %v7824_v41  ;;  %v2729_v20 = vadd.s32 8, %v7824_v41 }
 0x480   : > { %5449 = vmatprep.mubr.bf16.mxu1 %v5889_v32  ;;  %v5881_v61 = vld [vmem:[%s6840_s3 + $0x60] sm:$0xff]   ;;  %v5885_v7 = vld [vmem:[%s6840_s3 + $0x70] sm:$0xff]   ;;  %v5887_v16 = vld [vmem:[%s6840_s3 + $0x78] sm:$0xff]   ;;  %v2735_v27 = vadd.s32 56, %v7824_v41  ;;  %v2734_v18 = vadd.s32 48, %v7824_v41  ;;  %v6423_v32 = vmov 0  }
 0x481   : > { %v5890_v55 = vld [vmem:[%s6832_s12 + $0x8] sm:$0xff]   ;;  %v5892_v58 = vld [vmem:[%s6832_s12 + $0x10] sm:$0xff]   ;;  %v5893_v21 = vld [vmem:[%s6832_s12 + $0x18] sm:$0xff]   ;;  %vm2748_vm2 = vcmp.gt.s32.totalorder %v7827_v2, %v2730_v1  ;;  %vm2749_vm3 = vcmp.gt.s32.totalorder %v7827_v2, %v2731_v51  ;;  %vm2747_vm5 = vcmp.gt.s32.totalorder %v7827_v2, %v2729_v20  ;;  %5870 = vset.pattern.permute.xlu0 %v6423_v32  ;;  %5871 = vset.pattern.permute.xlu1 %v6423_v32  ;;  %v2737_v1 = vadd.s32 72, %v7824_v41 }
 0x482   : > { %v5891_v34 = vld [vmem:[%s6832_s12 + $0x48] sm:$0xff]   ;;  %v5894_v28 = vld [vmem:[%s6832_s12 + $0x50] sm:$0xff]   ;;  %v5895_v10 = vld [vmem:[%s6832_s12 + $0x58] sm:$0xff]   ;;  %vm2753_vm6 = vcmp.gt.s32.totalorder %v7827_v2, %v2735_v27  ;;  %vm2752_vm7 = vcmp.gt.s32.totalorder %v7827_v2, %v2734_v18  ;;  %v2736_v51 = vadd.s32 64, %v7824_v41  ;;  %v2743_v20 = vadd.s32 120, %v7824_v41 }
 0x483   : > { %v5896_v17 = vld [vmem:[%s6832_s12 + $0x20] sm:$0xff]   ;;  %v5897_v12 = vld [vmem:[%s6832_s12 + $0x28] sm:$0xff]   ;;  %v5900_v56 = vld [vmem:[%s6832_s12 + $0x30] sm:$0xff]   ;;  %vm2755_vm13 = vcmp.gt.s32.totalorder %v7827_v2, %v2737_v1 }
 0x484   : > { %v5898_v43 = vld [vmem:[%s6832_s12 + $0x60] sm:$0xff]   ;;  %v5899_v5 = vld [vmem:[%s6832_s12 + $0x68] sm:$0xff]   ;;  %v5902_v6 = vld [vmem:[%s6832_s12 + $0x70] sm:$0xff]   ;;  %vm2754_vm14 = vcmp.gt.s32.totalorder %v7827_v2, %v2736_v51  ;;  %vm2761_vm1 = vcmp.gt.s32.totalorder %v7827_v2, %v2743_v20 }
 0x485   : > { %5404 = vmatpush3.bf16.xpose.msra.mxu0 %v5874_v45  ;;  %v5901_v4 = vld [vmem:[%s6832_s12 + $0x38] sm:$0xff]   ;;  %v5905_v32 = vld [vmem:[%s6847_s23 + $0x8] sm:$0xff]  }
 0x486   : > { %5436 = vmatpush3.bf16.xpose.msra.mxu1 %v5875_v42  ;;  %5405 = vmatprep.subr.bf16.mxu0 %v5876_v19  ;;  %v5903_v22 = vld [vmem:[%s6832_s12 + $0x78] sm:$0xff]   ;;  %v2733_v42 = vadd.s32 40, %v7824_v41 }
 0x487   : > { %5437 = vmatprep.subr.bf16.mxu1 %v5877_v44 }
 0x488   : > { %vm2751_vm8 = vcmp.gt.s32.totalorder %v7827_v2, %v2733_v42 }
 0x48d   : > { %5406 = vmatpush3.bf16.xpose.msra.mxu0 %v5876_v19  ;;  %v2732_v19 = vadd.s32 32, %v7824_v41 }
 0x48e   : > { %5438 = vmatpush3.bf16.xpose.msra.mxu1 %v5877_v44  ;;  %5407 = vmatprep.subr.bf16.mxu0 %v5878_v14 }
 0x48f   : > { %5439 = vmatprep.subr.bf16.mxu1 %v5879_v13  ;;  %vm2750_vm9 = vcmp.gt.s32.totalorder %v7827_v2, %v2732_v19  ;;  %v7990_v19 = vld [vmem:[#allocation2 + $0x18] sm:$0xff] }
 0x495   : > { %5408 = vmatpush3.bf16.xpose.msra.mxu0 %v5878_v14 }
 0x496   : > { %5440 = vmatpush3.bf16.xpose.msra.mxu1 %v5879_v13  ;;  %5409 = vmatprep.subr.bf16.mxu0 %v5880_v60 }
 0x497   : > { %5441 = vmatprep.subr.bf16.mxu1 %v5881_v61 }
 0x49d   : > { %5410 = vmatpush3.bf16.xpose.msra.mxu0 %v5880_v60 }
 0x49e   : > { %5442 = vmatpush3.bf16.xpose.msra.mxu1 %v5881_v61  ;;  %5411 = vmatprep.subr.bf16.mxu0 %v5882_v53 }
 0x49f   : > { %5443 = vmatprep.subr.bf16.mxu1 %v5883_v39 }
 0x4a5   : > { %5412 = vmatpush3.bf16.xpose.msra.mxu0 %v5882_v53 }
 0x4a6   : > { %5444 = vmatpush3.bf16.xpose.msra.mxu1 %v5883_v39  ;;  %5413 = vmatprep.subr.bf16.mxu0 %v5884_v49 }
 0x4a7   : > { %5445 = vmatprep.subr.bf16.mxu1 %v5885_v7 }
 0x4ad   : > { %5414 = vmatpush3.bf16.xpose.msra.mxu0 %v5884_v49 }
 0x4ae   : > { %5446 = vmatpush3.bf16.xpose.msra.mxu1 %v5885_v7  ;;  %5415 = vmatprep.subr.bf16.mxu0 %v5886_v57 }
 0x4af   : > { %5447 = vmatprep.subr.bf16.mxu1 %v5887_v16 }
 0x4b5   : > { %5416 = vmatpush3.bf16.xpose.msra.mxu0 %v5886_v57 }
 0x4b6   : > { %5448 = vmatpush3.bf16.xpose.msra.mxu1 %v5887_v16  ;;  %v2739_v16 = vadd.s32 88, %v7824_v41 }
 0x4b8   : > { %vm2757_vm10 = vcmp.gt.s32.totalorder %v7827_v2, %v2739_v16  ;;  %v8010_v16 = vld [vmem:[#allocation2 + $0x98] sm:$0xff] }
 0x4bc   : > { %5418 = vmatmul.mubr.bf16.vlgmr.msra.gmra.mrb[0].mxu0 %v5890_v55 }
 0x4bd   : > { %5450 = vmatmul.mubr.bf16.vlgmr.msra.gmra.mrb[0].mxu1 %v5891_v34  ;;  %5421 = vmatprep.mubr.bf16.mxu0 %v5892_v58  ;;  %v2741_v34 = vadd.s32 104, %v7824_v41  ;;  %v2738_v58 = vadd.s32 80, %v7824_v41 }
 0x4be   : > { %5453 = vmatprep.mubr.bf16.mxu1 %v5894_v28 }
 0x4bf   : > { %vm2759_vm11 = vcmp.gt.s32.totalorder %v7827_v2, %v2741_v34  ;;  %vm2756_vm12 = vcmp.gt.s32.totalorder %v7827_v2, %v2738_v58  ;;  %v8017_v34 = vld [vmem:[#allocation2 + $0x80] sm:$0xff] }
 0x4c4   : > { %5422 = vmatmul.mubr.bf16.gmra.mrb[4].mxu0 %v5893_v21 }
 0x4c5   : > { %5454 = vmatmul.mubr.bf16.gmra.mrb[4].mxu1 %v5895_v10  ;;  %5425 = vmatprep.mubr.bf16.mxu0 %v5896_v17 }
 0x4c6   : > { %5457 = vmatprep.mubr.bf16.mxu1 %v5898_v43 }
 0x4cc   : > { %5426 = vmatmul.mubr.bf16.gmra.mrb[8].mxu0 %v5897_v12 }
 0x4cd   : > { %5458 = vmatmul.mubr.bf16.gmra.mrb[8].mxu1 %v5899_v5  ;;  %5429 = vmatprep.mubr.bf16.mxu0 %v5900_v56 }
 0x4ce   : > { %5461 = vmatprep.mubr.bf16.mxu1 %v5902_v6 }
 0x4d4   : > { %5430 = vmatmul.mubr.bf16.gmra.mrb[12].mxu0 %v5901_v4 }
 0x4d5   : > { %5462 = vmatmul.mubr.bf16.gmra.mrb[12].mxu1 %v5903_v22 }
 0x58f   : > { %v5419_v62 = vpop.f32.mrb[0].mxu0 }
 0x590   : > { %v5451_v26 = vpop.f32.mrb[0].mxu1  ;;  %v2471_v25 = vpop.f32.mrb[1].mxu0  ;;  %v7832_v52 = vsel %vm2748_vm2, -1e+30, %v5419_v62 }
 0x591   : > { %v2664_v9 = vpop.f32.mrb[1].mxu1  ;;  %v7834_v33 = vsel %vm2748_vm2, -1e+30, %v5451_v26  ;;  %2862 = vmax.xlane.f32.xlu1 %v7832_v52  ;;  %v5420_v8 = vpop.f32.mrb[2].mxu0  ;;  %v7844_v3 = vsel %vm2746_vm4, -1e+30, %v2471_v25 }
 0x592   : > { %9254 = vst [vmem:[#allocation70_spill] sm:$0xff] %v7834_v33  ;;  %2894 = vmax.xlane.f32.xlu0 %v7834_v33  ;;  %v5452_v35 = vpop.f32.mrb[2].mxu1  ;;  %v2474_v59 = vpop.f32.mrb[3].mxu0  ;;  %v7842_v54 = vsel %vm2749_vm3, -1e+30, %v5420_v8  ;;  %v2742_v8 = vadd.s32 112, %v7824_v41 }
 0x593   : > { %v2667_v48 = vpop.f32.mrb[3].mxu1  ;;  %v7852_v30 = vsel %vm2749_vm3, -1e+30, %v5452_v35  ;;  %v7855_v46 = vsel %vm2746_vm4, -1e+30, %v2664_v9  ;;  %v2740_v35 = vadd.s32 96, %v7824_v41 }
 0x594   : > { %9255 = vst [vmem:[#allocation71_spill] sm:$0xff] %v7852_v30  ;;  %9256 = vst [vmem:[#allocation72_spill] sm:$0xff] %v7855_v46  ;;  %v7861_v36 = vsel %vm2747_vm5, -1e+30, %v2667_v48  ;;  %v7865_v29 = vsel %vm2747_vm5, -1e+30, %v2474_v59  ;;  %vm2760_vm15 = vcmp.gt.s32.totalorder %v7827_v2, %v2742_v8 }
 0x595   : > { %2864 = vmax.xlane.f32.xlu1 %v7842_v54  ;;  %9257 = vst [vmem:[#allocation73_spill] sm:$0xff] %v7861_v36  ;;  %vm2758_vm0 = vcmp.gt.s32.totalorder %v7827_v2, %v2740_v35  ;;  %vm3466_vm2 = vcmask 7168   ;;  %v5907_v8 = vld [vmem:[%s6847_s23 + $0x18] sm:$0xff]  }
 0x596   : > { %2858 = vmax.xlane.f32.xlu0 %v7844_v3 }
 0x597   : > { %v5423_v23 = vpop.f32.mrb[4].mxu0 }
 0x598   : > { %v5455_v11 = vpop.f32.mrb[4].mxu1  ;;  %v2487_v37 = vpop.f32.mrb[5].mxu0  ;;  %v7874_v24 = vsel %vm2752_vm7, -1e+30, %v5423_v23 }
 0x599   : > { %2896 = vmax.xlane.f32.xlu1 %v7852_v30  ;;  %v2680_v63 = vpop.f32.mrb[5].mxu1  ;;  %v5424_v40 = vpop.f32.mrb[6].mxu0  ;;  %v7886_v39 = vsel %vm2752_vm7, -1e+30, %v5455_v11  ;;  %v7898_v57 = vsel %vm2750_vm9, -1e+30, %v2487_v37 }
 0x59a   : > { %2890 = vmax.xlane.f32.xlu0 %v7855_v46  ;;  %v2490_v0 = vpop.f32.mrb[7].mxu0  ;;  %v5456_v38 = vpop.f32.mrb[6].mxu1  ;;  %v7870_v47 = vsel %vm2753_vm6, -1e+30, %v5424_v40  ;;  %9259 = vst [vmem:[#allocation75_spill] sm:$0xff] %v7886_v39  ;;  %v7979_v40 = vld [vmem:[#allocation2 + $0x10] sm:$0xff] }
 0x59b   : > { %v2683_v15 = vpop.f32.mrb[7].mxu1  ;;  %v7882_v60 = vsel %vm2753_vm6, -1e+30, %v5456_v38  ;;  %v7894_v7 = vsel %vm2751_vm8, -1e+30, %v2490_v0  ;;  %v7981_v0 = vld [vmem:[#allocation2 + $0x90] sm:$0xff] }
 0x59c   : > { %9258 = vst [vmem:[#allocation74_spill] sm:$0xff] %v7882_v60  ;;  %v7907_v43 = vsel %vm2751_vm8, -1e+30, %v2683_v15  ;;  %v7911_v56 = vsel %vm2750_vm9, -1e+30, %v2680_v63  ;;  %v5904_v15 = vld [vmem:[%s6847_s23] sm:$0xff]  }
 0x59d   : > { %2892 = vmax.xlane.f32.xlu1 %v7861_v36  ;;  %9260 = vst [vmem:[#allocation76_spill] sm:$0xff] %v7907_v43  ;;  %9261 = vst [vmem:[#allocation77_spill] sm:$0xff] %v7911_v56  ;;  %5465 = vmatprep.subr.bf16.mxu1 %v5904_v15  ;;  %v8217_v36 = vld [vmem:[#allocation2 + $0x78] sm:$0xff] }
 0x59e   : > { %2860 = vmax.xlane.f32.xlu0 %v7865_v29  ;;  %5466 = vmatpush3.bf16.msra.mxu1 %v5904_v15  ;;  %v8048_v15 = vld [vmem:[#allocation2 + $0x38] sm:$0xff]  ;;  %9286 = vst [vmem:[#allocation102_spill] sm:$0xff] %v8217_v36 }
 0x59f   : > { %v5427_v45 = vpop.f32.mrb[8].mxu0  ;;  %5467 = vmatprep.subr.bf16.mxu1 %v5905_v32  ;;  %9276 = vst [vmem:[#allocation92_spill] sm:$0xff] %v8048_v15  ;;  %v8260_v46 = vld [vmem:[#allocation2 + $0xf8] sm:$0xff] }
 0x5a0   : > { %v5459_v44 = vpop.f32.mrb[8].mxu1  ;;  %v2503_v14 = vpop.f32.mrb[9].mxu0  ;;  %v7924_v50 = vsel %vm2756_vm12, -1e+30, %v5427_v45  ;;  %9289 = vst [vmem:[#allocation105_spill] sm:$0xff] %v8260_v46 }
 0x5a1   : > { %2872 = vmax.xlane.f32.xlu1 %v7870_v47  ;;  %v2696_v13 = vpop.f32.mrb[9].mxu1  ;;  %v5428_v31 = vpop.f32.mrb[10].mxu0  ;;  %v7932_v26 = vsel %vm2756_vm12, -1e+30, %v5459_v44  ;;  %v7940_v9 = vsel %vm2754_vm14, -1e+30, %v2503_v14 }
 0x5a2   : > { %2870 = vmax.xlane.f32.xlu0 %v7874_v24  ;;  %v2506_v61 = vpop.f32.mrb[11].mxu0  ;;  %v5460_v53 = vpop.f32.mrb[10].mxu1  ;;  %v7922_v22 = vsel %vm2757_vm10, -1e+30, %v5428_v31  ;;  %9265 = vst [vmem:[#allocation81_spill] sm:$0xff] %v7932_v26  ;;  %v7997_v14 = vld [vmem:[#allocation2] sm:$0xff]  ;;  %5468 = vmatpush3.bf16.msra.mxu1 %v5905_v32 }
 0x5a3   : > { %v2699_v49 = vpop.f32.mrb[11].mxu1  ;;  %9263 = vst [vmem:[#allocation79_spill] sm:$0xff] %v7922_v22  ;;  %v7930_v62 = vsel %vm2757_vm10, -1e+30, %v5460_v53  ;;  %v7938_v25 = vsel %vm2755_vm13, -1e+30, %v2506_v61 }
 0x5a4   : > { %9264 = vst [vmem:[#allocation80_spill] sm:$0xff] %v7930_v62  ;;  %9266 = vst [vmem:[#allocation82_spill] sm:$0xff] %v7938_v25  ;;  %v7946_v59 = vsel %vm2755_vm13, -1e+30, %v2699_v49  ;;  %v7948_v48 = vsel %vm2754_vm14, -1e+30, %v2696_v13 }
 0x5a5   : > { %2904 = vmax.xlane.f32.xlu1 %v7882_v60  ;;  %9267 = vst [vmem:[#allocation83_spill] sm:$0xff] %v7946_v59  ;;  %9268 = vst [vmem:[#allocation84_spill] sm:$0xff] %v7948_v48  ;;  %v8181_v60 = vld [vmem:[#allocation2 + $0xc0] sm:$0xff] }
 0x5a6   : > { %2902 = vmax.xlane.f32.xlu0 %v7886_v39  ;;  %v8143_v39 = vld [vmem:[#allocation2 + $0xd0] sm:$0xff] }
 0x5a7   : > { %v5431_v55 = vpop.f32.mrb[12].mxu0 }
 0x5a8   : > { %v2519_v28 = vpop.f32.mrb[13].mxu0  ;;  %v5463_v21 = vpop.f32.mrb[12].mxu1  ;;  %v7957_v27 = vsel %vm2760_vm15, -1e+30, %v5431_v55  ;;  %v8141_v55 = vld [vmem:[#allocation2 + $0xd8] sm:$0xff] }
 0x5a9   : > { %2868 = vmax.xlane.f32.xlu1 %v7894_v7  ;;  %v2712_v10 = vpop.f32.mrb[13].mxu1  ;;  %v5432_v17 = vpop.f32.mrb[14].mxu0  ;;  %9270 = vst [vmem:[#allocation86_spill] sm:$0xff] %v7957_v27  ;;  %v7964_v18 = vsel %vm2758_vm0, -1e+30, %v2519_v28  ;;  %9281 = vst [vmem:[#allocation97_spill] sm:$0xff] %v8141_v55 }
 0x5aa   : > { %2866 = vmax.xlane.f32.xlu0 %v7898_v57  ;;  %v2522_v12 = vpop.f32.mrb[15].mxu0  ;;  %v5464_v5 = vpop.f32.mrb[14].mxu1  ;;  %v7955_v23 = vsel %vm2758_vm0, -1e+30, %v2712_v10  ;;  %v7962_v41 = vsel %vm2761_vm1, -1e+30, %v5432_v17 }
 0x5ab   : > { %v2715_v6 = vpop.f32.mrb[15].mxu1  ;;  %9269 = vst [vmem:[#allocation85_spill] sm:$0xff] %v7955_v23  ;;  %9271 = vst [vmem:[#allocation87_spill] sm:$0xff] %v7962_v41  ;;  %v7970_v11 = vsel %vm2759_vm11, -1e+30, %v2522_v12 }
 0x5ac   : > { %v7918_v4 = vsel %vm2759_vm11, -1e+30, %v2715_v6  ;;  %9272 = vst [vmem:[#allocation88_spill] sm:$0xff] %v7964_v18  ;;  %9273 = vst [vmem:[#allocation89_spill] sm:$0xff] %v7970_v11  ;;  %v7973_v37 = vsel %vm2760_vm15, -1e+30, %v5463_v21 }
 0x5ad   : > { %9262 = vst [vmem:[#allocation78_spill] sm:$0xff] %v7918_v4  ;;  %2900 = vmax.xlane.f32.xlu1 %v7907_v43  ;;  %9274 = vst [vmem:[#allocation90_spill] sm:$0xff] %v7973_v37  ;;  %v7976_v63 = vsel %vm2761_vm1, -1e+30, %v5464_v5  ;;  %v5906_v21 = vld [vmem:[%s6847_s23 + $0x10] sm:$0xff]   ;;  %v8031_v5 = vld [vmem:[#allocation2 + $0x88] sm:$0xff] }
 0x5ae   : > { %2898 = vmax.xlane.f32.xlu0 %v7911_v56  ;;  %9275 = vst [vmem:[#allocation91_spill] sm:$0xff] %v7976_v63  ;;  %5469 = vmatprep.subr.bf16.mxu1 %v5906_v21  ;;  %v8035_v6 = vld [vmem:[#allocation2 + $0x8] sm:$0xff] }
 0x5af   : > { %5470 = vmatpush3.bf16.msra.mxu1 %v5906_v21 }
 0x5b0   : > { %5471 = vmatprep.subr.bf16.mxu1 %v5907_v8 }
 0x5b1   : > { %2880 = vmax.xlane.f32.xlu1 %v7922_v22 }
 0x5b2   : > { %2878 = vmax.xlane.f32.xlu0 %v7924_v50 }
 0x5b3   : > { %5472 = vmatpush3.bf16.msra.mxu1 %v5907_v8  ;;  %v8068_v8 = vld [vmem:[#allocation2 + $0xb0] sm:$0xff] }
 0x5b5   : > { %2912 = vmax.xlane.f32.xlu1 %v7930_v62 }
 0x5b6   : > { %2910 = vmax.xlane.f32.xlu0 %v7932_v26  ;;  %v8122_v26 = vld [vmem:[#allocation2 + $0x58] sm:$0xff] }
 0x5b7   : > { %9280 = vst [vmem:[#allocation96_spill] sm:$0xff] %v8122_v26 }
 0x5b9   : > { %2876 = vmax.xlane.f32.xlu1 %v7938_v25  ;;  %v8235_v25 = vld [vmem:[#allocation2 + $0x68] sm:$0xff] }
 0x5ba   : > { %2874 = vmax.xlane.f32.xlu0 %v7940_v9 }
 0x5bd   : > { %2908 = vmax.xlane.f32.xlu1 %v7946_v59 }
 0x5be   : > { %2906 = vmax.xlane.f32.xlu0 %v7948_v48 }
 0x5c1   : > { %2914 = vmax.xlane.f32.xlu1 %v7955_v23  ;;  %v8102_v23 = vld [vmem:[#allocation2 + $0xa8] sm:$0xff] }
 0x5c2   : > { %2886 = vmax.xlane.f32.xlu0 %v7957_v27 }
 0x5c5   : > { %2888 = vmax.xlane.f32.xlu1 %v7962_v41  ;;  %v8179_v41 = vld [vmem:[#allocation2 + $0xc8] sm:$0xff] }
 0x5c6   : > { %2882 = vmax.xlane.f32.xlu0 %v7964_v18  ;;  %9283 = vst [vmem:[#allocation99_spill] sm:$0xff] %v8179_v41 }
 0x5c9   : > { %2884 = vmax.xlane.f32.xlu1 %v7970_v11 }
 0x5cd   : > { %2918 = vmax.xlane.f32.xlu1 %v7973_v37  ;;  %v8104_v37 = vld [vmem:[#allocation2 + $0xa0] sm:$0xff] }
 0x5d1   : > { %2920 = vmax.xlane.f32.xlu1 %v7976_v63 }
 0x61e   : > { %v2863_v38 = vpop.xlane.xlu1 %2862 }
 0x61f   : > { %v2895_v2 = vpop.xlane.xlu0 %2894  ;;  %v7985_v45 = vmax.f32 %v7979_v40, %v2863_v38 }
 0x620   : > { %v7988_v42 = vmax.f32 %v7981_v0, %v2895_v2  ;;  %v8052_v2 = vld [vmem:[#allocation2 + $0x30] sm:$0xff] }
 0x621   : > { %4127 = vst.msk [vmem:[#allocation2 + $0x10] sm:$0xff] %vm3466_vm2, %v7985_v45  ;;  %3062 = vperm.xlu1 %5871, %v7985_v45  }
 0x622   : > { %4143 = vst.msk [vmem:[#allocation2 + $0x90] sm:$0xff] %vm3466_vm2, %v7988_v42  ;;  %v2865_v31 = vpop.xlane.xlu1 %2864 }
 0x623   : > { %v2859_v61 = vpop.xlane.xlu0 %2858  ;;  %v8005_v53 = vmax.f32 %v7990_v19, %v2865_v31  ;;  %v5910_v31 = vld [vmem:[%s6847_s23 + $0x30] sm:$0xff]  }
 0x624   : > { %v8008_v49 = vmax.f32 %v7997_v14, %v2859_v61  ;;  %v5908_v61 = vld [vmem:[%s6847_s23 + $0x20] sm:$0xff]  }
 0x625   : > { %4128 = vst.msk [vmem:[#allocation2 + $0x18] sm:$0xff] %vm3466_vm2, %v8005_v53  ;;  %3067 = vperm.xlu1 %5871, %v8005_v53   ;;  %5473 = vmatprep.subr.bf16.mxu1 %v5908_v61 }
 0x626   : > { %4125 = vst.msk [vmem:[#allocation2] sm:$0xff] %vm3466_vm2, %v8008_v49  ;;  %3052 = vperm.xlu0 %5870, %v8008_v49   ;;  %v2897_v28 = vpop.xlane.xlu1 %2896  ;;  %5474 = vmatpush3.bf16.msra.mxu1 %v5908_v61  ;;  %v8088_v61 = vld [vmem:[#allocation2 + $0x20] sm:$0xff] }
 0x627   : > { %v2891_v10 = vpop.xlane.xlu0 %2890  ;;  %v8026_v17 = vmax.f32 %v8010_v16, %v2897_v28 }
 0x628   : > { %v8029_v12 = vmax.f32 %v8017_v34, %v2891_v10 }
 0x629   : > { %4144 = vst.msk [vmem:[#allocation2 + $0x98] sm:$0xff] %vm3466_vm2, %v8026_v17 }
 0x62a   : > { %4141 = vst.msk [vmem:[#allocation2 + $0x80] sm:$0xff] %vm3466_vm2, %v8029_v12  ;;  %v2893_v51 = vpop.xlane.xlu1 %2892 }
 0x62b   : > { %v8043_v35 = vmax.f32 %v8031_v5, %v2893_v51  ;;  %v2861_v20 = vpop.xlane.xlu0 %2860  ;;  %v8066_v51 = vld [vmem:[#allocation2 + $0xb8] sm:$0xff] }
 0x62c   : > { %v8046_v38 = vmax.f32 %v8035_v6, %v2861_v20  ;;  %9278 = vst [vmem:[#allocation94_spill] sm:$0xff] %v8066_v51  ;;  %v8086_v20 = vld [vmem:[#allocation2 + $0x28] sm:$0xff] }
 0x62d   : > { %4142 = vst.msk [vmem:[#allocation2 + $0x88] sm:$0xff] %vm3466_vm2, %v8043_v35  ;;  %9279 = vst [vmem:[#allocation95_spill] sm:$0xff] %v8086_v20 }
 0x62e   : > { %4126 = vst.msk [vmem:[#allocation2 + $0x8] sm:$0xff] %vm3466_vm2, %v8046_v38  ;;  %3057 = vperm.xlu1 %5871, %v8046_v38   ;;  %v2873_v32 = vpop.xlane.xlu1 %2872 }
 0x62f   : > { %v2871_v28 = vpop.xlane.xlu0 %2870  ;;  %v8061_v21 = vmax.f32 %v8048_v15, %v2873_v32 }
 0x630   : > { %v8064_v10 = vmax.f32 %v8052_v2, %v2871_v28  ;;  %v5909_v28 = vld [vmem:[%s6847_s23 + $0x28] sm:$0xff]  }
 0x631   : > { %9277 = vst [vmem:[#allocation93_spill] sm:$0xff] %v8061_v21  ;;  %4132 = vst.msk [vmem:[#allocation2 + $0x38] sm:$0xff] %vm3466_vm2, %v8061_v21  ;;  %5475 = vmatprep.subr.bf16.mxu1 %v5909_v28 }
 0x632   : > { %4131 = vst.msk [vmem:[#allocation2 + $0x30] sm:$0xff] %vm3466_vm2, %v8064_v10  ;;  %v2905_v32 = vpop.xlane.xlu1 %2904  ;;  %5476 = vmatpush3.bf16.msra.mxu1 %v5909_v28 }
 0x633   : > { %v2903_v1 = vpop.xlane.xlu0 %2902  ;;  %v8081_v44 = vmax.f32 %v8066_v51, %v2905_v32  ;;  %5477 = vmatprep.subr.bf16.mxu1 %v5910_v31 }
 0x634   : > { %v8084_v13 = vmax.f32 %v8068_v8, %v2903_v1 }
 0x635   : > { %4148 = vst.msk [vmem:[#allocation2 + $0xb8] sm:$0xff] %vm3466_vm2, %v8081_v44 }
 0x636   : > { %4147 = vst.msk [vmem:[#allocation2 + $0xb0] sm:$0xff] %vm3466_vm2, %v8084_v13  ;;  %v2869_v32 = vpop.xlane.xlu1 %2868  ;;  %5478 = vmatpush3.bf16.msra.mxu1 %v5910_v31  ;;  %v8124_v31 = vld [vmem:[#allocation2 + $0x50] sm:$0xff] }
 0x637   : > { %v2867_v1 = vpop.xlane.xlu0 %2866  ;;  %v8097_v58 = vmax.f32 %v8086_v20, %v2869_v32 }
 0x638   : > { %v8100_v63 = vmax.f32 %v8088_v61, %v2867_v1  ;;  %v5911_v1 = vld [vmem:[%s6847_s23 + $0x38] sm:$0xff]  }
 0x639   : > { %4130 = vst.msk [vmem:[#allocation2 + $0x28] sm:$0xff] %vm3466_vm2, %v8097_v58  ;;  %5479 = vmatprep.subr.bf16.mxu1 %v5911_v1 }
 0x63a   : > { %4129 = vst.msk [vmem:[#allocation2 + $0x20] sm:$0xff] %vm3466_vm2, %v8100_v63  ;;  %3072 = vperm.xlu1 %5871, %v8100_v63   ;;  %v2901_v32 = vpop.xlane.xlu1 %2900  ;;  %5480 = vmatpush3.bf16.msra.mxu1 %v5911_v1  ;;  %v8160_v1 = vld [vmem:[#allocation2 + $0x48] sm:$0xff] }
 0x63b   : > { %v2899_v62 = vpop.xlane.xlu0 %2898  ;;  %v8117_v59 = vmax.f32 %v8102_v23, %v2901_v32  ;;  %9282 = vst [vmem:[#allocation98_spill] sm:$0xff] %v8160_v1 }
 0x63c   : > { %v8120_v28 = vmax.f32 %v8104_v37, %v2899_v62 }
 0x63d   : > { %4146 = vst.msk [vmem:[#allocation2 + $0xa8] sm:$0xff] %vm3466_vm2, %v8117_v59 }
 0x63e   : > { %4145 = vst.msk [vmem:[#allocation2 + $0xa0] sm:$0xff] %vm3466_vm2, %v8120_v28  ;;  %3082 = vperm.xlu1 %5871, %v8064_v10   ;;  %v2881_v62 = vpop.xlane.xlu1 %2880 }
 0x63f   : > { %v2879_v32 = vpop.xlane.xlu0 %2878  ;;  %v8136_v48 = vmax.f32 %v8122_v26, %v2881_v62  ;;  %v8163_v26 = vld [vmem:[#allocation2 + $0x40] sm:$0xff] }
 0x640   : > { %v8139_v43 = vmax.f32 %v8124_v31, %v2879_v32 }
 0x641   : > { %4136 = vst.msk [vmem:[#allocation2 + $0x58] sm:$0xff] %vm3466_vm2, %v8136_v48 }
 0x642   : > { %4135 = vst.msk [vmem:[#allocation2 + $0x50] sm:$0xff] %vm3466_vm2, %v8139_v43  ;;  %3087 = vperm.xlu1 %5871, %v8061_v21   ;;  %v2913_v62 = vpop.xlane.xlu1 %2912 }
 0x643   : > { %v2911_v32 = vpop.xlane.xlu0 %2910  ;;  %v8155_v30 = vmax.f32 %v8141_v55, %v2913_v62  ;;  %v8198_v55 = vld [vmem:[#allocation2 + $0xe0] sm:$0xff] }
 0x644   : > { %v8158_v56 = vmax.f32 %v8143_v39, %v2911_v32 }
 0x645   : > { %2916 = vmax.xlane.f32.xlu0 %v7918_v4  ;;  %4152 = vst.msk [vmem:[#allocation2 + $0xd8] sm:$0xff] %vm3466_vm2, %v8155_v30 }
 0x646   : > { %4151 = vst.msk [vmem:[#allocation2 + $0xd0] sm:$0xff] %vm3466_vm2, %v8158_v56  ;;  %v2877_v62 = vpop.xlane.xlu1 %2876 }
 0x647   : > { %v2875_v32 = vpop.xlane.xlu0 %2874  ;;  %v8174_v33 = vmax.f32 %v8160_v1, %v2877_v62  ;;  %v8200_v1 = vld [vmem:[#allocation2 + $0x70] sm:$0xff] }
 0x648   : > { %v8177_v4 = vmax.f32 %v8163_v26, %v2875_v32  ;;  %9284 = vst [vmem:[#allocation100_spill] sm:$0xff] %v8200_v1 }
 0x649   : > { %4134 = vst.msk [vmem:[#allocation2 + $0x48] sm:$0xff] %vm3466_vm2, %v8174_v33 }
 0x64a   : > { %4133 = vst.msk [vmem:[#allocation2 + $0x40] sm:$0xff] %vm3466_vm2, %v8177_v4  ;;  %3092 = vperm.xlu1 %5871, %v8177_v4   ;;  %v2909_v62 = vpop.xlane.xlu1 %2908 }
 0x64b   : > { %v2907_v32 = vpop.xlane.xlu0 %2906  ;;  %v8193_v21 = vmax.f32 %v8179_v41, %v2909_v62  ;;  %v8219_v41 = vld [vmem:[#allocation2 + $0x60] sm:$0xff] }
 0x64c   : > { %v8196_v15 = vmax.f32 %v8181_v60, %v2907_v32 }
 0x64d   : > { %4150 = vst.msk [vmem:[#allocation2 + $0xc8] sm:$0xff] %vm3466_vm2, %v8193_v21 }
 0x64e   : > { %4149 = vst.msk [vmem:[#allocation2 + $0xc0] sm:$0xff] %vm3466_vm2, %v8196_v15  ;;  %3102 = vperm.xlu1 %5871, %v8139_v43   ;;  %v2915_v62 = vpop.xlane.xlu1 %2914 }
 0x64f   : > { %v2887_v32 = vpop.xlane.xlu0 %2886  ;;  %v8212_v27 = vmax.f32 %v8198_v55, %v2915_v62 }
 0x650   : > { %v8215_v22 = vmax.f32 %v8200_v1, %v2887_v32  ;;  %v8249_v1 = vld [vmem:[#allocation2 + $0xf0] sm:$0xff] }
 0x651   : > { %4153 = vst.msk [vmem:[#allocation2 + $0xe0] sm:$0xff] %vm3466_vm2, %v8212_v27  ;;  %9288 = vst [vmem:[#allocation104_spill] sm:$0xff] %v8249_v1 }
 0x652   : > { %9285 = vst [vmem:[#allocation101_spill] sm:$0xff] %v8215_v22  ;;  %4139 = vst.msk [vmem:[#allocation2 + $0x70] sm:$0xff] %vm3466_vm2, %v8215_v22  ;;  %v2889_v62 = vpop.xlane.xlu1 %2888 }
 0x653   : > { %v2883_v20 = vpop.xlane.xlu0 %2882  ;;  %v8230_v32 = vmax.f32 %v8217_v36, %v2889_v62 }
 0x654   : > { %v8233_v51 = vmax.f32 %v8219_v41, %v2883_v20 }
 0x655   : > { %9287 = vst [vmem:[#allocation103_spill] sm:$0xff] %v8230_v32  ;;  %4140 = vst.msk [vmem:[#allocation2 + $0x78] sm:$0xff] %vm3466_vm2, %v8230_v32 }
 0x656   : > { %4137 = vst.msk [vmem:[#allocation2 + $0x60] sm:$0xff] %vm3466_vm2, %v8233_v51  ;;  %3112 = vperm.xlu1 %5871, %v8233_v51   ;;  %v2885_v62 = vpop.xlane.xlu1 %2884 }
 0x657   : > { %v8247_v20 = vmax.f32 %v8235_v25, %v2885_v62 }
 0x659   : > { %4138 = vst.msk [vmem:[#allocation2 + $0x68] sm:$0xff] %vm3466_vm2, %v8247_v20 }
 0x65a   : > { %3122 = vperm.xlu1 %5871, %v8215_v22   ;;  %v2919_v18 = vpop.xlane.xlu1 %2918 }
 0x65b   : > { %3077 = vperm.xlu0 %5870, %v8097_v58   ;;  %v8258_v36 = vmax.f32 %v8249_v1, %v2919_v18  ;;  %v8276_v18 = vld [vmem:[%s6847_s23 + $0x40] sm:$0xff]  }
 0x65c   : > { %5497 = vmatprep.subr.bf16.mxu1 %v8276_v18 }
 0x65d   : > { %4155 = vst.msk [vmem:[#allocation2 + $0xf0] sm:$0xff] %vm3466_vm2, %v8258_v36 }
 0x65e   : > { %3132 = vperm.xlu1 %5871, %v8029_v12   ;;  %v2921_v11 = vpop.xlane.xlu1 %2920 }
 0x65f   : > { %3097 = vperm.xlu0 %5870, %v8174_v33   ;;  %v8269_v22 = vmax.f32 %v8260_v46, %v2921_v11  ;;  %v2971_v11 = vsub.f32 %v8031_v5, %v8043_v35  ;;  %v9290_v46 = vsub.f32 %v7997_v14, %v8008_v49  ;;  %v9291_v5 = vsub.f32 %v7981_v0, %v7988_v42 }
 0x660   : > { %v9293_v0 = vsub.f32 %v8104_v37, %v8120_v28  ;;  %v9295_v37 = vsub.f32 %v8068_v8, %v8084_v13 }
 0x661   : > { %4156 = vst.msk [vmem:[#allocation2 + $0xf8] sm:$0xff] %vm3466_vm2, %v8269_v22  ;;  %v3020_v62 = vmul.f32 1.442695, %v2971_v11  ;;  %v2986_v1 = vmul.f32 1.442695, %v9290_v46  ;;  %v9297_v11 = vsub.f32 %v8143_v39, %v8158_v56 }
 0x662   : > { %3142 = vperm.xlu1 %5871, %v7988_v42   ;;  %v3026_v42 = vmul.f32 1.442695, %v9293_v0 }
 0x663   : > { %3107 = vperm.xlu0 %5870, %v8136_v48   ;;  %5936 = vpow2.f32 %v3020_v62 }
 0x664   : > { %5938 = vpow2.f32 %v2986_v1 }
 0x666   : > { %3152 = vperm.xlu1 %5871, %v8120_v28   ;;  %v3030_v28 = vmul.f32 1.442695, %v9295_v37 }
 0x667   : > { %3117 = vperm.xlu0 %5870, %v8247_v20  }
 0x66a   : > { %3162 = vperm.xlu1 %5871, %v8084_v13   ;;  %v3038_v13 = vmul.f32 1.442695, %v9297_v11 }
 0x66b   : > { %3127 = vperm.xlu0 %5870, %v8230_v32   ;;  %v3022_v32 = vmul.f32 1.442695, %v9291_v5  ;;  %v9298_v5 = vsub.f32 %v8124_v31, %v8139_v43  ;;  %v9301_v31 = vsub.f32 %v8198_v55, %v8212_v27 }
 0x66d   : > { %5940 = vpow2.f32 %v3022_v32  ;;  %v8302_v46 = vpop.eup %5936 }
 0x66e   : > { %3172 = vperm.xlu1 %5871, %v8196_v15   ;;  %v8309_v49 = vpop.eup %5938 }
 0x66f   : > { %3137 = vperm.xlu0 %5870, %v8043_v35   ;;  %v9292_v35 = vsub.f32 %v7979_v40, %v7985_v45  ;;  %v9294_v40 = vsub.f32 %v8088_v61, %v8100_v63  ;;  %v9296_v63 = vsub.f32 %v8052_v2, %v8064_v10  ;;  %v9299_v10 = vsub.f32 %v8181_v60, %v8196_v15 }
 0x671   : > { %v2990_v14 = vmul.f32 1.442695, %v9292_v35  ;;  %v2994_v45 = vmul.f32 1.442695, %v9294_v40  ;;  %v2998_v61 = vmul.f32 1.442695, %v9296_v63  ;;  %v9302_v40 = vsub.f32 %v8219_v41, %v8233_v51 }
 0x672   : > { %3182 = vperm.xlu1 %5871, %v8158_v56   ;;  %v3006_v35 = vmul.f32 1.442695, %v9298_v5  ;;  %v9300_v56 = vsub.f32 %v8163_v26, %v8177_v4 }
 0x673   : > { %3147 = vperm.xlu0 %5870, %v8026_v17   ;;  %5942 = vpow2.f32 %v2990_v14  ;;  %v3034_v14 = vmul.f32 1.442695, %v9299_v10  ;;  %v3010_v4 = vmul.f32 1.442695, %v9302_v40  ;;  %v5915_v40 = vld [vmem:[%s6847_s23 + $0x58] sm:$0xff]  }
 0x674   : > { %5944 = vpow2.f32 %v3026_v42  ;;  %v3002_v0 = vmul.f32 1.442695, %v9300_v56  ;;  %v3042_v42 = vmul.f32 1.442695, %v9301_v31  ;;  %v5913_v31 = vld [vmem:[%s6847_s23 + $0x48] sm:$0xff]  }
 0x675   : > { %5946 = vpow2.f32 %v2994_v45 }
 0x676   : > { %3192 = vperm.xlu1 %5871, %v8212_v27   ;;  %5948 = vpow2.f32 %v3030_v28 }
 0x677   : > { %3157 = vperm.xlu0 %5870, %v8117_v59   ;;  %v8316_v1 = vpop.eup %5940  ;;  %5950 = vpow2.f32 %v2998_v61 }
 0x678   : > { %5952 = vpow2.f32 %v3038_v13 }
 0x679   : > { %5954 = vpow2.f32 %v3006_v35 }
 0x67a   : > { %3202 = vperm.xlu1 %5871, %v8258_v36   ;;  %5956 = vpow2.f32 %v3034_v14 }
 0x67b   : > { %3167 = vperm.xlu0 %5870, %v8081_v44   ;;  %5958 = vpow2.f32 %v3002_v0 }
 0x67c   : > { %5960 = vpow2.f32 %v3042_v42 }
 0x67d   : > { %v8322_v32 = vpop.eup %5942  ;;  %5962 = vpow2.f32 %v3010_v4 }
 0x67e   : > { %3618 = vperm.xlu1 %5871, %v8302_v46   ;;  %v8328_v62 = vpop.eup %5944 }
 0x67f   : > { %3177 = vperm.xlu0 %5870, %v8193_v21   ;;  %v8334_v8 = vpop.eup %5946 }
 0x680   : > { %v8340_v2 = vpop.eup %5948 }
 0x681   : > { %v8346_v39 = vpop.eup %5950 }
 0x682   : > { %3533 = vperm.xlu1 %5871, %v8309_v49   ;;  %v8352_v43 = vpop.eup %5952 }
 0x683   : > { %3187 = vperm.xlu0 %5870, %v8155_v30   ;;  %v8358_v15 = vpop.eup %5954 }
 0x684   : > { %v8364_v26 = vpop.eup %5956 }
 0x685   : > { %v8368_v55 = vpop.eup %5958 }
 0x686   : > { %3623 = vperm.xlu1 %5871, %v8316_v1   ;;  %v8373_v51 = vpop.eup %5960 }
 0x687   : > { %v8377_v35 = vpop.eup %5962 }
 0x688   : > { %9303 = vst [vmem:[#allocation106_spill] sm:$0xff] %v8377_v35 }
 0x68a   : > { %3543 = vperm.xlu1 %5871, %v8322_v32  }
 0x68e   : > { %3633 = vperm.xlu1 %5871, %v8328_v62  }
 0x692   : > { %3553 = vperm.xlu1 %5871, %v8334_v8  }
 0x696   : > { %3643 = vperm.xlu1 %5871, %v8340_v2  }
 0x69a   : > { %3563 = vperm.xlu1 %5871, %v8346_v39  }
 0x69e   : > { %3663 = vperm.xlu1 %5871, %v8352_v43  }
 0x6a0   : > { %v3063_v60 = vpop.permute.xlu1 %3062 }
 0x6a1   : > { %v3212_v63 = vsub.f32 %v7832_v52, %v3063_v60  ;;  %v5914_v60 = vld [vmem:[%s6847_s23 + $0x50] sm:$0xff]  }
 0x6a2   : > { %3583 = vperm.xlu1 %5871, %v8358_v15  }
 0x6a3   : > { %v3246_v5 = vmul.f32 1.442695, %v3212_v63  ;;  %v5917_v63 = vld [vmem:[%s6847_s23 + $0x68] sm:$0xff]  }
 0x6a4   : > { %v3068_v45 = vpop.permute.xlu1 %3067 }
 0x6a5   : > { %v3053_v37 = vpop.permute.xlu0 %3052  ;;  %v3213_v27 = vsub.f32 %v7842_v54, %v3068_v45  ;;  %v5916_v45 = vld [vmem:[%s6847_s23 + $0x60] sm:$0xff]  }
 0x6a6   : > { %3653 = vperm.xlu1 %5871, %v8364_v26   ;;  %v3210_v28 = vsub.f32 %v7844_v3, %v3053_v37 }
 0x6a7   : > { %v3248_v41 = vmul.f32 1.442695, %v3213_v27  ;;  %v9304_v27 = vsub.f32 %v8017_v34, %v8029_v12 }
 0x6a8   : > { %v3242_v61 = vmul.f32 1.442695, %v3210_v28 }
 0x6a9   : > { %5964 = vpow2.f32 %v3248_v41  ;;  %v3018_v28 = vmul.f32 1.442695, %v9304_v27  ;;  %v8401_v41 = vld [vmem:[#allocation2 + $0xe8] sm:$0xff] }
 0x6aa   : > { %3573 = vperm.xlu1 %5871, %v8368_v55   ;;  %5966 = vpow2.f32 %v3242_v61  ;;  %v2973_v61 = vsub.f32 %v8010_v16, %v8026_v17 }
 0x6ac   : > { %v3024_v16 = vmul.f32 1.442695, %v2973_v61 }
 0x6ad   : > { %v3058_v11 = vpop.permute.xlu1 %3057 }
 0x6ae   : > { %v3211_v13 = vsub.f32 %v7865_v29, %v3058_v11  ;;  %3673 = vperm.xlu1 %5871, %v8373_v51   ;;  %v9305_v11 = vsub.f32 %v8035_v6, %v8046_v38  ;;  %v5919_v6 = vld [vmem:[%s6847_s23 + $0x78] sm:$0xff]   ;;  %v9306_v38 = vsub.f32 %v7990_v19, %v8005_v53 }
 0x6b0   : > { %v3244_v54 = vmul.f32 1.442695, %v3211_v13  ;;  %v2988_v13 = vmul.f32 1.442695, %v9305_v11 }
 0x6b2   : > { %5968 = vpow2.f32 %v3244_v54  ;;  %3593 = vperm.xlu1 %5871, %v8377_v35   ;;  %v5918_v54 = vld [vmem:[%s6847_s23 + $0x70] sm:$0xff]  }
 0x6b3   : > { %5970 = vpow2.f32 %v3246_v5  ;;  %v8380_v52 = vpop.eup %5964 }
 0x6b4   : > { %v8382_v3 = vpop.eup %5966  ;;  %5972 = vpow2.f32 %v3018_v28 }
 0x6b5   : > { %5974 = vpow2.f32 %v2988_v13  ;;  %v9310_v13 = vld [vmem:[#allocation94_spill] sm:$0xff] }
 0x6b6   : > { %5976 = vpow2.f32 %v3024_v16 }
 0x6b9   : > { %v3073_v29 = vpop.permute.xlu1 %3072 }
 0x6ba   : > { %v3214_v12 = vsub.f32 %v7898_v57, %v3073_v29  ;;  %v9307_v57 = vsub.f32 %v8102_v23, %v8117_v59 }
 0x6bc   : > { %v8384_v10 = vpop.eup %5968  ;;  %v3028_v29 = vmul.f32 1.442695, %v9307_v57  ;;  %v9314_v57 = vld [vmem:[#allocation79_spill] sm:$0xff] }
 0x6bd   : > { %v8386_v14 = vpop.eup %5970  ;;  %v3723_v56 = vpack.c.bf16 %v8384_v10, %v8382_v3  ;;  %v3083_v42 = vpop.permute.xlu1 %3082 }
 0x6be   : > { %v3724_v0 = vpack.c.bf16 %v8380_v52, %v8386_v14  ;;  %v8428_v53 = vpop.eup %5972 }
 0x6bf   : > { %5481 = vmatprep.mubr.bf16.mxu1 %v3723_v56  ;;  %v8434_v61 = vpop.eup %5974 }
 0x6c0   : > { %5482 = vmatmul.mubr.bf16.vlgmr.msra.gmra.mrb[16].mxu1 %v3724_v0  ;;  %v2992_v0 = vmul.f32 1.442695, %v9306_v38 }
 0x6c1   : > { %5498 = vmatpush3.bf16.msra.mxu1 %v8276_v18  ;;  %v3088_v4 = vpop.permute.xlu1 %3087 }
 0x6c2   : > { %5499 = vmatprep.subr.bf16.mxu1 %v5913_v31  ;;  %v3217_v17 = vsub.f32 %v7870_v47, %v3088_v4  ;;  %5978 = vpow2.f32 %v2992_v0 }
 0x6c3   : > { %5980 = vpow2.f32 %v3028_v29 }
 0x6c4   : > { %v3256_v47 = vmul.f32 1.442695, %v3217_v17 }
 0x6c5   : > { %5500 = vmatpush3.bf16.msra.mxu1 %v5913_v31  ;;  %v3216_v31 = vsub.f32 %v7874_v24, %v3083_v42 }
 0x6c6   : > { %5501 = vmatprep.subr.bf16.mxu1 %v5914_v60 }
 0x6c7   : > { %v3254_v59 = vmul.f32 1.442695, %v3216_v31  ;;  %v8444_v31 = vpop.eup %5976 }
 0x6c9   : > { %5502 = vmatpush3.bf16.msra.mxu1 %v5914_v60  ;;  %v3093_v37 = vpop.permute.xlu1 %3092  ;;  %v3250_v60 = vmul.f32 1.442695, %v3214_v12 }
 0x6ca   : > { %5503 = vmatprep.subr.bf16.mxu1 %v5915_v40 }
 0x6cb   : > { %5982 = vpow2.f32 %v3250_v60 }
 0x6cc   : > { %5984 = vpow2.f32 %v3256_v47 }
 0x6cd   : > { %5504 = vmatpush3.bf16.msra.mxu1 %v5915_v40  ;;  %v3103_v18 = vpop.permute.xlu1 %3102  ;;  %v3218_v40 = vsub.f32 %v7940_v9, %v3093_v37  ;;  %v9308_v37 = vld [vmem:[#allocation72_spill] sm:$0xff] }
 0x6ce   : > { %5505 = vmatprep.subr.bf16.mxu1 %v5916_v45  ;;  %v3220_v42 = vsub.f32 %v7924_v50, %v3103_v18  ;;  %v9313_v18 = vld [vmem:[#allocation88_spill] sm:$0xff] }
 0x6cf   : > { %v3258_v24 = vmul.f32 1.442695, %v3218_v40 }
 0x6d0   : > { %v3262_v50 = vmul.f32 1.442695, %v3220_v42 }
 0x6d1   : > { %5506 = vmatpush3.bf16.msra.mxu1 %v5916_v45 }
 0x6d2   : > { %v2917_v5 = vpop.xlane.xlu0 %2916  ;;  %5507 = vmatprep.subr.bf16.mxu1 %v5917_v63 }
 0x6d3   : > { %v8410_v34 = vmax.f32 %v8401_v41, %v2917_v5  ;;  %v2977_v5 = vsub.f32 %v9310_v13, %v8081_v44  ;;  %v8446_v44 = vpop.eup %5978 }
 0x6d4   : > { %v8449_v40 = vpop.eup %5980 }
 0x6d5   : > { %4154 = vst.msk [vmem:[#allocation2 + $0xe8] sm:$0xff] %vm3466_vm2, %v8410_v34  ;;  %3197 = vperm.xlu0 %5870, %v8410_v34   ;;  %v3113_v56 = vpop.permute.xlu1 %3112  ;;  %5508 = vmatpush3.bf16.msra.mxu1 %v5917_v63  ;;  %v9309_v63 = vld [vmem:[#allocation82_spill] sm:$0xff]  ;;  %v3032_v60 = vmul.f32 1.442695, %v2977_v5 }
 0x6d6   : > { %5509 = vmatprep.subr.bf16.mxu1 %v5918_v54 }
 0x6d9   : > { %3207 = vperm.xlu0 %5870, %v8269_v22   ;;  %v3123_v45 = vpop.permute.xlu1 %3122  ;;  %5510 = vmatpush3.bf16.msra.mxu1 %v5918_v54  ;;  %v9311_v54 = vld [vmem:[#allocation95_spill] sm:$0xff] }
 0x6da   : > { %v3078_v4 = vpop.permute.xlu0 %3077  ;;  %5511 = vmatprep.subr.bf16.mxu1 %v5919_v6  ;;  %v9312_v12 = vsub.f32 %v9311_v54, %v8097_v58 }
 0x6db   : > { %v3215_v19 = vsub.f32 %v7894_v7, %v3078_v4 }
 0x6dc   : > { %v2996_v16 = vmul.f32 1.442695, %v9312_v12 }
 0x6dd   : > { %v3252_v23 = vmul.f32 1.442695, %v3215_v19  ;;  %3613 = vperm.xlu0 %5870, %v8428_v53   ;;  %v3133_v9 = vpop.permute.xlu1 %3132  ;;  %5512 = vmatpush3.bf16.msra.mxu1 %v5919_v6  ;;  %v3222_v6 = vsub.f32 %v9313_v18, %v3113_v56  ;;  %v9315_v56 = vld [vmem:[#allocation86_spill] sm:$0xff] }
 0x6de   : > { %v3226_v27 = vsub.f32 %v9308_v37, %v3133_v9  ;;  %v3098_v28 = vpop.permute.xlu0 %3097  ;;  %v3224_v4 = vsub.f32 %v9315_v56, %v3123_v45  ;;  %v9317_v37 = vld [vmem:[#allocation92_spill] sm:$0xff] }
 0x6df   : > { %5986 = vpow2.f32 %v3252_v23  ;;  %v3219_v7 = vsub.f32 %v9309_v63, %v3098_v28  ;;  %v3266_v47 = vmul.f32 1.442695, %v3222_v6 }
 0x6e0   : > { %5988 = vpow2.f32 %v3254_v59  ;;  %v3274_v11 = vmul.f32 1.442695, %v3226_v27  ;;  %v8452_v59 = vpop.eup %5982  ;;  %v9318_v27 = vld [vmem:[#allocation93_spill] sm:$0xff]  ;;  %v3270_v13 = vmul.f32 1.442695, %v3224_v4 }
 0x6e1   : > { %5990 = vpow2.f32 %v3258_v24  ;;  %v3260_v17 = vmul.f32 1.442695, %v3219_v7  ;;  %3538 = vperm.xlu0 %5870, %v8434_v61   ;;  %v3143_v0 = vpop.permute.xlu1 %3142  ;;  %v9316_v24 = vld [vmem:[#allocation89_spill] sm:$0xff]  ;;  %v8455_v9 = vpop.eup %5984  ;;  %v9319_v28 = vsub.f32 %v9317_v37, %v9318_v27 }
 0x6e2   : > { %5992 = vpow2.f32 %v3274_v11  ;;  %v3108_v38 = vpop.permute.xlu0 %3107 }
 0x6e3   : > { %5994 = vpow2.f32 %v3260_v17  ;;  %v3221_v29 = vsub.f32 %v9314_v57, %v3108_v38  ;;  %v3000_v63 = vmul.f32 1.442695, %v9319_v28  ;;  %v9321_v57 = vld [vmem:[#allocation97_spill] sm:$0xff]  ;;  %v9325_v28 = vld [vmem:[#allocation96_spill] sm:$0xff] }
 0x6e4   : > { %5996 = vpow2.f32 %v2996_v16  ;;  %v9320_v16 = vld [vmem:[#allocation87_spill] sm:$0xff] }
 0x6e5   : > { %v3264_v58 = vmul.f32 1.442695, %v3221_v29  ;;  %3628 = vperm.xlu0 %5870, %v8444_v31   ;;  %5998 = vpow2.f32 %v3262_v50  ;;  %v3153_v7 = vpop.permute.xlu1 %3152  ;;  %v9322_v29 = vsub.f32 %v9321_v57, %v8155_v30 }
 0x6e6   : > { %v3118_v19 = vpop.permute.xlu0 %3117 }
 0x6e7   : > { %6000 = vpow2.f32 %v3264_v58  ;;  %v3223_v23 = vsub.f32 %v9316_v24, %v3118_v19  ;;  %v9323_v58 = vld [vmem:[#allocation70_spill] sm:$0xff] }
 0x6e8   : > { %6002 = vpow2.f32 %v3032_v60  ;;  %v3040_v60 = vmul.f32 1.442695, %v9322_v29 }
 0x6e9   : > { %v8457_v42 = vpop.eup %5986  ;;  %v3268_v11 = vmul.f32 1.442695, %v3223_v23  ;;  %3548 = vperm.xlu0 %5870, %v8446_v44   ;;  %6004 = vpow2.f32 %v3266_v47  ;;  %v3228_v47 = vsub.f32 %v9323_v58, %v3143_v0  ;;  %v3163_v24 = vpop.permute.xlu1 %3162  ;;  %v9324_v23 = vld [vmem:[#allocation73_spill] sm:$0xff]  ;;  %v9326_v0 = vsub.f32 %v9325_v28, %v8136_v48  ;;  %v9329_v58 = vld [vmem:[#allocation99_spill] sm:$0xff] }
 0x6ea   : > { %v8463_v45 = vpop.eup %5988  ;;  %v3128_v5 = vpop.permute.xlu0 %3127  ;;  %v3725_v54 = vpack.c.bf16 %v8457_v42, %v8452_v59 }
 0x6eb   : > { %v8467_v12 = vpop.eup %5990  ;;  %6006 = vpow2.f32 %v3268_v11  ;;  %v3225_v17 = vsub.f32 %v9320_v16, %v3128_v5  ;;  %v3726_v50 = vpack.c.bf16 %v8455_v9, %v8463_v45  ;;  %v9327_v5 = vld [vmem:[#allocation77_spill] sm:$0xff] }
 0x6ec   : > { %v8472_v18 = vpop.eup %5992  ;;  %5485 = vmatprep.mubr.bf16.mxu1 %v3725_v54  ;;  %6008 = vpow2.f32 %v3000_v63  ;;  %v3008_v63 = vmul.f32 1.442695, %v9326_v0  ;;  %v3230_v54 = vsub.f32 %v9327_v5, %v3153_v7 }
 0x6ed   : > { %v8474_v6 = vpop.eup %5994  ;;  %v3272_v38 = vmul.f32 1.442695, %v3225_v17  ;;  %3638 = vperm.xlu0 %5870, %v8449_v40   ;;  %5486 = vmatmul.mubr.bf16.gmra.mrb[20].mxu1 %v3726_v50  ;;  %6010 = vpow2.f32 %v3270_v13  ;;  %v3278_v13 = vmul.f32 1.442695, %v3228_v47 }
 0x6ee   : > { %3402 = vadd.xlane.f32.xlu1 %v8472_v18  ;;  %v3138_v56 = vpop.permute.xlu0 %3137  ;;  %v3727_v4 = vpack.c.bf16 %v8474_v6, %v8467_v12  ;;  %v8484_v19 = vpop.eup %5996 }
 0x6ef   : > { %6012 = vpow2.f32 %v3272_v38  ;;  %v3227_v37 = vsub.f32 %v9324_v23, %v3138_v56  ;;  %v8487_v27 = vpop.eup %5998  ;;  %v9328_v38 = vld [vmem:[#allocation71_spill] sm:$0xff]  ;;  %v3173_v56 = vpop.permute.xlu1 %3172 }
 0x6f0   : > { %5489 = vmatprep.mubr.bf16.mxu1 %v3727_v4  ;;  %6014 = vpow2.f32 %v3040_v60  ;;  %v9330_v60 = vsub.f32 %v9329_v58, %v8193_v21  ;;  %v3282_v4 = vmul.f32 1.442695, %v3230_v54  ;;  %v9331_v23 = vld [vmem:[#allocation75_spill] sm:$0xff]  ;;  %v9335_v58 = vld [vmem:[#allocation84_spill] sm:$0xff] }
 0x6f1   : > { %v8489_v30 = vpop.eup %6000  ;;  %v3276_v11 = vmul.f32 1.442695, %v3227_v37  ;;  %3558 = vperm.xlu0 %5870, %v8484_v19   ;;  %v3232_v37 = vsub.f32 %v9331_v23, %v3163_v24  ;;  %v2983_v24 = vsub.f32 %v8401_v41, %v8410_v34 }
 0x6f2   : > { %v3148_v16 = vpop.permute.xlu0 %3147  ;;  %v3728_v17 = vpack.c.bf16 %v8489_v30, %v8487_v27  ;;  %v8498_v50 = vpop.eup %6002  ;;  %v3036_v47 = vmul.f32 1.442695, %v9330_v60  ;;  %v3234_v60 = vsub.f32 %v9335_v58, %v3173_v56 }
 0x6f3   : > { %6016 = vpow2.f32 %v3276_v11  ;;  %v3229_v57 = vsub.f32 %v9328_v38, %v3148_v16  ;;  %v8501_v29 = vpop.eup %6004  ;;  %v9333_v38 = vld [vmem:[#allocation98_spill] sm:$0xff]  ;;  %v3044_v41 = vmul.f32 1.442695, %v2983_v24 }
 0x6f4   : > { %6018 = vpow2.f32 %v3008_v63  ;;  %v9332_v63 = vld [vmem:[#allocation76_spill] sm:$0xff]  ;;  %v3290_v56 = vmul.f32 1.442695, %v3234_v60 }
 0x6f5   : > { %v8503_v48 = vpop.eup %6006  ;;  %v3280_v7 = vmul.f32 1.442695, %v3229_v57  ;;  %3648 = vperm.xlu0 %5870, %v8498_v50   ;;  %5490 = vmatmul.mubr.bf16.gmra.mrb[24].mxu1 %v3728_v17  ;;  %6020 = vpow2.f32 %v3278_v13  ;;  %v9334_v13 = vsub.f32 %v9333_v38, %v8174_v33  ;;  %v3286_v57 = vmul.f32 1.442695, %v3232_v37 }
 0x6f6   : > { %v3158_v28 = vpop.permute.xlu0 %3157  ;;  %v3729_v0 = vpack.c.bf16 %v8503_v48, %v8501_v29  ;;  %v8512_v11 = vpop.eup %6008 }
 0x6f7   : > { %6022 = vpow2.f32 %v3280_v7  ;;  %v3231_v5 = vsub.f32 %v9332_v63, %v3158_v28  ;;  %v8515_v21 = vpop.eup %6010  ;;  %v3004_v54 = vmul.f32 1.442695, %v9334_v13  ;;  %v3183_v28 = vpop.permute.xlu1 %3182 }
 0x6f8   : > { %5493 = vmatprep.mubr.bf16.mxu1 %v3729_v0  ;;  %6024 = vpow2.f32 %v3036_v47  ;;  %v9336_v0 = vld [vmem:[#allocation74_spill] sm:$0xff] }
 0x6f9   : > { %v8517_v16 = vpop.eup %6012  ;;  %v3284_v17 = vmul.f32 1.442695, %v3231_v5  ;;  %3568 = vperm.xlu0 %5870, %v8512_v11   ;;  %6026 = vpow2.f32 %v3282_v4  ;;  %v9337_v4 = vld [vmem:[#allocation81_spill] sm:$0xff] }
 0x6fa   : > { %v3168_v7 = vpop.permute.xlu0 %3167  ;;  %v3730_v23 = vpack.c.bf16 %v8517_v16, %v8515_v21  ;;  %v8529_v63 = vpop.eup %6014  ;;  %v3236_v37 = vsub.f32 %v9337_v4, %v3183_v28 }
 0x6fb   : > { %6028 = vpow2.f32 %v3284_v17  ;;  %v3233_v33 = vsub.f32 %v9336_v0, %v3168_v7  ;;  %v9338_v17 = vld [vmem:[#allocation83_spill] sm:$0xff] }
 0x6fc   : > { %6030 = vpow2.f32 %v3004_v54 }
 0x6fd   : > { %v8531_v47 = vpop.eup %6016  ;;  %v3288_v34 = vmul.f32 1.442695, %v3233_v33  ;;  %3668 = vperm.xlu0 %5870, %v8529_v63   ;;  %5494 = vmatmul.mubr.bf16.gmra.mrb[28].mxu1 %v3730_v23  ;;  %6032 = vpow2.f32 %v3286_v57  ;;  %v3294_v57 = vmul.f32 1.442695, %v3236_v37 }
 0x6fe   : > { %v3178_v5 = vpop.permute.xlu0 %3177  ;;  %v3731_v38 = vpack.c.bf16 %v8531_v47, %v8472_v18  ;;  %v8537_v13 = vpop.eup %6018  ;;  %v9339_v18 = vld [vmem:[#allocation80_spill] sm:$0xff] }
 0x6ff   : > { %6034 = vpow2.f32 %v3288_v34  ;;  %v3235_v58 = vsub.f32 %v9338_v17, %v3178_v5  ;;  %v6021_v7 = vpop.eup %6020 }
 0x700   : > { %5513 = vmatprep.mubr.bf16.mxu1 %v3731_v38  ;;  %6036 = vpow2.f32 %v3044_v41 }
 0x701   : > { %v6023_v54 = vpop.eup %6022  ;;  %v3292_v24 = vmul.f32 1.442695, %v3235_v58  ;;  %3588 = vperm.xlu0 %5870, %v8537_v13   ;;  %6038 = vpow2.f32 %v3290_v56 }
 0x702   : > { %v3188_v60 = vpop.permute.xlu0 %3187  ;;  %3408 = vadd.xlane.f32.xlu1 %v6023_v54  ;;  %v3732_v23 = vpack.c.bf16 %v6023_v54, %v6021_v7  ;;  %v8541_v28 = vpop.eup %6024 }
 0x703   : > { %6040 = vpow2.f32 %v3292_v24  ;;  %v3237_v0 = vsub.f32 %v9339_v18, %v3188_v60  ;;  %v6027_v33 = vpop.eup %6026 }
 0x704   : > { %6042 = vpow2.f32 %v3294_v57 }
 0x705   : > { %v6029_v34 = vpop.eup %6028  ;;  %v3296_v4 = vmul.f32 1.442695, %v3237_v0  ;;  %3658 = vperm.xlu0 %5870, %v8541_v28   ;;  %5514 = vmatmul.mubr.bf16.vlgmr.msra.gmra.mrb[32].mxu1 %v3732_v23 }
 0x706   : > { %3376 = vadd.xlane.f32.xlu1 %v8380_v52  ;;  %v3733_v41 = vpack.c.bf16 %v6029_v34, %v6027_v33  ;;  %v8546_v56 = vpop.eup %6030 }
 0x707   : > { %6044 = vpow2.f32 %v3296_v4  ;;  %v6033_v37 = vpop.eup %6032  ;;  %v9342_v4 = vld [vmem:[#allocation85_spill] sm:$0xff] }
 0x708   : > { %5517 = vmatprep.mubr.bf16.mxu1 %v3733_v41 }
 0x709   : > { %v6035_v5 = vpop.eup %6034  ;;  %3578 = vperm.xlu0 %5870, %v8546_v56  }
 0x70a   : > { %3372 = vadd.xlane.f32.xlu1 %v8384_v10  ;;  %v3734_v38 = vpack.c.bf16 %v6035_v5, %v6033_v37  ;;  %v8550_v17 = vpop.eup %6036  ;;  %v3193_v10 = vpop.permute.xlu1 %3192 }
 0x70b   : > { %9340 = vst [vmem:[#allocation72_spill] sm:$0xff] %v8550_v17  ;;  %v6039_v58 = vpop.eup %6038 }
 0x70d   : > { %v6041_v54 = vpop.eup %6040  ;;  %3678 = vperm.xlu0 %5870, %v8550_v17   ;;  %5518 = vmatmul.mubr.bf16.gmra.mrb[36].mxu1 %v3734_v38 }
 0x70e   : > { %3416 = vadd.xlane.f32.xlu1 %v6035_v5  ;;  %v3735_v52 = vpack.c.bf16 %v6041_v54, %v6039_v58  ;;  %v6043_v24 = vpop.eup %6042  ;;  %v3203_v23 = vpop.permute.xlu1 %3202 }
 0x710   : > { %5521 = vmatprep.mubr.bf16.mxu1 %v3735_v52  ;;  %v9344_v52 = vld [vmem:[#allocation91_spill] sm:$0xff] }
 0x711   : > { %v6045_v57 = vpop.eup %6044 }
 0x712   : > { %3384 = vadd.xlane.f32.xlu1 %v8455_v9  ;;  %v3736_v60 = vpack.c.bf16 %v6045_v57, %v6043_v24  ;;  %v8556_v18 = vpop.permute.xlu1 %3618 }
 0x715   : > { %5522 = vmatmul.mubr.bf16.gmra.mrb[40].mxu1 %v3736_v60 }
 0x716   : > { %3412 = vadd.xlane.f32.xlu1 %v6029_v34  ;;  %v8559_v0 = vpop.permute.xlu1 %3533 }
 0x71a   : > { %3380 = vadd.xlane.f32.xlu1 %v8457_v42  ;;  %v8563_v9 = vpop.permute.xlu1 %3623 }
 0x71e   : > { %3424 = vadd.xlane.f32.xlu1 %v6045_v57  ;;  %v8566_v42 = vpop.permute.xlu1 %3543 }
 0x722   : > { %3392 = vadd.xlane.f32.xlu1 %v8489_v30  ;;  %v8569_v30 = vpop.permute.xlu1 %3633 }
 0x726   : > { %3420 = vadd.xlane.f32.xlu1 %v6041_v54 }
 0x72a   : > { %3388 = vadd.xlane.f32.xlu1 %v8474_v6  ;;  %v8571_v6 = vpop.permute.xlu1 %3553 }
 0x72c   : > { %3406 = vadd.xlane.f32.xlu0 %v6021_v7  ;;  %v9341_v7 = vld [vmem:[#allocation90_spill] sm:$0xff] }
 0x72e   : > { %v8575_v34 = vpop.permute.xlu1 %3643 }
 0x730   : > { %3374 = vadd.xlane.f32.xlu0 %v8386_v14  ;;  %v3240_v14 = vsub.f32 %v9341_v7, %v3203_v23 }
 0x732   : > { %v8579_v41 = vpop.permute.xlu1 %3563 }
 0x734   : > { %3370 = vadd.xlane.f32.xlu0 %v8382_v3  ;;  %v3302_v3 = vmul.f32 1.442695, %v3240_v14 }
 0x736   : > { %6046 = vpow2.f32 %v3302_v3  ;;  %v8583_v54 = vpop.permute.xlu1 %3663 }
 0x738   : > { %3404 = vadd.xlane.f32.xlu0 %v8531_v47  ;;  %v3238_v47 = vsub.f32 %v9342_v4, %v3193_v10 }
 0x73a   : > { %v8586_v60 = vpop.permute.xlu1 %3583 }
 0x73c   : > { %3414 = vadd.xlane.f32.xlu0 %v6033_v37 }
 0x73e   : > { %v8589_v7 = vpop.permute.xlu1 %3653 }
 0x740   : > { %3382 = vadd.xlane.f32.xlu0 %v8463_v45  ;;  %v3298_v45 = vmul.f32 1.442695, %v3238_v47  ;;  %v6047_v57 = vpop.eup %6046 }
 0x742   : > { %6048 = vpow2.f32 %v3298_v45  ;;  %v8592_v3 = vpop.permute.xlu1 %3573 }
 0x744   : > { %3410 = vadd.xlane.f32.xlu0 %v6027_v33  ;;  %v9343_v33 = vld [vmem:[#allocation78_spill] sm:$0xff] }
 0x746   : > { %v8600_v45 = vpop.permute.xlu1 %3673 }
 0x747   : > { %9346 = vst [vmem:[#allocation82_spill] sm:$0xff] %v8600_v45 }
 0x748   : > { %3378 = vadd.xlane.f32.xlu0 %v8452_v59 }
 0x74c   : > { %3422 = vadd.xlane.f32.xlu0 %v6043_v24 }
 0x750   : > { %3390 = vadd.xlane.f32.xlu0 %v8487_v27 }
 0x754   : > { %v3198_v37 = vpop.permute.xlu0 %3197  ;;  %3418 = vadd.xlane.f32.xlu0 %v6039_v58  ;;  %v6049_v58 = vpop.eup %6048 }
 0x755   : > { %v3239_v5 = vsub.f32 %v9343_v33, %v3198_v37  ;;  %v3322_v33 = vld [vmem:[#allocation3 + $0x80] sm:$0xff] }
 0x757   : > { %v3300_v38 = vmul.f32 1.442695, %v3239_v5 }
 0x758   : > { %v3208_v59 = vpop.permute.xlu0 %3207  ;;  %3386 = vadd.xlane.f32.xlu0 %v8467_v12 }
 0x759   : > { %6050 = vpow2.f32 %v3300_v38  ;;  %v3241_v24 = vsub.f32 %v9344_v52, %v3208_v59 }
 0x75b   : > { %v3304_v27 = vmul.f32 1.442695, %v3241_v24 }
 0x75c   : > { %3430 = vadd.xlane.f32.xlu0 %v6047_v57  ;;  %v8595_v4 = vpop.permute.xlu0 %3613 }
 0x75d   : > { %6052 = vpow2.f32 %v3304_v27  ;;  %v3501_v27 = vld [vmem:[#allocation4 + $0x10] sm:$0xff] }
 0x760   : > { %3398 = vadd.xlane.f32.xlu0 %v8515_v21  ;;  %v9345_v21 = vsub.f32 %v8235_v25, %v8247_v20  ;;  %v3539_v37 = vpop.permute.xlu0 %3538 }
 0x762   : > { %v3012_v47 = vmul.f32 1.442695, %v9345_v21  ;;  %v3693_v21 = vmul.f32 %v8566_v42, %v3501_v27 }
 0x763   : > { %v6051_v10 = vpop.eup %6050 }
 0x764   : > { %3426 = vadd.xlane.f32.xlu0 %v6049_v58  ;;  %v3737_v23 = vpack.c.bf16 %v6051_v10, %v6049_v58  ;;  %6054 = vpow2.f32 %v3012_v47  ;;  %v8605_v5 = vpop.permute.xlu0 %3628  ;;  %v3500_v47 = vld [vmem:[#allocation4 + $0x8] sm:$0xff] }
 0x766   : > { %5525 = vmatprep.mubr.bf16.mxu1 %v3737_v23 }
 0x767   : > { %v6053_v12 = vpop.eup %6052 }
 0x768   : > { %3432 = vadd.xlane.f32.xlu1 %v6053_v12  ;;  %3394 = vadd.xlane.f32.xlu0 %v8501_v29  ;;  %v3738_v14 = vpack.c.bf16 %v6053_v12, %v6047_v57  ;;  %v8603_v29 = vpop.permute.xlu1 %3593  ;;  %v3549_v25 = vpop.permute.xlu0 %3548  ;;  %v3502_v12 = vld [vmem:[#allocation4 + $0x18] sm:$0xff] }
 0x76a   : > { %5526 = vmatmul.mubr.bf16.gmra.mrb[44].mxu1 %v3738_v14 }
 0x76c   : > { %3400 = vadd.xlane.f32.xlu1 %v8517_v16  ;;  %v3354_v16 = vmul.f32 %v8428_v53, %v3322_v33  ;;  %v8612_v20 = vpop.permute.xlu0 %3638  ;;  %v3499_v53 = vld [vmem:[#allocation4] sm:$0xff] }
 0x76e   : > { %v8608_v52 = vpop.eup %6054 }
 0x76f   : > { %9347 = vst [vmem:[#allocation94_spill] sm:$0xff] %v8608_v52 }
 0x770   : > { %3428 = vadd.xlane.f32.xlu1 %v6051_v10  ;;  %v8614_v24 = vpop.permute.xlu0 %3558  ;;  %v3309_v10 = vld [vmem:[#allocation3 + $0x18] sm:$0xff] }
 0x771   : > { %v3341_v33 = vmul.f32 %v8446_v44, %v3309_v10 }
 0x774   : > { %3396 = vadd.xlane.f32.xlu1 %v8503_v48  ;;  %v3325_v48 = vld [vmem:[#allocation3 + $0x98] sm:$0xff]  ;;  %v8617_v14 = vpop.permute.xlu0 %3648 }
 0x775   : > { %v3357_v57 = vmul.f32 %v8444_v31, %v3325_v48  ;;  %v3307_v31 = vld [vmem:[#allocation3 + $0x8] sm:$0xff]  ;;  %v3694_v48 = vmul.f32 %v3549_v25, %v3502_v12 }
 0x778   : > { %v8632_v27 = vpop.permute.xlu0 %3568 }
 0x77b   : > { %v3403_v38 = vpop.xlane.xlu1 %3402 }
 0x77c   : > { %v3450_v59 = vadd.f32 %v3403_v38, %v3354_v16  ;;  %v3691_v16 = vmul.f32 %v8559_v0, %v3499_v53  ;;  %v3339_v0 = vmul.f32 %v8434_v61, %v3307_v31 }
 0x77e   : > { %3483 = vst.msk [vmem:[#allocation3 + $0x80] sm:$0xff] %vm3466_vm2, %v3450_v59  ;;  %3598 = vperm.xlu0 %5870, %v8608_v52  }
 0x78f   : > { %v3409_v58 = vpop.xlane.xlu1 %3408 }
 0x790   : > { %v3453_v23 = vadd.f32 %v3409_v58, %v3357_v57  ;;  %v3692_v58 = vmul.f32 %v3539_v37, %v3500_v47  ;;  %v3329_v37 = vld [vmem:[#allocation3 + $0xb8] sm:$0xff] }
 0x792   : > { %3486 = vst.msk [vmem:[#allocation3 + $0x98] sm:$0xff] %vm3466_vm2, %v3453_v23 }
 0x793   : > { %v5483_v38 = vpop.f32.mrb[16].mxu1  ;;  %v3377_v59 = vpop.xlane.xlu1 %3376 }
 0x794   : > { %v8623_v45 = vadd.f32 %v5483_v38, %v3693_v21  ;;  %v3437_v52 = vadd.f32 %v3377_v59, %v3341_v33  ;;  %v3853_v57 = vpop.f32.mrb[17].mxu1  ;;  %v8641_v21 = vpop.permute.xlu0 %3668  ;;  %v3327_v38 = vld [vmem:[#allocation3 + $0xa8] sm:$0xff] }
 0x795   : > { %v8625_v17 = vadd.f32 %v3853_v57, %v3691_v16  ;;  %v5484_v35 = vpop.f32.mrb[18].mxu1  ;;  %v3359_v31 = vmul.f32 %v8449_v40, %v3327_v38  ;;  %v3311_v57 = vld [vmem:[#allocation3 + $0x28] sm:$0xff] }
 0x796   : > { %4095 = vst [vmem:[#allocation4 + $0x10] sm:$0xff] %v8623_v45  ;;  %3470 = vst.msk [vmem:[#allocation3 + $0x18] sm:$0xff] %vm3466_vm2, %v3437_v52  ;;  %v8629_v42 = vadd.f32 %v5484_v35, %v3694_v48  ;;  %v3856_v44 = vpop.f32.mrb[19].mxu1  ;;  %v3361_v35 = vmul.f32 %v8498_v50, %v3329_v37  ;;  %v3313_v52 = vld [vmem:[#allocation3 + $0x38] sm:$0xff] }
 0x797   : > { %4093 = vst [vmem:[#allocation4] sm:$0xff] %v8625_v17  ;;  %v8635_v25 = vadd.f32 %v3856_v44, %v3692_v58  ;;  %v3373_v10 = vpop.xlane.xlu1 %3372  ;;  %v3345_v33 = vmul.f32 %v8512_v11, %v3313_v52  ;;  %v3333_v11 = vld [vmem:[#allocation3 + $0xd8] sm:$0xff] }
 0x798   : > { %4096 = vst [vmem:[#allocation4 + $0x18] sm:$0xff] %v8629_v42  ;;  %v3435_v53 = vadd.f32 %v3373_v10, %v3339_v0  ;;  %v8647_v48 = vpop.permute.xlu0 %3588  ;;  %v3343_v0 = vmul.f32 %v8484_v19, %v3311_v57  ;;  %v3365_v40 = vmul.f32 %v8529_v63, %v3333_v11  ;;  %v3324_v57 = vld [vmem:[#allocation3 + $0x90] sm:$0xff] }
 0x799   : > { %v4176_v23 = vld [vmem:[#allocation3 + $0x98] sm:$0xff]  ;;  %4094 = vst [vmem:[#allocation4 + $0x8] sm:$0xff] %v8635_v25  ;;  %v3308_v11 = vld [vmem:[#allocation3 + $0x10] sm:$0xff] }
 0x79a   : > { %6056 = vrcp.f32 %v4176_v23  ;;  %3468 = vst.msk [vmem:[#allocation3 + $0x8] sm:$0xff] %vm3466_vm2, %v3435_v53 }
 0x79b   : > { %v3417_v61 = vpop.xlane.xlu1 %3416 }
 0x79c   : > { %v3457_v12 = vadd.f32 %v3417_v61, %v3361_v35  ;;  %v8651_v23 = vpop.permute.xlu0 %3658  ;;  %v3317_v61 = vld [vmem:[#allocation3 + $0x58] sm:$0xff] }
 0x79d   : > { %v4160_v47 = vld [vmem:[#allocation3 + $0x18] sm:$0xff] }
 0x79e   : > { %6058 = vrcp.f32 %v4160_v47  ;;  %3490 = vst.msk [vmem:[#allocation3 + $0xb8] sm:$0xff] %vm3466_vm2, %v3457_v12  ;;  %v3349_v12 = vmul.f32 %v8537_v13, %v3317_v61  ;;  %v3306_v61 = vld [vmem:[#allocation3] sm:$0xff] }
 0x79f   : > { %v3385_v16 = vpop.xlane.xlu1 %3384 }
 0x7a0   : > { %v3441_v59 = vadd.f32 %v3385_v16, %v3345_v33  ;;  %v8657_v47 = vpop.permute.xlu0 %3578  ;;  %v3331_v33 = vld [vmem:[#allocation3 + $0xc8] sm:$0xff] }
 0x7a1   : > { %v3363_v38 = vmul.f32 %v8541_v28, %v3331_v33  ;;  %v3505_v28 = vld [vmem:[#allocation4 + $0x30] sm:$0xff] }
 0x7a2   : > { %3474 = vst.msk [vmem:[#allocation3 + $0x38] sm:$0xff] %vm3466_vm2, %v3441_v59 }
 0x7a3   : > { %v3413_v50 = vpop.xlane.xlu1 %3412 }
 0x7a4   : > { %v6057_v58 = vpop.eup %6056  ;;  %v3455_v44 = vadd.f32 %v3413_v50, %v3359_v31  ;;  %v3315_v31 = vld [vmem:[#allocation3 + $0x48] sm:$0xff]  ;;  %v8661_v63 = vpop.permute.xlu0 %3678 }
 0x7a5   : > { %4382 = vperm.xlu0 %5870, %v6057_v58   ;;  %v3347_v58 = vmul.f32 %v8546_v56, %v3315_v31  ;;  %v3697_v56 = vmul.f32 %v8579_v41, %v3505_v28  ;;  %v3507_v28 = vld [vmem:[#allocation4 + $0x40] sm:$0xff] }
 0x7a6   : > { %3488 = vst.msk [vmem:[#allocation3 + $0xa8] sm:$0xff] %vm3466_vm2, %v3455_v44 }
 0x7a7   : > { %v3381_v10 = vpop.xlane.xlu1 %3380 }
 0x7a8   : > { %v6059_v37 = vpop.eup %6058  ;;  %v3439_v53 = vadd.f32 %v3381_v10, %v3343_v0  ;;  %v3356_v0 = vmul.f32 %v8316_v1, %v3324_v57 }
 0x7a9   : > { %4302 = vperm.xlu0 %5870, %v6059_v37  }
 0x7aa   : > { %3472 = vst.msk [vmem:[#allocation3 + $0x28] sm:$0xff] %vm3466_vm2, %v3439_v53  ;;  %v3340_v53 = vmul.f32 %v8322_v32, %v3308_v11  ;;  %v3509_v11 = vld [vmem:[#allocation4 + $0x50] sm:$0xff] }
 0x7ab   : > { %v3425_v35 = vpop.xlane.xlu1 %3424 }
 0x7ac   : > { %v3461_v52 = vadd.f32 %v3425_v35, %v3365_v40  ;;  %v3503_v40 = vld [vmem:[#allocation4 + $0x20] sm:$0xff] }
 0x7ad   : > { %v3695_v1 = vmul.f32 %v8571_v6, %v3503_v40  ;;  %v3328_v40 = vld [vmem:[#allocation3 + $0xb0] sm:$0xff] }
 0x7ae   : > { %3494 = vst.msk [vmem:[#allocation3 + $0xd8] sm:$0xff] %vm3466_vm2, %v3461_v52  ;;  %v3506_v52 = vld [vmem:[#allocation4 + $0x38] sm:$0xff] }
 0x7af   : > { %v3393_v19 = vpop.xlane.xlu1 %3392 }
 0x7b0   : > { %v3445_v16 = vadd.f32 %v3393_v19, %v3349_v12  ;;  %v3504_v19 = vld [vmem:[#allocation4 + $0x28] sm:$0xff] }
 0x7b1   : > { %v3696_v57 = vmul.f32 %v8614_v24, %v3504_v19  ;;  %v3508_v19 = vld [vmem:[#allocation4 + $0x48] sm:$0xff] }
 0x7b2   : > { %3478 = vst.msk [vmem:[#allocation3 + $0x58] sm:$0xff] %vm3466_vm2, %v3445_v16  ;;  %v3338_v16 = vmul.f32 %v8309_v49, %v3306_v61  ;;  %v3510_v61 = vld [vmem:[#allocation4 + $0x58] sm:$0xff] }
 0x7b3   : > { %v3421_v59 = vpop.xlane.xlu1 %3420 }
 0x7b4   : > { %v3459_v50 = vadd.f32 %v3421_v59, %v3363_v38  ;;  %v3698_v38 = vmul.f32 %v8632_v27, %v3506_v52  ;;  %v5922_v27 = vld [vmem:[#allocation15 + $0x48] sm:$0xff]  }
 0x7b6   : > { %3492 = vst.msk [vmem:[#allocation3 + $0xc8] sm:$0xff] %vm3466_vm2, %v3459_v50  ;;  %v3323_v50 = vld [vmem:[#allocation3 + $0x88] sm:$0xff] }
 0x7b7   : > { %v3389_v13 = vpop.xlane.xlu1 %3388 }
 0x7b8   : > { %v3443_v44 = vadd.f32 %v3389_v13, %v3347_v58 }
 0x7b9   : > { %v3407_v10 = vpop.xlane.xlu0 %3406 }
 0x7ba   : > { %3476 = vst.msk [vmem:[#allocation3 + $0x48] sm:$0xff] %vm3466_vm2, %v3443_v44  ;;  %v3452_v37 = vadd.f32 %v3407_v10, %v3356_v0  ;;  %v5920_v44 = vld [vmem:[#allocation15 + $0x40] sm:$0xff]  }
 0x7bb   : > { %v5921_v10 = vld [vmem:[#allocation15] sm:$0xff]   ;;  %5209 = vmatprep.subr.bf16.mxu0 %v5920_v44 }
 0x7bc   : > { %3485 = vst.msk [vmem:[#allocation3 + $0x90] sm:$0xff] %vm3466_vm2, %v3452_v37  ;;  %v3355_v37 = vmul.f32 %v8302_v46, %v3323_v50  ;;  %5210 = vmatpush3.bf16.msra.mxu0 %v5921_v10  ;;  %v3699_v46 = vmul.f32 %v8592_v3, %v3507_v28 }
 0x7bd   : > { %v3375_v35 = vpop.xlane.xlu0 %3374  ;;  %5211 = vmatprep.subr.bf16.mxu0 %v5922_v27  ;;  %v3511_v27 = vld [vmem:[#allocation4 + $0x60] sm:$0xff] }
 0x7be   : > { %v3436_v12 = vadd.f32 %v3375_v35, %v3340_v53  ;;  %v5923_v35 = vld [vmem:[#allocation15 + $0x8] sm:$0xff]  }
 0x7c0   : > { %3469 = vst.msk [vmem:[#allocation3 + $0x10] sm:$0xff] %vm3466_vm2, %v3436_v12  ;;  %v5487_v33 = vpop.f32.mrb[20].mxu1  ;;  %v5924_v12 = vld [vmem:[#allocation15 + $0x50] sm:$0xff]   ;;  %5212 = vmatpush3.bf16.msra.mxu0 %v5923_v35 }
 0x7c1   : > { %v8674_v59 = vadd.f32 %v5487_v33, %v3697_v56  ;;  %v3869_v32 = vpop.f32.mrb[21].mxu1  ;;  %v3371_v31 = vpop.xlane.xlu0 %3370  ;;  %v3701_v56 = vmul.f32 %v8586_v60, %v3509_v11  ;;  %v5925_v60 = vld [vmem:[#allocation15 + $0x10] sm:$0xff]   ;;  %5213 = vmatprep.subr.bf16.mxu0 %v5924_v12  ;;  %v4158_v12 = vld [vmem:[#allocation3 + $0x8] sm:$0xff] }
 0x7c2   : > { %v8677_v58 = vadd.f32 %v3869_v32, %v3695_v1  ;;  %v3434_v41 = vadd.f32 %v3371_v31, %v3338_v16  ;;  %v5488_v13 = vpop.f32.mrb[22].mxu1  ;;  %v3360_v16 = vmul.f32 %v8340_v2, %v3328_v40  ;;  %v3702_v32 = vmul.f32 %v8647_v48, %v3510_v61  ;;  %v5926_v40 = vld [vmem:[#allocation15 + $0x58] sm:$0xff]  }
 0x7c3   : > { %v4175_v6 = vld [vmem:[#allocation3 + $0x90] sm:$0xff]  ;;  %4099 = vst [vmem:[#allocation4 + $0x30] sm:$0xff] %v8674_v59  ;;  %v8680_v0 = vadd.f32 %v5488_v13, %v3698_v38  ;;  %v3872_v49 = vpop.f32.mrb[23].mxu1  ;;  %v4173_v38 = vld [vmem:[#allocation3 + $0x80] sm:$0xff]  ;;  %v3700_v13 = vmul.f32 %v8657_v47, %v3508_v19  ;;  %v5927_v61 = vld [vmem:[#allocation15 + $0x18] sm:$0xff]  }
 0x7c4   : > { %6060 = vrcp.f32 %v4175_v6  ;;  %4097 = vst [vmem:[#allocation4 + $0x20] sm:$0xff] %v8677_v58  ;;  %3467 = vst.msk [vmem:[#allocation3] sm:$0xff] %vm3466_vm2, %v3434_v41  ;;  %v8684_v24 = vadd.f32 %v3872_v49, %v3696_v57  ;;  %v3312_v41 = vld [vmem:[#allocation3 + $0x30] sm:$0xff]  ;;  %5214 = vmatpush3.bf16.msra.mxu0 %v5925_v60 }
 0x7c5   : > { %4100 = vst [vmem:[#allocation4 + $0x38] sm:$0xff] %v8680_v0  ;;  %v3405_v53 = vpop.xlane.xlu0 %3404  ;;  %v3344_v47 = vmul.f32 %v8346_v39, %v3312_v41  ;;  %5215 = vmatprep.subr.bf16.mxu0 %v5926_v40  ;;  %v5929_v41 = vld [vmem:[#allocation15 + $0x20] sm:$0xff]   ;;  %v3517_v60 = vld [vmem:[#allocation4 + $0x90] sm:$0xff]  ;;  %v3516_v40 = vld [vmem:[#allocation4 + $0x88] sm:$0xff] }
 0x7c6   : > { %4098 = vst [vmem:[#allocation4 + $0x28] sm:$0xff] %v8684_v24  ;;  %v3451_v52 = vadd.f32 %v3405_v53, %v3355_v37  ;;  %v3326_v37 = vld [vmem:[#allocation3 + $0xa0] sm:$0xff] }
 0x7c7   : > { %v4159_v1 = vld [vmem:[#allocation3 + $0x10] sm:$0xff] }
 0x7c8   : > { %6062 = vrcp.f32 %v4159_v1  ;;  %3484 = vst.msk [vmem:[#allocation3 + $0x88] sm:$0xff] %vm3466_vm2, %v3451_v52  ;;  %v5491_v33 = vpop.f32.mrb[24].mxu1  ;;  %v3703_v52 = vmul.f32 %v8603_v29, %v3511_v27  ;;  %5216 = vmatpush3.bf16.msra.mxu0 %v5927_v61  ;;  %v5928_v29 = vld [vmem:[#allocation15 + $0x60] sm:$0xff]  }
 0x7c9   : > { %v8694_v31 = vadd.f32 %v5491_v33, %v3701_v56  ;;  %v3885_v50 = vpop.f32.mrb[25].mxu1  ;;  %v3415_v57 = vpop.xlane.xlu0 %3414  ;;  %6064 = vrcp.f32 %v4173_v38  ;;  %v3358_v56 = vmul.f32 %v8328_v62, %v3326_v37  ;;  %v4180_v62 = vld [vmem:[#allocation3 + $0xb8] sm:$0xff]  ;;  %5217 = vmatprep.subr.bf16.mxu0 %v5928_v29 }
 0x7ca   : > { %v8697_v44 = vadd.f32 %v3885_v50, %v3699_v46  ;;  %v3456_v3 = vadd.f32 %v3415_v57, %v3360_v16  ;;  %v5492_v6 = vpop.f32.mrb[26].mxu1  ;;  %v3310_v46 = vld [vmem:[#allocation3 + $0x20] sm:$0xff]  ;;  %v3518_v37 = vld [vmem:[#allocation4 + $0x98] sm:$0xff] }
 0x7cb   : > { %4103 = vst [vmem:[#allocation4 + $0x50] sm:$0xff] %v8694_v31  ;;  %v8700_v2 = vadd.f32 %v5492_v6, %v3702_v32  ;;  %v3888_v49 = vpop.f32.mrb[27].mxu1  ;;  %v4157_v48 = vld [vmem:[#allocation3] sm:$0xff] }
 0x7cc   : > { %4101 = vst [vmem:[#allocation4 + $0x40] sm:$0xff] %v8697_v44  ;;  %3489 = vst.msk [vmem:[#allocation3 + $0xb0] sm:$0xff] %vm3466_vm2, %v3456_v3  ;;  %v8704_v10 = vadd.f32 %v3888_v49, %v3700_v13  ;;  %6066 = vrcp.f32 %v4157_v48  ;;  %v3342_v13 = vmul.f32 %v8334_v8, %v3310_v46  ;;  %v3515_v3 = vld [vmem:[#allocation4 + $0x80] sm:$0xff]  ;;  %v3332_v49 = vld [vmem:[#allocation3 + $0xd0] sm:$0xff]  ;;  %5218 = vmatpush3.bf16.msra.mxu0 %v5929_v41 }
 0x7cd   : > { %4104 = vst [vmem:[#allocation4 + $0x58] sm:$0xff] %v8700_v2  ;;  %v3383_v11 = vpop.xlane.xlu0 %3382  ;;  %v5931_v8 = vld [vmem:[#allocation15 + $0x28] sm:$0xff]   ;;  %v9351_v46 = vld [vmem:[#allocation101_spill] sm:$0xff] }
 0x7ce   : > { %v6061_v28 = vpop.eup %6060  ;;  %4102 = vst [vmem:[#allocation4 + $0x48] sm:$0xff] %v8704_v10  ;;  %v3440_v53 = vadd.f32 %v3383_v11, %v3344_v47  ;;  %v9348_v47 = vld [vmem:[#allocation104_spill] sm:$0xff] }
 0x7cf   : > { %v4174_v35 = vld [vmem:[#allocation3 + $0x88] sm:$0xff]  ;;  %4377 = vperm.xlu1 %5871, %v6061_v28   ;;  %v9349_v27 = vsub.f32 %v9348_v47, %v8258_v36  ;;  %v3364_v36 = vmul.f32 %v8352_v43, %v3332_v49  ;;  %v5933_v47 = vld [vmem:[#allocation15 + $0x30] sm:$0xff]  }
 0x7d0   : > { %6068 = vrcp.f32 %v4174_v35  ;;  %3473 = vst.msk [vmem:[#allocation3 + $0x30] sm:$0xff] %vm3466_vm2, %v3440_v53  ;;  %v8711_v39 = vpop.f32.mrb[28].mxu1  ;;  %v5930_v53 = vld [vmem:[#allocation15 + $0x68] sm:$0xff]   ;;  %v3709_v35 = vmul.f32 %v8563_v9, %v3517_v60  ;;  %v3710_v9 = vmul.f32 %v8605_v5, %v3518_v37 }
 0x7d1   : > { %v3901_v19 = vpop.f32.mrb[29].mxu1  ;;  %v3411_v1 = vpop.xlane.xlu0 %3410  ;;  %6070 = vrcp.f32 %v4158_v12  ;;  %v3046_v11 = vmul.f32 1.442695, %v9349_v27  ;;  %v4164_v12 = vld [vmem:[#allocation3 + $0x38] sm:$0xff]  ;;  %5219 = vmatprep.subr.bf16.mxu0 %v5930_v53  ;;  %v3521_v27 = vld [vmem:[#allocation4 + $0xb0] sm:$0xff]  ;;  %v4178_v37 = vld [vmem:[#allocation3 + $0xa8] sm:$0xff] }
 0x7d2   : > { %v6063_v33 = vpop.eup %6062  ;;  %v8714_v16 = vadd.f32 %v3901_v19, %v3703_v52  ;;  %v3454_v38 = vadd.f32 %v3411_v1, %v3358_v56  ;;  %v8716_v32 = vpop.f32.mrb[30].mxu1  ;;  %v3707_v52 = vmul.f32 %v8595_v4, %v3515_v3  ;;  %v9350_v1 = vld [vmem:[#allocation100_spill] sm:$0xff]  ;;  %5220 = vmatpush3.bf16.msra.mxu0 %v5931_v8  ;;  %v3519_v53 = vld [vmem:[#allocation4 + $0xa0] sm:$0xff]  ;;  %v9353_v8 = vld [vmem:[#allocation105_spill] sm:$0xff] }
 0x7d3   : > { %v4179_v50 = vld [vmem:[#allocation3 + $0xb0] sm:$0xff]  ;;  %v8718_v57 = vpop.f32.mrb[31].mxu1  ;;  %4297 = vperm.xlu1 %5871, %v6063_v33   ;;  %v6065_v48 = vpop.eup %6064  ;;  %v9352_v33 = vsub.f32 %v9350_v1, %v9351_v46  ;;  %v5935_v46 = vld [vmem:[#allocation15 + $0x38] sm:$0xff]  }
 0x7d4   : > { %6072 = vrcp.f32 %v4179_v50  ;;  %4105 = vst [vmem:[#allocation4 + $0x60] sm:$0xff] %v8714_v16  ;;  %3487 = vst.msk [vmem:[#allocation3 + $0xa0] sm:$0xff] %vm3466_vm2, %v3454_v38  ;;  %v3316_v4 = vld [vmem:[#allocation3 + $0x50] sm:$0xff] }
 0x7d5   : > { %v3379_v6 = vpop.xlane.xlu0 %3378  ;;  %6074 = vrcp.f32 %v4180_v62  ;;  %v3014_v38 = vmul.f32 1.442695, %v9352_v33  ;;  %v3708_v62 = vmul.f32 %v8556_v18, %v3516_v40  ;;  %v3711_v33 = vmul.f32 %v8569_v30, %v3519_v53 }
 0x7d6   : > { %v3438_v28 = vadd.f32 %v3379_v6, %v3342_v13  ;;  %v6067_v19 = vpop.eup %6066  ;;  %v5932_v6 = vld [vmem:[#allocation15 + $0x70] sm:$0xff]  }
 0x7d7   : > { %v4163_v61 = vld [vmem:[#allocation3 + $0x30] sm:$0xff]  ;;  %4367 = vperm.xlu1 %5871, %v6065_v48   ;;  %5221 = vmatprep.subr.bf16.mxu0 %v5932_v6 }
 0x7d8   : > { %6076 = vrcp.f32 %v4163_v61  ;;  %3471 = vst.msk [vmem:[#allocation3 + $0x20] sm:$0xff] %vm3466_vm2, %v3438_v28  ;;  %v5515_v56 = vpop.f32.mrb[32].mxu1  ;;  %5222 = vmatpush3.bf16.msra.mxu0 %v5933_v47 }
 0x7d9   : > { %v8734_v29 = vadd.f32 %v5515_v56, %v3709_v35  ;;  %v3998_v50 = vpop.f32.mrb[33].mxu1  ;;  %v3423_v41 = vpop.xlane.xlu0 %3422  ;;  %6078 = vpow2.f32 %v3046_v11  ;;  %v3348_v11 = vmul.f32 %v8358_v15, %v3316_v4  ;;  %v3330_v35 = vld [vmem:[#allocation3 + $0xc0] sm:$0xff]  ;;  %v3713_v15 = vmul.f32 %v8575_v34, %v3521_v27 }
 0x7da   : > { %v6069_v60 = vpop.eup %6068  ;;  %v8737_v13 = vadd.f32 %v3998_v50, %v3707_v52  ;;  %v3460_v43 = vadd.f32 %v3423_v41, %v3364_v36  ;;  %v5516_v3 = vpop.f32.mrb[34].mxu1  ;;  %6080 = vrcp.f32 %v4164_v12  ;;  %v2985_v52 = vsub.f32 %v9353_v8, %v8269_v22  ;;  %v3522_v12 = vld [vmem:[#allocation4 + $0xb8] sm:$0xff] }
 0x7db   : > { %v4177_v49 = vld [vmem:[#allocation3 + $0xa0] sm:$0xff]  ;;  %4111 = vst [vmem:[#allocation4 + $0x90] sm:$0xff] %v8734_v29  ;;  %v8740_v5 = vadd.f32 %v5516_v3, %v3710_v9  ;;  %v4001_v48 = vpop.f32.mrb[35].mxu1  ;;  %4287 = vperm.xlu1 %5871, %v6067_v19   ;;  %4372 = vperm.xlu0 %5870, %v6069_v60   ;;  %v6071_v28 = vpop.eup %6070  ;;  %v5934_v36 = vld [vmem:[#allocation15 + $0x78] sm:$0xff]   ;;  %v3520_v19 = vld [vmem:[#allocation4 + $0xa8] sm:$0xff]  ;;  %v3714_v41 = vmul.f32 %v8617_v14, %v3522_v12 }
 0x7dc   : > { %6082 = vrcp.f32 %v4177_v49  ;;  %4109 = vst [vmem:[#allocation4 + $0x80] sm:$0xff] %v8737_v13  ;;  %3493 = vst.msk [vmem:[#allocation3 + $0xd0] sm:$0xff] %vm3466_vm2, %v3460_v43  ;;  %v8744_v18 = vadd.f32 %v4001_v48, %v3708_v62  ;;  %v4162_v9 = vld [vmem:[#allocation3 + $0x28] sm:$0xff]  ;;  %5223 = vmatprep.subr.bf16.mxu0 %v5934_v36  ;;  %v3314_v62 = vld [vmem:[#allocation3 + $0x40] sm:$0xff]  ;;  %v3048_v3 = vmul.f32 1.442695, %v2985_v52  ;;  %v3712_v30 = vmul.f32 %v8612_v20, %v3520_v19 }
 0x7dd   : > { %4112 = vst [vmem:[#allocation4 + $0x98] sm:$0xff] %v8740_v5  ;;  %v3391_v40 = vpop.xlane.xlu0 %3390  ;;  %6084 = vpow2.f32 %v3014_v38  ;;  %v3362_v38 = vmul.f32 %v8364_v26, %v3330_v35  ;;  %5224 = vmatpush3.bf16.msra.mxu0 %v5935_v46  ;;  %v9354_v52 = vld [vmem:[#allocation102_spill] sm:$0xff]  ;;  %v9355_v12 = vld [vmem:[#allocation103_spill] sm:$0xff] }
 0x7de   : > { %v6073_v61 = vpop.eup %6072  ;;  %4110 = vst [vmem:[#allocation4 + $0x88] sm:$0xff] %v8744_v18  ;;  %v3444_v56 = vadd.f32 %v3391_v40, %v3348_v11  ;;  %6086 = vrcp.f32 %v4178_v37  ;;  %v3525_v37 = vld [vmem:[#allocation4 + $0xd0] sm:$0xff]  ;;  %v4184_v11 = vld [vmem:[#allocation3 + $0xd8] sm:$0xff]  ;;  %v3523_v40 = vld [vmem:[#allocation4 + $0xc0] sm:$0xff] }
 0x7df   : > { %v4161_v1 = vld [vmem:[#allocation3 + $0x20] sm:$0xff]  ;;  %4397 = vperm.xlu1 %5871, %v6073_v61   ;;  %4292 = vperm.xlu0 %5870, %v6071_v28   ;;  %v6075_v50 = vpop.eup %6074  ;;  %v3346_v28 = vmul.f32 %v8368_v55, %v3314_v62  ;;  %v3336_v61 = vld [vmem:[#allocation3 + $0xf0] sm:$0xff]  ;;  %v3524_v46 = vld [vmem:[#allocation4 + $0xc8] sm:$0xff] }
 0x7e0   : > { %6088 = vrcp.f32 %v4161_v1  ;;  %3477 = vst.msk [vmem:[#allocation3 + $0x50] sm:$0xff] %vm3466_vm2, %v3444_v56  ;;  %v5519_v22 = vpop.f32.mrb[36].mxu1  ;;  %v9356_v56 = vsub.f32 %v9354_v52, %v9355_v12  ;;  %v3717_v1 = vmul.f32 %v8583_v54, %v3525_v37  ;;  %v4182_v37 = vld [vmem:[#allocation3 + $0xc8] sm:$0xff] }
 0x7e1   : > { %v8756_v34 = vadd.f32 %v5519_v22, %v3713_v15  ;;  %v4014_v4 = vpop.f32.mrb[37].mxu1  ;;  %v3419_v60 = vpop.xlane.xlu0 %3418  ;;  %6090 = vrcp.f32 %v4162_v9  ;;  %v3526_v15 = vld [vmem:[#allocation4 + $0xd8] sm:$0xff]  ;;  %v3715_v9 = vmul.f32 %v8589_v7, %v3523_v40  ;;  %v3334_v40 = vld [vmem:[#allocation3 + $0xe0] sm:$0xff] }
 0x7e2   : > { %v6077_v43 = vpop.eup %6076  ;;  %v8759_v6 = vadd.f32 %v4014_v4, %v3711_v33  ;;  %v3458_v49 = vadd.f32 %v3419_v60, %v3362_v38  ;;  %v5520_v48 = vpop.f32.mrb[38].mxu1  ;;  %v3016_v36 = vmul.f32 1.442695, %v9356_v56  ;;  %v4168_v22 = vld [vmem:[#allocation3 + $0x58] sm:$0xff]  ;;  %v3718_v4 = vmul.f32 %v8641_v21, %v3526_v15 }
 0x7e3   : > { %v4183_v26 = vld [vmem:[#allocation3 + $0xd0] sm:$0xff]  ;;  %4115 = vst [vmem:[#allocation4 + $0xb0] sm:$0xff] %v8756_v34  ;;  %v8762_v47 = vadd.f32 %v5520_v48, %v3714_v41  ;;  %v4017_v14 = vpop.f32.mrb[39].mxu1  ;;  %4317 = vperm.xlu1 %5871, %v6077_v43   ;;  %4402 = vperm.xlu0 %5870, %v6075_v50   ;;  %v8764_v27 = vpop.eup %6078  ;;  %v3366_v12 = vmul.f32 %v8373_v51, %v3334_v40  ;;  %v3321_v51 = vld [vmem:[#allocation3 + $0x78] sm:$0xff] }
 0x7e4   : > { %6092 = vrcp.f32 %v4183_v26  ;;  %4113 = vst [vmem:[#allocation4 + $0xa0] sm:$0xff] %v8759_v6  ;;  %3491 = vst.msk [vmem:[#allocation3 + $0xc0] sm:$0xff] %vm3466_vm2, %v3458_v49  ;;  %v8768_v20 = vadd.f32 %v4017_v14, %v3712_v30  ;;  %v6081_v53 = vpop.eup %6080  ;;  %v3368_v50 = vmul.f32 %v8764_v27, %v3336_v61  ;;  %v3320_v43 = vld [vmem:[#allocation3 + $0x70] sm:$0xff]  ;;  %v3716_v30 = vmul.f32 %v8651_v23, %v3524_v46 }
 0x7e5   : > { %4116 = vst [vmem:[#allocation4 + $0xb8] sm:$0xff] %v8762_v47  ;;  %v3387_v35 = vpop.xlane.xlu0 %3386  ;;  %6094 = vpow2.f32 %v3048_v3 }
 0x7e6   : > { %v6083_v8 = vpop.eup %6082  ;;  %4114 = vst [vmem:[#allocation4 + $0xa8] sm:$0xff] %v8768_v20  ;;  %v3442_v19 = vadd.f32 %v3387_v35, %v3346_v28  ;;  %6096 = vrcp.f32 %v4184_v11 }
 0x7e7   : > { %v4167_v55 = vld [vmem:[#allocation3 + $0x50] sm:$0xff]  ;;  %4387 = vperm.xlu1 %5871, %v6083_v8   ;;  %4322 = vperm.xlu0 %5870, %v6081_v53   ;;  %v8777_v33 = vpop.eup %6084 }
 0x7e8   : > { %6098 = vrcp.f32 %v4167_v55  ;;  %3475 = vst.msk [vmem:[#allocation3 + $0x40] sm:$0xff] %vm3466_vm2, %v3442_v19  ;;  %v5523_v38 = vpop.f32.mrb[40].mxu1  ;;  %v6087_v41 = vpop.eup %6086  ;;  %v3352_v11 = vmul.f32 %v8777_v33, %v3320_v43  ;;  %v3318_v19 = vld [vmem:[#allocation3 + $0x60] sm:$0xff] }
 0x7e9   : > { %v8783_v54 = vadd.f32 %v5523_v38, %v3717_v1  ;;  %v4030_v60 = vpop.f32.mrb[41].mxu1  ;;  %v3431_v62 = vpop.xlane.xlu0 %3430  ;;  %6100 = vpow2.f32 %v3016_v36  ;;  %v4166_v36 = vld [vmem:[#allocation3 + $0x48] sm:$0xff]  ;;  %v3337_v1 = vld [vmem:[#allocation3 + $0xf8] sm:$0xff] }
 0x7ea   : > { %v6089_v3 = vpop.eup %6088  ;;  %v8786_v7 = vadd.f32 %v4030_v60, %v3715_v9  ;;  %v3464_v49 = vadd.f32 %v3431_v62, %v3368_v50  ;;  %v5524_v48 = vpop.f32.mrb[42].mxu1  ;;  %6102 = vrcp.f32 %v4168_v22  ;;  %v9357_v22 = vld [vmem:[#allocation106_spill] sm:$0xff] }
 0x7eb   : > { %v4181_v26 = vld [vmem:[#allocation3 + $0xc0] sm:$0xff]  ;;  %4119 = vst [vmem:[#allocation4 + $0xd0] sm:$0xff] %v8783_v54  ;;  %v8789_v14 = vadd.f32 %v5524_v48, %v3718_v4  ;;  %v4033_v21 = vpop.f32.mrb[43].mxu1  ;;  %4307 = vperm.xlu1 %5871, %v6089_v3   ;;  %4392 = vperm.xlu0 %5870, %v6087_v41   ;;  %v6091_v28 = vpop.eup %6090  ;;  %v3350_v38 = vmul.f32 %v9357_v22, %v3318_v19 }
 0x7ec   : > { %6104 = vrcp.f32 %v4181_v26  ;;  %4117 = vst [vmem:[#allocation4 + $0xc0] sm:$0xff] %v8786_v7  ;;  %3497 = vst.msk [vmem:[#allocation3 + $0xf0] sm:$0xff] %vm3466_vm2, %v3464_v49  ;;  %v8793_v23 = vadd.f32 %v4033_v21, %v3716_v30  ;;  %v3335_v26 = vld [vmem:[#allocation3 + $0xe8] sm:$0xff] }
 0x7ed   : > { %4120 = vst [vmem:[#allocation4 + $0xd8] sm:$0xff] %v8789_v14  ;;  %v3399_v53 = vpop.xlane.xlu0 %3398  ;;  %6106 = vrcp.f32 %v4182_v37 }
 0x7ee   : > { %v6093_v35 = vpop.eup %6092  ;;  %4118 = vst [vmem:[#allocation4 + $0xc8] sm:$0xff] %v8793_v23  ;;  %v3448_v61 = vadd.f32 %v3399_v53, %v3352_v11  ;;  %v9358_v53 = vld [vmem:[#allocation72_spill] sm:$0xff] }
 0x7ef   : > { %v4165_v8 = vld [vmem:[#allocation3 + $0x40] sm:$0xff]  ;;  %4417 = vperm.xlu1 %5871, %v6093_v35   ;;  %4312 = vperm.xlu0 %5870, %v6091_v28   ;;  %v6095_v52 = vpop.eup %6094  ;;  %v3512_v28 = vld [vmem:[#allocation4 + $0x68] sm:$0xff]  ;;  %v3367_v40 = vmul.f32 %v9358_v53, %v3335_v26 }
 0x7f0   : > { %6108 = vrcp.f32 %v4165_v8  ;;  %3481 = vst.msk [vmem:[#allocation3 + $0x70] sm:$0xff] %vm3466_vm2, %v3448_v61  ;;  %v6097_v56 = vpop.eup %6096  ;;  %v3369_v50 = vmul.f32 %v6095_v52, %v3337_v1  ;;  %v3319_v8 = vld [vmem:[#allocation3 + $0x68] sm:$0xff]  ;;  %v9359_v1 = vld [vmem:[#allocation94_spill] sm:$0xff] }
 0x7f1   : > { %v3427_v15 = vpop.xlane.xlu0 %3426  ;;  %6110 = vrcp.f32 %v4166_v36 }
 0x7f2   : > { %v6099_v46 = vpop.eup %6098  ;;  %v3462_v55 = vadd.f32 %v3427_v15, %v3366_v12 }
 0x7f3   : > { %4337 = vperm.xlu1 %5871, %v6099_v46   ;;  %4422 = vperm.xlu0 %5870, %v6097_v56   ;;  %v6101_v9 = vpop.eup %6100  ;;  %v3351_v46 = vmul.f32 %v9359_v1, %v3319_v8 }
 0x7f4   : > { %3495 = vst.msk [vmem:[#allocation3 + $0xe0] sm:$0xff] %vm3466_vm2, %v3462_v55  ;;  %v6103_v41 = vpop.eup %6102  ;;  %v3353_v30 = vmul.f32 %v6101_v9, %v3321_v51  ;;  %v4187_v55 = vld [vmem:[#allocation3 + $0xf0] sm:$0xff] }
 0x7f5   : > { %v3395_v4 = vpop.xlane.xlu0 %3394  ;;  %v3433_v60 = vpop.xlane.xlu1 %3432 }
 0x7f6   : > { %v6105_v62 = vpop.eup %6104  ;;  %v3446_v43 = vadd.f32 %v3395_v4, %v3350_v38  ;;  %v3465_v3 = vadd.f32 %v3433_v60, %v3369_v50 }
 0x7f7   : > { %4407 = vperm.xlu1 %5871, %v6105_v62   ;;  %4342 = vperm.xlu0 %5870, %v6103_v41   ;;  %v6107_v49 = vpop.eup %6106  ;;  %v4171_v50 = vld [vmem:[#allocation3 + $0x70] sm:$0xff] }
 0x7f8   : > { %3479 = vst.msk [vmem:[#allocation3 + $0x60] sm:$0xff] %vm3466_vm2, %v3446_v43  ;;  %3498 = vst.msk [vmem:[#allocation3 + $0xf8] sm:$0xff] %vm3466_vm2, %v3465_v3 }
 0x7f9   : > { %v3401_v48 = vpop.xlane.xlu1 %3400 }
 0x7fa   : > { %v6109_v21 = vpop.eup %6108  ;;  %v3449_v37 = vadd.f32 %v3401_v48, %v3353_v30  ;;  %v3527_v30 = vld [vmem:[#allocation4 + $0xe0] sm:$0xff] }
 0x7fb   : > { %v4185_v11 = vld [vmem:[#allocation3 + $0xe0] sm:$0xff]  ;;  %4327 = vperm.xlu1 %5871, %v6109_v21   ;;  %4412 = vperm.xlu0 %5870, %v6107_v49   ;;  %v6111_v12 = vpop.eup %6110  ;;  %v3528_v49 = vld [vmem:[#allocation4 + $0xe8] sm:$0xff] }
 0x7fc   : > { %6112 = vrcp.f32 %v4185_v11  ;;  %3482 = vst.msk [vmem:[#allocation3 + $0x78] sm:$0xff] %vm3466_vm2, %v3449_v37  ;;  %v9360_v48 = vld [vmem:[#allocation82_spill] sm:$0xff]  ;;  %v3720_v11 = vmul.f32 %v8661_v63, %v3528_v49 }
 0x7fd   : > { %v3599_v35 = vpop.permute.xlu0 %3598  ;;  %v3429_v61 = vpop.xlane.xlu1 %3428  ;;  %v3719_v26 = vmul.f32 %v9360_v48, %v3527_v30 }
 0x7fe   : > { %v3704_v56 = vmul.f32 %v3599_v35, %v3512_v28  ;;  %v3463_v36 = vadd.f32 %v3429_v61, %v3367_v40 }
 0x7ff   : > { %v4169_v15 = vld [vmem:[#allocation3 + $0x60] sm:$0xff]  ;;  %3683 = vperm.xlu1 %5871, %v8764_v27   ;;  %4332 = vperm.xlu0 %5870, %v6111_v12   ;;  %v4188_v60 = vld [vmem:[#allocation3 + $0xf8] sm:$0xff] }
 0x800   : > { %6114 = vrcp.f32 %v4169_v15  ;;  %v8808_v19 = vadd.f32 %v8718_v57, %v3704_v56  ;;  %3496 = vst.msk [vmem:[#allocation3 + $0xe8] sm:$0xff] %vm3466_vm2, %v3463_v36 }
 0x801   : > { %v3397_v22 = vpop.xlane.xlu1 %3396  ;;  %6116 = vrcp.f32 %v4187_v55 }
 0x802   : > { %4106 = vst [vmem:[#allocation4 + $0x68] sm:$0xff] %v8808_v19  ;;  %v3447_v38 = vadd.f32 %v3397_v22, %v3351_v46  ;;  %6118 = vrcp.f32 %v4171_v50 }
 0x803   : > { %3603 = vperm.xlu1 %5871, %v8777_v33   ;;  %3688 = vperm.xlu0 %5870, %v6095_v52   ;;  %v4172_v52 = vld [vmem:[#allocation3 + $0x78] sm:$0xff] }
 0x804   : > { %3480 = vst.msk [vmem:[#allocation3 + $0x68] sm:$0xff] %vm3466_vm2, %v3447_v38 }
 0x806   : > { %v6113_v27 = vpop.eup %6112 }
 0x807   : > { %v4186_v57 = vld [vmem:[#allocation3 + $0xe8] sm:$0xff]  ;;  %4427 = vperm.xlu1 %5871, %v6113_v27   ;;  %3608 = vperm.xlu0 %5870, %v6101_v9  }
 0x808   : > { %6120 = vrcp.f32 %v4186_v57 }
 0x80a   : > { %v6115_v41 = vpop.eup %6114 }
 0x80b   : > { %v4170_v4 = vld [vmem:[#allocation3 + $0x68] sm:$0xff]  ;;  %4347 = vperm.xlu1 %5871, %v6115_v41   ;;  %v6117_v51 = vpop.eup %6116 }
 0x80c   : > { %6122 = vrcp.f32 %v4170_v4  ;;  %v6119_v33 = vpop.eup %6118 }
 0x80d   : > { %6124 = vrcp.f32 %v4188_v60 }
 0x80e   : > { %6126 = vrcp.f32 %v4172_v52 }
 0x80f   : > { %4437 = vperm.xlu1 %5871, %v6117_v51  }
 0x812   : > { %v6121_v62 = vpop.eup %6120 }
 0x813   : > { %4357 = vperm.xlu1 %5871, %v6119_v33   ;;  %4432 = vperm.xlu0 %5870, %v6121_v62  }
 0x816   : > { %v6123_v43 = vpop.eup %6122 }
 0x817   : > { %4352 = vperm.xlu0 %5870, %v6123_v43   ;;  %v6125_v3 = vpop.eup %6124 }
 0x818   : > { %v6127_v9 = vpop.eup %6126 }
 0x81b   : > { %4442 = vperm.xlu0 %5870, %v6125_v3  }
 0x81f   : > { %4362 = vperm.xlu0 %5870, %v6127_v9  }
 0x824   : > { %v4383_v8 = vpop.permute.xlu0 %4382 }
 0x825   : > { %v4464_v41 = vmul.f32 %v4383_v8, %v8740_v5 }
 0x828   : > { %v4303_v56 = vpop.permute.xlu0 %4302 }
 0x83d   : > { %v8816_v21 = vpop.f32.mrb[44].mxu1 }
 0x83e   : > { %v4046_v37 = vpop.f32.mrb[45].mxu1 }
 0x83f   : > { %v8819_v28 = vadd.f32 %v4046_v37, %v3719_v26  ;;  %v8821_v53 = vpop.f32.mrb[46].mxu1 }
 0x840   : > { %v4049_v40 = vpop.f32.mrb[47].mxu1 }
 0x841   : > { %4121 = vst [vmem:[#allocation4 + $0xe0] sm:$0xff] %v8819_v28  ;;  %v8824_v35 = vadd.f32 %v4049_v40, %v3720_v11 }
 0x843   : > { %4122 = vst [vmem:[#allocation4 + $0xe8] sm:$0xff] %v8824_v35 }
 0x84e   : > { %v4378_v61 = vpop.permute.xlu1 %4377 }
 0x84f   : > { %v4463_v22 = vmul.f32 %v4378_v61, %v8734_v29  ;;  %v4448_v29 = vmul.f32 %v4303_v56, %v8629_v42 }
 0x851   : > { %v4494_v60 = vpack.c.bf16 %v4464_v41, %v4463_v22  ;;  %v3530_v22 = vld [vmem:[#allocation4 + $0xf8] sm:$0xff] }
 0x852   : > { %v4298_v12 = vpop.permute.xlu1 %4297 }
 0x856   : > { %v4368_v36 = vpop.permute.xlu1 %4367 }
 0x857   : > { %v4461_v63 = vmul.f32 %v4368_v36, %v8737_v13  ;;  %v4447_v13 = vmul.f32 %v4298_v12, %v8623_v45 }
 0x859   : > { %v4478_v62 = vpack.c.bf16 %v4448_v29, %v4447_v13 }
 0x85a   : > { %v4373_v15 = vpop.permute.xlu0 %4372  ;;  %v4288_v1 = vpop.permute.xlu1 %4287 }
 0x85b   : > { %v4462_v46 = vmul.f32 %v4373_v15, %v8744_v18  ;;  %v4445_v27 = vmul.f32 %v4288_v1, %v8625_v17 }
 0x85d   : > { %v4493_v55 = vpack.c.bf16 %v4462_v46, %v4461_v63 }
 0x85e   : > { %v4293_v38 = vpop.permute.xlu0 %4292  ;;  %v4398_v50 = vpop.permute.xlu1 %4397 }
 0x85f   : > { %v4446_v57 = vmul.f32 %v4293_v38, %v8635_v25  ;;  %4692 = vmatprep.mubr.bf16.mxu0 %v4493_v55  ;;  %v4467_v42 = vmul.f32 %v4398_v50, %v8756_v34  ;;  %v3529_v34 = vld [vmem:[#allocation4 + $0xf0] sm:$0xff] }
 0x860   : > { %v3513_v38 = vld [vmem:[#allocation4 + $0x70] sm:$0xff] }
 0x861   : > { %v4477_v4 = vpack.c.bf16 %v4446_v57, %v4445_v27 }
 0x862   : > { %v4403_v51 = vpop.permute.xlu0 %4402  ;;  %v4318_v33 = vpop.permute.xlu1 %4317 }
 0x863   : > { %4693 = vmatmul.mubr.bf16.vlgmr.msra.gmra.mrb[16].mxu0 %v4477_v4  ;;  %v4468_v9 = vmul.f32 %v4403_v51, %v8762_v47  ;;  %v4451_v47 = vmul.f32 %v4318_v33, %v8674_v59 }
 0x864   : > { %4700 = vmatprep.mubr.bf16.mxu0 %v4494_v60 }
 0x865   : > { %v4496_v37 = vpack.c.bf16 %v4468_v9, %v4467_v42 }
 0x866   : > { %v4323_v18 = vpop.permute.xlu0 %4322  ;;  %v4388_v52 = vpop.permute.xlu1 %4387 }
 0x867   : > { %v4465_v25 = vmul.f32 %v4388_v52, %v8759_v6  ;;  %v4452_v6 = vmul.f32 %v4323_v18, %v8680_v0 }
 0x869   : > { %v4480_v8 = vpack.c.bf16 %v4452_v6, %v4451_v47 }
 0x86a   : > { %v4393_v43 = vpop.permute.xlu0 %4392  ;;  %v4308_v17 = vpop.permute.xlu1 %4307 }
 0x86b   : > { %v4466_v3 = vmul.f32 %v4393_v43, %v8768_v20  ;;  %4701 = vmatmul.mubr.bf16.gmra.mrb[20].mxu0 %v4478_v62  ;;  %v4449_v48 = vmul.f32 %v4308_v17, %v8677_v58 }
 0x86d   : > { %v4495_v5 = vpack.c.bf16 %v4466_v3, %v4465_v25 }
 0x86e   : > { %v4313_v30 = vpop.permute.xlu0 %4312  ;;  %v4418_v49 = vpop.permute.xlu1 %4417 }
 0x86f   : > { %v4450_v45 = vmul.f32 %v4313_v30, %v8684_v24  ;;  %4708 = vmatprep.mubr.bf16.mxu0 %v4495_v5  ;;  %v4471_v59 = vmul.f32 %v4418_v49, %v8783_v54 }
 0x871   : > { %v4479_v26 = vpack.c.bf16 %v4450_v45, %v4449_v48 }
 0x872   : > { %v4423_v11 = vpop.permute.xlu0 %4422  ;;  %v4338_v40 = vpop.permute.xlu1 %4337 }
 0x873   : > { %4709 = vmatmul.mubr.bf16.gmra.mrb[24].mxu0 %v4479_v26  ;;  %v4472_v15 = vmul.f32 %v4423_v11, %v8789_v14  ;;  %v4455_v51 = vmul.f32 %v4338_v40, %v8694_v31 }
 0x874   : > { %4716 = vmatprep.mubr.bf16.mxu0 %v4496_v37 }
 0x875   : > { %v4498_v50 = vpack.c.bf16 %v4472_v15, %v4471_v59 }
 0x876   : > { %v4343_v20 = vpop.permute.xlu0 %4342  ;;  %v4408_v61 = vpop.permute.xlu1 %4407 }
 0x877   : > { %v4469_v24 = vmul.f32 %v4408_v61, %v8786_v7 }
 0x87a   : > { %v4413_v12 = vpop.permute.xlu0 %4412  ;;  %v4328_v58 = vpop.permute.xlu1 %4327 }
 0x87b   : > { %v4470_v56 = vmul.f32 %v4413_v12, %v8793_v23  ;;  %4717 = vmatmul.mubr.bf16.gmra.mrb[28].mxu0 %v4480_v8  ;;  %v4453_v0 = vmul.f32 %v4328_v58, %v8697_v44  ;;  %v3514_v44 = vld [vmem:[#allocation4 + $0x78] sm:$0xff] }
 0x87d   : > { %v4497_v36 = vpack.c.bf16 %v4470_v56, %v4469_v24 }
 0x87e   : > { %v4333_v1 = vpop.permute.xlu0 %4332  ;;  %v3684_v63 = vpop.permute.xlu1 %3683 }
 0x87f   : > { %v4454_v46 = vmul.f32 %v4333_v1, %v8704_v10  ;;  %v3721_v55 = vmul.f32 %v3684_v63, %v3529_v34  ;;  %4724 = vmatprep.mubr.bf16.mxu0 %v4497_v36  ;;  %v4456_v10 = vmul.f32 %v4343_v20, %v8700_v2 }
 0x881   : > { %v4481_v7 = vpack.c.bf16 %v4454_v46, %v4453_v0  ;;  %v4091_v23 = vadd.f32 %v8816_v21, %v3721_v55  ;;  %v4482_v33 = vpack.c.bf16 %v4456_v10, %v4455_v51 }
 0x882   : > { %v3689_v27 = vpop.permute.xlu0 %3688  ;;  %v3604_v57 = vpop.permute.xlu1 %3603 }
 0x883   : > { %4123 = vst [vmem:[#allocation4 + $0xf0] sm:$0xff] %v4091_v23  ;;  %v3722_v14 = vmul.f32 %v3689_v27, %v3530_v22  ;;  %v3705_v41 = vmul.f32 %v3604_v57, %v3513_v38  ;;  %4725 = vmatmul.mubr.bf16.gmra.mrb[32].mxu0 %v4481_v7 }
 0x884   : > { %4732 = vmatprep.mubr.bf16.mxu0 %v4498_v50 }
 0x885   : > { %v4092_v4 = vadd.f32 %v8821_v53, %v3722_v14  ;;  %v4075_v54 = vadd.f32 %v8711_v39, %v3705_v41 }
 0x886   : > { %v3609_v60 = vpop.permute.xlu0 %3608  ;;  %v4428_v18 = vpop.permute.xlu1 %4427 }
 0x887   : > { %4124 = vst [vmem:[#allocation4 + $0xf8] sm:$0xff] %v4092_v4  ;;  %4107 = vst [vmem:[#allocation4 + $0x70] sm:$0xff] %v4075_v54  ;;  %v3706_v21 = vmul.f32 %v3609_v60, %v3514_v44  ;;  %v4473_v2 = vmul.f32 %v4428_v18, %v8819_v28 }
 0x889   : > { %v4076_v13 = vadd.f32 %v8716_v32, %v3706_v21 }
 0x88a   : > { %v4348_v52 = vpop.permute.xlu1 %4347 }
 0x88b   : > { %4108 = vst [vmem:[#allocation4 + $0x78] sm:$0xff] %v4076_v13  ;;  %4733 = vmatmul.mubr.bf16.gmra.mrb[36].mxu0 %v4482_v33  ;;  %v4457_v31 = vmul.f32 %v4348_v52, %v8714_v16  ;;  %v8862_v16 = vld [vmem:[%s9361_s4] ss:$0 sm:$0xff] }
 0x88e   : > { %v4438_v39 = vpop.permute.xlu1 %4437 }
 0x88f   : > { %v4475_v32 = vmul.f32 %v4438_v39, %v4091_v23 }
 0x892   : > { %v4433_v29 = vpop.permute.xlu0 %4432  ;;  %v4358_v9 = vpop.permute.xlu1 %4357 }
 0x893   : > { %v4474_v53 = vmul.f32 %v4433_v29, %v8824_v35  ;;  %v4459_v28 = vmul.f32 %v4358_v9, %v4075_v54 }
 0x895   : > { %v4499_v62 = vpack.c.bf16 %v4474_v53, %v4473_v2 }
 0x896   : > { %v4353_v43 = vpop.permute.xlu0 %4352 }
 0x897   : > { %v4458_v17 = vmul.f32 %v4353_v43, %v8808_v19  ;;  %4740 = vmatprep.mubr.bf16.mxu0 %v4499_v62 }
 0x899   : > { %v4483_v25 = vpack.c.bf16 %v4458_v17, %v4457_v31 }
 0x89a   : > { %v4443_v3 = vpop.permute.xlu0 %4442 }
 0x89b   : > { %v4476_v5 = vmul.f32 %v4443_v3, %v4092_v4  ;;  %4741 = vmatmul.mubr.bf16.gmra.mrb[40].mxu0 %v4483_v25 }
 0x89d   : > { %v4500_v30 = vpack.c.bf16 %v4476_v5, %v4475_v32 }
 0x89e   : > { %v4363_v49 = vpop.permute.xlu0 %4362 }
 0x89f   : > { %v4460_v35 = vmul.f32 %v4363_v49, %v4076_v13  ;;  %4748 = vmatprep.mubr.bf16.mxu0 %v4500_v30 }
 0x8a1   : > { %v4484_v48 = vpack.c.bf16 %v4460_v35, %v4459_v28 }
 0x8a3   : > { %4749 = vmatmul.mubr.bf16.gmra.mrb[44].mxu0 %v4484_v48 }
 0x936   : > { %v5225_v45 = vpop.f32.mrb[16].mxu0 }
 0x937   : > { %v5226_v19 = vpop.f32.mrb[17].mxu0 }
 0x938   : > { %v5227_v42 = vadd.f32 %v5226_v19, %v5225_v45  ;;  %v5228_v26 = vpop.f32.mrb[18].mxu0 }
 0x939   : > { %v5229_v37 = vpop.f32.mrb[19].mxu0 }
 0x93a   : > { %v4695_v11 = vadd.f32 %v5227_v42, %v8862_v16  ;;  %v5230_v40 = vadd.f32 %v5229_v37, %v5228_v26 }
 0x93c   : > { %4757 = vst [vmem:[%s6864_s25] sm:$0xff] %v4695_v11  ;;  %v4698_v6 = vadd.f32 %v5230_v40, %v8862_v16 }
 0x93e   : > { %4758 = vst [vmem:[%s6864_s25 + $0x8] sm:$0xff] %v4698_v6  ;;  %v5231_v20 = vpop.f32.mrb[20].mxu0 }
 0x93f   : > { %v5232_v61 = vpop.f32.mrb[21].mxu0 }
 0x940   : > { %v5233_v47 = vadd.f32 %v5232_v61, %v5231_v20  ;;  %v5234_v8 = vpop.f32.mrb[22].mxu0 }
 0x941   : > { %v5235_v12 = vpop.f32.mrb[23].mxu0 }
 0x942   : > { %v4703_v58 = vadd.f32 %v5233_v47, %v8862_v16  ;;  %v5236_v24 = vadd.f32 %v5235_v12, %v5234_v8 }
 0x944   : > { %4759 = vst [vmem:[%s6864_s25 + $0x10] sm:$0xff] %v4703_v58  ;;  %v4706_v56 = vadd.f32 %v5236_v24, %v8862_v16 }
 0x946   : > { %4760 = vst [vmem:[%s6864_s25 + $0x18] sm:$0xff] %v4706_v56  ;;  %v5237_v34 = vpop.f32.mrb[24].mxu0 }
 0x947   : > { %v5238_v36 = vpop.f32.mrb[25].mxu0 }
 0x948   : > { %v5239_v15 = vadd.f32 %v5238_v36, %v5237_v34  ;;  %v5240_v1 = vpop.f32.mrb[26].mxu0 }
 0x949   : > { %v5241_v63 = vpop.f32.mrb[27].mxu0 }
 0x94a   : > { %v4711_v0 = vadd.f32 %v5239_v15, %v8862_v16  ;;  %v5242_v46 = vadd.f32 %v5241_v63, %v5240_v1 }
 0x94c   : > { %4761 = vst [vmem:[%s6864_s25 + $0x20] sm:$0xff] %v4711_v0  ;;  %v4714_v55 = vadd.f32 %v5242_v46, %v8862_v16 }
 0x94e   : > { %4762 = vst [vmem:[%s6864_s25 + $0x28] sm:$0xff] %v4714_v55  ;;  %v5243_v59 = vpop.f32.mrb[28].mxu0 }
 0x94f   : > { %v5244_v22 = vpop.f32.mrb[29].mxu0 }
 0x950   : > { %v5245_v38 = vadd.f32 %v5244_v22, %v5243_v59  ;;  %v5246_v7 = vpop.f32.mrb[30].mxu0 }
 0x951   : > { %v5247_v23 = vpop.f32.mrb[31].mxu0 }
 0x952   : > { %v4719_v50 = vadd.f32 %v5245_v38, %v8862_v16  ;;  %v5248_v27 = vadd.f32 %v5247_v23, %v5246_v7 }
 0x954   : > { %4763 = vst [vmem:[%s6864_s25 + $0x30] sm:$0xff] %v4719_v50  ;;  %v4722_v57 = vadd.f32 %v5248_v27, %v8862_v16 }
 0x956   : > { %4764 = vst [vmem:[%s6864_s25 + $0x38] sm:$0xff] %v4722_v57  ;;  %v5249_v14 = vpop.f32.mrb[32].mxu0 }
 0x957   : > { %v5250_v41 = vpop.f32.mrb[33].mxu0 }
 0x958   : > { %v5251_v44 = vadd.f32 %v5250_v41, %v5249_v14  ;;  %v5252_v10 = vpop.f32.mrb[34].mxu0 }
 0x959   : > { %v5253_v4 = vpop.f32.mrb[35].mxu0 }
 0x95a   : > { %v4727_v54 = vadd.f32 %v5251_v44, %v8862_v16  ;;  %v5254_v60 = vadd.f32 %v5253_v4, %v5252_v10 }
 0x95c   : > { %4765 = vst [vmem:[%s6864_s25 + $0x40] sm:$0xff] %v4727_v54  ;;  %v4730_v51 = vadd.f32 %v5254_v60, %v8862_v16 }
 0x95e   : > { %4766 = vst [vmem:[%s6864_s25 + $0x48] sm:$0xff] %v4730_v51  ;;  %v5255_v21 = vpop.f32.mrb[36].mxu0 }
 0x95f   : > { %v5256_v33 = vpop.f32.mrb[37].mxu0 }
 0x960   : > { %v5257_v13 = vadd.f32 %v5256_v33, %v5255_v21  ;;  %v5258_v18 = vpop.f32.mrb[38].mxu0 }
 0x961   : > { %v5259_v52 = vpop.f32.mrb[39].mxu0 }
 0x962   : > { %v4735_v29 = vadd.f32 %v5257_v13, %v8862_v16  ;;  %v5260_v2 = vadd.f32 %v5259_v52, %v5258_v18 }
 0x964   : > { %4767 = vst [vmem:[%s6864_s25 + $0x50] sm:$0xff] %v4735_v29  ;;  %v4738_v53 = vadd.f32 %v5260_v2, %v8862_v16 }
 0x966   : > { %4768 = vst [vmem:[%s6864_s25 + $0x58] sm:$0xff] %v4738_v53 }
 0x96e   : > { %v5261_v62 = vpop.f32.mrb[40].mxu0 }
 0x96f   : > { %v5262_v39 = vpop.f32.mrb[41].mxu0 }
 0x970   : > { %v5263_v43 = vadd.f32 %v5262_v39, %v5261_v62  ;;  %v5264_v31 = vpop.f32.mrb[42].mxu0 }
 0x971   : > { %v5265_v17 = vpop.f32.mrb[43].mxu0 }
 0x972   : > { %v4743_v25 = vadd.f32 %v5263_v43, %v8862_v16  ;;  %v5266_v3 = vadd.f32 %v5265_v17, %v5264_v31 }
 0x974   : > { %4769 = vst [vmem:[%s6864_s25 + $0x60] sm:$0xff] %v4743_v25  ;;  %v4746_v32 = vadd.f32 %v5266_v3, %v8862_v16 }
 0x976   : > { %4770 = vst [vmem:[%s6864_s25 + $0x68] sm:$0xff] %v4746_v32  ;;  %v5267_v5 = vpop.f32.mrb[44].mxu0 }
 0x977   : > { %v5268_v9 = vpop.f32.mrb[45].mxu0 }
 0x978   : > { %v5269_v30 = vadd.f32 %v5268_v9, %v5267_v5  ;;  %v5270_v49 = vpop.f32.mrb[46].mxu0 }
 0x979   : > { %v5271_v28 = vpop.f32.mrb[47].mxu0 }
 0x97a   : > { %v4751_v35 = vadd.f32 %v5269_v30, %v8862_v16  ;;  %v5272_v48 = vadd.f32 %v5271_v28, %v5270_v49 }
 0x97c   : > { %4771 = vst [vmem:[%s6864_s25 + $0x70] sm:$0xff] %v4751_v35  ;;  %v4754_v45 = vadd.f32 %v5272_v48, %v8862_v16 }
 0x97e   : > { %4772 = vst [vmem:[%s6864_s25 + $0x78] sm:$0xff] %v4754_v45 }
 0x97f PF: > { %s4781_s27 = sld [smem:[#allocation7]]  ;;  %s9362_s30 = sld [smem:[#allocation28_spill]] }
 0x980   : > { %s4790_s8 = sshll.u32 %s6864_s25, 4  ;;  %s9363_s9 = sld [smem:[#allocation112_spill]]  ;;  %s8898_s8 = int_to_ptr.vmem [resolvable:$true] %s4790_s8 }
 0x981   : > { %s8907_s23 = scalar_lea.sflag [#allocation11], %s373_s20  ;;  %s6246_s26 = scalar_lea.vmem %s8898_s8, 2048 }
 0x982   : > { %p6247_p5 = scmp.ne.s32.totalorder %s8898_s8, %s6246_s26  ;;  %p9365_p3 = scmp.ne.s32.totalorder %s9114_s0, 0 }
 0x983   : > { %s6424_s22 = smov [#allocation17]  }
 0x984   : > { %p6248_p9 = pnand %p6247_p5, %p9365_p3  ;;  %s6250_s7 = sshll.u32 %s6424_s22, 4  ;;  %s6251_s7 = int_to_ptr.vmem [resolvable:$false] %s6250_s7 }
 0x985   : > { %s5077_s12 = sshll.u32 %s9362_s30, 4  ;;  %s5076_s24 = sshll.u32 %s4781_s27, 4 }
 0x986   : > { %s4787_s2 = sadd.s32 %s5077_s12, %s5076_s24  ;;  %s9364_s19 = smov %s9363_s9 }
 0x987   : > { %s5078_s6 = sshll.u32 %s4787_s2, 7  ;;  %p6249_p1 = pneg %p6248_p9 }
 0x988   : > { %s8903_s18 = scalar_lea.hbm %s9363_s9, %s5078_s6  ;;  %s6252_s25 = scalar_lea.vmem %s6251_s7, 4096 }
 0x989   : > { %p6253_p10 = scmp.lt.s32.totalorder %s8898_s8, %s6251_s7  ;;  %p6254_p6 = scmp.lt.s32.totalorder %s6252_s25, %s6246_s26 }
 0x98b   : > { %p6255_p12 = por %p6254_p6, %p6253_p10 }
 0x98d   : > { %p6256_p2 = pnand %p6255_p12, %p6249_p1 }
 0x98f   : > { %6259 = shalt.err (!%p6256_p2)
}
 0x990   : > { %s6260_s20 = scalar_lea.hbm %s8903_s18, 2048  ;;  %s6264_s4 = scalar_lea.hbm %s9364_s19, 4096 }
 0x991   : > { %p6261_p0 = scmp.ne.s32.totalorder %s8903_s18, %s6260_s20  ;;  %p6265_p4 = scmp.lt.u32.totalorder %s8903_s18, %s9364_s19 }
 0x992   : > { %p6266_p7 = scmp.lt.u32.totalorder %s6264_s4, %s6260_s20  ;;  %p6268_p5 = scmp.lt.u32.totalorder %s6260_s20, %s8903_s18 }
 0x993   : > { %p6262_p8 = pnand %p6261_p0, %p9365_p3 }
 0x994   : > { %p6267_p13 = por %p6266_p7, %p6265_p4 }
 0x995   : > { %p6263_p11 = pneg %p6262_p8 }
 0x996   : > { %p6269_p9 = por %p6268_p5, %p6267_p13 }
 0x998   : > { %p6270_p1 = pnand %p6269_p9, %p6263_p11 }
 0x99a   : > { %6273 = shalt.err (!%p6270_p1)
}
 0x99b   : > { %s6425_s12 = smov 128   ;;  %s6426_s24 = smov 8  }
 0x99c   : > { %5539 = dma.vmem_to_hbm [thread:$0]  (%p9365_p3), %s8898_s8, 2048, %s8903_s18, %s8907_s23, %s6425_s12, %s6425_s12, %s6426_s24  }
 0x99d PF: > { %s9366_s2 = sld [smem:[#allocation32_spill]]  ;;  %s4805_s6 = sand.u32 1, %s6356_s28  }
 0x99e   : > { %p9368_p6 = scmp.ge.s32.totalorder %s6412_s17, 2  ;;  %s4806_s15 = scalar_lea.sflag [#allocation11], %s4805_s6 }
 0x9a3   : > { %p9367_p10 = scmp.ne.s32.totalorder %s9366_s2, 0 }
 0x9a5   : > { %p5556_p12 = pnand %p9368_p6, %p9367_p10 }
 0x9a7   : > { %6351 = dma.done.wait (!%p5556_p12), %s4806_s15, 2048  }
 0x9a8   : > { %6353 = vsyncadd (!%p5556_p12), %s4806_s15, 4294965248  ;;  %s29_s17 = sadd.s32 1, %s6412_s17   ;;  %s9370_s0 = sld [smem:[#allocation23_spill]] }
 0x9a9   : > { %p8937_p2 = scmp.ge.s32.totalorder %s29_s17, 4   ;;  %s9371_s30 = sld [smem:[#allocation30_spill]] }
 0x9aa   : > { %s9372_s8 = sld [smem:[#allocation25_spill]]  ;;  %s9373_s9 = sld [smem:[#allocation26_spill]] }
 0x9ab   : > { %s9374_s18 = sld [smem:[#allocation27_spill]]  ;;  %s9375_s11 = sld [smem:[#allocation31_spill]] }
 0x9ac   : > { %s9376_s23 = sld [smem:[#allocation33_spill]]  ;;  %s9377_s26 = sld [smem:[#allocation29_spill]] }
 0x9ad   : > { %s9378_s28 = smov %s6360_s29  ;;  %s9384_s12 = smov %s6396_s13 }
 0x9ae   : > { %s9379_s29 = smov %s9370_s0  ;;  %s9385_s13 = smov %s6400_s14 }
 0x9af   : > { %s9387_s15 = smov %s6408_s16  ;;  %28 = sbr.rel (!%p8937_p2) target bundleno = 23 (0x17), region = 125 }
 0x9b0   : > { %s9380_s0 = smov %s9373_s9  ;;  %s9381_s9 = smov %s6772_s1 }
 0x9b1   : > { %s9382_s1 = smov %s6384_s10  ;;  %s9383_s10 = smov %s9374_s18 }
 0x9b2   : > { %s9386_s14 = smov %s9376_s23  ;;  %s9388_s16 = smov %s9377_s26 }
 0x9b6   :  { %4811 = vsyncpa [#allocation10], 1 }
 0x9b7   :  { %4813 = vsyncpa [#allocation10 + $0x1], 1 }
 0x9b8   :  { %4814 = vsyncpa [#allocation13], 1 }
 0x9b9   :  { %4816 = vsyncpa [#allocation13 + $0x1], 1 }
 0x9ba   :  { %4817 = vsyncpa [#allocation16], 1 }
 0x9bb   :  { %4818 = vsyncpa [#allocation11], 1 }
 0x9bc   :  { %4820 = vsyncpa [#allocation11 + $0x1], 1 }

</bundles_post_ra>
